<compile_context>
chip_gen: v7x
topology: tpu7x:2x2x1
jax: 0.10.0
libtpu: 0.0.40
codegen_flags: <defaults>
</compile_context>

<pallas_src>
import functools
import math

import jax
import jax.numpy as jnp
import numpy as np
from jax.experimental import pallas as pl
from jax.experimental.pallas import tpu as pltpu

LN_EPS = 1e-5  # PyTorch nn.LayerNorm default


# ----------------------------------------------------------------------------
# In-kernel helpers (traced inside the Pallas kernel)
# ----------------------------------------------------------------------------
def _layernorm(z, gamma, beta):
    mu = jnp.mean(z, axis=-1, keepdims=True)
    var = jnp.mean((z - mu) ** 2, axis=-1, keepdims=True)
    return (z - mu) * jax.lax.rsqrt(var + LN_EPS) * gamma + beta


def _mha_proj(qkv, w_proj, *, batch, seq, n_head, head_dim, hidden):
    """Multi-head attention on packed (B*S, 3H) QKV, head-concat folded into
    the output projection.

    Returns sum_h softmax(q_h k_h^T / sqrt(d)) v_h @ w_proj[h*d:(h+1)*d, :],
    mathematically identical to `concat_heads(attn) @ w_proj` but expressed as
    per-head partial matmuls accumulated in place (MRB-friendly on v7x; no
    lane-concatenate relayout on any generation).
    """
    scale = 1.0 / math.sqrt(head_dim)
    acc = None
    for h in range(n_head):
        lo = h * head_dim
        # (B*S, d) lane slices -> (B, S, d): leading-dim split only (cheap).
        q = qkv[:, lo:lo + head_dim].reshape(batch, seq, head_dim)
        k = qkv[:, hidden + lo:hidden + lo + head_dim].reshape(batch, seq, head_dim)
        v = qkv[:, 2 * hidden + lo:2 * hidden + lo + head_dim].reshape(
            batch, seq, head_dim)
        s = jnp.einsum('bqd,bkd->bqk', q, k,
                       preferred_element_type=jnp.float32) * scale      # (B,S,S)
        s = s - jnp.max(s, axis=-1, keepdims=True)
        e = jnp.exp(s)
        p = e / jnp.sum(e, axis=-1, keepdims=True)     # exact division (accuracy)
        o = jnp.einsum('bqk,bkd->bqd', p, v,
                       preferred_element_type=jnp.float32)               # (B,S,d)
        part = jnp.dot(o.reshape(batch * seq, head_dim),
                       w_proj[lo:lo + head_dim, :],
                       preferred_element_type=jnp.float32)
        acc = part if acc is None else acc + part
    return acc


def _mlp_head(z, mlp_refs, n_mlp):
    # Each mlp_refs[i] is a packed (in_f + 1, out_f) slab: rows [:-1] = W, [-1:] = b.
    for i in range(n_mlp):
        wb = mlp_refs[i][...]
        z = jnp.maximum(
            jnp.dot(z, wb[:-1, :], preferred_element_type=jnp.float32) + wb[-1:, :],
            0.0)
        if i == n_mlp - 1:
            z = jax.nn.sigmoid(z)
    return z


# ----------------------------------------------------------------------------
# Fused kernels
# ----------------------------------------------------------------------------
def _fused_kernel(x_ref, pool_ref, qkvvec_ref, lqkvw_ref, aowres_ref, fow_ref,
                  hvec_ref, dvec_ref, *rest,
                  batch, seq, n_head, head_dim, stack, n_mlp):
    out_ref = rest[-1]
    mlp_refs = rest[:n_mlp]
    hidden = n_head * head_dim
    rows = batch * seq

    # ---- hoist all weight loads / bias broadcasts out of the unrolled loops ----
    qkvvec = qkvvec_ref[...]            # (3, 3H): rows = [qkv1_w, qkv1_b, lqkv_b]
    lqkv_w = lqkvw_ref[...]             # (H, 3H) packed loop q|k|v weights
    aow_res = aowres_ref[...]           # (H, H)  == attention_out_linear.W + I
    fo_w = fow_ref[...]                 # (H, D)  final_attention_out_linear.W
    hvec = hvec_ref[...]                # (3, H): rows = [ao_b, n_g, n_b]
    dvec = dvec_ref[...]                # (3, D): rows = [fo_b, fn_g, fn_b]

    qkv1_w = qkvvec[0:1, :]
    qkv1_b = qkvvec[1:2, :]
    lqkv_b = jnp.broadcast_to(qkvvec[2:3, :], (rows, 3 * hidden))
    ao_b = jnp.broadcast_to(hvec[0:1, :], (rows, hidden))
    n_g = jnp.broadcast_to(hvec[1:2, :], (rows, hidden))
    n_b = jnp.broadcast_to(hvec[2:3, :], (rows, hidden))
    fo_b = dvec[0:1, :]
    fn_g = dvec[1:2, :]
    fn_b = dvec[2:3, :]

    # ---- first attention block: Linear(1, H) on x.unsqueeze(-1), QKV packed ----
    xf = x_ref[...]                                     # (B*S, 1)
    qkv = xf * qkv1_w + qkv1_b                          # (B*S, 3H)
    # residual `proj + ao` is folded into aow_res = ao_w + I on the host.
    acc = _mha_proj(qkv, aow_res, batch=batch, seq=seq, n_head=n_head,
                    head_dim=head_dim, hidden=hidden)
    h = _layernorm(acc + ao_b, n_g, n_b)                # (B*S, H)

    # ---- loop attention blocks (static unroll; stack is a small constant) ----
    for st in range(stack - 1):
        qkv = jnp.dot(h, lqkv_w, preferred_element_type=jnp.float32) + lqkv_b
        if st != stack - 2:
            acc = _mha_proj(qkv, aow_res, batch=batch, seq=seq, n_head=n_head,
                            head_dim=head_dim, hidden=hidden)
            h = _layernorm(acc + ao_b, n_g, n_b)
        else:
            # reference: output == attention_output == final_linear(ao), so the
            # residual sum is exactly 2 * (ao @ fo_w + fo_b), then final_norm.
            acc = _mha_proj(qkv, fo_w, batch=batch, seq=seq, n_head=n_head,
                            head_dim=head_dim, hidden=hidden)
            h = _layernorm(2.0 * acc + 2.0 * fo_b, fn_g, fn_b)   # (B*S, D)

    # ---- seq-mean pooling as one tiny MXU matmul (pool_ref is (B, B*S)) ----
    z = jnp.dot(pool_ref[...], h, preferred_element_type=jnp.float32)    # (B, D)

    # ---- MLP head: ReLU activations, sigmoid after the last layer ----
    out_ref[...] = _mlp_head(z, mlp_refs, n_mlp)        # (B, last_dim) single store


def _mlp_only_kernel(x_ref, *rest, n_mlp):
    # stack == 0 path: MLP head only.
    out_ref = rest[-1]
    mlp_refs = rest[:n_mlp]
    out_ref[...] = _mlp_head(x_ref[...], mlp_refs, n_mlp)


# ----------------------------------------------------------------------------
# Wrapper: one pallas_call for the whole forward (host-side weight packing)
# ----------------------------------------------------------------------------
def model_forward(params, x, *, n_head, head_dim, stack):
    B, S = x.shape
    H = n_head * head_dim
    p = params
    mlp = p['mlp']
    n_mlp = len(mlp)
    mlp_packed = [jnp.concatenate([W, b], axis=0) for (W, b) in mlp]  # (in+1, out)
    out_dim = mlp[-1][0].shape[1]
    out_shape = jax.ShapeDtypeStruct((B, out_dim), jnp.float32)
    vmem = pl.BlockSpec(memory_space=pltpu.MemorySpace.VMEM)

    if stack == 0:
        out = pl.pallas_call(
            functools.partial(_mlp_only_kernel, n_mlp=n_mlp),
            out_shape=out_shape,
            in_specs=[vmem] * (1 + n_mlp),
            out_specs=vmem,
        )(x, *mlp_packed)
    else:
        # Flat (B*S, 1) input column (64 bytes) and a constant pooling matrix.
        xf = x.reshape(B * S, 1)
        pool_mat = jnp.asarray(
            np.kron(np.eye(B, dtype=np.float32),
                    np.full((1, S), 1.0 / S, dtype=np.float32)))        # (B, B*S)

        # Host-side packing (one-time per call, removes ~20 tiny input DMAs).
        qkv1_w = jnp.concatenate([p['q1_w'], p['k1_w'], p['v1_w']], axis=1)  # (1,3H)
        qkv1_b = jnp.concatenate([p['q1_b'], p['k1_b'], p['v1_b']], axis=1)  # (1,3H)
        lqkv_w = jnp.concatenate([p['lq_w'], p['lk_w'], p['lv_w']], axis=1)  # (H,3H)
        lqkv_b = jnp.concatenate([p['lq_b'], p['lk_b'], p['lv_b']], axis=1)  # (1,3H)
        qkv_vecs = jnp.concatenate([qkv1_w, qkv1_b, lqkv_b], axis=0)         # (3,3H)
        aow_res = p['ao_w'] + jnp.eye(H, dtype=p['ao_w'].dtype)  # fold +ao residual
        hvec = jnp.concatenate([p['ao_b'], p['n_g'], p['n_b']], axis=0)      # (3,H)
        dvec = jnp.concatenate([p['fo_b'], p['fn_g'], p['fn_b']], axis=0)    # (3,D)

        kernel = functools.partial(
            _fused_kernel, batch=B, seq=S, n_head=n_head, head_dim=head_dim,
            stack=stack, n_mlp=n_mlp)
        n_in = 8 + n_mlp
        out = pl.pallas_call(
            kernel,
            out_shape=out_shape,
            in_specs=[vmem] * n_in,
            out_specs=vmem,
        )(xf, pool_mat, qkv_vecs, lqkv_w, aow_res, p['fo_w'], hvec, dvec,
          *mlp_packed)

    if out.shape[-1] == 1:
        out = jnp.squeeze(out, axis=-1)
    return out


# ----------------------------------------------------------------------------
# Pure-JAX reference (mirrors the PyTorch forward, eval mode) for verification
# ----------------------------------------------------------------------------
def reference_forward(p, x, *, n_head, head_dim, stack):
    B, S = x.shape
    H = n_head * head_dim

    def ln(z, g, b):
        mu = z.mean(-1, keepdims=True)
        var = ((z - mu) ** 2).mean(-1, keepdims=True)
        return (z - mu) / jnp.sqrt(var + LN_EPS) * g + b

    def mha(Q, K, V):
        Qh = Q.reshape(B, S, n_head, head_dim).transpose(0, 2, 1, 3)
        Kh = K.reshape(B, S, n_head, head_dim).transpose(0, 2, 1, 3)
        Vh = V.reshape(B, S, n_head, head_dim).transpose(0, 2, 1, 3)
        score = jnp.einsum('bhqd,bhkd->bhqk', Qh, Kh) / math.sqrt(head_dim)
        w = jax.nn.softmax(score, axis=-1)
        ao = jnp.einsum('bhqk,bhkd->bhqd', w, Vh)
        return ao.transpose(0, 2, 1, 3).reshape(B, S, H)

    if stack != 0:
        x1 = x[..., None]
        Q = x1 * p['q1_w'] + p['q1_b']
        K = x1 * p['k1_w'] + p['k1_b']
        V = x1 * p['v1_w'] + p['v1_b']
        ao = mha(Q, K, V)
        out = ao @ p['ao_w'] + p['ao_b']
        h = ln(out + ao, p['n_g'], p['n_b'])
        for st in range(stack - 1):
            Q = h @ p['lq_w'] + p['lq_b']
            K = h @ p['lk_w'] + p['lk_b']
            V = h @ p['lv_w'] + p['lv_b']
            ao = mha(Q, K, V)
            if st != stack - 2:
                out = ao @ p['ao_w'] + p['ao_b']
                h = ln(out + ao, p['n_g'], p['n_b'])
            else:
                y = ao @ p['fo_w'] + p['fo_b']
                h = ln(2.0 * y, p['fn_g'], p['fn_b'])
        x = h.mean(axis=1)
    for i, (W, b) in enumerate(p['mlp']):
        x = jnp.maximum(x @ W + b, 0.0)
        if i == len(p['mlp']) - 1:
            x = jax.nn.sigmoid(x)
    if x.shape[-1] == 1:
        x = x[..., 0]
    return x


# ----------------------------------------------------------------------------
# Deterministic parameter init (same shapes as the nn.Module's __init__)
# ----------------------------------------------------------------------------
def init_params(key, input_dim, hidden, linear_dim_list):
    n_needed = 8 + len(linear_dim_list)
    keys = iter(jax.random.split(key, n_needed))

    def linear(in_f, out_f):
        kw, kb = jax.random.split(next(keys))
        bound = 1.0 / math.sqrt(in_f)
        W = jax.random.uniform(kw, (in_f, out_f), jnp.float32, -bound, bound)
        b = jax.random.uniform(kb, (1, out_f), jnp.float32, -bound, bound)
        return W, b

    p = {}
    p['q1_w'], p['q1_b'] = linear(1, hidden)           # q_linear
    p['k1_w'], p['k1_b'] = linear(1, hidden)           # k_linear
    p['v1_w'], p['v1_b'] = linear(1, hidden)           # v_linear
    p['lq_w'], p['lq_b'] = linear(hidden, hidden)      # loop_q_linear
    p['lk_w'], p['lk_b'] = linear(hidden, hidden)      # loop_k_linear
    p['lv_w'], p['lv_b'] = linear(hidden, hidden)      # loop_v_linear
    p['ao_w'], p['ao_b'] = linear(hidden, hidden)      # attention_out_linear
    p['fo_w'], p['fo_b'] = linear(hidden, input_dim)   # final_attention_out_linear
    p['n_g'] = jnp.ones((1, hidden), jnp.float32)      # norm
    p['n_b'] = jnp.zeros((1, hidden), jnp.float32)
    p['fn_g'] = jnp.ones((1, input_dim), jnp.float32)  # final_norm
    p['fn_b'] = jnp.zeros((1, input_dim), jnp.float32)
    dims = [input_dim] + list(linear_dim_list)
    p['mlp'] = tuple(linear(dims[i], dims[i + 1]) for i in range(len(dims) - 1))
    return p


if __name__ == "__main__":
    # Full-precision f32 matmuls everywhere (kernel and reference) so the
    # correctness check can be tight now that the approx reciprocal is gone.
    jax.config.update("jax_default_matmul_precision", "highest")

    INPUT_DIM = 8          # seq length of x == input_dim (row-of-dataframe semantics)
    HIDDEN = 32
    N_HEAD = 4
    HEAD_DIM = HIDDEN // N_HEAD
    STACK = 3              # exercises first block + loop block + final block
    LINEAR_DIMS = [16, 8, 1]
    BATCH = 2
    SEQ = INPUT_DIM

    key = jax.random.PRNGKey(0)
    kp, kx = jax.random.split(key)
    params = init_params(kp, INPUT_DIM, HIDDEN, LINEAR_DIMS)
    x = jax.random.normal(kx, (BATCH, SEQ), dtype=jnp.float32)

    fwd = jax.jit(functools.partial(model_forward, n_head=N_HEAD,
                                    head_dim=HEAD_DIM, stack=STACK))
    y = jax.block_until_ready(fwd(params, x))

    y_ref = reference_forward(params, x, n_head=N_HEAD, head_dim=HEAD_DIM, stack=STACK)
    np.testing.assert_allclose(np.asarray(y), np.asarray(y_ref), rtol=2e-3, atol=2e-3)
    print("KERNEL_OK")
</pallas_src>

<mosaic_0001>
module attributes {stable_mosaic.version = 11 : i64} {
  func.func @_fused_kernel(%arg0: memref<16x1xf32, #tpu.memory_space<vmem>>, %arg1: memref<2x16xf32, #tpu.memory_space<vmem>>, %arg2: memref<3x96xf32, #tpu.memory_space<vmem>>, %arg3: memref<32x96xf32, #tpu.memory_space<vmem>>, %arg4: memref<32x32xf32, #tpu.memory_space<vmem>>, %arg5: memref<32x8xf32, #tpu.memory_space<vmem>>, %arg6: memref<3x32xf32, #tpu.memory_space<vmem>>, %arg7: memref<3x8xf32, #tpu.memory_space<vmem>>, %arg8: memref<9x16xf32, #tpu.memory_space<vmem>>, %arg9: memref<17x8xf32, #tpu.memory_space<vmem>>, %arg10: memref<9x1xf32, #tpu.memory_space<vmem>>, %arg11: memref<2x1xf32, #tpu.memory_space<vmem>>) attributes {dimension_semantics = [], scalar_prefetch = 0 : i64, scratch_operands = 0 : i64, tpu.core_type = #tpu.core_type<tc>} {
    %c0 = arith.constant 0 : index
    %c0_0 = arith.constant 0 : index
    %0 = vector.load %arg2[%c0, %c0_0] : memref<3x96xf32, #tpu.memory_space<vmem>>, vector<3x96xf32>
    %c0_1 = arith.constant 0 : index
    %c0_2 = arith.constant 0 : index
    %1 = vector.load %arg3[%c0_1, %c0_2] : memref<32x96xf32, #tpu.memory_space<vmem>>, vector<32x96xf32>
    %c0_3 = arith.constant 0 : index
    %c0_4 = arith.constant 0 : index
    %2 = vector.load %arg4[%c0_3, %c0_4] : memref<32x32xf32, #tpu.memory_space<vmem>>, vector<32x32xf32>
    %c0_5 = arith.constant 0 : index
    %c0_6 = arith.constant 0 : index
    %3 = vector.load %arg5[%c0_5, %c0_6] : memref<32x8xf32, #tpu.memory_space<vmem>>, vector<32x8xf32>
    %c0_7 = arith.constant 0 : index
    %c0_8 = arith.constant 0 : index
    %4 = vector.load %arg6[%c0_7, %c0_8] : memref<3x32xf32, #tpu.memory_space<vmem>>, vector<3x32xf32>
    %c0_9 = arith.constant 0 : index
    %c0_10 = arith.constant 0 : index
    %5 = vector.load %arg7[%c0_9, %c0_10] : memref<3x8xf32, #tpu.memory_space<vmem>>, vector<3x8xf32>
    %6 = vector.extract_strided_slice %0 {offsets = [0, 0], sizes = [1, 96], strides = [1, 1]} : vector<3x96xf32> to vector<1x96xf32>
    %7 = vector.extract_strided_slice %0 {offsets = [1, 0], sizes = [1, 96], strides = [1, 1]} : vector<3x96xf32> to vector<1x96xf32>
    %8 = vector.extract_strided_slice %0 {offsets = [2, 0], sizes = [1, 96], strides = [1, 1]} : vector<3x96xf32> to vector<1x96xf32>
    %9 = vector.shape_cast %8 : vector<1x96xf32> to vector<1x96xf32>
    %10 = vector.broadcast %9 : vector<1x96xf32> to vector<16x96xf32>
    %11 = vector.extract_strided_slice %4 {offsets = [0, 0], sizes = [1, 32], strides = [1, 1]} : vector<3x32xf32> to vector<1x32xf32>
    %12 = vector.shape_cast %11 : vector<1x32xf32> to vector<1x32xf32>
    %13 = vector.broadcast %12 : vector<1x32xf32> to vector<16x32xf32>
    %14 = vector.extract_strided_slice %4 {offsets = [1, 0], sizes = [1, 32], strides = [1, 1]} : vector<3x32xf32> to vector<1x32xf32>
    %15 = vector.shape_cast %14 : vector<1x32xf32> to vector<1x32xf32>
    %16 = vector.broadcast %15 : vector<1x32xf32> to vector<16x32xf32>
    %17 = vector.extract_strided_slice %4 {offsets = [2, 0], sizes = [1, 32], strides = [1, 1]} : vector<3x32xf32> to vector<1x32xf32>
    %18 = vector.shape_cast %17 : vector<1x32xf32> to vector<1x32xf32>
    %19 = vector.broadcast %18 : vector<1x32xf32> to vector<16x32xf32>
    %20 = vector.extract_strided_slice %5 {offsets = [0, 0], sizes = [1, 8], strides = [1, 1]} : vector<3x8xf32> to vector<1x8xf32>
    %21 = vector.extract_strided_slice %5 {offsets = [1, 0], sizes = [1, 8], strides = [1, 1]} : vector<3x8xf32> to vector<1x8xf32>
    %22 = vector.extract_strided_slice %5 {offsets = [2, 0], sizes = [1, 8], strides = [1, 1]} : vector<3x8xf32> to vector<1x8xf32>
    %c0_11 = arith.constant 0 : index
    %c0_12 = arith.constant 0 : index
    %23 = vector.load %arg0[%c0_11, %c0_12] : memref<16x1xf32, #tpu.memory_space<vmem>>, vector<16x1xf32>
    %24 = vector.broadcast %23 : vector<16x1xf32> to vector<16x96xf32>
    %25 = vector.broadcast %6 : vector<1x96xf32> to vector<16x96xf32>
    %26 = arith.mulf %24, %25 : vector<16x96xf32>
    %27 = vector.broadcast %7 : vector<1x96xf32> to vector<16x96xf32>
    %28 = arith.addf %26, %27 : vector<16x96xf32>
    %29 = vector.extract_strided_slice %28 {offsets = [0, 0], sizes = [16, 8], strides = [1, 1]} : vector<16x96xf32> to vector<16x8xf32>
    %30 = vector.shape_cast %29 : vector<16x8xf32> to vector<2x8x8xf32>
    %31 = vector.extract_strided_slice %28 {offsets = [0, 32], sizes = [16, 8], strides = [1, 1]} : vector<16x96xf32> to vector<16x8xf32>
    %32 = vector.shape_cast %31 : vector<16x8xf32> to vector<2x8x8xf32>
    %33 = vector.extract_strided_slice %28 {offsets = [0, 64], sizes = [16, 8], strides = [1, 1]} : vector<16x96xf32> to vector<16x8xf32>
    %34 = vector.shape_cast %33 : vector<16x8xf32> to vector<2x8x8xf32>
    "tpu.trace_start"() <{level = 10 : i32, message = "bqd,bkd->bqk"}> : () -> ()
    %cst = arith.constant dense<0.000000e+00> : vector<2x8x8xf32>
    %35 = tpu.matmul %30, %32, %cst {dimension_numbers = #tpu.dot_dimension_numbers<[2], [2], [1], [1], [0, 0, 0, 1, 1, 1], [0], [0]>, precision = #tpu.contract_precision<fp32>} : vector<2x8x8xf32>, vector<2x8x8xf32>, vector<2x8x8xf32> -> vector<2x8x8xf32>
    "tpu.trace_stop"() : () -> ()
    %cst_13 = arith.constant 0.353553385 : f32
    %36 = vector.broadcast %cst_13 : f32 to vector<2x8x8xf32>
    %37 = arith.mulf %35, %36 : vector<2x8x8xf32>
    %cst_14 = arith.constant dense<0xFF800000> : vector<2x8xf32>
    %38 = vector.multi_reduction <maximumf>, %37, %cst_14 [2] : vector<2x8x8xf32> to vector<2x8xf32>
    %39 = vector.shape_cast %38 : vector<2x8xf32> to vector<2x8x1xf32>
    %40 = vector.broadcast %39 : vector<2x8x1xf32> to vector<2x8x8xf32>
    %41 = arith.subf %37, %40 : vector<2x8x8xf32>
    %42 = math.exp %41 : vector<2x8x8xf32>
    %cst_15 = arith.constant dense<0.000000e+00> : vector<2x8xf32>
    %43 = vector.multi_reduction <add>, %42, %cst_15 [2] : vector<2x8x8xf32> to vector<2x8xf32>
    %44 = vector.shape_cast %43 : vector<2x8xf32> to vector<2x8x1xf32>
    %45 = vector.broadcast %44 : vector<2x8x1xf32> to vector<2x8x8xf32>
    %46 = arith.divf %42, %45 : vector<2x8x8xf32>
    "tpu.trace_start"() <{level = 10 : i32, message = "bqk,bkd->bqd"}> : () -> ()
    %cst_16 = arith.constant dense<0.000000e+00> : vector<2x8x8xf32>
    %47 = tpu.matmul %46, %34, %cst_16 {dimension_numbers = #tpu.dot_dimension_numbers<[2], [1], [1], [2], [0, 0, 0, 1, 1, 2], [0], [0]>, precision = #tpu.contract_precision<fp32>} : vector<2x8x8xf32>, vector<2x8x8xf32>, vector<2x8x8xf32> -> vector<2x8x8xf32>
    "tpu.trace_stop"() : () -> ()
    %48 = vector.shape_cast %47 : vector<2x8x8xf32> to vector<16x8xf32>
    %49 = vector.extract_strided_slice %2 {offsets = [0, 0], sizes = [8, 32], strides = [1, 1]} : vector<32x32xf32> to vector<8x32xf32>
    %cst_17 = arith.constant dense<0.000000e+00> : vector<16x32xf32>
    %50 = tpu.matmul %48, %49, %cst_17 {dimension_numbers = #tpu.dot_dimension_numbers<[1], [0], [0], [1], [0, 0, 1, 1], [], []>, precision = #tpu.contract_precision<fp32>} : vector<16x8xf32>, vector<8x32xf32>, vector<16x32xf32> -> vector<16x32xf32>
    %51 = vector.extract_strided_slice %28 {offsets = [0, 8], sizes = [16, 8], strides = [1, 1]} : vector<16x96xf32> to vector<16x8xf32>
    %52 = vector.shape_cast %51 : vector<16x8xf32> to vector<2x8x8xf32>
    %53 = vector.extract_strided_slice %28 {offsets = [0, 40], sizes = [16, 8], strides = [1, 1]} : vector<16x96xf32> to vector<16x8xf32>
    %54 = vector.shape_cast %53 : vector<16x8xf32> to vector<2x8x8xf32>
    %55 = vector.extract_strided_slice %28 {offsets = [0, 72], sizes = [16, 8], strides = [1, 1]} : vector<16x96xf32> to vector<16x8xf32>
    %56 = vector.shape_cast %55 : vector<16x8xf32> to vector<2x8x8xf32>
    "tpu.trace_start"() <{level = 10 : i32, message = "bqd,bkd->bqk"}> : () -> ()
    %cst_18 = arith.constant dense<0.000000e+00> : vector<2x8x8xf32>
    %57 = tpu.matmul %52, %54, %cst_18 {dimension_numbers = #tpu.dot_dimension_numbers<[2], [2], [1], [1], [0, 0, 0, 1, 1, 1], [0], [0]>, precision = #tpu.contract_precision<fp32>} : vector<2x8x8xf32>, vector<2x8x8xf32>, vector<2x8x8xf32> -> vector<2x8x8xf32>
    "tpu.trace_stop"() : () -> ()
    %cst_19 = arith.constant 0.353553385 : f32
    %58 = vector.broadcast %cst_19 : f32 to vector<2x8x8xf32>
    %59 = arith.mulf %57, %58 : vector<2x8x8xf32>
    %cst_20 = arith.constant dense<0xFF800000> : vector<2x8xf32>
    %60 = vector.multi_reduction <maximumf>, %59, %cst_20 [2] : vector<2x8x8xf32> to vector<2x8xf32>
    %61 = vector.shape_cast %60 : vector<2x8xf32> to vector<2x8x1xf32>
    %62 = vector.broadcast %61 : vector<2x8x1xf32> to vector<2x8x8xf32>
    %63 = arith.subf %59, %62 : vector<2x8x8xf32>
    %64 = math.exp %63 : vector<2x8x8xf32>
    %cst_21 = arith.constant dense<0.000000e+00> : vector<2x8xf32>
    %65 = vector.multi_reduction <add>, %64, %cst_21 [2] : vector<2x8x8xf32> to vector<2x8xf32>
    %66 = vector.shape_cast %65 : vector<2x8xf32> to vector<2x8x1xf32>
    %67 = vector.broadcast %66 : vector<2x8x1xf32> to vector<2x8x8xf32>
    %68 = arith.divf %64, %67 : vector<2x8x8xf32>
    "tpu.trace_start"() <{level = 10 : i32, message = "bqk,bkd->bqd"}> : () -> ()
    %cst_22 = arith.constant dense<0.000000e+00> : vector<2x8x8xf32>
    %69 = tpu.matmul %68, %56, %cst_22 {dimension_numbers = #tpu.dot_dimension_numbers<[2], [1], [1], [2], [0, 0, 0, 1, 1, 2], [0], [0]>, precision = #tpu.contract_precision<fp32>} : vector<2x8x8xf32>, vector<2x8x8xf32>, vector<2x8x8xf32> -> vector<2x8x8xf32>
    "tpu.trace_stop"() : () -> ()
    %70 = vector.shape_cast %69 : vector<2x8x8xf32> to vector<16x8xf32>
    %71 = vector.extract_strided_slice %2 {offsets = [8, 0], sizes = [8, 32], strides = [1, 1]} : vector<32x32xf32> to vector<8x32xf32>
    %cst_23 = arith.constant dense<0.000000e+00> : vector<16x32xf32>
    %72 = tpu.matmul %70, %71, %cst_23 {dimension_numbers = #tpu.dot_dimension_numbers<[1], [0], [0], [1], [0, 0, 1, 1], [], []>, precision = #tpu.contract_precision<fp32>} : vector<16x8xf32>, vector<8x32xf32>, vector<16x32xf32> -> vector<16x32xf32>
    %73 = arith.addf %50, %72 : vector<16x32xf32>
    %74 = vector.extract_strided_slice %28 {offsets = [0, 16], sizes = [16, 8], strides = [1, 1]} : vector<16x96xf32> to vector<16x8xf32>
    %75 = vector.shape_cast %74 : vector<16x8xf32> to vector<2x8x8xf32>
    %76 = vector.extract_strided_slice %28 {offsets = [0, 48], sizes = [16, 8], strides = [1, 1]} : vector<16x96xf32> to vector<16x8xf32>
    %77 = vector.shape_cast %76 : vector<16x8xf32> to vector<2x8x8xf32>
    %78 = vector.extract_strided_slice %28 {offsets = [0, 80], sizes = [16, 8], strides = [1, 1]} : vector<16x96xf32> to vector<16x8xf32>
    %79 = vector.shape_cast %78 : vector<16x8xf32> to vector<2x8x8xf32>
    "tpu.trace_start"() <{level = 10 : i32, message = "bqd,bkd->bqk"}> : () -> ()
    %cst_24 = arith.constant dense<0.000000e+00> : vector<2x8x8xf32>
    %80 = tpu.matmul %75, %77, %cst_24 {dimension_numbers = #tpu.dot_dimension_numbers<[2], [2], [1], [1], [0, 0, 0, 1, 1, 1], [0], [0]>, precision = #tpu.contract_precision<fp32>} : vector<2x8x8xf32>, vector<2x8x8xf32>, vector<2x8x8xf32> -> vector<2x8x8xf32>
    "tpu.trace_stop"() : () -> ()
    %cst_25 = arith.constant 0.353553385 : f32
    %81 = vector.broadcast %cst_25 : f32 to vector<2x8x8xf32>
    %82 = arith.mulf %80, %81 : vector<2x8x8xf32>
    %cst_26 = arith.constant dense<0xFF800000> : vector<2x8xf32>
    %83 = vector.multi_reduction <maximumf>, %82, %cst_26 [2] : vector<2x8x8xf32> to vector<2x8xf32>
    %84 = vector.shape_cast %83 : vector<2x8xf32> to vector<2x8x1xf32>
    %85 = vector.broadcast %84 : vector<2x8x1xf32> to vector<2x8x8xf32>
    %86 = arith.subf %82, %85 : vector<2x8x8xf32>
    %87 = math.exp %86 : vector<2x8x8xf32>
    %cst_27 = arith.constant dense<0.000000e+00> : vector<2x8xf32>
    %88 = vector.multi_reduction <add>, %87, %cst_27 [2] : vector<2x8x8xf32> to vector<2x8xf32>
    %89 = vector.shape_cast %88 : vector<2x8xf32> to vector<2x8x1xf32>
    %90 = vector.broadcast %89 : vector<2x8x1xf32> to vector<2x8x8xf32>
    %91 = arith.divf %87, %90 : vector<2x8x8xf32>
    "tpu.trace_start"() <{level = 10 : i32, message = "bqk,bkd->bqd"}> : () -> ()
    %cst_28 = arith.constant dense<0.000000e+00> : vector<2x8x8xf32>
    %92 = tpu.matmul %91, %79, %cst_28 {dimension_numbers = #tpu.dot_dimension_numbers<[2], [1], [1], [2], [0, 0, 0, 1, 1, 2], [0], [0]>, precision = #tpu.contract_precision<fp32>} : vector<2x8x8xf32>, vector<2x8x8xf32>, vector<2x8x8xf32> -> vector<2x8x8xf32>
    "tpu.trace_stop"() : () -> ()
    %93 = vector.shape_cast %92 : vector<2x8x8xf32> to vector<16x8xf32>
    %94 = vector.extract_strided_slice %2 {offsets = [16, 0], sizes = [8, 32], strides = [1, 1]} : vector<32x32xf32> to vector<8x32xf32>
    %cst_29 = arith.constant dense<0.000000e+00> : vector<16x32xf32>
    %95 = tpu.matmul %93, %94, %cst_29 {dimension_numbers = #tpu.dot_dimension_numbers<[1], [0], [0], [1], [0, 0, 1, 1], [], []>, precision = #tpu.contract_precision<fp32>} : vector<16x8xf32>, vector<8x32xf32>, vector<16x32xf32> -> vector<16x32xf32>
    %96 = arith.addf %73, %95 : vector<16x32xf32>
    %97 = vector.extract_strided_slice %28 {offsets = [0, 24], sizes = [16, 8], strides = [1, 1]} : vector<16x96xf32> to vector<16x8xf32>
    %98 = vector.shape_cast %97 : vector<16x8xf32> to vector<2x8x8xf32>
    %99 = vector.extract_strided_slice %28 {offsets = [0, 56], sizes = [16, 8], strides = [1, 1]} : vector<16x96xf32> to vector<16x8xf32>
    %100 = vector.shape_cast %99 : vector<16x8xf32> to vector<2x8x8xf32>
    %101 = vector.extract_strided_slice %28 {offsets = [0, 88], sizes = [16, 8], strides = [1, 1]} : vector<16x96xf32> to vector<16x8xf32>
    %102 = vector.shape_cast %101 : vector<16x8xf32> to vector<2x8x8xf32>
    "tpu.trace_start"() <{level = 10 : i32, message = "bqd,bkd->bqk"}> : () -> ()
    %cst_30 = arith.constant dense<0.000000e+00> : vector<2x8x8xf32>
    %103 = tpu.matmul %98, %100, %cst_30 {dimension_numbers = #tpu.dot_dimension_numbers<[2], [2], [1], [1], [0, 0, 0, 1, 1, 1], [0], [0]>, precision = #tpu.contract_precision<fp32>} : vector<2x8x8xf32>, vector<2x8x8xf32>, vector<2x8x8xf32> -> vector<2x8x8xf32>
    "tpu.trace_stop"() : () -> ()
    %cst_31 = arith.constant 0.353553385 : f32
    %104 = vector.broadcast %cst_31 : f32 to vector<2x8x8xf32>
    %105 = arith.mulf %103, %104 : vector<2x8x8xf32>
    %cst_32 = arith.constant dense<0xFF800000> : vector<2x8xf32>
    %106 = vector.multi_reduction <maximumf>, %105, %cst_32 [2] : vector<2x8x8xf32> to vector<2x8xf32>
    %107 = vector.shape_cast %106 : vector<2x8xf32> to vector<2x8x1xf32>
    %108 = vector.broadcast %107 : vector<2x8x1xf32> to vector<2x8x8xf32>
    %109 = arith.subf %105, %108 : vector<2x8x8xf32>
    %110 = math.exp %109 : vector<2x8x8xf32>
    %cst_33 = arith.constant dense<0.000000e+00> : vector<2x8xf32>
    %111 = vector.multi_reduction <add>, %110, %cst_33 [2] : vector<2x8x8xf32> to vector<2x8xf32>
    %112 = vector.shape_cast %111 : vector<2x8xf32> to vector<2x8x1xf32>
    %113 = vector.broadcast %112 : vector<2x8x1xf32> to vector<2x8x8xf32>
    %114 = arith.divf %110, %113 : vector<2x8x8xf32>
    "tpu.trace_start"() <{level = 10 : i32, message = "bqk,bkd->bqd"}> : () -> ()
    %cst_34 = arith.constant dense<0.000000e+00> : vector<2x8x8xf32>
    %115 = tpu.matmul %114, %102, %cst_34 {dimension_numbers = #tpu.dot_dimension_numbers<[2], [1], [1], [2], [0, 0, 0, 1, 1, 2], [0], [0]>, precision = #tpu.contract_precision<fp32>} : vector<2x8x8xf32>, vector<2x8x8xf32>, vector<2x8x8xf32> -> vector<2x8x8xf32>
    "tpu.trace_stop"() : () -> ()
    %116 = vector.shape_cast %115 : vector<2x8x8xf32> to vector<16x8xf32>
    %117 = vector.extract_strided_slice %2 {offsets = [24, 0], sizes = [8, 32], strides = [1, 1]} : vector<32x32xf32> to vector<8x32xf32>
    %cst_35 = arith.constant dense<0.000000e+00> : vector<16x32xf32>
    %118 = tpu.matmul %116, %117, %cst_35 {dimension_numbers = #tpu.dot_dimension_numbers<[1], [0], [0], [1], [0, 0, 1, 1], [], []>, precision = #tpu.contract_precision<fp32>} : vector<16x8xf32>, vector<8x32xf32>, vector<16x32xf32> -> vector<16x32xf32>
    %119 = arith.addf %96, %118 : vector<16x32xf32>
    %120 = arith.addf %119, %13 : vector<16x32xf32>
    %cst_36 = arith.constant dense<0.000000e+00> : vector<16xf32>
    %121 = vector.multi_reduction <add>, %120, %cst_36 [1] : vector<16x32xf32> to vector<16xf32>
    %122 = vector.shape_cast %121 : vector<16xf32> to vector<16x1xf32>
    %cst_37 = arith.constant 3.200000e+01 : f32
    %123 = vector.broadcast %cst_37 : f32 to vector<16x1xf32>
    %124 = arith.divf %122, %123 : vector<16x1xf32>
    %125 = vector.broadcast %124 : vector<16x1xf32> to vector<16x32xf32>
    %126 = arith.subf %120, %125 : vector<16x32xf32>
    %127 = arith.mulf %126, %126 : vector<16x32xf32>
    %cst_38 = arith.constant dense<0.000000e+00> : vector<16xf32>
    %128 = vector.multi_reduction <add>, %127, %cst_38 [1] : vector<16x32xf32> to vector<16xf32>
    %129 = vector.shape_cast %128 : vector<16xf32> to vector<16x1xf32>
    %cst_39 = arith.constant 3.200000e+01 : f32
    %130 = vector.broadcast %cst_39 : f32 to vector<16x1xf32>
    %131 = arith.divf %129, %130 : vector<16x1xf32>
    %132 = vector.broadcast %124 : vector<16x1xf32> to vector<16x32xf32>
    %133 = arith.subf %120, %132 : vector<16x32xf32>
    %cst_40 = arith.constant 9.99999974E-6 : f32
    %134 = vector.broadcast %cst_40 : f32 to vector<16x1xf32>
    %135 = arith.addf %131, %134 : vector<16x1xf32>
    %136 = math.rsqrt %135 : vector<16x1xf32>
    %137 = vector.broadcast %136 : vector<16x1xf32> to vector<16x32xf32>
    %138 = arith.mulf %133, %137 : vector<16x32xf32>
    %139 = arith.mulf %138, %16 : vector<16x32xf32>
    %140 = arith.addf %139, %19 : vector<16x32xf32>
    %cst_41 = arith.constant dense<0.000000e+00> : vector<16x96xf32>
    %141 = tpu.matmul %140, %1, %cst_41 {dimension_numbers = #tpu.dot_dimension_numbers<[1], [0], [0], [1], [0, 0, 1, 1], [], []>, precision = #tpu.contract_precision<fp32>} : vector<16x32xf32>, vector<32x96xf32>, vector<16x96xf32> -> vector<16x96xf32>
    %142 = arith.addf %141, %10 : vector<16x96xf32>
    %143 = vector.extract_strided_slice %142 {offsets = [0, 0], sizes = [16, 8], strides = [1, 1]} : vector<16x96xf32> to vector<16x8xf32>
    %144 = vector.shape_cast %143 : vector<16x8xf32> to vector<2x8x8xf32>
    %145 = vector.extract_strided_slice %142 {offsets = [0, 32], sizes = [16, 8], strides = [1, 1]} : vector<16x96xf32> to vector<16x8xf32>
    %146 = vector.shape_cast %145 : vector<16x8xf32> to vector<2x8x8xf32>
    %147 = vector.extract_strided_slice %142 {offsets = [0, 64], sizes = [16, 8], strides = [1, 1]} : vector<16x96xf32> to vector<16x8xf32>
    %148 = vector.shape_cast %147 : vector<16x8xf32> to vector<2x8x8xf32>
    "tpu.trace_start"() <{level = 10 : i32, message = "bqd,bkd->bqk"}> : () -> ()
    %cst_42 = arith.constant dense<0.000000e+00> : vector<2x8x8xf32>
    %149 = tpu.matmul %144, %146, %cst_42 {dimension_numbers = #tpu.dot_dimension_numbers<[2], [2], [1], [1], [0, 0, 0, 1, 1, 1], [0], [0]>, precision = #tpu.contract_precision<fp32>} : vector<2x8x8xf32>, vector<2x8x8xf32>, vector<2x8x8xf32> -> vector<2x8x8xf32>
    "tpu.trace_stop"() : () -> ()
    %cst_43 = arith.constant 0.353553385 : f32
    %150 = vector.broadcast %cst_43 : f32 to vector<2x8x8xf32>
    %151 = arith.mulf %149, %150 : vector<2x8x8xf32>
    %cst_44 = arith.constant dense<0xFF800000> : vector<2x8xf32>
    %152 = vector.multi_reduction <maximumf>, %151, %cst_44 [2] : vector<2x8x8xf32> to vector<2x8xf32>
    %153 = vector.shape_cast %152 : vector<2x8xf32> to vector<2x8x1xf32>
    %154 = vector.broadcast %153 : vector<2x8x1xf32> to vector<2x8x8xf32>
    %155 = arith.subf %151, %154 : vector<2x8x8xf32>
    %156 = math.exp %155 : vector<2x8x8xf32>
    %cst_45 = arith.constant dense<0.000000e+00> : vector<2x8xf32>
    %157 = vector.multi_reduction <add>, %156, %cst_45 [2] : vector<2x8x8xf32> to vector<2x8xf32>
    %158 = vector.shape_cast %157 : vector<2x8xf32> to vector<2x8x1xf32>
    %159 = vector.broadcast %158 : vector<2x8x1xf32> to vector<2x8x8xf32>
    %160 = arith.divf %156, %159 : vector<2x8x8xf32>
    "tpu.trace_start"() <{level = 10 : i32, message = "bqk,bkd->bqd"}> : () -> ()
    %cst_46 = arith.constant dense<0.000000e+00> : vector<2x8x8xf32>
    %161 = tpu.matmul %160, %148, %cst_46 {dimension_numbers = #tpu.dot_dimension_numbers<[2], [1], [1], [2], [0, 0, 0, 1, 1, 2], [0], [0]>, precision = #tpu.contract_precision<fp32>} : vector<2x8x8xf32>, vector<2x8x8xf32>, vector<2x8x8xf32> -> vector<2x8x8xf32>
    "tpu.trace_stop"() : () -> ()
    %162 = vector.shape_cast %161 : vector<2x8x8xf32> to vector<16x8xf32>
    %163 = vector.extract_strided_slice %2 {offsets = [0, 0], sizes = [8, 32], strides = [1, 1]} : vector<32x32xf32> to vector<8x32xf32>
    %cst_47 = arith.constant dense<0.000000e+00> : vector<16x32xf32>
    %164 = tpu.matmul %162, %163, %cst_47 {dimension_numbers = #tpu.dot_dimension_numbers<[1], [0], [0], [1], [0, 0, 1, 1], [], []>, precision = #tpu.contract_precision<fp32>} : vector<16x8xf32>, vector<8x32xf32>, vector<16x32xf32> -> vector<16x32xf32>
    %165 = vector.extract_strided_slice %142 {offsets = [0, 8], sizes = [16, 8], strides = [1, 1]} : vector<16x96xf32> to vector<16x8xf32>
    %166 = vector.shape_cast %165 : vector<16x8xf32> to vector<2x8x8xf32>
    %167 = vector.extract_strided_slice %142 {offsets = [0, 40], sizes = [16, 8], strides = [1, 1]} : vector<16x96xf32> to vector<16x8xf32>
    %168 = vector.shape_cast %167 : vector<16x8xf32> to vector<2x8x8xf32>
    %169 = vector.extract_strided_slice %142 {offsets = [0, 72], sizes = [16, 8], strides = [1, 1]} : vector<16x96xf32> to vector<16x8xf32>
    %170 = vector.shape_cast %169 : vector<16x8xf32> to vector<2x8x8xf32>
    "tpu.trace_start"() <{level = 10 : i32, message = "bqd,bkd->bqk"}> : () -> ()
    %cst_48 = arith.constant dense<0.000000e+00> : vector<2x8x8xf32>
    %171 = tpu.matmul %166, %168, %cst_48 {dimension_numbers = #tpu.dot_dimension_numbers<[2], [2], [1], [1], [0, 0, 0, 1, 1, 1], [0], [0]>, precision = #tpu.contract_precision<fp32>} : vector<2x8x8xf32>, vector<2x8x8xf32>, vector<2x8x8xf32> -> vector<2x8x8xf32>
    "tpu.trace_stop"() : () -> ()
    %cst_49 = arith.constant 0.353553385 : f32
    %172 = vector.broadcast %cst_49 : f32 to vector<2x8x8xf32>
    %173 = arith.mulf %171, %172 : vector<2x8x8xf32>
    %cst_50 = arith.constant dense<0xFF800000> : vector<2x8xf32>
    %174 = vector.multi_reduction <maximumf>, %173, %cst_50 [2] : vector<2x8x8xf32> to vector<2x8xf32>
    %175 = vector.shape_cast %174 : vector<2x8xf32> to vector<2x8x1xf32>
    %176 = vector.broadcast %175 : vector<2x8x1xf32> to vector<2x8x8xf32>
    %177 = arith.subf %173, %176 : vector<2x8x8xf32>
    %178 = math.exp %177 : vector<2x8x8xf32>
    %cst_51 = arith.constant dense<0.000000e+00> : vector<2x8xf32>
    %179 = vector.multi_reduction <add>, %178, %cst_51 [2] : vector<2x8x8xf32> to vector<2x8xf32>
    %180 = vector.shape_cast %179 : vector<2x8xf32> to vector<2x8x1xf32>
    %181 = vector.broadcast %180 : vector<2x8x1xf32> to vector<2x8x8xf32>
    %182 = arith.divf %178, %181 : vector<2x8x8xf32>
    "tpu.trace_start"() <{level = 10 : i32, message = "bqk,bkd->bqd"}> : () -> ()
    %cst_52 = arith.constant dense<0.000000e+00> : vector<2x8x8xf32>
    %183 = tpu.matmul %182, %170, %cst_52 {dimension_numbers = #tpu.dot_dimension_numbers<[2], [1], [1], [2], [0, 0, 0, 1, 1, 2], [0], [0]>, precision = #tpu.contract_precision<fp32>} : vector<2x8x8xf32>, vector<2x8x8xf32>, vector<2x8x8xf32> -> vector<2x8x8xf32>
    "tpu.trace_stop"() : () -> ()
    %184 = vector.shape_cast %183 : vector<2x8x8xf32> to vector<16x8xf32>
    %185 = vector.extract_strided_slice %2 {offsets = [8, 0], sizes = [8, 32], strides = [1, 1]} : vector<32x32xf32> to vector<8x32xf32>
    %cst_53 = arith.constant dense<0.000000e+00> : vector<16x32xf32>
    %186 = tpu.matmul %184, %185, %cst_53 {dimension_numbers = #tpu.dot_dimension_numbers<[1], [0], [0], [1], [0, 0, 1, 1], [], []>, precision = #tpu.contract_precision<fp32>} : vector<16x8xf32>, vector<8x32xf32>, vector<16x32xf32> -> vector<16x32xf32>
    %187 = arith.addf %164, %186 : vector<16x32xf32>
    %188 = vector.extract_strided_slice %142 {offsets = [0, 16], sizes = [16, 8], strides = [1, 1]} : vector<16x96xf32> to vector<16x8xf32>
    %189 = vector.shape_cast %188 : vector<16x8xf32> to vector<2x8x8xf32>
    %190 = vector.extract_strided_slice %142 {offsets = [0, 48], sizes = [16, 8], strides = [1, 1]} : vector<16x96xf32> to vector<16x8xf32>
    %191 = vector.shape_cast %190 : vector<16x8xf32> to vector<2x8x8xf32>
    %192 = vector.extract_strided_slice %142 {offsets = [0, 80], sizes = [16, 8], strides = [1, 1]} : vector<16x96xf32> to vector<16x8xf32>
    %193 = vector.shape_cast %192 : vector<16x8xf32> to vector<2x8x8xf32>
    "tpu.trace_start"() <{level = 10 : i32, message = "bqd,bkd->bqk"}> : () -> ()
    %cst_54 = arith.constant dense<0.000000e+00> : vector<2x8x8xf32>
    %194 = tpu.matmul %189, %191, %cst_54 {dimension_numbers = #tpu.dot_dimension_numbers<[2], [2], [1], [1], [0, 0, 0, 1, 1, 1], [0], [0]>, precision = #tpu.contract_precision<fp32>} : vector<2x8x8xf32>, vector<2x8x8xf32>, vector<2x8x8xf32> -> vector<2x8x8xf32>
    "tpu.trace_stop"() : () -> ()
    %cst_55 = arith.constant 0.353553385 : f32
    %195 = vector.broadcast %cst_55 : f32 to vector<2x8x8xf32>
    %196 = arith.mulf %194, %195 : vector<2x8x8xf32>
    %cst_56 = arith.constant dense<0xFF800000> : vector<2x8xf32>
    %197 = vector.multi_reduction <maximumf>, %196, %cst_56 [2] : vector<2x8x8xf32> to vector<2x8xf32>
    %198 = vector.shape_cast %197 : vector<2x8xf32> to vector<2x8x1xf32>
    %199 = vector.broadcast %198 : vector<2x8x1xf32> to vector<2x8x8xf32>
    %200 = arith.subf %196, %199 : vector<2x8x8xf32>
    %201 = math.exp %200 : vector<2x8x8xf32>
    %cst_57 = arith.constant dense<0.000000e+00> : vector<2x8xf32>
    %202 = vector.multi_reduction <add>, %201, %cst_57 [2] : vector<2x8x8xf32> to vector<2x8xf32>
    %203 = vector.shape_cast %202 : vector<2x8xf32> to vector<2x8x1xf32>
    %204 = vector.broadcast %203 : vector<2x8x1xf32> to vector<2x8x8xf32>
    %205 = arith.divf %201, %204 : vector<2x8x8xf32>
    "tpu.trace_start"() <{level = 10 : i32, message = "bqk,bkd->bqd"}> : () -> ()
    %cst_58 = arith.constant dense<0.000000e+00> : vector<2x8x8xf32>
    %206 = tpu.matmul %205, %193, %cst_58 {dimension_numbers = #tpu.dot_dimension_numbers<[2], [1], [1], [2], [0, 0, 0, 1, 1, 2], [0], [0]>, precision = #tpu.contract_precision<fp32>} : vector<2x8x8xf32>, vector<2x8x8xf32>, vector<2x8x8xf32> -> vector<2x8x8xf32>
    "tpu.trace_stop"() : () -> ()
    %207 = vector.shape_cast %206 : vector<2x8x8xf32> to vector<16x8xf32>
    %208 = vector.extract_strided_slice %2 {offsets = [16, 0], sizes = [8, 32], strides = [1, 1]} : vector<32x32xf32> to vector<8x32xf32>
    %cst_59 = arith.constant dense<0.000000e+00> : vector<16x32xf32>
    %209 = tpu.matmul %207, %208, %cst_59 {dimension_numbers = #tpu.dot_dimension_numbers<[1], [0], [0], [1], [0, 0, 1, 1], [], []>, precision = #tpu.contract_precision<fp32>} : vector<16x8xf32>, vector<8x32xf32>, vector<16x32xf32> -> vector<16x32xf32>
    %210 = arith.addf %187, %209 : vector<16x32xf32>
    %211 = vector.extract_strided_slice %142 {offsets = [0, 24], sizes = [16, 8], strides = [1, 1]} : vector<16x96xf32> to vector<16x8xf32>
    %212 = vector.shape_cast %211 : vector<16x8xf32> to vector<2x8x8xf32>
    %213 = vector.extract_strided_slice %142 {offsets = [0, 56], sizes = [16, 8], strides = [1, 1]} : vector<16x96xf32> to vector<16x8xf32>
    %214 = vector.shape_cast %213 : vector<16x8xf32> to vector<2x8x8xf32>
    %215 = vector.extract_strided_slice %142 {offsets = [0, 88], sizes = [16, 8], strides = [1, 1]} : vector<16x96xf32> to vector<16x8xf32>
    %216 = vector.shape_cast %215 : vector<16x8xf32> to vector<2x8x8xf32>
    "tpu.trace_start"() <{level = 10 : i32, message = "bqd,bkd->bqk"}> : () -> ()
    %cst_60 = arith.constant dense<0.000000e+00> : vector<2x8x8xf32>
    %217 = tpu.matmul %212, %214, %cst_60 {dimension_numbers = #tpu.dot_dimension_numbers<[2], [2], [1], [1], [0, 0, 0, 1, 1, 1], [0], [0]>, precision = #tpu.contract_precision<fp32>} : vector<2x8x8xf32>, vector<2x8x8xf32>, vector<2x8x8xf32> -> vector<2x8x8xf32>
    "tpu.trace_stop"() : () -> ()
    %cst_61 = arith.constant 0.353553385 : f32
    %218 = vector.broadcast %cst_61 : f32 to vector<2x8x8xf32>
    %219 = arith.mulf %217, %218 : vector<2x8x8xf32>
    %cst_62 = arith.constant dense<0xFF800000> : vector<2x8xf32>
    %220 = vector.multi_reduction <maximumf>, %219, %cst_62 [2] : vector<2x8x8xf32> to vector<2x8xf32>
    %221 = vector.shape_cast %220 : vector<2x8xf32> to vector<2x8x1xf32>
    %222 = vector.broadcast %221 : vector<2x8x1xf32> to vector<2x8x8xf32>
    %223 = arith.subf %219, %222 : vector<2x8x8xf32>
    %224 = math.exp %223 : vector<2x8x8xf32>
    %cst_63 = arith.constant dense<0.000000e+00> : vector<2x8xf32>
    %225 = vector.multi_reduction <add>, %224, %cst_63 [2] : vector<2x8x8xf32> to vector<2x8xf32>
    %226 = vector.shape_cast %225 : vector<2x8xf32> to vector<2x8x1xf32>
    %227 = vector.broadcast %226 : vector<2x8x1xf32> to vector<2x8x8xf32>
    %228 = arith.divf %224, %227 : vector<2x8x8xf32>
    "tpu.trace_start"() <{level = 10 : i32, message = "bqk,bkd->bqd"}> : () -> ()
    %cst_64 = arith.constant dense<0.000000e+00> : vector<2x8x8xf32>
    %229 = tpu.matmul %228, %216, %cst_64 {dimension_numbers = #tpu.dot_dimension_numbers<[2], [1], [1], [2], [0, 0, 0, 1, 1, 2], [0], [0]>, precision = #tpu.contract_precision<fp32>} : vector<2x8x8xf32>, vector<2x8x8xf32>, vector<2x8x8xf32> -> vector<2x8x8xf32>
    "tpu.trace_stop"() : () -> ()
    %230 = vector.shape_cast %229 : vector<2x8x8xf32> to vector<16x8xf32>
    %231 = vector.extract_strided_slice %2 {offsets = [24, 0], sizes = [8, 32], strides = [1, 1]} : vector<32x32xf32> to vector<8x32xf32>
    %cst_65 = arith.constant dense<0.000000e+00> : vector<16x32xf32>
    %232 = tpu.matmul %230, %231, %cst_65 {dimension_numbers = #tpu.dot_dimension_numbers<[1], [0], [0], [1], [0, 0, 1, 1], [], []>, precision = #tpu.contract_precision<fp32>} : vector<16x8xf32>, vector<8x32xf32>, vector<16x32xf32> -> vector<16x32xf32>
    %233 = arith.addf %210, %232 : vector<16x32xf32>
    %234 = arith.addf %233, %13 : vector<16x32xf32>
    %cst_66 = arith.constant dense<0.000000e+00> : vector<16xf32>
    %235 = vector.multi_reduction <add>, %234, %cst_66 [1] : vector<16x32xf32> to vector<16xf32>
    %236 = vector.shape_cast %235 : vector<16xf32> to vector<16x1xf32>
    %cst_67 = arith.constant 3.200000e+01 : f32
    %237 = vector.broadcast %cst_67 : f32 to vector<16x1xf32>
    %238 = arith.divf %236, %237 : vector<16x1xf32>
    %239 = vector.broadcast %238 : vector<16x1xf32> to vector<16x32xf32>
    %240 = arith.subf %234, %239 : vector<16x32xf32>
    %241 = arith.mulf %240, %240 : vector<16x32xf32>
    %cst_68 = arith.constant dense<0.000000e+00> : vector<16xf32>
    %242 = vector.multi_reduction <add>, %241, %cst_68 [1] : vector<16x32xf32> to vector<16xf32>
    %243 = vector.shape_cast %242 : vector<16xf32> to vector<16x1xf32>
    %cst_69 = arith.constant 3.200000e+01 : f32
    %244 = vector.broadcast %cst_69 : f32 to vector<16x1xf32>
    %245 = arith.divf %243, %244 : vector<16x1xf32>
    %246 = vector.broadcast %238 : vector<16x1xf32> to vector<16x32xf32>
    %247 = arith.subf %234, %246 : vector<16x32xf32>
    %cst_70 = arith.constant 9.99999974E-6 : f32
    %248 = vector.broadcast %cst_70 : f32 to vector<16x1xf32>
    %249 = arith.addf %245, %248 : vector<16x1xf32>
    %250 = math.rsqrt %249 : vector<16x1xf32>
    %251 = vector.broadcast %250 : vector<16x1xf32> to vector<16x32xf32>
    %252 = arith.mulf %247, %251 : vector<16x32xf32>
    %253 = arith.mulf %252, %16 : vector<16x32xf32>
    %254 = arith.addf %253, %19 : vector<16x32xf32>
    %cst_71 = arith.constant dense<0.000000e+00> : vector<16x96xf32>
    %255 = tpu.matmul %254, %1, %cst_71 {dimension_numbers = #tpu.dot_dimension_numbers<[1], [0], [0], [1], [0, 0, 1, 1], [], []>, precision = #tpu.contract_precision<fp32>} : vector<16x32xf32>, vector<32x96xf32>, vector<16x96xf32> -> vector<16x96xf32>
    %256 = arith.addf %255, %10 : vector<16x96xf32>
    %257 = vector.extract_strided_slice %256 {offsets = [0, 0], sizes = [16, 8], strides = [1, 1]} : vector<16x96xf32> to vector<16x8xf32>
    %258 = vector.shape_cast %257 : vector<16x8xf32> to vector<2x8x8xf32>
    %259 = vector.extract_strided_slice %256 {offsets = [0, 32], sizes = [16, 8], strides = [1, 1]} : vector<16x96xf32> to vector<16x8xf32>
    %260 = vector.shape_cast %259 : vector<16x8xf32> to vector<2x8x8xf32>
    %261 = vector.extract_strided_slice %256 {offsets = [0, 64], sizes = [16, 8], strides = [1, 1]} : vector<16x96xf32> to vector<16x8xf32>
    %262 = vector.shape_cast %261 : vector<16x8xf32> to vector<2x8x8xf32>
    "tpu.trace_start"() <{level = 10 : i32, message = "bqd,bkd->bqk"}> : () -> ()
    %cst_72 = arith.constant dense<0.000000e+00> : vector<2x8x8xf32>
    %263 = tpu.matmul %258, %260, %cst_72 {dimension_numbers = #tpu.dot_dimension_numbers<[2], [2], [1], [1], [0, 0, 0, 1, 1, 1], [0], [0]>, precision = #tpu.contract_precision<fp32>} : vector<2x8x8xf32>, vector<2x8x8xf32>, vector<2x8x8xf32> -> vector<2x8x8xf32>
    "tpu.trace_stop"() : () -> ()
    %cst_73 = arith.constant 0.353553385 : f32
    %264 = vector.broadcast %cst_73 : f32 to vector<2x8x8xf32>
    %265 = arith.mulf %263, %264 : vector<2x8x8xf32>
    %cst_74 = arith.constant dense<0xFF800000> : vector<2x8xf32>
    %266 = vector.multi_reduction <maximumf>, %265, %cst_74 [2] : vector<2x8x8xf32> to vector<2x8xf32>
    %267 = vector.shape_cast %266 : vector<2x8xf32> to vector<2x8x1xf32>
    %268 = vector.broadcast %267 : vector<2x8x1xf32> to vector<2x8x8xf32>
    %269 = arith.subf %265, %268 : vector<2x8x8xf32>
    %270 = math.exp %269 : vector<2x8x8xf32>
    %cst_75 = arith.constant dense<0.000000e+00> : vector<2x8xf32>
    %271 = vector.multi_reduction <add>, %270, %cst_75 [2] : vector<2x8x8xf32> to vector<2x8xf32>
    %272 = vector.shape_cast %271 : vector<2x8xf32> to vector<2x8x1xf32>
    %273 = vector.broadcast %272 : vector<2x8x1xf32> to vector<2x8x8xf32>
    %274 = arith.divf %270, %273 : vector<2x8x8xf32>
    "tpu.trace_start"() <{level = 10 : i32, message = "bqk,bkd->bqd"}> : () -> ()
    %cst_76 = arith.constant dense<0.000000e+00> : vector<2x8x8xf32>
    %275 = tpu.matmul %274, %262, %cst_76 {dimension_numbers = #tpu.dot_dimension_numbers<[2], [1], [1], [2], [0, 0, 0, 1, 1, 2], [0], [0]>, precision = #tpu.contract_precision<fp32>} : vector<2x8x8xf32>, vector<2x8x8xf32>, vector<2x8x8xf32> -> vector<2x8x8xf32>
    "tpu.trace_stop"() : () -> ()
    %276 = vector.shape_cast %275 : vector<2x8x8xf32> to vector<16x8xf32>
    %277 = vector.extract_strided_slice %3 {offsets = [0, 0], sizes = [8, 8], strides = [1, 1]} : vector<32x8xf32> to vector<8x8xf32>
    %cst_77 = arith.constant dense<0.000000e+00> : vector<16x8xf32>
    %278 = tpu.matmul %276, %277, %cst_77 {dimension_numbers = #tpu.dot_dimension_numbers<[1], [0], [0], [1], [0, 0, 1, 1], [], []>, precision = #tpu.contract_precision<fp32>} : vector<16x8xf32>, vector<8x8xf32>, vector<16x8xf32> -> vector<16x8xf32>
    %279 = vector.extract_strided_slice %256 {offsets = [0, 8], sizes = [16, 8], strides = [1, 1]} : vector<16x96xf32> to vector<16x8xf32>
    %280 = vector.shape_cast %279 : vector<16x8xf32> to vector<2x8x8xf32>
    %281 = vector.extract_strided_slice %256 {offsets = [0, 40], sizes = [16, 8], strides = [1, 1]} : vector<16x96xf32> to vector<16x8xf32>
    %282 = vector.shape_cast %281 : vector<16x8xf32> to vector<2x8x8xf32>
    %283 = vector.extract_strided_slice %256 {offsets = [0, 72], sizes = [16, 8], strides = [1, 1]} : vector<16x96xf32> to vector<16x8xf32>
    %284 = vector.shape_cast %283 : vector<16x8xf32> to vector<2x8x8xf32>
    "tpu.trace_start"() <{level = 10 : i32, message = "bqd,bkd->bqk"}> : () -> ()
    %cst_78 = arith.constant dense<0.000000e+00> : vector<2x8x8xf32>
    %285 = tpu.matmul %280, %282, %cst_78 {dimension_numbers = #tpu.dot_dimension_numbers<[2], [2], [1], [1], [0, 0, 0, 1, 1, 1], [0], [0]>, precision = #tpu.contract_precision<fp32>} : vector<2x8x8xf32>, vector<2x8x8xf32>, vector<2x8x8xf32> -> vector<2x8x8xf32>
    "tpu.trace_stop"() : () -> ()
    %cst_79 = arith.constant 0.353553385 : f32
    %286 = vector.broadcast %cst_79 : f32 to vector<2x8x8xf32>
    %287 = arith.mulf %285, %286 : vector<2x8x8xf32>
    %cst_80 = arith.constant dense<0xFF800000> : vector<2x8xf32>
    %288 = vector.multi_reduction <maximumf>, %287, %cst_80 [2] : vector<2x8x8xf32> to vector<2x8xf32>
    %289 = vector.shape_cast %288 : vector<2x8xf32> to vector<2x8x1xf32>
    %290 = vector.broadcast %289 : vector<2x8x1xf32> to vector<2x8x8xf32>
    %291 = arith.subf %287, %290 : vector<2x8x8xf32>
    %292 = math.exp %291 : vector<2x8x8xf32>
    %cst_81 = arith.constant dense<0.000000e+00> : vector<2x8xf32>
    %293 = vector.multi_reduction <add>, %292, %cst_81 [2] : vector<2x8x8xf32> to vector<2x8xf32>
    %294 = vector.shape_cast %293 : vector<2x8xf32> to vector<2x8x1xf32>
    %295 = vector.broadcast %294 : vector<2x8x1xf32> to vector<2x8x8xf32>
    %296 = arith.divf %292, %295 : vector<2x8x8xf32>
    "tpu.trace_start"() <{level = 10 : i32, message = "bqk,bkd->bqd"}> : () -> ()
    %cst_82 = arith.constant dense<0.000000e+00> : vector<2x8x8xf32>
    %297 = tpu.matmul %296, %284, %cst_82 {dimension_numbers = #tpu.dot_dimension_numbers<[2], [1], [1], [2], [0, 0, 0, 1, 1, 2], [0], [0]>, precision = #tpu.contract_precision<fp32>} : vector<2x8x8xf32>, vector<2x8x8xf32>, vector<2x8x8xf32> -> vector<2x8x8xf32>
    "tpu.trace_stop"() : () -> ()
    %298 = vector.shape_cast %297 : vector<2x8x8xf32> to vector<16x8xf32>
    %299 = vector.extract_strided_slice %3 {offsets = [8, 0], sizes = [8, 8], strides = [1, 1]} : vector<32x8xf32> to vector<8x8xf32>
    %cst_83 = arith.constant dense<0.000000e+00> : vector<16x8xf32>
    %300 = tpu.matmul %298, %299, %cst_83 {dimension_numbers = #tpu.dot_dimension_numbers<[1], [0], [0], [1], [0, 0, 1, 1], [], []>, precision = #tpu.contract_precision<fp32>} : vector<16x8xf32>, vector<8x8xf32>, vector<16x8xf32> -> vector<16x8xf32>
    %301 = arith.addf %278, %300 : vector<16x8xf32>
    %302 = vector.extract_strided_slice %256 {offsets = [0, 16], sizes = [16, 8], strides = [1, 1]} : vector<16x96xf32> to vector<16x8xf32>
    %303 = vector.shape_cast %302 : vector<16x8xf32> to vector<2x8x8xf32>
    %304 = vector.extract_strided_slice %256 {offsets = [0, 48], sizes = [16, 8], strides = [1, 1]} : vector<16x96xf32> to vector<16x8xf32>
    %305 = vector.shape_cast %304 : vector<16x8xf32> to vector<2x8x8xf32>
    %306 = vector.extract_strided_slice %256 {offsets = [0, 80], sizes = [16, 8], strides = [1, 1]} : vector<16x96xf32> to vector<16x8xf32>
    %307 = vector.shape_cast %306 : vector<16x8xf32> to vector<2x8x8xf32>
    "tpu.trace_start"() <{level = 10 : i32, message = "bqd,bkd->bqk"}> : () -> ()
    %cst_84 = arith.constant dense<0.000000e+00> : vector<2x8x8xf32>
    %308 = tpu.matmul %303, %305, %cst_84 {dimension_numbers = #tpu.dot_dimension_numbers<[2], [2], [1], [1], [0, 0, 0, 1, 1, 1], [0], [0]>, precision = #tpu.contract_precision<fp32>} : vector<2x8x8xf32>, vector<2x8x8xf32>, vector<2x8x8xf32> -> vector<2x8x8xf32>
    "tpu.trace_stop"() : () -> ()
    %cst_85 = arith.constant 0.353553385 : f32
    %309 = vector.broadcast %cst_85 : f32 to vector<2x8x8xf32>
    %310 = arith.mulf %308, %309 : vector<2x8x8xf32>
    %cst_86 = arith.constant dense<0xFF800000> : vector<2x8xf32>
    %311 = vector.multi_reduction <maximumf>, %310, %cst_86 [2] : vector<2x8x8xf32> to vector<2x8xf32>
    %312 = vector.shape_cast %311 : vector<2x8xf32> to vector<2x8x1xf32>
    %313 = vector.broadcast %312 : vector<2x8x1xf32> to vector<2x8x8xf32>
    %314 = arith.subf %310, %313 : vector<2x8x8xf32>
    %315 = math.exp %314 : vector<2x8x8xf32>
    %cst_87 = arith.constant dense<0.000000e+00> : vector<2x8xf32>
    %316 = vector.multi_reduction <add>, %315, %cst_87 [2] : vector<2x8x8xf32> to vector<2x8xf32>
    %317 = vector.shape_cast %316 : vector<2x8xf32> to vector<2x8x1xf32>
    %318 = vector.broadcast %317 : vector<2x8x1xf32> to vector<2x8x8xf32>
    %319 = arith.divf %315, %318 : vector<2x8x8xf32>
    "tpu.trace_start"() <{level = 10 : i32, message = "bqk,bkd->bqd"}> : () -> ()
    %cst_88 = arith.constant dense<0.000000e+00> : vector<2x8x8xf32>
    %320 = tpu.matmul %319, %307, %cst_88 {dimension_numbers = #tpu.dot_dimension_numbers<[2], [1], [1], [2], [0, 0, 0, 1, 1, 2], [0], [0]>, precision = #tpu.contract_precision<fp32>} : vector<2x8x8xf32>, vector<2x8x8xf32>, vector<2x8x8xf32> -> vector<2x8x8xf32>
    "tpu.trace_stop"() : () -> ()
    %321 = vector.shape_cast %320 : vector<2x8x8xf32> to vector<16x8xf32>
    %322 = vector.extract_strided_slice %3 {offsets = [16, 0], sizes = [8, 8], strides = [1, 1]} : vector<32x8xf32> to vector<8x8xf32>
    %cst_89 = arith.constant dense<0.000000e+00> : vector<16x8xf32>
    %323 = tpu.matmul %321, %322, %cst_89 {dimension_numbers = #tpu.dot_dimension_numbers<[1], [0], [0], [1], [0, 0, 1, 1], [], []>, precision = #tpu.contract_precision<fp32>} : vector<16x8xf32>, vector<8x8xf32>, vector<16x8xf32> -> vector<16x8xf32>
    %324 = arith.addf %301, %323 : vector<16x8xf32>
    %325 = vector.extract_strided_slice %256 {offsets = [0, 24], sizes = [16, 8], strides = [1, 1]} : vector<16x96xf32> to vector<16x8xf32>
    %326 = vector.shape_cast %325 : vector<16x8xf32> to vector<2x8x8xf32>
    %327 = vector.extract_strided_slice %256 {offsets = [0, 56], sizes = [16, 8], strides = [1, 1]} : vector<16x96xf32> to vector<16x8xf32>
    %328 = vector.shape_cast %327 : vector<16x8xf32> to vector<2x8x8xf32>
    %329 = vector.extract_strided_slice %256 {offsets = [0, 88], sizes = [16, 8], strides = [1, 1]} : vector<16x96xf32> to vector<16x8xf32>
    %330 = vector.shape_cast %329 : vector<16x8xf32> to vector<2x8x8xf32>
    "tpu.trace_start"() <{level = 10 : i32, message = "bqd,bkd->bqk"}> : () -> ()
    %cst_90 = arith.constant dense<0.000000e+00> : vector<2x8x8xf32>
    %331 = tpu.matmul %326, %328, %cst_90 {dimension_numbers = #tpu.dot_dimension_numbers<[2], [2], [1], [1], [0, 0, 0, 1, 1, 1], [0], [0]>, precision = #tpu.contract_precision<fp32>} : vector<2x8x8xf32>, vector<2x8x8xf32>, vector<2x8x8xf32> -> vector<2x8x8xf32>
    "tpu.trace_stop"() : () -> ()
    %cst_91 = arith.constant 0.353553385 : f32
    %332 = vector.broadcast %cst_91 : f32 to vector<2x8x8xf32>
    %333 = arith.mulf %331, %332 : vector<2x8x8xf32>
    %cst_92 = arith.constant dense<0xFF800000> : vector<2x8xf32>
    %334 = vector.multi_reduction <maximumf>, %333, %cst_92 [2] : vector<2x8x8xf32> to vector<2x8xf32>
    %335 = vector.shape_cast %334 : vector<2x8xf32> to vector<2x8x1xf32>
    %336 = vector.broadcast %335 : vector<2x8x1xf32> to vector<2x8x8xf32>
    %337 = arith.subf %333, %336 : vector<2x8x8xf32>
    %338 = math.exp %337 : vector<2x8x8xf32>
    %cst_93 = arith.constant dense<0.000000e+00> : vector<2x8xf32>
    %339 = vector.multi_reduction <add>, %338, %cst_93 [2] : vector<2x8x8xf32> to vector<2x8xf32>
    %340 = vector.shape_cast %339 : vector<2x8xf32> to vector<2x8x1xf32>
    %341 = vector.broadcast %340 : vector<2x8x1xf32> to vector<2x8x8xf32>
    %342 = arith.divf %338, %341 : vector<2x8x8xf32>
    "tpu.trace_start"() <{level = 10 : i32, message = "bqk,bkd->bqd"}> : () -> ()
    %cst_94 = arith.constant dense<0.000000e+00> : vector<2x8x8xf32>
    %343 = tpu.matmul %342, %330, %cst_94 {dimension_numbers = #tpu.dot_dimension_numbers<[2], [1], [1], [2], [0, 0, 0, 1, 1, 2], [0], [0]>, precision = #tpu.contract_precision<fp32>} : vector<2x8x8xf32>, vector<2x8x8xf32>, vector<2x8x8xf32> -> vector<2x8x8xf32>
    "tpu.trace_stop"() : () -> ()
    %344 = vector.shape_cast %343 : vector<2x8x8xf32> to vector<16x8xf32>
    %345 = vector.extract_strided_slice %3 {offsets = [24, 0], sizes = [8, 8], strides = [1, 1]} : vector<32x8xf32> to vector<8x8xf32>
    %cst_95 = arith.constant dense<0.000000e+00> : vector<16x8xf32>
    %346 = tpu.matmul %344, %345, %cst_95 {dimension_numbers = #tpu.dot_dimension_numbers<[1], [0], [0], [1], [0, 0, 1, 1], [], []>, precision = #tpu.contract_precision<fp32>} : vector<16x8xf32>, vector<8x8xf32>, vector<16x8xf32> -> vector<16x8xf32>
    %347 = arith.addf %324, %346 : vector<16x8xf32>
    %cst_96 = arith.constant 2.000000e+00 : f32
    %348 = vector.broadcast %cst_96 : f32 to vector<16x8xf32>
    %349 = arith.mulf %348, %347 : vector<16x8xf32>
    %cst_97 = arith.constant 2.000000e+00 : f32
    %350 = vector.broadcast %cst_97 : f32 to vector<1x8xf32>
    %351 = arith.mulf %350, %20 : vector<1x8xf32>
    %352 = vector.broadcast %351 : vector<1x8xf32> to vector<16x8xf32>
    %353 = arith.addf %349, %352 : vector<16x8xf32>
    %cst_98 = arith.constant dense<0.000000e+00> : vector<16xf32>
    %354 = vector.multi_reduction <add>, %353, %cst_98 [1] : vector<16x8xf32> to vector<16xf32>
    %355 = vector.shape_cast %354 : vector<16xf32> to vector<16x1xf32>
    %cst_99 = arith.constant 8.000000e+00 : f32
    %356 = vector.broadcast %cst_99 : f32 to vector<16x1xf32>
    %357 = arith.divf %355, %356 : vector<16x1xf32>
    %358 = vector.broadcast %357 : vector<16x1xf32> to vector<16x8xf32>
    %359 = arith.subf %353, %358 : vector<16x8xf32>
    %360 = arith.mulf %359, %359 : vector<16x8xf32>
    %cst_100 = arith.constant dense<0.000000e+00> : vector<16xf32>
    %361 = vector.multi_reduction <add>, %360, %cst_100 [1] : vector<16x8xf32> to vector<16xf32>
    %362 = vector.shape_cast %361 : vector<16xf32> to vector<16x1xf32>
    %cst_101 = arith.constant 8.000000e+00 : f32
    %363 = vector.broadcast %cst_101 : f32 to vector<16x1xf32>
    %364 = arith.divf %362, %363 : vector<16x1xf32>
    %365 = vector.broadcast %357 : vector<16x1xf32> to vector<16x8xf32>
    %366 = arith.subf %353, %365 : vector<16x8xf32>
    %cst_102 = arith.constant 9.99999974E-6 : f32
    %367 = vector.broadcast %cst_102 : f32 to vector<16x1xf32>
    %368 = arith.addf %364, %367 : vector<16x1xf32>
    %369 = math.rsqrt %368 : vector<16x1xf32>
    %370 = vector.broadcast %369 : vector<16x1xf32> to vector<16x8xf32>
    %371 = arith.mulf %366, %370 : vector<16x8xf32>
    %372 = vector.broadcast %21 : vector<1x8xf32> to vector<16x8xf32>
    %373 = arith.mulf %371, %372 : vector<16x8xf32>
    %374 = vector.broadcast %22 : vector<1x8xf32> to vector<16x8xf32>
    %375 = arith.addf %373, %374 : vector<16x8xf32>
    %c0_103 = arith.constant 0 : index
    %c0_104 = arith.constant 0 : index
    %376 = vector.load %arg1[%c0_103, %c0_104] : memref<2x16xf32, #tpu.memory_space<vmem>>, vector<2x16xf32>
    %cst_105 = arith.constant dense<0.000000e+00> : vector<2x8xf32>
    %377 = tpu.matmul %376, %375, %cst_105 {dimension_numbers = #tpu.dot_dimension_numbers<[1], [0], [0], [1], [0, 0, 1, 1], [], []>, precision = #tpu.contract_precision<fp32>} : vector<2x16xf32>, vector<16x8xf32>, vector<2x8xf32> -> vector<2x8xf32>
    %c0_106 = arith.constant 0 : index
    %c0_107 = arith.constant 0 : index
    %378 = vector.load %arg8[%c0_106, %c0_107] : memref<9x16xf32, #tpu.memory_space<vmem>>, vector<9x16xf32>
    %379 = vector.extract_strided_slice %378 {offsets = [0, 0], sizes = [8, 16], strides = [1, 1]} : vector<9x16xf32> to vector<8x16xf32>
    %cst_108 = arith.constant dense<0.000000e+00> : vector<2x16xf32>
    %380 = tpu.matmul %377, %379, %cst_108 {dimension_numbers = #tpu.dot_dimension_numbers<[1], [0], [0], [1], [0, 0, 1, 1], [], []>, precision = #tpu.contract_precision<fp32>} : vector<2x8xf32>, vector<8x16xf32>, vector<2x16xf32> -> vector<2x16xf32>
    %381 = vector.extract_strided_slice %378 {offsets = [8, 0], sizes = [1, 16], strides = [1, 1]} : vector<9x16xf32> to vector<1x16xf32>
    %382 = vector.broadcast %381 : vector<1x16xf32> to vector<2x16xf32>
    %383 = arith.addf %380, %382 : vector<2x16xf32>
    %cst_109 = arith.constant 0.000000e+00 : f32
    %384 = vector.broadcast %cst_109 : f32 to vector<2x16xf32>
    %385 = arith.maximumf %383, %384 : vector<2x16xf32>
    %c0_110 = arith.constant 0 : index
    %c0_111 = arith.constant 0 : index
    %386 = vector.load %arg9[%c0_110, %c0_111] : memref<17x8xf32, #tpu.memory_space<vmem>>, vector<17x8xf32>
    %387 = vector.extract_strided_slice %386 {offsets = [0, 0], sizes = [16, 8], strides = [1, 1]} : vector<17x8xf32> to vector<16x8xf32>
    %cst_112 = arith.constant dense<0.000000e+00> : vector<2x8xf32>
    %388 = tpu.matmul %385, %387, %cst_112 {dimension_numbers = #tpu.dot_dimension_numbers<[1], [0], [0], [1], [0, 0, 1, 1], [], []>, precision = #tpu.contract_precision<fp32>} : vector<2x16xf32>, vector<16x8xf32>, vector<2x8xf32> -> vector<2x8xf32>
    %389 = vector.extract_strided_slice %386 {offsets = [16, 0], sizes = [1, 8], strides = [1, 1]} : vector<17x8xf32> to vector<1x8xf32>
    %390 = vector.broadcast %389 : vector<1x8xf32> to vector<2x8xf32>
    %391 = arith.addf %388, %390 : vector<2x8xf32>
    %cst_113 = arith.constant 0.000000e+00 : f32
    %392 = vector.broadcast %cst_113 : f32 to vector<2x8xf32>
    %393 = arith.maximumf %391, %392 : vector<2x8xf32>
    %c0_114 = arith.constant 0 : index
    %c0_115 = arith.constant 0 : index
    %394 = vector.load %arg10[%c0_114, %c0_115] : memref<9x1xf32, #tpu.memory_space<vmem>>, vector<9x1xf32>
    %395 = vector.extract_strided_slice %394 {offsets = [0, 0], sizes = [8, 1], strides = [1, 1]} : vector<9x1xf32> to vector<8x1xf32>
    %cst_116 = arith.constant dense<0.000000e+00> : vector<2x1xf32>
    %396 = tpu.matmul %393, %395, %cst_116 {dimension_numbers = #tpu.dot_dimension_numbers<[1], [0], [0], [1], [0, 0, 1, 1], [], []>, precision = #tpu.contract_precision<fp32>} : vector<2x8xf32>, vector<8x1xf32>, vector<2x1xf32> -> vector<2x1xf32>
    %397 = vector.extract_strided_slice %394 {offsets = [8, 0], sizes = [1, 1], strides = [1, 1]} : vector<9x1xf32> to vector<1x1xf32>
    %398 = vector.broadcast %397 : vector<1x1xf32> to vector<2x1xf32>
    %399 = arith.addf %396, %398 : vector<2x1xf32>
    %cst_117 = arith.constant 0.000000e+00 : f32
    %400 = vector.broadcast %cst_117 : f32 to vector<2x1xf32>
    %401 = arith.maximumf %399, %400 : vector<2x1xf32>
    %402 = arith.negf %401 : vector<2x1xf32>
    %403 = math.exp %402 : vector<2x1xf32>
    %cst_118 = arith.constant 1.000000e+00 : f32
    %404 = vector.broadcast %cst_118 : f32 to vector<2x1xf32>
    %405 = arith.addf %404, %403 : vector<2x1xf32>
    %406 = arith.divf %404, %405 : vector<2x1xf32>
    %c0_119 = arith.constant 0 : index
    %c0_120 = arith.constant 0 : index
    %407 = vector.load %arg11[%c0_119, %c0_120] : memref<2x1xf32, #tpu.memory_space<vmem>>, vector<2x1xf32>
    tpu.vector_store %arg11[%c0_119, %c0_120], %406 {strides = array<i32>} : memref<2x1xf32, #tpu.memory_space<vmem>>, vector<2x1xf32>,
    return
  }
}

</mosaic_0001>

<bundles_post_ra>
// kernel: model_forward.1
= control target key start
LH: loop header
LB: loop body
LE: loop exit
PB: predicated region body
PF: predicated region fallthrough
CT: control target
= control target key end

     0   :  { %v35063_v0 = vmov 0   ;;  %v53_v3 = vlaneseq  ;;  %v35064_v7 = vmov 0.0   ;;  %vm35065_vm0 = vmmov 0   ;;  %s35067_s23 = smov 64   ;;  %s35068_s24 = smov 88   ;;  %s36909_s0 = inlined_call_operand.vmem [shape: f32[16,1], index: 0, kind: input, shape index: {}]   ;;  %s36910_s2 = inlined_call_operand.vmem [shape: f32[3,96], index: 2, kind: input, shape index: {}]   ;;  %s36911_s4 = inlined_call_operand.vmem [shape: f32[32,32], index: 4, kind: input, shape index: {}]   ;;  %s36912_s6 = inlined_call_operand.vmem [shape: f32[3,32], index: 6, kind: input, shape index: {}]   ;;  %s36913_s3 = inlined_call_operand.vmem [shape: f32[32,96], index: 3, kind: input, shape index: {}]   ;;  %s36914_s5 = inlined_call_operand.vmem [shape: f32[32,8], index: 5, kind: input, shape index: {}]   ;;  %s36915_s7 = inlined_call_operand.vmem [shape: f32[3,8], index: 7, kind: input, shape index: {}]   ;;  %s36916_s1 = inlined_call_operand.vmem [shape: f32[2,16], index: 1, kind: input, shape index: {}]   ;;  %s36917_s8 = inlined_call_operand.vmem [shape: f32[9,16], index: 8, kind: input, shape index: {}]   ;;  %s36918_s9 = inlined_call_operand.vmem [shape: f32[17,8], index: 9, kind: input, shape index: {}]   ;;  %s36919_s10 = inlined_call_operand.vmem [shape: f32[9,1], index: 10, kind: input, shape index: {}]   ;;  %s36920_s11 = inlined_call_operand.vmem [shape: f32[2,1], index: 11, kind: output, shape index: {}]  }
   0x1   :  { %34948 = vset.pattern.permute.xlu0 %v35063_v0  ;;  %v70_v1 = vld [vmem:[%s36909_s0 + $0x8] sm:$0xff]  ;;  %34949 = vset.pattern.permute.xlu1 %v35063_v0  ;;  %v69_v2 = vld [vmem:[%s36909_s0] sm:$0xff]  ;;  %s35066_s0 = smov 96   ;;  %vm96_vm1 = vcmask 64512   ;;  %s35069_s25 = smov 120   ;;  %vm9422_vm2 = vcmask 261120  }
   0x2   :  { %78 = vperm.xlu0 %34948, %v70_v1   ;;  %73 = vperm.xlu1 %34949, %v69_v2   ;;  %v35144_v4 = vshrl.u32 %v53_v3, 7  ;;  %v38_v6 = vld [vmem:[%s36910_s2] sm:$0x7]  ;;  %s35070_s26 = smov 56   ;;  %s35071_s27 = smov 80   ;;  %vm29255_vm3 = vcmask 130048  }
   0x3   :  { %32070 = vmatprep.subr.mxu1 %v35064_v7  ;;  %32040 = vmatprep.subr.mxu0 %v35064_v7  ;;  %s35072_s28 = smov 112   ;;  %s35073_s12 = smov 48   ;;  %vm31106_vm4 = vcmask 1024  }
   0x4   :  { %v35147_v5 = vsub.s32 0, %v35144_v4  ;;  %v35155_v8 = vsub.s32 1, %v35144_v4  ;;  %32072 = vmatprep.mubr.msk.f32.mxu1 %vm35065_vm0, %v35064_v7  ;;  %32042 = vmatprep.mubr.msk.f32.mxu0 %vm35065_vm0, %v35064_v7  ;;  %s35074_s13 = smov 104   ;;  %s35075_s16 = smov 72  }
   0x5   :  { %s35076_s19 = smov 40  }
   0x6   :  { %v84_v9 = vrot.slane %v38_v6, %v35147_v5  ;;  %v90_v10 = vrot.slane %v38_v6, %v35155_v8 }
  0x81   :  { %v79_v11 = vpop.permute.xlu0 %78  ;;  %v74_v14 = vpop.permute.xlu1 %73 }
  0x82   :  { %v86_v12 = vmul.f32 %v84_v9, %v79_v11  ;;  %v85_v15 = vmul.f32 %v84_v9, %v74_v14 }
  0x84   :  { %v35163_v13 = vadd.f32 %v90_v10, %v86_v12  ;;  %v35167_v16 = vadd.f32 %v90_v10, %v85_v15 }
  0x86   :  { %548 = vrot.lane.b32.xlu0 %v35163_v13, %s35066_s0  ;;  %94 = vrot.lane.b32.xlu1 %v35167_v16, %s35066_s0  ;;  %v550_v17 = vsel %vm96_vm1, %v35163_v13, 0  ;;  %v97_v28 = vsel %vm96_vm1, %v35167_v16, 0 }
  0x87   :  { %v620_v18 = vand.u32 4294901760, %v550_v17  ;;  %v167_v31 = vand.u32 4294901760, %v97_v28 }
  0x89   :  { %v621_v19 = vsub.f32 %v550_v17, %v620_v18  ;;  %v168_v32 = vsub.f32 %v97_v28, %v167_v31 }
  0x8b   :  { %v622_v20 = vand.u32 4294901760, %v621_v19  ;;  %v169_v33 = vand.u32 4294901760, %v168_v32 }
  0x8d   :  { %v623_v23 = vsub.f32 %v621_v19, %v622_v20  ;;  %v170_v34 = vsub.f32 %v168_v32, %v169_v33 }
  0x8f   :  { %v624_v26 = vand.u32 4294901760, %v623_v23  ;;  %v171_v38 = vand.u32 4294901760, %v170_v34 }
  0xf8   :  { %v549_v21 = vpop.permute.xlu0 %548  ;;  %v95_v35 = vpop.permute.xlu1 %94 }
  0xf9   :  { %v552_v22 = vsel %vm96_vm1, %v549_v21, 0  ;;  %v99_v36 = vsel %vm96_vm1, %v95_v35, 0 }
  0xfa   :  { %v555_v24 = vand.u32 4294901760, %v552_v22  ;;  %v102_v37 = vand.u32 4294901760, %v99_v36 }
  0xfc   :  { %v632_v25 = vsub.f32 %v552_v22, %v555_v24  ;;  %32071 = vmatpush3.xpose.msra.mxu1 %v555_v24  ;;  %v179_v39 = vsub.f32 %v99_v36, %v102_v37  ;;  %32041 = vmatpush3.xpose.msra.mxu0 %v102_v37 }
  0xfd   :  { %32075 = vmatprep.subr.mxu1 %v35064_v7  ;;  %32045 = vmatprep.subr.mxu0 %v35064_v7 }
  0xfe   :  { %v633_v27 = vand.u32 4294901760, %v632_v25  ;;  %v180_v40 = vand.u32 4294901760, %v179_v39 }
  0xff   :  { %32073 = vmatmul.mubr.f32.vlgmr.msra.gmra.mrb[0].mxu1 %v624_v26  ;;  %32043 = vmatmul.mubr.f32.vlgmr.msra.gmra.mrb[0].mxu0 %v171_v38 }
 0x100   :  { %v634_v29 = vsub.f32 %v632_v25, %v633_v27  ;;  %32077 = vmatprep.mubr.msk.f32.mxu1 %vm35065_vm0, %v35064_v7  ;;  %v181_v41 = vsub.f32 %v179_v39, %v180_v40  ;;  %32047 = vmatprep.mubr.msk.f32.mxu0 %vm35065_vm0, %v35064_v7 }
 0x102   :  { %v635_v30 = vand.u32 4294901760, %v634_v29  ;;  %v182_v42 = vand.u32 4294901760, %v181_v41 }
 0x104   :  { %32076 = vmatpush3.xpose.msra.mxu1 %v635_v30  ;;  %32046 = vmatpush3.xpose.msra.mxu0 %v182_v42 }
 0x105   :  { %32080 = vmatprep.subr.mxu1 %v35064_v7  ;;  %32050 = vmatprep.subr.mxu0 %v35064_v7 }
 0x107   :  { %32078 = vmatmul.mubr.f32.vlgmr.msra.gmra.mrb[0].mxu1 %v620_v18  ;;  %32048 = vmatmul.mubr.f32.vlgmr.msra.gmra.mrb[0].mxu0 %v167_v31 }
 0x108   :  { %32081 = vmatpush3.xpose.msra.mxu1 %v632_v25  ;;  %32082 = vmatprep.mubr.msk.f32.mxu1 %vm35065_vm0, %v35064_v7 }
 0x109   :  { %32085 = vmatprep.subr.mxu1 %v35064_v7  ;;  %32051 = vmatpush3.xpose.msra.mxu0 %v179_v39 }
 0x10a   :  { %32052 = vmatprep.mubr.msk.f32.mxu0 %vm35065_vm0, %v35064_v7  ;;  %32055 = vmatprep.subr.mxu0 %v35064_v7 }
 0x10f   :  { %32083 = vmatmul.mubr.f32.vlgmr.msra.gmra.mrb[0].mxu1 %v621_v19  ;;  %32053 = vmatmul.mubr.f32.vlgmr.msra.gmra.mrb[0].mxu0 %v168_v32 }
 0x110   :  { %32086 = vmatpush3.xpose.msra.mxu1 %v555_v24  ;;  %32087 = vmatprep.mubr.msk.f32.mxu1 %vm35065_vm0, %v35064_v7 }
 0x111   :  { %32090 = vmatprep.subr.mxu1 %v35064_v7  ;;  %32056 = vmatpush3.xpose.msra.mxu0 %v102_v37 }
 0x112   :  { %32057 = vmatprep.mubr.msk.f32.mxu0 %vm35065_vm0, %v35064_v7  ;;  %32060 = vmatprep.subr.mxu0 %v35064_v7 }
 0x117   :  { %32088 = vmatmul.mubr.f32.vlgmr.msra.gmra.mrb[0].mxu1 %v622_v20  ;;  %32058 = vmatmul.mubr.f32.vlgmr.msra.gmra.mrb[0].mxu0 %v169_v33 }
 0x118   :  { %32091 = vmatpush3.xpose.msra.mxu1 %v633_v27  ;;  %32092 = vmatprep.mubr.msk.f32.mxu1 %vm35065_vm0, %v35064_v7 }
 0x119   :  { %32095 = vmatprep.subr.mxu1 %v35064_v7  ;;  %32061 = vmatpush3.xpose.msra.mxu0 %v180_v40 }
 0x11a   :  { %32062 = vmatprep.mubr.msk.f32.mxu0 %vm35065_vm0, %v35064_v7  ;;  %32065 = vmatprep.subr.mxu0 %v35064_v7 }
 0x11f   :  { %32093 = vmatmul.mubr.f32.vlgmr.msra.gmra.mrb[0].mxu1 %v620_v18  ;;  %32063 = vmatmul.mubr.f32.vlgmr.msra.gmra.mrb[0].mxu0 %v167_v31 }
 0x120   :  { %32096 = vmatpush3.xpose.msra.mxu1 %v555_v24  ;;  %32097 = vmatprep.mubr.msk.f32.mxu1 %vm35065_vm0, %v35064_v7 }
 0x121   :  { %32130 = vmatprep.subr.mxu1 %v35064_v7  ;;  %32066 = vmatpush3.xpose.msra.mxu0 %v102_v37 }
 0x122   :  { %32067 = vmatprep.mubr.msk.f32.mxu0 %vm35065_vm0, %v35064_v7  ;;  %32100 = vmatprep.subr.mxu0 %v35064_v7 }
 0x127   :  { %32098 = vmatmul.mubr.f32.vlgmr.msra.gmra.mrb[0].mxu1 %v620_v18  ;;  %32068 = vmatmul.mubr.f32.vlgmr.msra.gmra.mrb[0].mxu0 %v167_v31 }
 0x128   :  { %32132 = vmatprep.mubr.msk.f32.mxu1 %vm35065_vm0, %v35064_v7  ;;  %32102 = vmatprep.mubr.msk.f32.mxu0 %vm35065_vm0, %v35064_v7 }
 0x1fa   :  { %v996_v43 = vpop.f32.mrb[0].mxu1  ;;  %v543_v47 = vpop.f32.mrb[0].mxu0 }
 0x1fb   :  { %v1001_v44 = vmul.f32 0.35355338, %v996_v43  ;;  %v32099_v45 = vpop.f32.mrb[1].mxu1  ;;  %v32069_v48 = vpop.f32.mrb[1].mxu0  ;;  %v1000_v56 = vmul.f32 0.35355338, %v543_v47 }
 0x1fd   :  { %v1005_v46 = vsel %vm96_vm1, %v1001_v44, -inf  ;;  %v1002_v57 = vsel %vm96_vm1, %v1000_v56, -inf }
 0x1fe   :  { %1006 = vmax.xlane.f32.xlu0 %v1005_v46 }
 0x214   :  { %1476 = vrot.lane.b32.xlu0 %v35163_v13, %s35067_s23 }
 0x218   :  { %2384 = vrot.lane.b32.xlu0 %v35163_v13, %s35068_s24 }
 0x28b   :  { %v1007_v49 = vpop.xlane.xlu0 %1006 }
 0x28c   :  { %v1009_v50 = vsub.f32 %v1001_v44, %v1007_v49 }
 0x28e   :  { %v1012_v51 = vmul.f32 1.442695, %v1009_v50 }
 0x28f   :  { %v1477_v52 = vpop.permute.xlu0 %1476 }
 0x290   :  { %34950 = vpow2.f32 %v1012_v51  ;;  %v1483_v53 = vand.u32 4294901760, %v1477_v52 }
 0x292   :  { %32131 = vmatpush3.msra.mxu1 %v1483_v53  ;;  %v1560_v60 = vsub.f32 %v1477_v52, %v1483_v53 }
 0x293   :  { %32135 = vmatprep.subr.mxu1 %v35064_v7  ;;  %v2385_v12 = vpop.permute.xlu0 %2384 }
 0x294   :  { %v1561_v0 = vand.u32 4294901760, %v1560_v60  ;;  %v2388_v15 = vsel %vm96_vm1, %v2385_v12, 0 }
 0x295   :  { %v2391_v18 = vand.u32 4294901760, %v2388_v15 }
 0x296   :  { %v1562_v3 = vsub.f32 %v1560_v60, %v1561_v0 }
 0x297   :  { %v2468_v22 = vsub.f32 %v2388_v15, %v2391_v18 }
 0x298   :  { %v1563_v10 = vand.u32 4294901760, %v1562_v3 }
 0x299   :  { %v2469_v25 = vand.u32 4294901760, %v2468_v22 }
 0x29a   :  { %v34951_v54 = vpop.eup %34950 }
 0x29b   :  { %v1017_v55 = vsel %vm96_vm1, %v34951_v54, 0.0  ;;  %v2470_v27 = vsub.f32 %v2468_v22, %v2469_v25 }
 0x29c   :  { %1018 = vadd.xlane.f32.xlu1 %v1017_v55 }
 0x29d   :  { %v2471_v30 = vand.u32 4294901760, %v2470_v27 }
 0x2ad   :  { %2382 = vrot.lane.b32.xlu1 %v35163_v13, %s35069_s25 }
 0x2d1   :  { %1003 = vmax.xlane.f32.xlu1 %v1002_v57 }
 0x2e2   :  { %1928 = vrot.lane.b32.xlu1 %v35167_v16, %s35069_s25 }
 0x2e6   :  { %1930 = vrot.lane.b32.xlu1 %v35167_v16, %s35068_s24 }
 0x329   :  { %v1019_v58 = vpop.xlane.xlu1 %1018 }
 0x32a   :  { %34952 = vrcp.f32 %v1019_v58 }
 0x32d   :  { %v2383_v11 = vpop.permute.xlu1 %2382 }
 0x32e   :  { %v2386_v14 = vsel %vm96_vm1, %v2383_v11, 0 }
 0x32f   :  { %v2456_v17 = vand.u32 4294901760, %v2386_v14 }
 0x331   :  { %v2457_v21 = vsub.f32 %v2386_v14, %v2456_v17 }
 0x333   :  { %v2458_v24 = vand.u32 4294901760, %v2457_v21 }
 0x334   :  { %v34953_v59 = vpop.eup %34952 }
 0x335   :  { %v1023_v61 = vmul.f32 %v34953_v59, %v34951_v54  ;;  %v2459_v26 = vsub.f32 %v2457_v21, %v2458_v24 }
 0x337   :  { %v1480_v62 = vsel %vm96_vm1, %v1023_v61, 0  ;;  %v2460_v28 = vand.u32 4294901760, %v2459_v26 }
 0x338   :  { %v1548_v63 = vand.u32 4294901760, %v1480_v62 }
 0x33a   :  { %v1549_v1 = vsub.f32 %v1480_v62, %v1548_v63 }
 0x33c   :  { %v1550_v2 = vand.u32 4294901760, %v1549_v1 }
 0x33e   :  { %v1551_v6 = vsub.f32 %v1549_v1, %v1550_v2 }
 0x340   :  { %v1552_v9 = vand.u32 4294901760, %v1551_v6 }
 0x342   :  { %32133 = vmatmul.mubr.f32.vlgmr.msra.gmra.mrb[2].mxu1 %v1552_v9 }
 0x343   :  { %32136 = vmatpush3.msra.mxu1 %v1563_v10  ;;  %32137 = vmatprep.mubr.msk.f32.mxu1 %vm35065_vm0, %v35064_v7 }
 0x344   :  { %32140 = vmatprep.subr.mxu1 %v35064_v7 }
 0x34a   :  { %32138 = vmatmul.mubr.f32.vlgmr.msra.gmra.mrb[2].mxu1 %v1548_v63 }
 0x34b   :  { %32141 = vmatpush3.msra.mxu1 %v1560_v60  ;;  %32142 = vmatprep.mubr.msk.f32.mxu1 %vm35065_vm0, %v35064_v7 }
 0x34c   :  { %32145 = vmatprep.subr.mxu1 %v35064_v7 }
 0x352   :  { %32143 = vmatmul.mubr.f32.vlgmr.msra.gmra.mrb[2].mxu1 %v1549_v1 }
 0x353   :  { %32146 = vmatpush3.msra.mxu1 %v1483_v53  ;;  %32147 = vmatprep.mubr.msk.f32.mxu1 %vm35065_vm0, %v35064_v7 }
 0x354   :  { %32150 = vmatprep.subr.mxu1 %v35064_v7 }
 0x35a   :  { %32148 = vmatmul.mubr.f32.vlgmr.msra.gmra.mrb[2].mxu1 %v1550_v2 }
 0x35b   :  { %32151 = vmatpush3.msra.mxu1 %v1561_v0  ;;  %32152 = vmatprep.mubr.msk.f32.mxu1 %vm35065_vm0, %v35064_v7 }
 0x35c   :  { %32155 = vmatprep.subr.mxu1 %v35064_v7 }
 0x35e   :  { %v1004_v19 = vpop.xlane.xlu1 %1003 }
 0x35f   :  { %v1008_v20 = vsub.f32 %v1000_v56, %v1004_v19 }
 0x361   :  { %v1010_v23 = vmul.f32 1.442695, %v1008_v20 }
 0x362   :  { %32153 = vmatmul.mubr.f32.vlgmr.msra.gmra.mrb[2].mxu1 %v1548_v63  ;;  %v1929_v47 = vpop.permute.xlu1 %1928 }
 0x363   :  { %34954 = vpow2.f32 %v1010_v23  ;;  %32156 = vmatpush3.msra.mxu1 %v1483_v53  ;;  %32157 = vmatprep.mubr.msk.f32.mxu1 %vm35065_vm0, %v35064_v7  ;;  %v1932_v49 = vsel %vm96_vm1, %v1929_v47, 0 }
 0x364   :  { %32190 = vmatprep.subr.mxu1 %v35064_v7  ;;  %v2002_v51 = vand.u32 4294901760, %v1932_v49 }
 0x366   :  { %v1931_v48 = vpop.permute.xlu1 %1930  ;;  %v2003_v53 = vsub.f32 %v1932_v49, %v2002_v51 }
 0x367   :  { %v1934_v50 = vsel %vm96_vm1, %v1931_v48, 0 }
 0x368   :  { %v1937_v52 = vand.u32 4294901760, %v1934_v50  ;;  %v2004_v55 = vand.u32 4294901760, %v2003_v53 }
 0x36a   :  { %32158 = vmatmul.mubr.f32.vlgmr.msra.gmra.mrb[2].mxu1 %v1548_v63  ;;  %v2014_v54 = vsub.f32 %v1934_v50, %v1937_v52  ;;  %v2005_v57 = vsub.f32 %v2003_v53, %v2004_v55 }
 0x36b   :  { %32191 = vmatpush3.xpose.msra.mxu1 %v2391_v18  ;;  %32192 = vmatprep.mubr.msk.f32.mxu1 %vm35065_vm0, %v35064_v7 }
 0x36c   :  { %32195 = vmatprep.subr.mxu1 %v35064_v7  ;;  %v2015_v56 = vand.u32 4294901760, %v2014_v54  ;;  %v2006_v61 = vand.u32 4294901760, %v2005_v57 }
 0x36d   :  { %v34955_v29 = vpop.eup %34954 }
 0x36e   :  { %32193 = vmatmul.mubr.f32.vlgmr.msra.gmra.mrb[4].mxu1 %v2460_v28  ;;  %v1014_v31 = vsel %vm96_vm1, %v34955_v29, 0.0  ;;  %v2016_v58 = vsub.f32 %v2014_v54, %v2015_v56 }
 0x36f   :  { %32196 = vmatpush3.xpose.msra.mxu1 %v2471_v30  ;;  %1015 = vadd.xlane.f32.xlu0 %v1014_v31 }
 0x370   :  { %32197 = vmatprep.mubr.msk.f32.mxu1 %vm35065_vm0, %v35064_v7  ;;  %32200 = vmatprep.subr.mxu1 %v35064_v7  ;;  %v2017_v62 = vand.u32 4294901760, %v2016_v58 }
 0x376   :  { %32198 = vmatmul.mubr.f32.vlgmr.msra.gmra.mrb[4].mxu1 %v2456_v17 }
 0x377   :  { %32201 = vmatpush3.xpose.msra.mxu1 %v2468_v22  ;;  %32202 = vmatprep.mubr.msk.f32.mxu1 %vm35065_vm0, %v35064_v7 }
 0x378   :  { %32205 = vmatprep.subr.mxu1 %v35064_v7 }
 0x37e   :  { %32203 = vmatmul.mubr.f32.vlgmr.msra.gmra.mrb[4].mxu1 %v2457_v21 }
 0x37f   :  { %32206 = vmatpush3.xpose.msra.mxu1 %v2391_v18  ;;  %32207 = vmatprep.mubr.msk.f32.mxu1 %vm35065_vm0, %v35064_v7 }
 0x380   :  { %32210 = vmatprep.subr.mxu1 %v35064_v7 }
 0x385   :  { %1024 = vrot.lane.b32.xlu0 %v35167_v16, %s35067_s23 }
 0x386   :  { %32208 = vmatmul.mubr.f32.vlgmr.msra.gmra.mrb[4].mxu1 %v2458_v24 }
 0x387   :  { %32211 = vmatpush3.xpose.msra.mxu1 %v2469_v25  ;;  %32212 = vmatprep.mubr.msk.f32.mxu1 %vm35065_vm0, %v35064_v7 }
 0x388   :  { %32215 = vmatprep.subr.mxu1 %v35064_v7 }
 0x38e   :  { %32213 = vmatmul.mubr.f32.vlgmr.msra.gmra.mrb[4].mxu1 %v2456_v17 }
 0x38f   :  { %32216 = vmatpush3.xpose.msra.mxu1 %v2391_v18  ;;  %32217 = vmatprep.mubr.msk.f32.mxu1 %vm35065_vm0, %v35064_v7 }
 0x390   :  { %32250 = vmatprep.subr.mxu1 %v35064_v7 }
 0x396   :  { %32218 = vmatmul.mubr.f32.vlgmr.msra.gmra.mrb[4].mxu1 %v2456_v17 }
 0x397   :  { %32252 = vmatprep.mubr.msk.f32.mxu1 %vm35065_vm0, %v35064_v7 }
 0x3fc   :  { %v1016_v32 = vpop.xlane.xlu0 %1015 }
 0x3fd   :  { %34956 = vrcp.f32 %v1016_v32 }
 0x400   :  { %v1025_v33 = vpop.permute.xlu0 %1024 }
 0x401   :  { %v1031_v34 = vand.u32 4294901760, %v1025_v33 }
 0x403   :  { %32101 = vmatpush3.msra.mxu0 %v1031_v34  ;;  %v1108_v37 = vsub.f32 %v1025_v33, %v1031_v34 }
 0x404   :  { %32105 = vmatprep.subr.mxu0 %v35064_v7 }
 0x405   :  { %v1109_v40 = vand.u32 4294901760, %v1108_v37 }
 0x407   :  { %v34957_v35 = vpop.eup %34956  ;;  %v1110_v43 = vsub.f32 %v1108_v37, %v1109_v40 }
 0x408   :  { %v1021_v36 = vmul.f32 %v34957_v35, %v34955_v29 }
 0x409   :  { %v1111_v46 = vand.u32 4294901760, %v1110_v43 }
 0x40a   :  { %v1028_v38 = vsel %vm96_vm1, %v1021_v36, 0 }
 0x40b   :  { %v1096_v39 = vand.u32 4294901760, %v1028_v38 }
 0x40d   :  { %v1097_v41 = vsub.f32 %v1028_v38, %v1096_v39 }
 0x40f   :  { %v1098_v42 = vand.u32 4294901760, %v1097_v41 }
 0x411   :  { %v1099_v44 = vsub.f32 %v1097_v41, %v1098_v42 }
 0x413   :  { %v1100_v45 = vand.u32 4294901760, %v1099_v44 }
 0x415   :  { %32103 = vmatmul.mubr.f32.vlgmr.msra.gmra.mrb[2].mxu0 %v1100_v45 }
 0x416   :  { %32106 = vmatpush3.msra.mxu0 %v1111_v46  ;;  %32107 = vmatprep.mubr.msk.f32.mxu0 %vm35065_vm0, %v35064_v7 }
 0x417   :  { %32110 = vmatprep.subr.mxu0 %v35064_v7 }
 0x41d   :  { %32108 = vmatmul.mubr.f32.vlgmr.msra.gmra.mrb[2].mxu0 %v1096_v39 }
 0x41e   :  { %32111 = vmatpush3.msra.mxu0 %v1108_v37  ;;  %32112 = vmatprep.mubr.msk.f32.mxu0 %vm35065_vm0, %v35064_v7 }
 0x41f   :  { %32115 = vmatprep.subr.mxu0 %v35064_v7 }
 0x425   :  { %32113 = vmatmul.mubr.f32.vlgmr.msra.gmra.mrb[2].mxu0 %v1097_v41 }
 0x426   :  { %32116 = vmatpush3.msra.mxu0 %v1031_v34  ;;  %32117 = vmatprep.mubr.msk.f32.mxu0 %vm35065_vm0, %v35064_v7 }
 0x427   :  { %32120 = vmatprep.subr.mxu0 %v35064_v7 }
 0x42d   :  { %32118 = vmatmul.mubr.f32.vlgmr.msra.gmra.mrb[2].mxu0 %v1098_v42 }
 0x42e   :  { %32121 = vmatpush3.msra.mxu0 %v1109_v40  ;;  %32122 = vmatprep.mubr.msk.f32.mxu0 %vm35065_vm0, %v35064_v7 }
 0x42f   :  { %32125 = vmatprep.subr.mxu0 %v35064_v7 }
 0x435   :  { %32123 = vmatmul.mubr.f32.vlgmr.msra.gmra.mrb[2].mxu0 %v1096_v39 }
 0x436   :  { %32126 = vmatpush3.msra.mxu0 %v1031_v34  ;;  %32127 = vmatprep.mubr.msk.f32.mxu0 %vm35065_vm0, %v35064_v7 }
 0x437   :  { %32160 = vmatprep.subr.mxu0 %v35064_v7 }
 0x43d   :  { %32128 = vmatmul.mubr.f32.vlgmr.msra.gmra.mrb[2].mxu0 %v1096_v39  ;;  %v35287_v59 = vpop.f32.mrb[2].mxu1 }
 0x43e   :  { %32161 = vmatpush3.xpose.msra.mxu0 %v1937_v52  ;;  %v32159_v60 = vpop.f32.mrb[3].mxu1  ;;  %32162 = vmatprep.mubr.msk.f32.mxu0 %vm35065_vm0, %v35064_v7 }
 0x43f   :  { %32165 = vmatprep.subr.mxu0 %v35064_v7 }
 0x441   :  { %32163 = vmatmul.mubr.f32.vlgmr.msra.gmra.mrb[4].mxu0 %v2006_v61 }
 0x442   :  { %32166 = vmatpush3.xpose.msra.mxu0 %v2017_v62  ;;  %32167 = vmatprep.mubr.msk.f32.mxu0 %vm35065_vm0, %v35064_v7 }
 0x443   :  { %32170 = vmatprep.subr.mxu0 %v35064_v7 }
 0x449   :  { %32168 = vmatmul.mubr.f32.vlgmr.msra.gmra.mrb[4].mxu0 %v2002_v51 }
 0x44a   :  { %32171 = vmatpush3.xpose.msra.mxu0 %v2014_v54  ;;  %32172 = vmatprep.mubr.msk.f32.mxu0 %vm35065_vm0, %v35064_v7 }
 0x44b   :  { %32175 = vmatprep.subr.mxu0 %v35064_v7 }
 0x451   :  { %32173 = vmatmul.mubr.f32.vlgmr.msra.gmra.mrb[4].mxu0 %v2003_v53 }
 0x452   :  { %32176 = vmatpush3.xpose.msra.mxu0 %v1937_v52  ;;  %32177 = vmatprep.mubr.msk.f32.mxu0 %vm35065_vm0, %v35064_v7 }
 0x453   :  { %32180 = vmatprep.subr.mxu0 %v35064_v7 }
 0x459   :  { %32178 = vmatmul.mubr.f32.vlgmr.msra.gmra.mrb[4].mxu0 %v2004_v55 }
 0x45a   :  { %32181 = vmatpush3.xpose.msra.mxu0 %v2015_v56  ;;  %32182 = vmatprep.mubr.msk.f32.mxu0 %vm35065_vm0, %v35064_v7 }
 0x45b   :  { %32185 = vmatprep.subr.mxu0 %v35064_v7 }
 0x461   :  { %32183 = vmatmul.mubr.f32.vlgmr.msra.gmra.mrb[4].mxu0 %v2002_v51 }
 0x462   :  { %32186 = vmatpush3.xpose.msra.mxu0 %v1937_v52  ;;  %32187 = vmatprep.mubr.msk.f32.mxu0 %vm35065_vm0, %v35064_v7 }
 0x463   :  { %32220 = vmatprep.subr.mxu0 %v35064_v7 }
 0x469   :  { %32188 = vmatmul.mubr.f32.vlgmr.msra.gmra.mrb[4].mxu0 %v2002_v51  ;;  %v2832_v63 = vpop.f32.mrb[4].mxu1 }
 0x46a   :  { %v2837_v0 = vmul.f32 0.35355338, %v2832_v63  ;;  %v32219_v1 = vpop.f32.mrb[5].mxu1  ;;  %32222 = vmatprep.mubr.msk.f32.mxu0 %vm35065_vm0, %v35064_v7 }
 0x46c   :  { %v2841_v2 = vsel %vm96_vm1, %v2837_v0, -inf }
 0x46d   :  { %2842 = vmax.xlane.f32.xlu0 %v2841_v2 }
 0x483   :  { %3312 = vrot.lane.b32.xlu0 %v35163_v13, %s35070_s26 }
 0x487   :  { %4756 = vrot.lane.b32.xlu0 %v35167_v16, %s35071_s27 }
 0x48b   :  { %5208 = vrot.lane.b32.xlu0 %v35163_v13, %s35072_s28 }
 0x48f   :  { %5210 = vrot.lane.b32.xlu0 %v35163_v13, %s35071_s27 }
 0x4fa   :  { %v2843_v3 = vpop.xlane.xlu0 %2842 }
 0x4fb   :  { %v2845_v6 = vsub.f32 %v2837_v0, %v2843_v3 }
 0x4fd   :  { %v2848_v9 = vmul.f32 1.442695, %v2845_v6 }
 0x4fe   :  { %v3313_v10 = vpop.permute.xlu0 %3312 }
 0x4ff   :  { %34958 = vpow2.f32 %v2848_v9  ;;  %v3319_v11 = vand.u32 4294901760, %v3313_v10 }
 0x501   :  { %32251 = vmatpush3.msra.mxu1 %v3319_v11  ;;  %v3396_v24 = vsub.f32 %v3313_v10, %v3319_v11 }
 0x502   :  { %32255 = vmatprep.subr.mxu1 %v35064_v7  ;;  %v4757_v36 = vpop.permute.xlu0 %4756 }
 0x503   :  { %v3397_v28 = vand.u32 4294901760, %v3396_v24  ;;  %v4760_v38 = vsel %vm96_vm1, %v4757_v36, 0  ;;  %v44_v36 = vld [vmem:[%s36911_s4 + $0x8] sm:$0xff] }
 0x504   :  { %v4763_v40 = vand.u32 4294901760, %v4760_v38 }
 0x505   :  { %v3398_v31 = vsub.f32 %v3396_v24, %v3397_v28 }
 0x506   :  { %v4840_v44 = vsub.f32 %v4760_v38, %v4763_v40  ;;  %v5209_v56 = vpop.permute.xlu0 %5208  ;;  %v35421_v38 = vand.u32 4294901760, %v44_v36 }
 0x507   :  { %v3399_v34 = vand.u32 4294901760, %v3398_v31  ;;  %v5212_v58 = vsel %vm96_vm1, %v5209_v56, 0 }
 0x508   :  { %v4841_v49 = vand.u32 4294901760, %v4840_v44  ;;  %v5282_v61 = vand.u32 4294901760, %v5212_v58 }
 0x509   :  { %v34959_v12 = vpop.eup %34958 }
 0x50a   :  { %v2853_v14 = vsel %vm96_vm1, %v34959_v12, 0.0  ;;  %v4842_v51 = vsub.f32 %v4840_v44, %v4841_v49  ;;  %v5211_v57 = vpop.permute.xlu0 %5210  ;;  %v5283_v63 = vsub.f32 %v5212_v58, %v5282_v61 }
 0x50b   :  { %2854 = vadd.xlane.f32.xlu1 %v2853_v14  ;;  %v5214_v60 = vsel %vm96_vm1, %v5211_v57, 0 }
 0x50c   :  { %v4843_v54 = vand.u32 4294901760, %v4842_v51  ;;  %v5217_v62 = vand.u32 4294901760, %v5214_v60  ;;  %v5284_v1 = vand.u32 4294901760, %v5283_v63 }
 0x50e   :  { %v5294_v0 = vsub.f32 %v5214_v60, %v5217_v62  ;;  %v5285_v3 = vsub.f32 %v5283_v63, %v5284_v1 }
 0x510   :  { %v35320_v15 = vpop.f32.mrb[2].mxu0  ;;  %v5295_v2 = vand.u32 4294901760, %v5294_v0  ;;  %v5286_v9 = vand.u32 4294901760, %v5285_v3 }
 0x511   :  { %v32129_v17 = vpop.f32.mrb[3].mxu0  ;;  %v4260_v3 = vsel %vm96_vm1, %v35320_v15, 0 }
 0x512   :  { %v5296_v6 = vsub.f32 %v5294_v0, %v5295_v2 }
 0x514   :  { %v5297_v10 = vand.u32 4294901760, %v5296_v6 }
 0x51c   :  { %4754 = vrot.lane.b32.xlu1 %v35167_v16, %s35072_s28 }
 0x53c   :  { %v2378_v18 = vpop.f32.mrb[4].mxu0 }
 0x53d   :  { %v2836_v19 = vmul.f32 0.35355338, %v2378_v18  ;;  %v32189_v20 = vpop.f32.mrb[5].mxu0 }
 0x53f   :  { %v2838_v21 = vsel %vm96_vm1, %v2836_v19, -inf }
 0x540   :  { %2839 = vmax.xlane.f32.xlu1 %v2838_v21 }
 0x551   :  { %2860 = vrot.lane.b32.xlu1 %v35167_v16, %s35070_s26 }
 0x598   :  { %v2855_v22 = vpop.xlane.xlu1 %2854 }
 0x599   :  { %34960 = vrcp.f32 %v2855_v22 }
 0x59c   :  { %v4755_v35 = vpop.permute.xlu1 %4754 }
 0x59d   :  { %v4758_v37 = vsel %vm96_vm1, %v4755_v35, 0 }
 0x59e   :  { %v4828_v39 = vand.u32 4294901760, %v4758_v37 }
 0x5a0   :  { %v4829_v43 = vsub.f32 %v4758_v37, %v4828_v39 }
 0x5a2   :  { %v4830_v48 = vand.u32 4294901760, %v4829_v43 }
 0x5a3   :  { %v34961_v23 = vpop.eup %34960 }
 0x5a4   :  { %v2859_v25 = vmul.f32 %v34961_v23, %v34959_v12  ;;  %v4831_v50 = vsub.f32 %v4829_v43, %v4830_v48 }
 0x5a6   :  { %v3316_v26 = vsel %vm96_vm1, %v2859_v25, 0  ;;  %v4832_v52 = vand.u32 4294901760, %v4831_v50 }
 0x5a7   :  { %v3384_v27 = vand.u32 4294901760, %v3316_v26 }
 0x5a9   :  { %v3385_v29 = vsub.f32 %v3316_v26, %v3384_v27 }
 0x5ab   :  { %v3386_v30 = vand.u32 4294901760, %v3385_v29 }
 0x5ad   :  { %v3387_v32 = vsub.f32 %v3385_v29, %v3386_v30 }
 0x5af   :  { %v3388_v33 = vand.u32 4294901760, %v3387_v32 }
 0x5b1   :  { %32253 = vmatmul.mubr.f32.vlgmr.msra.gmra.mrb[6].mxu1 %v3388_v33 }
 0x5b2   :  { %32256 = vmatpush3.msra.mxu1 %v3399_v34  ;;  %32257 = vmatprep.mubr.msk.f32.mxu1 %vm35065_vm0, %v35064_v7 }
 0x5b3   :  { %32260 = vmatprep.subr.mxu1 %v35064_v7 }
 0x5b9   :  { %32258 = vmatmul.mubr.f32.vlgmr.msra.gmra.mrb[6].mxu1 %v3384_v27 }
 0x5ba   :  { %32261 = vmatpush3.msra.mxu1 %v3396_v24  ;;  %32262 = vmatprep.mubr.msk.f32.mxu1 %vm35065_vm0, %v35064_v7 }
 0x5bb   :  { %32265 = vmatprep.subr.mxu1 %v35064_v7 }
 0x5c1   :  { %32263 = vmatmul.mubr.f32.vlgmr.msra.gmra.mrb[6].mxu1 %v3385_v29 }
 0x5c2   :  { %32266 = vmatpush3.msra.mxu1 %v3319_v11  ;;  %32267 = vmatprep.mubr.msk.f32.mxu1 %vm35065_vm0, %v35064_v7 }
 0x5c3   :  { %32270 = vmatprep.subr.mxu1 %v35064_v7 }
 0x5c9   :  { %32268 = vmatmul.mubr.f32.vlgmr.msra.gmra.mrb[6].mxu1 %v3386_v30 }
 0x5ca   :  { %32271 = vmatpush3.msra.mxu1 %v3397_v28  ;;  %32272 = vmatprep.mubr.msk.f32.mxu1 %vm35065_vm0, %v35064_v7 }
 0x5cb   :  { %32275 = vmatprep.subr.mxu1 %v35064_v7 }
 0x5cd   :  { %v2840_v41 = vpop.xlane.xlu1 %2839 }
 0x5ce   :  { %v2844_v42 = vsub.f32 %v2836_v19, %v2840_v41 }
 0x5d0   :  { %v2846_v45 = vmul.f32 1.442695, %v2844_v42 }
 0x5d1   :  { %32273 = vmatmul.mubr.f32.vlgmr.msra.gmra.mrb[6].mxu1 %v3384_v27  ;;  %v35342_v46 = vpop.permute.xlu1 %2860 }
 0x5d2   :  { %34962 = vpow2.f32 %v2846_v45  ;;  %32276 = vmatpush3.msra.mxu1 %v3319_v11  ;;  %v35345_v47 = vand.u32 4294901760, %v35342_v46  ;;  %32277 = vmatprep.mubr.msk.f32.mxu1 %vm35065_vm0, %v35064_v7 }
 0x5d3   :  { %32340 = vmatprep.subr.mxu1 %v35064_v7 }
 0x5d4   :  { %32221 = vmatpush3.msra.mxu0 %v35345_v47  ;;  %v2944_v14 = vsub.f32 %v35342_v46, %v35345_v47 }
 0x5d5   :  { %32225 = vmatprep.subr.mxu0 %v35064_v7 }
 0x5d6   :  { %v2945_v20 = vand.u32 4294901760, %v2944_v14 }
 0x5d8   :  { %v2946_v23 = vsub.f32 %v2944_v14, %v2945_v20 }
 0x5d9   :  { %32278 = vmatmul.mubr.f32.vlgmr.msra.gmra.mrb[6].mxu1 %v3384_v27 }
 0x5da   :  { %32341 = vmatpush3.xpose.msra.mxu1 %v4763_v40  ;;  %32342 = vmatprep.mubr.msk.f32.mxu1 %vm35065_vm0, %v35064_v7  ;;  %v2947_v26 = vand.u32 4294901760, %v2946_v23 }
 0x5db   :  { %32345 = vmatprep.subr.mxu1 %v35064_v7 }
 0x5dc   :  { %v35355_v53 = vpop.eup %34962 }
 0x5dd   :  { %32343 = vmatmul.mubr.f32.vlgmr.msra.gmra.mrb[8].mxu1 %v4832_v52  ;;  %v2850_v55 = vsel %vm96_vm1, %v35355_v53, 0.0 }
 0x5de   :  { %32346 = vmatpush3.xpose.msra.mxu1 %v4843_v54  ;;  %2851 = vadd.xlane.f32.xlu0 %v2850_v55 }
 0x5df   :  { %32347 = vmatprep.mubr.msk.f32.mxu1 %vm35065_vm0, %v35064_v7  ;;  %32350 = vmatprep.subr.mxu1 %v35064_v7 }
 0x5e5   :  { %32348 = vmatmul.mubr.f32.vlgmr.msra.gmra.mrb[8].mxu1 %v4828_v39 }
 0x5e6   :  { %32351 = vmatpush3.xpose.msra.mxu1 %v4840_v44  ;;  %32352 = vmatprep.mubr.msk.f32.mxu1 %vm35065_vm0, %v35064_v7 }
 0x5e7   :  { %32355 = vmatprep.subr.mxu1 %v35064_v7 }
 0x5ed   :  { %32353 = vmatmul.mubr.f32.vlgmr.msra.gmra.mrb[8].mxu1 %v4829_v43 }
 0x5ee   :  { %32356 = vmatpush3.xpose.msra.mxu1 %v4763_v40  ;;  %32357 = vmatprep.mubr.msk.f32.mxu1 %vm35065_vm0, %v35064_v7 }
 0x5ef   :  { %32360 = vmatprep.subr.mxu1 %v35064_v7 }
 0x5f5   :  { %32358 = vmatmul.mubr.f32.vlgmr.msra.gmra.mrb[8].mxu1 %v4830_v48 }
 0x5f6   :  { %32361 = vmatpush3.xpose.msra.mxu1 %v4841_v49  ;;  %32362 = vmatprep.mubr.msk.f32.mxu1 %vm35065_vm0, %v35064_v7 }
 0x5f7   :  { %32365 = vmatprep.subr.mxu1 %v35064_v7 }
 0x5fd   :  { %32363 = vmatmul.mubr.f32.vlgmr.msra.gmra.mrb[8].mxu1 %v4828_v39 }
 0x5fe   :  { %32366 = vmatpush3.xpose.msra.mxu1 %v4763_v40  ;;  %32367 = vmatprep.mubr.msk.f32.mxu1 %vm35065_vm0, %v35064_v7 }
 0x5ff   :  { %32370 = vmatprep.subr.mxu1 %v35064_v7 }
 0x605   :  { %32368 = vmatmul.mubr.f32.vlgmr.msra.gmra.mrb[8].mxu1 %v4828_v39  ;;  %v35426_v39 = vsub.f32 %v44_v36, %v35421_v38 }
 0x606   :  { %32371 = vmatpush3.xpose.msra.mxu1 %v5217_v62  ;;  %32372 = vmatprep.mubr.msk.f32.mxu1 %vm35065_vm0, %v35064_v7 }
 0x607   :  { %32375 = vmatprep.subr.mxu1 %v35064_v7  ;;  %v35429_v40 = vand.u32 4294901760, %v35426_v39 }
 0x609   :  { %32373 = vmatmul.mubr.f32.vlgmr.msra.gmra.mrb[10].mxu1 %v5286_v9  ;;  %v3860_v41 = vsub.f32 %v35426_v39, %v35429_v40  ;;  %v4331_v9 = vand.u32 4294901760, %v4260_v3 }
 0x60a   :  { %32376 = vmatpush3.xpose.msra.mxu1 %v5297_v10  ;;  %32377 = vmatprep.mubr.msk.f32.mxu1 %vm35065_vm0, %v35064_v7 }
 0x60b   :  { %32380 = vmatprep.subr.mxu1 %v35064_v7  ;;  %v35433_v42 = vand.u32 4294901760, %v3860_v41 }
 0x611   :  { %32378 = vmatmul.mubr.f32.vlgmr.msra.gmra.mrb[10].mxu1 %v5282_v61 }
 0x612   :  { %32381 = vmatpush3.xpose.msra.mxu1 %v5294_v0  ;;  %32382 = vmatprep.mubr.msk.f32.mxu1 %vm35065_vm0, %v35064_v7 }
 0x613   :  { %32385 = vmatprep.subr.mxu1 %v35064_v7 }
 0x619   :  { %32383 = vmatmul.mubr.f32.vlgmr.msra.gmra.mrb[10].mxu1 %v5283_v63 }
 0x61a   :  { %32386 = vmatpush3.xpose.msra.mxu1 %v5217_v62  ;;  %32387 = vmatprep.mubr.msk.f32.mxu1 %vm35065_vm0, %v35064_v7 }
 0x61b   :  { %32390 = vmatprep.subr.mxu1 %v35064_v7 }
 0x621   :  { %32388 = vmatmul.mubr.f32.vlgmr.msra.gmra.mrb[10].mxu1 %v5284_v1 }
 0x622   :  { %32391 = vmatpush3.xpose.msra.mxu1 %v5295_v2  ;;  %32392 = vmatprep.mubr.msk.f32.mxu1 %vm35065_vm0, %v35064_v7  ;;  %v43_v2 = vld [vmem:[%s36911_s4] sm:$0xff] }
 0x623   :  { %32395 = vmatprep.subr.mxu1 %v35064_v7  ;;  %v35467_v6 = vand.u32 4294901760, %v43_v2 }
 0x625   :  { %v35476_v15 = vsub.f32 %v43_v2, %v35467_v6 }
 0x629   :  { %32393 = vmatmul.mubr.f32.vlgmr.msra.gmra.mrb[10].mxu1 %v5282_v61 }
 0x62a   :  { %32396 = vmatpush3.xpose.msra.mxu1 %v5217_v62  ;;  %32397 = vmatprep.mubr.msk.f32.mxu1 %vm35065_vm0, %v35064_v7 }
 0x62b   :  { %32430 = vmatprep.subr.mxu1 %v35064_v7 }
 0x631   :  { %32398 = vmatmul.mubr.f32.vlgmr.msra.gmra.mrb[10].mxu1 %v5282_v61 }
 0x632   :  { %32432 = vmatprep.mubr.msk.f32.mxu1 %vm35065_vm0, %v35064_v7 }
 0x66b   :  { %v2852_v11 = vpop.xlane.xlu0 %2851 }
 0x66c   :  { %34964 = vrcp.f32 %v2852_v11 }
 0x676   :  { %v34965_v12 = vpop.eup %34964 }
 0x677   :  { %v2857_v17 = vmul.f32 %v34965_v12, %v35355_v53  ;;  %v4263_v12 = vsel %vm96_vm1, %v35287_v59, 0 }
 0x679   :  { %v2864_v18 = vsel %vm96_vm1, %v2857_v17, 0  ;;  %v4341_v17 = vand.u32 4294901760, %v4263_v12 }
 0x67a   :  { %v2932_v19 = vand.u32 4294901760, %v2864_v18 }
 0x67c   :  { %v2933_v21 = vsub.f32 %v2864_v18, %v2932_v19  ;;  %v35481_v18 = vand.u32 4294901760, %v35476_v15 }
 0x67e   :  { %v2934_v22 = vand.u32 4294901760, %v2933_v21 }
 0x680   :  { %v2935_v24 = vsub.f32 %v2933_v21, %v2934_v22 }
 0x682   :  { %v2936_v25 = vand.u32 4294901760, %v2935_v24 }
 0x684   :  { %32223 = vmatmul.mubr.f32.vlgmr.msra.gmra.mrb[6].mxu0 %v2936_v25 }
 0x685   :  { %32226 = vmatpush3.msra.mxu0 %v2947_v26  ;;  %32227 = vmatprep.mubr.msk.f32.mxu0 %vm35065_vm0, %v35064_v7 }
 0x686   :  { %32230 = vmatprep.subr.mxu0 %v35064_v7 }
 0x68c   :  { %32228 = vmatmul.mubr.f32.vlgmr.msra.gmra.mrb[6].mxu0 %v2932_v19 }
 0x68d   :  { %32231 = vmatpush3.msra.mxu0 %v2944_v14  ;;  %32232 = vmatprep.mubr.msk.f32.mxu0 %vm35065_vm0, %v35064_v7  ;;  %v4332_v14 = vsub.f32 %v4260_v3, %v4331_v9 }
 0x68e   :  { %32235 = vmatprep.subr.mxu0 %v35064_v7 }
 0x694   :  { %32233 = vmatmul.mubr.f32.vlgmr.msra.gmra.mrb[6].mxu0 %v2933_v21  ;;  %v4355_v21 = vsub.f32 %v35476_v15, %v35481_v18 }
 0x695   :  { %32236 = vmatpush3.msra.mxu0 %v35345_v47  ;;  %32237 = vmatprep.mubr.msk.f32.mxu0 %vm35065_vm0, %v35064_v7 }
 0x696   :  { %32240 = vmatprep.subr.mxu0 %v35064_v7  ;;  %v35488_v59 = vand.u32 4294901760, %v4355_v21 }
 0x69c   :  { %32238 = vmatmul.mubr.f32.vlgmr.msra.gmra.mrb[6].mxu0 %v2934_v22 }
 0x69d   :  { %32241 = vmatpush3.msra.mxu0 %v2945_v20  ;;  %32242 = vmatprep.mubr.msk.f32.mxu0 %vm35065_vm0, %v35064_v7  ;;  %v4342_v20 = vsub.f32 %v4263_v12, %v4341_v17 }
 0x69e   :  { %32245 = vmatprep.subr.mxu0 %v35064_v7 }
 0x69f   :  { %v4343_v23 = vand.u32 4294901760, %v4342_v20 }
 0x6a1   :  { %v4344_v25 = vsub.f32 %v4342_v20, %v4343_v23 }
 0x6a3   :  { %v4345_v26 = vand.u32 4294901760, %v4344_v25 }
 0x6a4   :  { %32243 = vmatmul.mubr.f32.vlgmr.msra.gmra.mrb[6].mxu0 %v2932_v19 }
 0x6a5   :  { %32246 = vmatpush3.msra.mxu0 %v35345_v47  ;;  %32247 = vmatprep.mubr.msk.f32.mxu0 %vm35065_vm0, %v35064_v7 }
 0x6a6   :  { %32280 = vmatprep.subr.mxu0 %v35421_v38 }
 0x6ac   :  { %32248 = vmatmul.mubr.f32.vlgmr.msra.gmra.mrb[6].mxu0 %v2932_v19  ;;  %v3760_v27 = vpop.f32.mrb[6].mxu1  ;;  %v4333_v19 = vand.u32 4294901760, %v4332_v14 }
 0x6ad   :  { %v32279_v28 = vpop.f32.mrb[7].mxu1  ;;  %32281 = vmatpush3.msra.mxu0 %v35421_v38  ;;  %v3768_v46 = vsel %vm96_vm1, %v3760_v27, 0 }
 0x6ae   :  { %32285 = vmatprep.subr.mxu0 %v35433_v42  ;;  %v35441_v49 = vand.u32 4294901760, %v3768_v46  ;;  %v4334_v22 = vsub.f32 %v4332_v14, %v4333_v19 }
 0x6b0   :  { %v3847_v50 = vsub.f32 %v3768_v46, %v35441_v49  ;;  %v4335_v24 = vand.u32 4294901760, %v4334_v22  ;;  %v45_v22 = vld [vmem:[%s36911_s4 + $0x10] sm:$0xff] }
 0x6b2   :  { %v3848_v55 = vand.u32 4294901760, %v3847_v50 }
 0x6b4   :  { %v3849_v58 = vsub.f32 %v3847_v50, %v3848_v55 }
 0x6b6   :  { %v3850_v62 = vand.u32 4294901760, %v3849_v58 }
 0x6d8   :  { %v5204_v29 = vpop.f32.mrb[8].mxu1 }
 0x6d9   :  { %v5662_v30 = vmul.f32 0.35355338, %v5204_v29  ;;  %v32369_v31 = vpop.f32.mrb[9].mxu1 }
 0x6db   :  { %v5664_v32 = vsel %vm96_vm1, %v5662_v30, -inf }
 0x6dc   :  { %5665 = vmax.xlane.f32.xlu0 %v5664_v32 }
 0x704   :  { %v5658_v33 = vpop.f32.mrb[10].mxu1 }
 0x705   :  { %v5663_v34 = vmul.f32 0.35355338, %v5658_v33  ;;  %v32399_v35 = vpop.f32.mrb[11].mxu1 }
 0x707   :  { %v5667_v37 = vsel %vm96_vm1, %v5663_v34, -inf }
 0x708   :  { %5668 = vmax.xlane.f32.xlu0 %v5667_v37 }
 0x769   :  { %v5666_v43 = vpop.xlane.xlu0 %5665 }
 0x76a   :  { %v5670_v44 = vsub.f32 %v5662_v30, %v5666_v43 }
 0x76c   :  { %v5672_v45 = vmul.f32 1.442695, %v5670_v44 }
 0x76e   :  { %34966 = vpow2.f32 %v5672_v45 }
 0x778   :  { %v35437_v47 = vpop.eup %34966 }
 0x779   :  { %v5676_v48 = vsel %vm96_vm1, %v35437_v47, 0.0 }
 0x77a   :  { %5677 = vadd.xlane.f32.xlu0 %v5676_v48 }
 0x77f   :  { %v3308_v51 = vpop.f32.mrb[6].mxu0 }
 0x780   :  { %v3765_v52 = vsel %vm96_vm1, %v3308_v51, 0  ;;  %v32249_v53 = vpop.f32.mrb[7].mxu0 }
 0x781   :  { %v3836_v54 = vand.u32 4294901760, %v3765_v52 }
 0x783   :  { %v3837_v56 = vsub.f32 %v3765_v52, %v3836_v54 }
 0x785   :  { %v3838_v57 = vand.u32 4294901760, %v3837_v56 }
 0x787   :  { %v3839_v60 = vsub.f32 %v3837_v56, %v3838_v57 }
 0x789   :  { %v3840_v61 = vand.u32 4294901760, %v3839_v60 }
 0x78b   :  { %32282 = vmatprep.mubr.f32.mxu0 %v3840_v61 }
 0x78c   :  { %32283 = vmatmul.mubr.f32.vlgmr.msra.gmra.mrb[8].mxu0 %v3850_v62 }
 0x78d   :  { %32287 = vmatprep.mubr.f32.mxu0 %v3836_v54  ;;  %32286 = vmatpush3.msra.mxu0 %v35433_v42 }
 0x78e   :  { %32290 = vmatprep.subr.mxu0 %v35426_v39 }
 0x790   :  { %5686 = vrot.lane.b32.xlu0 %v35167_v16, %s35073_s12 }
 0x794   :  { %6138 = vrot.lane.b32.xlu0 %v35163_v13, %s35073_s12  ;;  %32288 = vmatmul.mubr.f32.vlgmr.msra.gmra.mrb[8].mxu0 %v35441_v49 }
 0x795   :  { %v5669_v63 = vpop.xlane.xlu0 %5668  ;;  %32292 = vmatprep.mubr.f32.mxu0 %v3837_v56  ;;  %32291 = vmatpush3.msra.mxu0 %v35426_v39 }
 0x796   :  { %v5671_v0 = vsub.f32 %v5663_v34, %v5669_v63  ;;  %32295 = vmatprep.subr.mxu0 %v35421_v38 }
 0x798   :  { %v5674_v1 = vmul.f32 1.442695, %v5671_v0  ;;  %7087 = vrot.lane.b32.xlu0 %v35167_v16, %s35074_s13 }
 0x79a   :  { %34968 = vpow2.f32 %v5674_v1 }
 0x79c   :  { %7541 = vrot.lane.b32.xlu0 %v35163_v13, %s35074_s13  ;;  %32293 = vmatmul.mubr.f32.vlgmr.msra.gmra.mrb[8].mxu0 %v3847_v50 }
 0x79d   :  { %32297 = vmatprep.mubr.f32.mxu0 %v3838_v57  ;;  %32296 = vmatpush3.msra.mxu0 %v35421_v38 }
 0x79e   :  { %32300 = vmatprep.subr.mxu0 %v35429_v40 }
 0x7a0   :  { %7089 = vrot.lane.b32.xlu0 %v35167_v16, %s35075_s16 }
 0x7a4   :  { %v35469_v10 = vpop.eup %34968  ;;  %32298 = vmatmul.mubr.f32.vlgmr.msra.gmra.mrb[8].mxu0 %v3848_v55 }
 0x7a5   :  { %32302 = vmatprep.mubr.f32.mxu0 %v3836_v54  ;;  %v5679_v11 = vsel %vm96_vm1, %v35469_v10, 0.0  ;;  %32301 = vmatpush3.msra.mxu0 %v35429_v40 }
 0x7a6   :  { %5680 = vadd.xlane.f32.xlu1 %v5679_v11  ;;  %32305 = vmatprep.subr.mxu0 %v35421_v38 }
 0x7ac   :  { %32303 = vmatmul.mubr.f32.vlgmr.msra.gmra.mrb[8].mxu0 %v35441_v49 }
 0x7ad   :  { %32307 = vmatprep.mubr.f32.mxu0 %v3836_v54  ;;  %32306 = vmatpush3.msra.mxu0 %v35421_v38 }
 0x7ae   :  { %32310 = vmatprep.subr.mxu0 %v35467_v6 }
 0x7b4   :  { %32308 = vmatmul.mubr.f32.vlgmr.msra.gmra.mrb[8].mxu0 %v35441_v49 }
 0x7b5   :  { %32312 = vmatprep.mubr.f32.mxu0 %v4335_v24  ;;  %32311 = vmatpush3.msra.mxu0 %v35467_v6 }
 0x7b6   :  { %32315 = vmatprep.subr.mxu0 %v35488_v59 }
 0x7b7   :  { %7543 = vrot.lane.b32.xlu1 %v35163_v13, %s35075_s16 }
 0x7bc   :  { %32313 = vmatmul.mubr.f32.vlgmr.msra.gmra.mrb[8].mxu0 %v4345_v26 }
 0x7bd   :  { %32317 = vmatprep.mubr.f32.mxu0 %v4331_v9  ;;  %32316 = vmatpush3.msra.mxu0 %v35488_v59 }
 0x7be   :  { %32320 = vmatprep.subr.mxu0 %v35476_v15 }
 0x7c4   :  { %32318 = vmatmul.mubr.f32.vlgmr.msra.gmra.mrb[8].mxu0 %v4341_v17 }
 0x7c5   :  { %32322 = vmatprep.mubr.f32.mxu0 %v4332_v14  ;;  %32321 = vmatpush3.msra.mxu0 %v35476_v15 }
 0x7c6   :  { %32325 = vmatprep.subr.mxu0 %v35467_v6 }
 0x7cc   :  { %32323 = vmatmul.mubr.f32.vlgmr.msra.gmra.mrb[8].mxu0 %v4342_v20 }
 0x7cd   :  { %32327 = vmatprep.mubr.f32.mxu0 %v4333_v19  ;;  %32326 = vmatpush3.msra.mxu0 %v35467_v6 }
 0x7ce   :  { %32330 = vmatprep.subr.mxu0 %v35481_v18 }
 0x7d4   :  { %32328 = vmatmul.mubr.f32.vlgmr.msra.gmra.mrb[8].mxu0 %v4343_v23  ;;  %v35575_v23 = vand.u32 4294901760, %v45_v22 }
 0x7d5   :  { %32332 = vmatprep.mubr.f32.mxu0 %v4331_v9  ;;  %32331 = vmatpush3.msra.mxu0 %v35481_v18 }
 0x7d6   :  { %32335 = vmatprep.subr.mxu0 %v35467_v6  ;;  %v35579_v24 = vsub.f32 %v45_v22, %v35575_v23 }
 0x7d8   :  { %v35583_v25 = vand.u32 4294901760, %v35579_v24 }
 0x7da   :  { %v6686_v26 = vsub.f32 %v35579_v24, %v35583_v25 }
 0x7dc   :  { %32333 = vmatmul.mubr.f32.vlgmr.msra.gmra.mrb[8].mxu0 %v4341_v17 }
 0x7dd   :  { %32337 = vmatprep.mubr.f32.mxu0 %v4331_v9  ;;  %32336 = vmatpush3.msra.mxu0 %v35467_v6 }
 0x7de   :  { %32400 = vmatprep.subr.mxu0 %v35064_v7 }
 0x7e4   :  { %32338 = vmatmul.mubr.f32.vlgmr.msra.gmra.mrb[8].mxu0 %v4341_v17 }
 0x7e5   :  { %32402 = vmatprep.mubr.msk.f32.mxu0 %vm35065_vm0, %v35064_v7 }
 0x807   :  { %v5678_v27 = vpop.xlane.xlu0 %5677 }
 0x808   :  { %34970 = vrcp.f32 %v5678_v27  ;;  %v35587_v27 = vand.u32 4294901760, %v6686_v26 }
 0x80b   :  { %v5687_v28 = vpop.permute.xlu0 %5686 }
 0x80c   :  { %v5693_v29 = vand.u32 4294901760, %v5687_v28 }
 0x80e   :  { %32401 = vmatpush3.msra.mxu0 %v5693_v29  ;;  %v5770_v34 = vsub.f32 %v5687_v28, %v5693_v29 }
 0x80f   :  { %v6139_v30 = vpop.permute.xlu0 %6138  ;;  %32405 = vmatprep.subr.mxu0 %v35064_v7 }
 0x810   :  { %v35508_v31 = vand.u32 4294901760, %v6139_v30  ;;  %v5771_v37 = vand.u32 4294901760, %v5770_v34 }
 0x812   :  { %v34971_v32 = vpop.eup %34970  ;;  %32431 = vmatpush3.msra.mxu1 %v35508_v31  ;;  %v5772_v44 = vsub.f32 %v5770_v34, %v5771_v37  ;;  %v6222_v50 = vsub.f32 %v6139_v30, %v35508_v31 }
 0x813   :  { %v5683_v33 = vmul.f32 %v34971_v32, %v35437_v47  ;;  %32435 = vmatprep.subr.mxu1 %v35064_v7  ;;  %v7088_v62 = vpop.permute.xlu0 %7087 }
 0x814   :  { %v5773_v48 = vand.u32 4294901760, %v5772_v44  ;;  %v6223_v54 = vand.u32 4294901760, %v6222_v50  ;;  %v7091_v1 = vsel %vm96_vm1, %v7088_v62, 0 }
 0x815   :  { %v5690_v35 = vsel %vm96_vm1, %v5683_v33, 0  ;;  %v7161_v3 = vand.u32 4294901760, %v7091_v1 }
 0x816   :  { %v5758_v36 = vand.u32 4294901760, %v5690_v35  ;;  %v6224_v57 = vsub.f32 %v6222_v50, %v6223_v54 }
 0x817   :  { %v35537_v63 = vpop.permute.xlu0 %7541 }
 0x818   :  { %v5759_v41 = vsub.f32 %v5690_v35, %v5758_v36  ;;  %v6225_v61 = vand.u32 4294901760, %v6224_v57 }
 0x81a   :  { %v5760_v43 = vand.u32 4294901760, %v5759_v41 }
 0x81b   :  { %v7090_v0 = vpop.permute.xlu0 %7089 }
 0x81c   :  { %v5761_v45 = vsub.f32 %v5759_v41, %v5760_v43  ;;  %v7093_v2 = vsel %vm96_vm1, %v7090_v0, 0 }
 0x81d   :  { %v7096_v9 = vand.u32 4294901760, %v7093_v2 }
 0x81e   :  { %v5762_v46 = vand.u32 4294901760, %v5761_v45 }
 0x81f   :  { %v7173_v11 = vsub.f32 %v7093_v2, %v7096_v9 }
 0x820   :  { %32403 = vmatmul.mubr.f32.vlgmr.msra.gmra.mrb[10].mxu0 %v5762_v46 }
 0x821   :  { %32406 = vmatpush3.msra.mxu0 %v5773_v48  ;;  %32407 = vmatprep.mubr.msk.f32.mxu0 %vm35065_vm0, %v35064_v7  ;;  %v7174_v14 = vand.u32 4294901760, %v7173_v11 }
 0x822   :  { %32410 = vmatprep.subr.mxu0 %v35064_v7 }
 0x823   :  { %v7175_v19 = vsub.f32 %v7173_v11, %v7174_v14 }
 0x825   :  { %v7176_v21 = vand.u32 4294901760, %v7175_v19 }
 0x828   :  { %32408 = vmatmul.mubr.f32.vlgmr.msra.gmra.mrb[10].mxu0 %v5758_v36 }
 0x829   :  { %32411 = vmatpush3.msra.mxu0 %v5770_v34  ;;  %32412 = vmatprep.mubr.msk.f32.mxu0 %vm35065_vm0, %v35064_v7 }
 0x82a   :  { %32415 = vmatprep.subr.mxu0 %v35064_v7 }
 0x830   :  { %32413 = vmatmul.mubr.f32.vlgmr.msra.gmra.mrb[10].mxu0 %v5759_v41 }
 0x831   :  { %32416 = vmatpush3.msra.mxu0 %v5693_v29  ;;  %32417 = vmatprep.mubr.msk.f32.mxu0 %vm35065_vm0, %v35064_v7 }
 0x832   :  { %32420 = vmatprep.subr.mxu0 %v35064_v7 }
 0x833   :  { %v5681_v47 = vpop.xlane.xlu1 %5680 }
 0x834   :  { %34972 = vrcp.f32 %v5681_v47 }
 0x837   :  { %v7544_v47 = vpop.permute.xlu1 %7543 }
 0x838   :  { %32418 = vmatmul.mubr.f32.vlgmr.msra.gmra.mrb[10].mxu0 %v5760_v43 }
 0x839   :  { %32421 = vmatpush3.msra.mxu0 %v5771_v37  ;;  %32422 = vmatprep.mubr.msk.f32.mxu0 %vm35065_vm0, %v35064_v7 }
 0x83a   :  { %32425 = vmatprep.subr.mxu0 %v35064_v7 }
 0x83e   :  { %v34973_v49 = vpop.eup %34972 }
 0x83f   :  { %v5685_v51 = vmul.f32 %v34973_v49, %v35469_v10  ;;  %v7162_v10 = vsub.f32 %v7091_v1, %v7161_v3  ;;  %v7545_v49 = vsel %vm96_vm1, %v35537_v63, 0 }
 0x840   :  { %32423 = vmatmul.mubr.f32.vlgmr.msra.gmra.mrb[10].mxu0 %v5758_v36 }
 0x841   :  { %32426 = vmatpush3.msra.mxu0 %v5693_v29  ;;  %32427 = vmatprep.mubr.msk.f32.mxu0 %vm35065_vm0, %v35064_v7  ;;  %v6142_v52 = vsel %vm96_vm1, %v5685_v51, 0  ;;  %v7163_v12 = vand.u32 4294901760, %v7162_v10  ;;  %v7615_v51 = vand.u32 4294901760, %v7545_v49 }
 0x842   :  { %v6210_v53 = vand.u32 4294901760, %v6142_v52  ;;  %32460 = vmatprep.subr.mxu0 %v35575_v23 }
 0x843   :  { %v7164_v17 = vsub.f32 %v7162_v10, %v7163_v12 }
 0x844   :  { %v6211_v55 = vsub.f32 %v6142_v52, %v6210_v53 }
 0x845   :  { %v7165_v20 = vand.u32 4294901760, %v7164_v17 }
 0x846   :  { %v6212_v56 = vand.u32 4294901760, %v6211_v55 }
 0x848   :  { %32428 = vmatmul.mubr.f32.vlgmr.msra.gmra.mrb[10].mxu0 %v5758_v36  ;;  %v6213_v58 = vsub.f32 %v6211_v55, %v6212_v56 }
 0x849   :  { %32461 = vmatpush3.msra.mxu0 %v35575_v23 }
 0x84a   :  { %v6214_v60 = vand.u32 4294901760, %v6213_v58  ;;  %32465 = vmatprep.subr.mxu0 %v35587_v27 }
 0x84c   :  { %32433 = vmatmul.mubr.f32.vlgmr.msra.gmra.mrb[12].mxu1 %v6214_v60 }
 0x84d   :  { %32436 = vmatpush3.msra.mxu1 %v6225_v61  ;;  %32437 = vmatprep.mubr.msk.f32.mxu1 %vm35065_vm0, %v35064_v7 }
 0x84e   :  { %32440 = vmatprep.subr.mxu1 %v35064_v7 }
 0x854   :  { %32438 = vmatmul.mubr.f32.vlgmr.msra.gmra.mrb[12].mxu1 %v6210_v53 }
 0x855   :  { %32441 = vmatpush3.msra.mxu1 %v6222_v50  ;;  %32442 = vmatprep.mubr.msk.f32.mxu1 %vm35065_vm0, %v35064_v7  ;;  %v7547_v50 = vsel %vm96_vm1, %v7544_v47, 0 }
 0x856   :  { %32445 = vmatprep.subr.mxu1 %v35064_v7  ;;  %v7550_v52 = vand.u32 4294901760, %v7547_v50 }
 0x85c   :  { %32443 = vmatmul.mubr.f32.vlgmr.msra.gmra.mrb[12].mxu1 %v6211_v55 }
 0x85d   :  { %32446 = vmatpush3.msra.mxu1 %v35508_v31  ;;  %32447 = vmatprep.mubr.msk.f32.mxu1 %vm35065_vm0, %v35064_v7 }
 0x85e   :  { %32450 = vmatprep.subr.mxu1 %v35064_v7 }
 0x864   :  { %32448 = vmatmul.mubr.f32.vlgmr.msra.gmra.mrb[12].mxu1 %v6212_v56 }
 0x865   :  { %32451 = vmatpush3.msra.mxu1 %v6223_v54  ;;  %32452 = vmatprep.mubr.msk.f32.mxu1 %vm35065_vm0, %v35064_v7  ;;  %v7627_v54 = vsub.f32 %v7547_v50, %v7550_v52 }
 0x866   :  { %32455 = vmatprep.subr.mxu1 %v35064_v7 }
 0x867   :  { %v7628_v60 = vand.u32 4294901760, %v7627_v54 }
 0x869   :  { %v7629_v63 = vsub.f32 %v7627_v54, %v7628_v60 }
 0x86b   :  { %v7630_v1 = vand.u32 4294901760, %v7629_v63 }
 0x86c   :  { %32453 = vmatmul.mubr.f32.vlgmr.msra.gmra.mrb[12].mxu1 %v6210_v53 }
 0x86d   :  { %32456 = vmatpush3.msra.mxu1 %v35508_v31  ;;  %32457 = vmatprep.mubr.msk.f32.mxu1 %vm35065_vm0, %v35064_v7 }
 0x86e   :  { %32490 = vmatprep.subr.mxu1 %v35064_v7 }
 0x874   :  { %32458 = vmatmul.mubr.f32.vlgmr.msra.gmra.mrb[12].mxu1 %v6210_v53  ;;  %v7616_v53 = vsub.f32 %v7545_v49, %v7615_v51 }
 0x875   :  { %32491 = vmatpush3.xpose.msra.mxu1 %v7096_v9  ;;  %32492 = vmatprep.mubr.msk.f32.mxu1 %vm35065_vm0, %v35064_v7 }
 0x876   :  { %32495 = vmatprep.subr.mxu1 %v35064_v7  ;;  %v7617_v58 = vand.u32 4294901760, %v7616_v53 }
 0x878   :  { %32493 = vmatmul.mubr.f32.vlgmr.msra.gmra.mrb[14].mxu1 %v7165_v20  ;;  %v7618_v62 = vsub.f32 %v7616_v53, %v7617_v58 }
 0x879   :  { %32496 = vmatpush3.xpose.msra.mxu1 %v7176_v21  ;;  %32497 = vmatprep.mubr.msk.f32.mxu1 %vm35065_vm0, %v35064_v7 }
 0x87a   :  { %32500 = vmatprep.subr.mxu1 %v35064_v7  ;;  %v7619_v0 = vand.u32 4294901760, %v7618_v62  ;;  %v46_v62 = vld [vmem:[%s36911_s4 + $0x18] sm:$0xff] }
 0x87b   :  { %v35674_v63 = vand.u32 4294901760, %v46_v62 }
 0x880   :  { %32498 = vmatmul.mubr.f32.vlgmr.msra.gmra.mrb[14].mxu1 %v7161_v3 }
 0x881   :  { %32501 = vmatpush3.xpose.msra.mxu1 %v7173_v11  ;;  %32502 = vmatprep.mubr.msk.f32.mxu1 %vm35065_vm0, %v35064_v7 }
 0x882   :  { %32505 = vmatprep.subr.mxu1 %v35064_v7 }
 0x888   :  { %32503 = vmatmul.mubr.f32.vlgmr.msra.gmra.mrb[14].mxu1 %v7162_v10 }
 0x889   :  { %32506 = vmatpush3.xpose.msra.mxu1 %v7096_v9  ;;  %32507 = vmatprep.mubr.msk.f32.mxu1 %vm35065_vm0, %v35064_v7 }
 0x88a   :  { %32510 = vmatprep.subr.mxu1 %v35064_v7 }
 0x890   :  { %32508 = vmatmul.mubr.f32.vlgmr.msra.gmra.mrb[14].mxu1 %v7163_v12 }
 0x891   :  { %32511 = vmatpush3.xpose.msra.mxu1 %v7174_v14  ;;  %32512 = vmatprep.mubr.msk.f32.mxu1 %vm35065_vm0, %v35064_v7 }
 0x892   :  { %32515 = vmatprep.subr.mxu1 %v35064_v7 }
 0x898   :  { %32513 = vmatmul.mubr.f32.vlgmr.msra.gmra.mrb[14].mxu1 %v7161_v3 }
 0x899   :  { %32516 = vmatpush3.xpose.msra.mxu1 %v7096_v9  ;;  %32517 = vmatprep.mubr.msk.f32.mxu1 %vm35065_vm0, %v35064_v7 }
 0x89a   :  { %32550 = vmatprep.subr.mxu1 %v35064_v7 }
 0x8a0   :  { %32518 = vmatmul.mubr.f32.vlgmr.msra.gmra.mrb[14].mxu1 %v7161_v3 }
 0x8a1   :  { %32552 = vmatprep.mubr.msk.f32.mxu1 %vm35065_vm0, %v35064_v7 }
 0x91b   :  { %v6134_v28 = vpop.f32.mrb[10].mxu0 }
 0x91c   :  { %v6591_v29 = vsel %vm96_vm1, %v6134_v28, 0  ;;  %v32429_v30 = vpop.f32.mrb[11].mxu0 }
 0x91d   :  { %v6662_v31 = vand.u32 4294901760, %v6591_v29 }
 0x91f   :  { %v6663_v32 = vsub.f32 %v6591_v29, %v6662_v31 }
 0x921   :  { %v6664_v33 = vand.u32 4294901760, %v6663_v32 }
 0x923   :  { %v6665_v34 = vsub.f32 %v6663_v32, %v6664_v33 }
 0x925   :  { %v6666_v35 = vand.u32 4294901760, %v6665_v34 }
 0x927   :  { %32462 = vmatprep.mubr.f32.mxu0 %v6666_v35 }
 0x947   :  { %v6586_v36 = vpop.f32.mrb[12].mxu1 }
 0x948   :  { %v6594_v37 = vsel %vm96_vm1, %v6586_v36, 0  ;;  %v32459_v41 = vpop.f32.mrb[13].mxu1 }
 0x949   :  { %v6672_v43 = vand.u32 4294901760, %v6594_v37 }
 0x94b   :  { %v6673_v44 = vsub.f32 %v6594_v37, %v6672_v43 }
 0x94d   :  { %v6674_v45 = vand.u32 4294901760, %v6673_v44 }
 0x94f   :  { %v6675_v46 = vsub.f32 %v6673_v44, %v6674_v45 }
 0x951   :  { %v6676_v48 = vand.u32 4294901760, %v6675_v46 }
 0x953   :  { %32463 = vmatmul.mubr.f32.vlgmr.msra.gmra.mrb[8].mxu0 %v6676_v48 }
 0x954   :  { %32467 = vmatprep.mubr.f32.mxu0 %v6662_v31  ;;  %32466 = vmatpush3.msra.mxu0 %v35587_v27 }
 0x955   :  { %32470 = vmatprep.subr.mxu0 %v35579_v24 }
 0x95b   :  { %32468 = vmatmul.mubr.f32.vlgmr.msra.gmra.mrb[8].mxu0 %v6672_v43 }
 0x95c   :  { %32472 = vmatprep.mubr.f32.mxu0 %v6663_v32  ;;  %32471 = vmatpush3.msra.mxu0 %v35579_v24 }
 0x95d   :  { %32475 = vmatprep.subr.mxu0 %v35575_v23 }
 0x963   :  { %32473 = vmatmul.mubr.f32.vlgmr.msra.gmra.mrb[8].mxu0 %v6673_v44 }
 0x964   :  { %32477 = vmatprep.mubr.f32.mxu0 %v6664_v33  ;;  %32476 = vmatpush3.msra.mxu0 %v35575_v23 }
 0x965   :  { %32480 = vmatprep.subr.mxu0 %v35583_v25 }
 0x96b   :  { %32478 = vmatmul.mubr.f32.vlgmr.msra.gmra.mrb[8].mxu0 %v6674_v45 }
 0x96c   :  { %32482 = vmatprep.mubr.f32.mxu0 %v6662_v31  ;;  %32481 = vmatpush3.msra.mxu0 %v35583_v25 }
 0x96d   :  { %32485 = vmatprep.subr.mxu0 %v35575_v23 }
 0x973   :  { %32483 = vmatmul.mubr.f32.vlgmr.msra.gmra.mrb[8].mxu0 %v6672_v43  ;;  %v7537_v55 = vpop.f32.mrb[14].mxu1 }
 0x974   :  { %v7995_v56 = vmul.f32 0.35355338, %v7537_v55  ;;  %32486 = vmatpush3.msra.mxu0 %v35575_v23  ;;  %32487 = vmatprep.mubr.f32.mxu0 %v6662_v31  ;;  %v32519_v57 = vpop.f32.mrb[15].mxu1 }
 0x975   :  { %32520 = vmatprep.subr.mxu0 %v35064_v7 }
 0x976   :  { %v7997_v61 = vsel %vm96_vm1, %v7995_v56, -inf }
 0x977   :  { %7998 = vmax.xlane.f32.xlu0 %v7997_v61 }
 0x97b   :  { %32488 = vmatmul.mubr.f32.vlgmr.msra.gmra.mrb[8].mxu0 %v6672_v43 }
 0x97c   :  { %32521 = vmatpush3.xpose.msra.mxu0 %v7550_v52  ;;  %32522 = vmatprep.mubr.msk.f32.mxu0 %vm35065_vm0, %v35064_v7 }
 0x97d   :  { %32525 = vmatprep.subr.mxu0 %v35064_v7 }
 0x97f   :  { %32523 = vmatmul.mubr.f32.vlgmr.msra.gmra.mrb[12].mxu0 %v7619_v0  ;;  %v35678_v0 = vsub.f32 %v46_v62, %v35674_v63 }
 0x980   :  { %32526 = vmatpush3.xpose.msra.mxu0 %v7630_v1  ;;  %32527 = vmatprep.mubr.msk.f32.mxu0 %vm35065_vm0, %v35064_v7 }
 0x981   :  { %32530 = vmatprep.subr.mxu0 %v35064_v7  ;;  %v35682_v1 = vand.u32 4294901760, %v35678_v0 }
 0x987   :  { %32528 = vmatmul.mubr.f32.vlgmr.msra.gmra.mrb[12].mxu0 %v7615_v51 }
 0x988   :  { %32531 = vmatpush3.xpose.msra.mxu0 %v7627_v54  ;;  %32532 = vmatprep.mubr.msk.f32.mxu0 %vm35065_vm0, %v35064_v7 }
 0x989   :  { %32535 = vmatprep.subr.mxu0 %v35064_v7 }
 0x98f   :  { %32533 = vmatmul.mubr.f32.vlgmr.msra.gmra.mrb[12].mxu0 %v7616_v53 }
 0x990   :  { %32536 = vmatpush3.xpose.msra.mxu0 %v7550_v52  ;;  %32537 = vmatprep.mubr.msk.f32.mxu0 %vm35065_vm0, %v35064_v7 }
 0x991   :  { %32540 = vmatprep.subr.mxu0 %v35064_v7 }
 0x997   :  { %32538 = vmatmul.mubr.f32.vlgmr.msra.gmra.mrb[12].mxu0 %v7617_v58 }
 0x998   :  { %32541 = vmatpush3.xpose.msra.mxu0 %v7628_v60  ;;  %32542 = vmatprep.mubr.msk.f32.mxu0 %vm35065_vm0, %v35064_v7 }
 0x999   :  { %32545 = vmatprep.subr.mxu0 %v35064_v7 }
 0x99f   :  { %32543 = vmatmul.mubr.f32.vlgmr.msra.gmra.mrb[12].mxu0 %v7615_v51 }
 0x9a0   :  { %32546 = vmatpush3.xpose.msra.mxu0 %v7550_v52  ;;  %32547 = vmatprep.mubr.msk.f32.mxu0 %vm35065_vm0, %v35064_v7 }
 0x9a1   :  { %32580 = vmatprep.subr.mxu0 %v35064_v7 }
 0x9a7   :  { %32548 = vmatmul.mubr.f32.vlgmr.msra.gmra.mrb[12].mxu0 %v7615_v51 }
 0x9a8   :  { %32582 = vmatprep.mubr.msk.f32.mxu0 %vm35065_vm0, %v35064_v7 }
 0xa04   :  { %v7999_v2 = vpop.xlane.xlu0 %7998 }
 0xa05   :  { %v8003_v3 = vsub.f32 %v7995_v56, %v7999_v2  ;;  %v9019_v2 = vsub.f32 %v35678_v0, %v35682_v1 }
 0xa07   :  { %v8005_v9 = vmul.f32 1.442695, %v8003_v3  ;;  %v35686_v3 = vand.u32 4294901760, %v9019_v2 }
 0xa09   :  { %34974 = vpow2.f32 %v8005_v9 }
 0xa13   :  { %v34975_v10 = vpop.eup %34974 }
 0xa14   :  { %v8009_v11 = vsel %vm96_vm1, %v34975_v10, 0.0 }
 0xa15   :  { %8010 = vadd.xlane.f32.xlu0 %v8009_v11 }
 0xa7a   :  { %v7991_v12 = vpop.f32.mrb[12].mxu0 }
 0xa7b   :  { %v7996_v14 = vmul.f32 0.35355338, %v7991_v12  ;;  %v32549_v17 = vpop.f32.mrb[13].mxu0 }
 0xa7d   :  { %v8000_v19 = vsel %vm96_vm1, %v7996_v14, -inf }
 0xa7e   :  { %8001 = vmax.xlane.f32.xlu1 %v8000_v19 }
 0xa8f   :  { %8471 = vrot.lane.b32.xlu1 %v35163_v13, %s35076_s19 }
 0xaa2   :  { %v8011_v31 = vpop.xlane.xlu0 %8010 }
 0xb0b   :  { %v8002_v20 = vpop.xlane.xlu1 %8001 }
 0xb0c   :  { %v8004_v21 = vsub.f32 %v7996_v14, %v8002_v20 }
 0xb0e   :  { %v8007_v22 = vmul.f32 1.442695, %v8004_v21 }
 0xb0f   :  { %v8472_v26 = vpop.permute.xlu1 %8471 }
 0xb10   :  { %34976 = vpow2.f32 %v8007_v22  ;;  %v35630_v28 = vand.u32 4294901760, %v8472_v26 }
 0xb11   :  { %34978 = vrcp.f32 %v8011_v31 }
 0xb12   :  { %32581 = vmatpush3.msra.mxu0 %v35630_v28  ;;  %v8555_v49 = vsub.f32 %v8472_v26, %v35630_v28 }
 0xb13   :  { %32585 = vmatprep.subr.mxu0 %v35064_v7 }
 0xb14   :  { %v8556_v54 = vand.u32 4294901760, %v8555_v49 }
 0xb16   :  { %v8557_v57 = vsub.f32 %v8555_v49, %v8556_v54 }
 0xb18   :  { %v8558_v61 = vand.u32 4294901760, %v8557_v57 }
 0xb1a   :  { %v34977_v29 = vpop.eup %34976 }
 0xb1b   :  { %v8012_v30 = vsel %vm96_vm1, %v34977_v29, 0.0  ;;  %v34979_v13 = vpop.eup %34978 }
 0xb1c   :  { %8013 = vadd.xlane.f32.xlu0 %v8012_v30  ;;  %v8016_v32 = vmul.f32 %v34979_v13, %v34975_v10 }
 0xb1e   :  { %v8023_v33 = vsel %vm96_vm1, %v8016_v32, 0  ;;  %v35706_v32 = vld [vmem:[%s36912_s6] sm:$0x7] }
 0xb1f   :  { %v8091_v34 = vand.u32 4294901760, %v8023_v33 }
 0xb21   :  { %v8092_v35 = vsub.f32 %v8023_v33, %v8091_v34  ;;  %v35710_v33 = vrot.slane %v35706_v32, %v35147_v5 }
 0xb23   :  { %v8093_v36 = vand.u32 4294901760, %v8092_v35 }
 0xb25   :  { %v8094_v41 = vsub.f32 %v8092_v35, %v8093_v36 }
 0xb27   :  { %v8095_v45 = vand.u32 4294901760, %v8094_v41 }
 0xb32   :  { %8019 = vrot.lane.b32.xlu0 %v35167_v16, %s35076_s19 }
 0xba9   :  { %v8014_v37 = vpop.xlane.xlu0 %8013 }
 0xbaa   :  { %34980 = vrcp.f32 %v8014_v37 }
 0xbad   :  { %v8020_v43 = vpop.permute.xlu0 %8019 }
 0xbae   :  { %v8026_v44 = vand.u32 4294901760, %v8020_v43 }
 0xbb0   :  { %v8103_v46 = vsub.f32 %v8020_v43, %v8026_v44  ;;  %32551 = vmatpush3.msra.mxu1 %v8026_v44 }
 0xbb1   :  { %32553 = vmatmul.mubr.f32.vlgmr.msra.gmra.mrb[16].mxu1 %v8095_v45  ;;  %32555 = vmatprep.subr.mxu1 %v35064_v7 }
 0xbb2   :  { %v8104_v16 = vand.u32 4294901760, %v8103_v46  ;;  %32557 = vmatprep.mubr.msk.f32.mxu1 %vm35065_vm0, %v35064_v7 }
 0xbb4   :  { %v34981_v48 = vpop.eup %34980  ;;  %v8105_v47 = vsub.f32 %v8103_v46, %v8104_v16 }
 0xbb5   :  { %v8018_v50 = vmul.f32 %v34981_v48, %v34977_v29 }
 0xbb6   :  { %v8106_v51 = vand.u32 4294901760, %v8105_v47 }
 0xbb7   :  { %v8475_v52 = vsel %vm96_vm1, %v8018_v50, 0 }
 0xbb8   :  { %32556 = vmatpush3.msra.mxu1 %v8106_v51  ;;  %v8543_v53 = vand.u32 4294901760, %v8475_v52 }
 0xbb9   :  { %32558 = vmatmul.mubr.f32.vlgmr.msra.gmra.mrb[16].mxu1 %v8091_v34  ;;  %32560 = vmatprep.subr.mxu1 %v35064_v7 }
 0xbba   :  { %32561 = vmatpush3.msra.mxu1 %v8103_v46  ;;  %32562 = vmatprep.mubr.msk.f32.mxu1 %vm35065_vm0, %v35064_v7  ;;  %v8544_v55 = vsub.f32 %v8475_v52, %v8543_v53 }
 0xbbb   :  { %32565 = vmatprep.subr.mxu1 %v35064_v7 }
 0xbbc   :  { %v8545_v56 = vand.u32 4294901760, %v8544_v55 }
 0xbbe   :  { %v8546_v58 = vsub.f32 %v8544_v55, %v8545_v56 }
 0xbc0   :  { %v8547_v60 = vand.u32 4294901760, %v8546_v58  ;;  %v42_v58 = vld [vmem:[%s36913_s3 + $0x18] sm:$0xff] }
 0xbc1   :  { %32563 = vmatmul.mubr.f32.vlgmr.msra.gmra.mrb[16].mxu1 %v8092_v35 }
 0xbc2   :  { %32566 = vmatpush3.msra.mxu1 %v8026_v44  ;;  %32583 = vmatmul.mubr.f32.vlgmr.msra.gmra.mrb[14].mxu0 %v8547_v60 }
 0xbc3   :  { %32586 = vmatpush3.msra.mxu0 %v8558_v61  ;;  %32567 = vmatprep.mubr.msk.f32.mxu1 %vm35065_vm0, %v35064_v7  ;;  %v9470_v61 = vand.u32 4294901760, %v42_v58 }
 0xbc4   :  { %32570 = vmatprep.subr.mxu1 %v35064_v7  ;;  %32587 = vmatprep.mubr.msk.f32.mxu0 %vm35065_vm0, %v35064_v7 }
 0xbc5   :  { %32590 = vmatprep.subr.mxu0 %v35064_v7 }
 0xbc9   :  { %32568 = vmatmul.mubr.f32.vlgmr.msra.gmra.mrb[16].mxu1 %v8093_v36 }
 0xbca   :  { %32571 = vmatpush3.msra.mxu1 %v8104_v16  ;;  %32588 = vmatmul.mubr.f32.vlgmr.msra.gmra.mrb[14].mxu0 %v8543_v53 }
 0xbcb   :  { %32591 = vmatpush3.msra.mxu0 %v8555_v49  ;;  %32572 = vmatprep.mubr.msk.f32.mxu1 %vm35065_vm0, %v35064_v7 }
 0xbcc   :  { %32575 = vmatprep.subr.mxu1 %v35064_v7  ;;  %32592 = vmatprep.mubr.msk.f32.mxu0 %vm35065_vm0, %v35064_v7 }
 0xbcd   :  { %32595 = vmatprep.subr.mxu0 %v35064_v7 }
 0xbd1   :  { %32573 = vmatmul.mubr.f32.vlgmr.msra.gmra.mrb[16].mxu1 %v8091_v34 }
 0xbd2   :  { %32576 = vmatpush3.msra.mxu1 %v8026_v44  ;;  %32593 = vmatmul.mubr.f32.vlgmr.msra.gmra.mrb[14].mxu0 %v8544_v55  ;;  %v41_v55 = vld [vmem:[%s36913_s3 + $0x10] sm:$0xff] }
 0xbd3   :  { %32596 = vmatpush3.msra.mxu0 %v35630_v28  ;;  %32577 = vmatprep.mubr.msk.f32.mxu1 %vm35065_vm0, %v35064_v7  ;;  %v9467_v60 = vand.u32 4294901760, %v41_v55 }
 0xbd4   :  { %32597 = vmatprep.mubr.msk.f32.mxu0 %vm35065_vm0, %v35064_v7  ;;  %32600 = vmatprep.subr.mxu0 %v35064_v7 }
 0xbd5   :  { %v35732_v2 = vpack.c.bf16 %v9470_v61, %v9467_v60 }
 0xbd9   :  { %32578 = vmatmul.mubr.f32.vlgmr.msra.gmra.mrb[16].mxu1 %v8091_v34 }
 0xbda   :  { %32598 = vmatmul.mubr.f32.vlgmr.msra.gmra.mrb[14].mxu0 %v8545_v56 }
 0xbdb   :  { %32601 = vmatpush3.msra.mxu0 %v8556_v54  ;;  %32602 = vmatprep.mubr.msk.f32.mxu0 %vm35065_vm0, %v35064_v7  ;;  %v40_v54 = vld [vmem:[%s36913_s3 + $0x8] sm:$0xff] }
 0xbdc   :  { %32605 = vmatprep.subr.mxu0 %v35064_v7  ;;  %v9464_v57 = vand.u32 4294901760, %v40_v54 }
 0xbe2   :  { %32603 = vmatmul.mubr.f32.vlgmr.msra.gmra.mrb[14].mxu0 %v8543_v53 }
 0xbe3   :  { %32606 = vmatpush3.msra.mxu0 %v35630_v28  ;;  %32607 = vmatprep.mubr.msk.f32.mxu0 %vm35065_vm0, %v35064_v7 }
 0xbe4   :  { %32610 = vmatprep.subr.mxu0 %v35674_v63 }
 0xbea   :  { %32608 = vmatmul.mubr.f32.vlgmr.msra.gmra.mrb[14].mxu0 %v8543_v53  ;;  %v39_v53 = vld [vmem:[%s36913_s3] sm:$0xff] }
 0xbeb   :  { %32611 = vmatpush3.msra.mxu0 %v35674_v63  ;;  %v9461_v56 = vand.u32 4294901760, %v39_v53 }
 0xbec   :  { %32615 = vmatprep.subr.mxu0 %v35686_v3 }
 0xbed   :  { %v35730_v62 = vpack.c.bf16 %v9464_v57, %v9461_v56 }
 0xbef   :  { %34117 = vmatprep.subr.bf16.mxu1 %v35730_v62 }
 0xbf0   :  { %34119 = vmatpush3.bf16.msra.mxu1 %v35730_v62 }
 0xbf1   :  { %34121 = vmatprep.subr.bf16.mxu1 %v35732_v2 }
 0xbf4   :  { %34123 = vmatpush3.bf16.msra.mxu1 %v35732_v2 }
 0xcac   :  { %v8467_v9 = vpop.f32.mrb[16].mxu1 }
 0xcad   :  { %v8924_v10 = vsel %vm96_vm1, %v8467_v9, 0  ;;  %v32579_v11 = vpop.f32.mrb[17].mxu1  ;;  %v9551_v9 = vsub.f32 %v39_v53, %v9461_v56 }
 0xcae   :  { %v8995_v12 = vand.u32 4294901760, %v8924_v10 }
 0xcaf   :  { %v9552_v11 = vand.u32 4294901760, %v9551_v9 }
 0xcb0   :  { %v8996_v14 = vsub.f32 %v8924_v10, %v8995_v12  ;;  %v9558_v10 = vsub.f32 %v40_v54, %v9464_v57 }
 0xcb2   :  { %v8997_v17 = vand.u32 4294901760, %v8996_v14 }
 0xcb4   :  { %v8998_v19 = vsub.f32 %v8996_v14, %v8997_v17 }
 0xcb6   :  { %v8999_v20 = vand.u32 4294901760, %v8998_v19  ;;  %v9565_v19 = vsub.f32 %v41_v55, %v9467_v60 }
 0xcb8   :  { %32612 = vmatprep.mubr.f32.mxu0 %v8999_v20  ;;  %v9572_v20 = vsub.f32 %v42_v58, %v9470_v61 }
 0xcbd   :  { %v8919_v21 = vpop.f32.mrb[14].mxu0 }
 0xcbe   :  { %v8927_v22 = vsel %vm96_vm1, %v8919_v21, 0  ;;  %v32609_v26 = vpop.f32.mrb[15].mxu0 }
 0xcbf   :  { %v9005_v28 = vand.u32 4294901760, %v8927_v22  ;;  %v9566_v26 = vand.u32 4294901760, %v9565_v19 }
 0xcc1   :  { %v9006_v29 = vsub.f32 %v8927_v22, %v9005_v28 }
 0xcc3   :  { %v9007_v30 = vand.u32 4294901760, %v9006_v29 }
 0xcc5   :  { %v9008_v31 = vsub.f32 %v9006_v29, %v9007_v30 }
 0xcc7   :  { %v9009_v13 = vand.u32 4294901760, %v9008_v31 }
 0xcc9   :  { %32613 = vmatmul.mubr.f32.vlgmr.msra.gmra.mrb[8].mxu0 %v9009_v13 }
 0xcca   :  { %32617 = vmatprep.mubr.f32.mxu0 %v8995_v12  ;;  %32616 = vmatpush3.msra.mxu0 %v35686_v3 }
 0xccb   :  { %32620 = vmatprep.subr.mxu0 %v35678_v0 }
 0xcd1   :  { %32618 = vmatmul.mubr.f32.vlgmr.msra.gmra.mrb[8].mxu0 %v9005_v28 }
 0xcd2   :  { %32622 = vmatprep.mubr.f32.mxu0 %v8996_v14  ;;  %32621 = vmatpush3.msra.mxu0 %v35678_v0  ;;  %v9553_v14 = vsub.f32 %v9551_v9, %v9552_v11 }
 0xcd3   :  { %32625 = vmatprep.subr.mxu0 %v35674_v63 }
 0xcd4   :  { %v9554_v21 = vand.u32 4294901760, %v9553_v14 }
 0xcd9   :  { %32623 = vmatmul.mubr.f32.vlgmr.msra.gmra.mrb[8].mxu0 %v9006_v29 }
 0xcda   :  { %32627 = vmatprep.mubr.f32.mxu0 %v8997_v17  ;;  %32626 = vmatpush3.msra.mxu0 %v35674_v63 }
 0xcdb   :  { %32630 = vmatprep.subr.mxu0 %v35682_v1 }
 0xce1   :  { %32628 = vmatmul.mubr.f32.vlgmr.msra.gmra.mrb[8].mxu0 %v9007_v30  ;;  %v9567_v30 = vsub.f32 %v9565_v19, %v9566_v26 }
 0xce2   :  { %32632 = vmatprep.mubr.f32.mxu0 %v8995_v12  ;;  %32631 = vmatpush3.msra.mxu0 %v35682_v1 }
 0xce3   :  { %32635 = vmatprep.subr.mxu0 %v35674_v63  ;;  %v9568_v13 = vand.u32 4294901760, %v9567_v30 }
 0xce9   :  { %32633 = vmatmul.mubr.f32.vlgmr.msra.gmra.mrb[8].mxu0 %v9005_v28 }
 0xcea   :  { %32637 = vmatprep.mubr.f32.mxu0 %v8995_v12  ;;  %32636 = vmatpush3.msra.mxu0 %v35674_v63  ;;  %v9559_v12 = vand.u32 4294901760, %v9558_v10 }
 0xceb   :  { %32706 = vmatprep.subr.mxu0 %v35064_v7 }
 0xcec   :  { %v9560_v17 = vsub.f32 %v9558_v10, %v9559_v12 }
 0xcee   :  { %v9561_v22 = vand.u32 4294901760, %v9560_v17 }
 0xcf0   :  { %v35738_v29 = vpack.c.bf16 %v9561_v22, %v9554_v21  ;;  %v35062_v22 = vld [vmem:[%s36910_s2] sm:$0x7] }
 0xcf1   :  { %32638 = vmatmul.mubr.f32.vlgmr.msra.gmra.mrb[8].mxu0 %v9005_v28  ;;  %v9573_v28 = vand.u32 4294901760, %v9572_v20 }
 0xcf2   :  { %32708 = vmatprep.mubr.msk.f32.mxu0 %vm35065_vm0, %v35064_v7  ;;  %34125 = vmatprep.subr.bf16.mxu1 %v35738_v29 }
 0xcf3   :  { %v9574_v31 = vsub.f32 %v9572_v20, %v9573_v28 }
 0xdc4   :  { %v32639_v34 = vpop.f32.mrb[8].mxu0 }
 0xdc5   :  { %v9421_v35 = vadd.f32 %v32639_v34, %v35710_v33  ;;  %v9408_v36 = vpop.f32.mrb[9].mxu0  ;;  %v9575_v34 = vand.u32 4294901760, %v9574_v31 }
 0xdc6   :  { %v9420_v37 = vadd.f32 %v9408_v36, %v35710_v33  ;;  %v35743_v36 = vpack.c.bf16 %v9558_v10, %v9551_v9 }
 0xdc7   :  { %v9426_v41 = vsel %vm9422_vm2, %v9421_v35, 0.0 }
 0xdc8   :  { %9427 = vadd.xlane.f32.xlu1 %v9426_v41  ;;  %v9423_v43 = vsel %vm9422_vm2, %v9420_v37, 0.0  ;;  %v35747_v41 = vpack.c.bf16 %v9559_v12, %v9552_v11 }
 0xdc9   :  { %9424 = vadd.xlane.f32.xlu0 %v9423_v43  ;;  %v35749_v43 = vpack.c.bf16 %v9573_v28, %v9566_v26 }
 0xe55   :  { %v9428_v44 = vpop.xlane.xlu1 %9427 }
 0xe56   :  { %v9431_v45 = vmul.f32 0.03125, %v9428_v44  ;;  %v9425_v46 = vpop.xlane.xlu0 %9424 }
 0xe57   :  { %v9430_v16 = vmul.f32 0.03125, %v9425_v46 }
 0xe58   :  { %v9433_v48 = vsub.f32 %v9421_v35, %v9431_v45  ;;  %v35741_v35 = vpack.c.bf16 %v9575_v34, %v9568_v13 }
 0xe59   :  { %v9432_v47 = vsub.f32 %v9420_v37, %v9430_v16  ;;  %v35745_v37 = vpack.c.bf16 %v9572_v20, %v9565_v19 }
 0xe5a   :  { %v9435_v51 = vmul.f32 %v9433_v48, %v9433_v48 }
 0xe5b   :  { %v9434_v49 = vmul.f32 %v9432_v47, %v9432_v47 }
 0xe5c   :  { %v9439_v52 = vsel %vm9422_vm2, %v9435_v51, 0.0  ;;  %v35752_v51 = vsub.s32 2, %v35144_v4 }
 0xe5d   :  { %v9436_v50 = vsel %vm9422_vm2, %v9434_v49, 0.0 }
 0xe5e   :  { %9437 = vadd.xlane.f32.xlu0 %v9436_v50  ;;  %v35760_v54 = vrot.slane %v35706_v32, %v35752_v51  ;;  %v35794_v26 = vrot.slane %v35062_v22, %v35752_v51 }
 0xe62   :  { %9440 = vadd.xlane.f32.xlu0 %v9439_v52  ;;  %v35756_v52 = vrot.slane %v35706_v32, %v35155_v8 }
 0xeeb   :  { %v9438_v44 = vpop.xlane.xlu0 %9437 }
 0xeec   :  { %v9442_v45 = vmul.f32 0.03125, %v9438_v44 }
 0xeee   :  { %v9444_v46 = vadd.f32 1e-05, %v9442_v45 }
 0xeef   :  { %v9441_v16 = vpop.xlane.xlu0 %9440 }
 0xef0   :  { %34982 = vrsqrt.f32 %v9444_v46  ;;  %v9443_v49 = vmul.f32 0.03125, %v9441_v16 }
 0xef2   :  { %v9445_v50 = vadd.f32 1e-05, %v9443_v49 }
 0xef4   :  { %34984 = vrsqrt.f32 %v9445_v50 }
 0xefa   :  { %v34983_v53 = vpop.eup %34982 }
 0xefb   :  { %v9448_v55 = vmul.f32 %v34983_v53, %v9432_v47 }
 0xefd   :  { %v9450_v56 = vmul.f32 %v9448_v55, %v35756_v52 }
 0xefe   :  { %v34985_v57 = vpop.eup %34984 }
 0xeff   :  { %v9449_v58 = vmul.f32 %v34985_v57, %v9433_v48  ;;  %v9452_v60 = vadd.f32 %v9450_v56, %v35760_v54 }
 0xf01   :  { %v9451_v61 = vmul.f32 %v9449_v58, %v35756_v52  ;;  %v9455_v4 = vsel %vm9422_vm2, %v9452_v60, 0 }
 0xf02   :  { %v9529_v9 = vand.u32 4294901760, %v9455_v4 }
 0xf03   :  { %v9453_v10 = vadd.f32 %v9451_v61, %v35760_v54 }
 0xf04   :  { %v9530_v11 = vsub.f32 %v9455_v4, %v9529_v9 }
 0xf05   :  { %v9458_v12 = vsel %vm9422_vm2, %v9453_v10, 0 }
 0xf06   :  { %v9531_v14 = vand.u32 4294901760, %v9530_v11  ;;  %v9539_v32 = vand.u32 4294901760, %v9458_v12 }
 0xf08   :  { %v9532_v17 = vsub.f32 %v9530_v11, %v9531_v14  ;;  %v9540_v47 = vsub.f32 %v9458_v12, %v9539_v32 }
 0xf0a   :  { %v9533_v19 = vand.u32 4294901760, %v9532_v17  ;;  %v9541_v20 = vand.u32 4294901760, %v9540_v47 }
 0xf0c   :  { %32648 = vmatprep.mubr.f32.mxu1 %v9533_v19  ;;  %v9542_v48 = vsub.f32 %v9540_v47, %v9541_v20 }
 0xf0e   :  { %v9543_v21 = vand.u32 4294901760, %v9542_v48 }
 0xf10   :  { %32649 = vmatmul.mubr.f32.vlgmr.msra.gmra.mrb[18].mxu1 %v9543_v21 }
 0xf11   :  { %34127 = vmatpush3.bf16.msra.mxu1 %v35738_v29  ;;  %32659 = vmatprep.mubr.f32.mxu1 %v9529_v9 }
 0xf12   :  { %34129 = vmatprep.subr.bf16.mxu1 %v35741_v35 }
 0xf15   :  { %34131 = vmatpush3.bf16.msra.mxu1 %v35741_v35 }
 0xf16   :  { %34133 = vmatprep.subr.bf16.mxu1 %v35743_v36 }
 0xf18   :  { %32660 = vmatmul.mubr.f32.vlgmr.msra.gmra.mrb[18].mxu1 %v9539_v32 }
 0xf19   :  { %34135 = vmatpush3.bf16.msra.mxu1 %v35743_v36  ;;  %32670 = vmatprep.mubr.f32.mxu1 %v9530_v11 }
 0xf1a   :  { %34137 = vmatprep.subr.bf16.mxu1 %v35745_v37 }
 0xf1d   :  { %34139 = vmatpush3.bf16.msra.mxu1 %v35745_v37 }
 0xf1e   :  { %34141 = vmatprep.subr.bf16.mxu1 %v35730_v62 }
 0xf20   :  { %32671 = vmatmul.mubr.f32.vlgmr.msra.gmra.mrb[18].mxu1 %v9540_v47 }
 0xf21   :  { %34143 = vmatpush3.bf16.msra.mxu1 %v35730_v62  ;;  %32681 = vmatprep.mubr.f32.mxu1 %v9531_v14 }
 0xf22   :  { %34145 = vmatprep.subr.bf16.mxu1 %v35732_v2 }
 0xf25   :  { %34147 = vmatpush3.bf16.msra.mxu1 %v35732_v2 }
 0xf26   :  { %34149 = vmatprep.subr.bf16.mxu1 %v35747_v41 }
 0xf28   :  { %32682 = vmatmul.mubr.f32.vlgmr.msra.gmra.mrb[18].mxu1 %v9541_v20 }
 0xf29   :  { %34151 = vmatpush3.bf16.msra.mxu1 %v35747_v41  ;;  %32692 = vmatprep.mubr.f32.mxu1 %v9529_v9 }
 0xf2a   :  { %34153 = vmatprep.subr.bf16.mxu1 %v35749_v43 }
 0xf2d   :  { %34155 = vmatpush3.bf16.msra.mxu1 %v35749_v43 }
 0xf2e   :  { %34157 = vmatprep.subr.bf16.mxu1 %v35730_v62 }
 0xf30   :  { %32693 = vmatmul.mubr.f32.vlgmr.msra.gmra.mrb[18].mxu1 %v9539_v32 }
 0xf31   :  { %34159 = vmatpush3.bf16.msra.mxu1 %v35730_v62  ;;  %32703 = vmatprep.mubr.f32.mxu1 %v9529_v9 }
 0xf32   :  { %34161 = vmatprep.subr.bf16.mxu1 %v35732_v2 }
 0xf35   :  { %34163 = vmatpush3.bf16.msra.mxu1 %v35732_v2 }
 0xf36   :  { %32736 = vmatprep.subr.mxu1 %v35064_v7 }
 0xf38   :  { %32704 = vmatmul.mubr.f32.vlgmr.msra.gmra.mrb[18].mxu1 %v9539_v32 }
 0xf39   :  { %32738 = vmatprep.mubr.msk.f32.mxu1 %vm35065_vm0, %v35064_v7 }
0x100b   :  { %v32705_v28 = vpop.f32.mrb[18].mxu1 }
0x100c   :  { %v35797_v30 = vadd.f32 %v32705_v28, %v35794_v26  ;;  %v9978_v31 = vpop.f32.mrb[19].mxu1 }
0x100d   :  { %v35800_v13 = vadd.f32 %v9978_v31, %v35794_v26 }
0x100e   :  { %10442 = vrot.lane.b32.xlu0 %v35797_v30, %s35066_s0  ;;  %v10444_v34 = vsel %vm96_vm1, %v35797_v30, 0 }
0x100f   :  { %9989 = vrot.lane.b32.xlu1 %v35800_v13, %s35066_s0  ;;  %v9991_v44 = vsel %vm96_vm1, %v35800_v13, 0  ;;  %v35810_v45 = vand.u32 4294901760, %v10444_v34 }
0x1010   :  { %v35812_v46 = vand.u32 4294901760, %v9991_v44 }
0x1011   :  { %v10515_v16 = vsub.f32 %v10444_v34, %v35810_v45 }
0x1012   :  { %v10062_v49 = vsub.f32 %v9991_v44, %v35812_v46 }
0x1013   :  { %v10516_v50 = vand.u32 4294901760, %v10515_v16 }
0x1014   :  { %v10063_v53 = vand.u32 4294901760, %v10062_v49 }
0x1015   :  { %v10517_v58 = vsub.f32 %v10515_v16, %v10516_v50 }
0x1016   :  { %v10064_v4 = vsub.f32 %v10062_v49, %v10063_v53 }
0x1017   :  { %v10518_v12 = vand.u32 4294901760, %v10517_v58 }
0x1018   :  { %v10065_v32 = vand.u32 4294901760, %v10064_v4 }
0x1080   :  { %v10443_v55 = vpop.permute.xlu0 %10442 }
0x1081   :  { %v10446_v56 = vsel %vm96_vm1, %v10443_v55, 0  ;;  %v9990_v57 = vpop.permute.xlu1 %9989 }
0x1082   :  { %v10449_v60 = vand.u32 4294901760, %v10446_v56  ;;  %v9993_v61 = vsel %vm96_vm1, %v9990_v57, 0 }
0x1083   :  { %v9996_v9 = vand.u32 4294901760, %v9993_v61 }
0x1084   :  { %v10526_v10 = vsub.f32 %v10446_v56, %v10449_v60  ;;  %32737 = vmatpush3.xpose.msra.mxu1 %v10449_v60 }
0x1085   :  { %v10073_v11 = vsub.f32 %v9993_v61, %v9996_v9  ;;  %32707 = vmatpush3.xpose.msra.mxu0 %v9996_v9  ;;  %32741 = vmatprep.subr.mxu1 %v35064_v7 }
0x1086   :  { %v10527_v14 = vand.u32 4294901760, %v10526_v10  ;;  %32711 = vmatprep.subr.mxu0 %v35064_v7 }
0x1087   :  { %v10074_v17 = vand.u32 4294901760, %v10073_v11  ;;  %32739 = vmatmul.mubr.f32.vlgmr.msra.gmra.mrb[20].mxu1 %v10518_v12 }
0x1088   :  { %v10528_v47 = vsub.f32 %v10526_v10, %v10527_v14  ;;  %32709 = vmatmul.mubr.f32.vlgmr.msra.gmra.mrb[16].mxu0 %v10065_v32  ;;  %32743 = vmatprep.mubr.msk.f32.mxu1 %vm35065_vm0, %v35064_v7 }
0x1089   :  { %v10075_v19 = vsub.f32 %v10073_v11, %v10074_v17  ;;  %32713 = vmatprep.mubr.msk.f32.mxu0 %vm35065_vm0, %v35064_v7 }
0x108a   :  { %v10529_v20 = vand.u32 4294901760, %v10528_v47 }
0x108b   :  { %v10076_v48 = vand.u32 4294901760, %v10075_v19 }
0x108c   :  { %32742 = vmatpush3.xpose.msra.mxu1 %v10529_v20 }
0x108d   :  { %32712 = vmatpush3.xpose.msra.mxu0 %v10076_v48  ;;  %32746 = vmatprep.subr.mxu1 %v35064_v7 }
0x108e   :  { %32716 = vmatprep.subr.mxu0 %v35064_v7 }
0x108f   :  { %32744 = vmatmul.mubr.f32.vlgmr.msra.gmra.mrb[20].mxu1 %v35810_v45 }
0x1090   :  { %32714 = vmatmul.mubr.f32.vlgmr.msra.gmra.mrb[16].mxu0 %v35812_v46  ;;  %32747 = vmatpush3.xpose.msra.mxu1 %v10526_v10 }
0x1091   :  { %32717 = vmatpush3.xpose.msra.mxu0 %v10073_v11  ;;  %32748 = vmatprep.mubr.msk.f32.mxu1 %vm35065_vm0, %v35064_v7 }
0x1092   :  { %32751 = vmatprep.subr.mxu1 %v35064_v7  ;;  %32718 = vmatprep.mubr.msk.f32.mxu0 %vm35065_vm0, %v35064_v7 }
0x1093   :  { %32721 = vmatprep.subr.mxu0 %v35064_v7 }
0x1097   :  { %32749 = vmatmul.mubr.f32.vlgmr.msra.gmra.mrb[20].mxu1 %v10515_v16 }
0x1098   :  { %32752 = vmatpush3.xpose.msra.mxu1 %v10449_v60  ;;  %32719 = vmatmul.mubr.f32.vlgmr.msra.gmra.mrb[16].mxu0 %v10062_v49 }
0x1099   :  { %32722 = vmatpush3.xpose.msra.mxu0 %v9996_v9  ;;  %32753 = vmatprep.mubr.msk.f32.mxu1 %vm35065_vm0, %v35064_v7 }
0x109a   :  { %32756 = vmatprep.subr.mxu1 %v35064_v7  ;;  %32723 = vmatprep.mubr.msk.f32.mxu0 %vm35065_vm0, %v35064_v7 }
0x109b   :  { %32726 = vmatprep.subr.mxu0 %v35064_v7 }
0x109f   :  { %32754 = vmatmul.mubr.f32.vlgmr.msra.gmra.mrb[20].mxu1 %v10516_v50 }
0x10a0   :  { %32757 = vmatpush3.xpose.msra.mxu1 %v10527_v14  ;;  %32724 = vmatmul.mubr.f32.vlgmr.msra.gmra.mrb[16].mxu0 %v10063_v53 }
0x10a1   :  { %32727 = vmatpush3.xpose.msra.mxu0 %v10074_v17  ;;  %32758 = vmatprep.mubr.msk.f32.mxu1 %vm35065_vm0, %v35064_v7 }
0x10a2   :  { %32761 = vmatprep.subr.mxu1 %v35064_v7  ;;  %32728 = vmatprep.mubr.msk.f32.mxu0 %vm35065_vm0, %v35064_v7 }
0x10a3   :  { %32731 = vmatprep.subr.mxu0 %v35064_v7 }
0x10a7   :  { %32759 = vmatmul.mubr.f32.vlgmr.msra.gmra.mrb[20].mxu1 %v35810_v45 }
0x10a8   :  { %32762 = vmatpush3.xpose.msra.mxu1 %v10449_v60  ;;  %32729 = vmatmul.mubr.f32.vlgmr.msra.gmra.mrb[16].mxu0 %v35812_v46 }
0x10a9   :  { %32732 = vmatpush3.xpose.msra.mxu0 %v9996_v9  ;;  %32763 = vmatprep.mubr.msk.f32.mxu1 %vm35065_vm0, %v35064_v7 }
0x10aa   :  { %32733 = vmatprep.mubr.msk.f32.mxu0 %vm35065_vm0, %v35064_v7  ;;  %32796 = vmatprep.subr.mxu1 %v35064_v7 }
0x10ab   :  { %32766 = vmatprep.subr.mxu0 %v35064_v7 }
0x10af   :  { %32764 = vmatmul.mubr.f32.vlgmr.msra.gmra.mrb[20].mxu1 %v35810_v45 }
0x10b0   :  { %32734 = vmatmul.mubr.f32.vlgmr.msra.gmra.mrb[16].mxu0 %v35812_v46  ;;  %32798 = vmatprep.mubr.msk.f32.mxu1 %vm35065_vm0, %v35064_v7 }
0x10b1   :  { %32768 = vmatprep.mubr.msk.f32.mxu0 %vm35065_vm0, %v35064_v7 }
0x1182   :  { %v10890_v21 = vpop.f32.mrb[20].mxu1 }
0x1183   :  { %v10895_v22 = vmul.f32 0.35355338, %v10890_v21  ;;  %v10437_v28 = vpop.f32.mrb[16].mxu0  ;;  %v32765_v31 = vpop.f32.mrb[21].mxu1 }
0x1184   :  { %v32735_v34 = vpop.f32.mrb[17].mxu0  ;;  %v10894_v53 = vmul.f32 0.35355338, %v10437_v28 }
0x1185   :  { %v10899_v44 = vsel %vm96_vm1, %v10895_v22, -inf }
0x1186   :  { %10900 = vmax.xlane.f32.xlu1 %v10899_v44  ;;  %v10896_v55 = vsel %vm96_vm1, %v10894_v53, -inf }
0x1197   :  { %12276 = vrot.lane.b32.xlu1 %v35797_v30, %s35069_s25 }
0x119b   :  { %12278 = vrot.lane.b32.xlu1 %v35797_v30, %s35068_s24 }
0x1213   :  { %v10901_v45 = vpop.xlane.xlu1 %10900 }
0x1214   :  { %v10903_v46 = vsub.f32 %v10895_v22, %v10901_v45 }
0x1216   :  { %v10906_v16 = vmul.f32 1.442695, %v10903_v46 }
0x1217   :  { %v12277_v20 = vpop.permute.xlu1 %12276 }
0x1218   :  { %34986 = vpow2.f32 %v10906_v16  ;;  %v12280_v21 = vsel %vm96_vm1, %v12277_v20, 0 }
0x1219   :  { %v12350_v28 = vand.u32 4294901760, %v12280_v21 }
0x121b   :  { %v12279_v48 = vpop.permute.xlu1 %12278  ;;  %v12351_v45 = vsub.f32 %v12280_v21, %v12350_v28 }
0x121c   :  { %v12282_v22 = vsel %vm96_vm1, %v12279_v48, 0 }
0x121d   :  { %v12285_v31 = vand.u32 4294901760, %v12282_v22 }
0x121f   :  { %v12362_v46 = vsub.f32 %v12282_v22, %v12285_v31 }
0x1222   :  { %v34987_v49 = vpop.eup %34986 }
0x1223   :  { %v10911_v50 = vsel %vm96_vm1, %v34987_v49, 0.0 }
0x1224   :  { %10912 = vadd.xlane.f32.xlu0 %v10911_v50 }
0x123a   :  { %11370 = vrot.lane.b32.xlu0 %v35797_v30, %s35067_s23 }
0x1259   :  { %10897 = vmax.xlane.f32.xlu0 %v10896_v55  ;;  %v12352_v55 = vand.u32 4294901760, %v12351_v45 }
0x126f   :  { %10918 = vrot.lane.b32.xlu0 %v35800_v13, %s35067_s23 }
0x1273   :  { %11824 = vrot.lane.b32.xlu0 %v35800_v13, %s35068_s24 }
0x12b1   :  { %v10913_v56 = vpop.xlane.xlu0 %10912 }
0x12b2   :  { %34988 = vrcp.f32 %v10913_v56  ;;  %v12363_v56 = vand.u32 4294901760, %v12362_v46 }
0x12b5   :  { %v11371_v57 = vpop.permute.xlu0 %11370 }
0x12b6   :  { %v11377_v58 = vand.u32 4294901760, %v11371_v57 }
0x12b8   :  { %32797 = vmatpush3.msra.mxu1 %v11377_v58  ;;  %v11454_v4 = vsub.f32 %v11371_v57, %v11377_v58  ;;  %v12364_v57 = vsub.f32 %v12362_v46, %v12363_v56 }
0x12b9   :  { %32801 = vmatprep.subr.mxu1 %v35064_v7 }
0x12ba   :  { %v11455_v11 = vand.u32 4294901760, %v11454_v4 }
0x12bc   :  { %v34989_v60 = vpop.eup %34988  ;;  %v11456_v32 = vsub.f32 %v11454_v4, %v11455_v11 }
0x12bd   :  { %v10917_v61 = vmul.f32 %v34989_v60, %v34987_v49 }
0x12be   :  { %v11457_v19 = vand.u32 4294901760, %v11456_v32 }
0x12bf   :  { %v11374_v9 = vsel %vm96_vm1, %v10917_v61, 0  ;;  %v12365_v61 = vand.u32 4294901760, %v12364_v57 }
0x12c0   :  { %v11442_v10 = vand.u32 4294901760, %v11374_v9 }
0x12c2   :  { %v11443_v12 = vsub.f32 %v11374_v9, %v11442_v10 }
0x12c4   :  { %v11444_v14 = vand.u32 4294901760, %v11443_v12 }
0x12c6   :  { %v11445_v17 = vsub.f32 %v11443_v12, %v11444_v14 }
0x12c8   :  { %v11446_v47 = vand.u32 4294901760, %v11445_v17 }
0x12ca   :  { %32799 = vmatmul.mubr.f32.vlgmr.msra.gmra.mrb[22].mxu1 %v11446_v47 }
0x12cb   :  { %32802 = vmatpush3.msra.mxu1 %v11457_v19  ;;  %32803 = vmatprep.mubr.msk.f32.mxu1 %vm35065_vm0, %v35064_v7 }
0x12cc   :  { %32806 = vmatprep.subr.mxu1 %v35064_v7 }
0x12d2   :  { %32804 = vmatmul.mubr.f32.vlgmr.msra.gmra.mrb[22].mxu1 %v11442_v10 }
0x12d3   :  { %32807 = vmatpush3.msra.mxu1 %v11454_v4  ;;  %32808 = vmatprep.mubr.msk.f32.mxu1 %vm35065_vm0, %v35064_v7 }
0x12d4   :  { %32811 = vmatprep.subr.mxu1 %v35064_v7 }
0x12da   :  { %32809 = vmatmul.mubr.f32.vlgmr.msra.gmra.mrb[22].mxu1 %v11443_v12 }
0x12db   :  { %32812 = vmatpush3.msra.mxu1 %v11377_v58  ;;  %32813 = vmatprep.mubr.msk.f32.mxu1 %vm35065_vm0, %v35064_v7 }
0x12dc   :  { %32816 = vmatprep.subr.mxu1 %v35064_v7 }
0x12e2   :  { %32814 = vmatmul.mubr.f32.vlgmr.msra.gmra.mrb[22].mxu1 %v11444_v14 }
0x12e3   :  { %32817 = vmatpush3.msra.mxu1 %v11455_v11  ;;  %32818 = vmatprep.mubr.msk.f32.mxu1 %vm35065_vm0, %v35064_v7 }
0x12e4   :  { %32821 = vmatprep.subr.mxu1 %v35064_v7 }
0x12e6   :  { %v10898_v34 = vpop.xlane.xlu0 %10897 }
0x12e7   :  { %v10902_v44 = vsub.f32 %v10894_v53, %v10898_v34  ;;  %v12353_v53 = vsub.f32 %v12351_v45, %v12352_v55 }
0x12e9   :  { %v10904_v16 = vmul.f32 1.442695, %v10902_v44 }
0x12ea   :  { %32819 = vmatmul.mubr.f32.vlgmr.msra.gmra.mrb[22].mxu1 %v11442_v10  ;;  %v10919_v49 = vpop.permute.xlu0 %10918 }
0x12eb   :  { %34990 = vpow2.f32 %v10904_v16  ;;  %32822 = vmatpush3.msra.mxu1 %v11377_v58  ;;  %v35889_v50 = vand.u32 4294901760, %v10919_v49  ;;  %32823 = vmatprep.mubr.msk.f32.mxu1 %vm35065_vm0, %v35064_v7  ;;  %v12354_v58 = vand.u32 4294901760, %v12353_v53 }
0x12ec   :  { %32856 = vmatprep.subr.mxu1 %v35064_v7 }
0x12ed   :  { %32767 = vmatpush3.msra.mxu0 %v35889_v50  ;;  %v11002_v11 = vsub.f32 %v10919_v49, %v35889_v50 }
0x12ee   :  { %32771 = vmatprep.subr.mxu0 %v35064_v7 }
0x12ef   :  { %v11003_v17 = vand.u32 4294901760, %v11002_v11 }
0x12f1   :  { %v11004_v20 = vsub.f32 %v11002_v11, %v11003_v17 }
0x12f2   :  { %32824 = vmatmul.mubr.f32.vlgmr.msra.gmra.mrb[22].mxu1 %v11442_v10 }
0x12f3   :  { %32857 = vmatpush3.xpose.msra.mxu1 %v12285_v31  ;;  %32858 = vmatprep.mubr.msk.f32.mxu1 %vm35065_vm0, %v35064_v7  ;;  %v11005_v22 = vand.u32 4294901760, %v11004_v20 }
0x12f4   :  { %32861 = vmatprep.subr.mxu1 %v35064_v7 }
0x12f5   :  { %v34991_v60 = vpop.eup %34990 }
0x12f6   :  { %32859 = vmatmul.mubr.f32.vlgmr.msra.gmra.mrb[24].mxu1 %v12354_v58  ;;  %v10908_v4 = vsel %vm96_vm1, %v34991_v60, 0.0 }
0x12f7   :  { %32862 = vmatpush3.xpose.msra.mxu1 %v12365_v61  ;;  %10909 = vadd.xlane.f32.xlu1 %v10908_v4 }
0x12f8   :  { %32863 = vmatprep.mubr.msk.f32.mxu1 %vm35065_vm0, %v35064_v7  ;;  %32866 = vmatprep.subr.mxu1 %v35064_v7 }
0x12fe   :  { %32864 = vmatmul.mubr.f32.vlgmr.msra.gmra.mrb[24].mxu1 %v12350_v28 }
0x12ff   :  { %32867 = vmatpush3.xpose.msra.mxu1 %v12362_v46  ;;  %32868 = vmatprep.mubr.msk.f32.mxu1 %vm35065_vm0, %v35064_v7 }
0x1300   :  { %32871 = vmatprep.subr.mxu1 %v35064_v7 }
0x1306   :  { %32869 = vmatmul.mubr.f32.vlgmr.msra.gmra.mrb[24].mxu1 %v12351_v45 }
0x1307   :  { %32872 = vmatpush3.xpose.msra.mxu1 %v12285_v31  ;;  %32873 = vmatprep.mubr.msk.f32.mxu1 %vm35065_vm0, %v35064_v7 }
0x1308   :  { %11822 = vrot.lane.b32.xlu1 %v35800_v13, %s35069_s25  ;;  %32876 = vmatprep.subr.mxu1 %v35064_v7 }
0x130e   :  { %32874 = vmatmul.mubr.f32.vlgmr.msra.gmra.mrb[24].mxu1 %v12352_v55 }
0x130f   :  { %32877 = vmatpush3.xpose.msra.mxu1 %v12363_v56  ;;  %32878 = vmatprep.mubr.msk.f32.mxu1 %vm35065_vm0, %v35064_v7 }
0x1310   :  { %32881 = vmatprep.subr.mxu1 %v35064_v7 }
0x1316   :  { %32879 = vmatmul.mubr.f32.vlgmr.msra.gmra.mrb[24].mxu1 %v12350_v28 }
0x1317   :  { %32882 = vmatpush3.xpose.msra.mxu1 %v12285_v31  ;;  %32883 = vmatprep.mubr.msk.f32.mxu1 %vm35065_vm0, %v35064_v7  ;;  %v11825_v31 = vpop.permute.xlu0 %11824 }
0x1318   :  { %32916 = vmatprep.subr.mxu1 %v35064_v7  ;;  %v11828_v44 = vsel %vm96_vm1, %v11825_v31, 0 }
0x1319   :  { %v11831_v46 = vand.u32 4294901760, %v11828_v44 }
0x131b   :  { %v11908_v49 = vsub.f32 %v11828_v44, %v11831_v46 }
0x131d   :  { %v11909_v56 = vand.u32 4294901760, %v11908_v49 }
0x131e   :  { %32884 = vmatmul.mubr.f32.vlgmr.msra.gmra.mrb[24].mxu1 %v12350_v28 }
0x131f   :  { %32918 = vmatprep.mubr.msk.f32.mxu1 %vm35065_vm0, %v35064_v7  ;;  %v11910_v57 = vsub.f32 %v11908_v49, %v11909_v56 }
0x1384   :  { %v10910_v9 = vpop.xlane.xlu1 %10909 }
0x1385   :  { %34992 = vrcp.f32 %v10910_v9 }
0x1388   :  { %v11823_v28 = vpop.permute.xlu1 %11822 }
0x1389   :  { %v11826_v34 = vsel %vm96_vm1, %v11823_v28, 0 }
0x138a   :  { %v11896_v45 = vand.u32 4294901760, %v11826_v34 }
0x138c   :  { %v11897_v16 = vsub.f32 %v11826_v34, %v11896_v45 }
0x138e   :  { %v11898_v55 = vand.u32 4294901760, %v11897_v16 }
0x138f   :  { %v34993_v10 = vpop.eup %34992 }
0x1390   :  { %v10915_v12 = vmul.f32 %v34993_v10, %v34991_v60  ;;  %v11899_v53 = vsub.f32 %v11897_v16, %v11898_v55 }
0x1392   :  { %v10922_v14 = vsel %vm96_vm1, %v10915_v12, 0  ;;  %v11900_v61 = vand.u32 4294901760, %v11899_v53 }
0x1393   :  { %v10990_v32 = vand.u32 4294901760, %v10922_v14 }
0x1395   :  { %v10991_v47 = vsub.f32 %v10922_v14, %v10990_v32 }
0x1397   :  { %v10992_v19 = vand.u32 4294901760, %v10991_v47 }
0x1399   :  { %v10993_v48 = vsub.f32 %v10991_v47, %v10992_v19 }
0x139b   :  { %v10994_v21 = vand.u32 4294901760, %v10993_v48 }
0x139d   :  { %32769 = vmatmul.mubr.f32.vlgmr.msra.gmra.mrb[18].mxu0 %v10994_v21 }
0x139e   :  { %32772 = vmatpush3.msra.mxu0 %v11005_v22  ;;  %32773 = vmatprep.mubr.msk.f32.mxu0 %vm35065_vm0, %v35064_v7 }
0x139f   :  { %32776 = vmatprep.subr.mxu0 %v35064_v7 }
0x13a5   :  { %32774 = vmatmul.mubr.f32.vlgmr.msra.gmra.mrb[18].mxu0 %v10990_v32 }
0x13a6   :  { %32777 = vmatpush3.msra.mxu0 %v11002_v11  ;;  %32778 = vmatprep.mubr.msk.f32.mxu0 %vm35065_vm0, %v35064_v7 }
0x13a7   :  { %32781 = vmatprep.subr.mxu0 %v35064_v7 }
0x13ad   :  { %32779 = vmatmul.mubr.f32.vlgmr.msra.gmra.mrb[18].mxu0 %v10991_v47 }
0x13ae   :  { %32782 = vmatpush3.msra.mxu0 %v35889_v50  ;;  %32783 = vmatprep.mubr.msk.f32.mxu0 %vm35065_vm0, %v35064_v7 }
0x13af   :  { %32786 = vmatprep.subr.mxu0 %v35064_v7 }
0x13b5   :  { %32784 = vmatmul.mubr.f32.vlgmr.msra.gmra.mrb[18].mxu0 %v10992_v19 }
0x13b6   :  { %32787 = vmatpush3.msra.mxu0 %v11003_v17  ;;  %32788 = vmatprep.mubr.msk.f32.mxu0 %vm35065_vm0, %v35064_v7 }
0x13b7   :  { %32791 = vmatprep.subr.mxu0 %v35064_v7 }
0x13bd   :  { %32789 = vmatmul.mubr.f32.vlgmr.msra.gmra.mrb[18].mxu0 %v10990_v32 }
0x13be   :  { %32792 = vmatpush3.msra.mxu0 %v35889_v50  ;;  %32793 = vmatprep.mubr.msk.f32.mxu0 %vm35065_vm0, %v35064_v7  ;;  %v11911_v50 = vand.u32 4294901760, %v11910_v57 }
0x13bf   :  { %32826 = vmatprep.subr.mxu0 %v35064_v7 }
0x13c5   :  { %32794 = vmatmul.mubr.f32.vlgmr.msra.gmra.mrb[18].mxu0 %v10990_v32  ;;  %v35940_v58 = vpop.f32.mrb[22].mxu1 }
0x13c6   :  { %32827 = vmatpush3.xpose.msra.mxu0 %v11831_v46  ;;  %v32825_v60 = vpop.f32.mrb[23].mxu1  ;;  %32828 = vmatprep.mubr.msk.f32.mxu0 %vm35065_vm0, %v35064_v7 }
0x13c7   :  { %32831 = vmatprep.subr.mxu0 %v35064_v7 }
0x13c9   :  { %32829 = vmatmul.mubr.f32.vlgmr.msra.gmra.mrb[20].mxu0 %v11900_v61 }
0x13ca   :  { %32832 = vmatpush3.xpose.msra.mxu0 %v11911_v50  ;;  %32833 = vmatprep.mubr.msk.f32.mxu0 %vm35065_vm0, %v35064_v7 }
0x13cb   :  { %32836 = vmatprep.subr.mxu0 %v35064_v7 }
0x13d1   :  { %32834 = vmatmul.mubr.f32.vlgmr.msra.gmra.mrb[20].mxu0 %v11896_v45 }
0x13d2   :  { %32837 = vmatpush3.xpose.msra.mxu0 %v11908_v49  ;;  %32838 = vmatprep.mubr.msk.f32.mxu0 %vm35065_vm0, %v35064_v7 }
0x13d3   :  { %32841 = vmatprep.subr.mxu0 %v35064_v7 }
0x13d9   :  { %32839 = vmatmul.mubr.f32.vlgmr.msra.gmra.mrb[20].mxu0 %v11897_v16 }
0x13da   :  { %32842 = vmatpush3.xpose.msra.mxu0 %v11831_v46  ;;  %32843 = vmatprep.mubr.msk.f32.mxu0 %vm35065_vm0, %v35064_v7 }
0x13db   :  { %32846 = vmatprep.subr.mxu0 %v35064_v7 }
0x13e1   :  { %32844 = vmatmul.mubr.f32.vlgmr.msra.gmra.mrb[20].mxu0 %v11898_v55 }
0x13e2   :  { %32847 = vmatpush3.xpose.msra.mxu0 %v11909_v56  ;;  %32848 = vmatprep.mubr.msk.f32.mxu0 %vm35065_vm0, %v35064_v7 }
0x13e3   :  { %32851 = vmatprep.subr.mxu0 %v35064_v7 }
0x13e9   :  { %32849 = vmatmul.mubr.f32.vlgmr.msra.gmra.mrb[20].mxu0 %v11896_v45 }
0x13ea   :  { %32852 = vmatpush3.xpose.msra.mxu0 %v11831_v46  ;;  %32853 = vmatprep.mubr.msk.f32.mxu0 %vm35065_vm0, %v35064_v7 }
0x13eb   :  { %32886 = vmatprep.subr.mxu0 %v35064_v7 }
0x13f1   :  { %32854 = vmatmul.mubr.f32.vlgmr.msra.gmra.mrb[20].mxu0 %v11896_v45  ;;  %v12726_v4 = vpop.f32.mrb[24].mxu1 }
0x13f2   :  { %v12731_v9 = vmul.f32 0.35355338, %v12726_v4  ;;  %v32885_v10 = vpop.f32.mrb[25].mxu1  ;;  %32888 = vmatprep.mubr.msk.f32.mxu0 %vm35065_vm0, %v35064_v7 }
0x13f4   :  { %v12735_v11 = vsel %vm96_vm1, %v12731_v9, -inf }
0x13f5   :  { %12736 = vmax.xlane.f32.xlu1 %v12735_v11 }
0x1406   :  { %14648 = vrot.lane.b32.xlu1 %v35800_v13, %s35072_s28 }
0x140a   :  { %14650 = vrot.lane.b32.xlu1 %v35800_v13, %s35071_s27 }
0x140e   :  { %15102 = vrot.lane.b32.xlu1 %v35797_v30, %s35072_s28 }
0x1412   :  { %15104 = vrot.lane.b32.xlu1 %v35797_v30, %s35071_s27 }
0x1482   :  { %v12737_v12 = vpop.xlane.xlu1 %12736 }
0x1483   :  { %v12739_v14 = vsub.f32 %v12731_v9, %v12737_v12 }
0x1485   :  { %v12742_v32 = vmul.f32 1.442695, %v12739_v14 }
0x1486   :  { %v14649_v9 = vpop.permute.xlu1 %14648 }
0x1487   :  { %34994 = vpow2.f32 %v12742_v32  ;;  %v14652_v11 = vsel %vm96_vm1, %v14649_v9, 0 }
0x1488   :  { %v14722_v14 = vand.u32 4294901760, %v14652_v11 }
0x148a   :  { %v14651_v10 = vpop.permute.xlu1 %14650 }
0x148b   :  { %v14654_v12 = vsel %vm96_vm1, %v14651_v10, 0 }
0x148c   :  { %v14657_v32 = vand.u32 4294901760, %v14654_v12 }
0x1491   :  { %v34995_v17 = vpop.eup %34994 }
0x1492   :  { %v12747_v47 = vsel %vm96_vm1, %v34995_v17, 0.0 }
0x1493   :  { %12748 = vadd.xlane.f32.xlu0 %v12747_v47 }
0x1498   :  { %v35972_v19 = vpop.f32.mrb[18].mxu0 }
0x1499   :  { %v32795_v20 = vpop.f32.mrb[19].mxu0 }
0x149a   :  { %v14723_v20 = vsub.f32 %v14652_v11, %v14722_v14 }
0x14a9   :  { %13206 = vrot.lane.b32.xlu0 %v35797_v30, %s35070_s26 }
0x14c4   :  { %v12272_v48 = vpop.f32.mrb[20].mxu0 }
0x14c5   :  { %v12730_v21 = vmul.f32 0.35355338, %v12272_v48  ;;  %v32855_v22 = vpop.f32.mrb[21].mxu0  ;;  %v14734_v48 = vsub.f32 %v14654_v12, %v14657_v32 }
0x14c7   :  { %v12732_v28 = vsel %vm96_vm1, %v12730_v21, -inf }
0x14c8   :  { %12733 = vmax.xlane.f32.xlu0 %v12732_v28 }
0x14de   :  { %12754 = vrot.lane.b32.xlu0 %v35800_v13, %s35070_s26 }
0x1520   :  { %v12749_v31 = vpop.xlane.xlu0 %12748 }
0x1521   :  { %34996 = vrcp.f32 %v12749_v31 }
0x1524   :  { %v13207_v34 = vpop.permute.xlu0 %13206 }
0x1525   :  { %v13213_v44 = vand.u32 4294901760, %v13207_v34 }
0x1527   :  { %32917 = vmatpush3.msra.mxu1 %v13213_v44  ;;  %v13290_v16 = vsub.f32 %v13207_v34, %v13213_v44  ;;  %v14724_v34 = vand.u32 4294901760, %v14723_v20 }
0x1528   :  { %32921 = vmatprep.subr.mxu1 %v35064_v7 }
0x1529   :  { %v13291_v56 = vand.u32 4294901760, %v13290_v16 }
0x152b   :  { %v34997_v45 = vpop.eup %34996  ;;  %v13292_v60 = vsub.f32 %v13290_v16, %v13291_v56 }
0x152c   :  { %v12753_v46 = vmul.f32 %v34997_v45, %v34995_v17  ;;  %v14735_v45 = vand.u32 4294901760, %v14734_v48 }
0x152d   :  { %v13293_v4 = vand.u32 4294901760, %v13292_v60 }
0x152e   :  { %v13210_v49 = vsel %vm96_vm1, %v12753_v46, 0  ;;  %v14736_v46 = vsub.f32 %v14734_v48, %v14735_v45 }
0x152f   :  { %v13278_v55 = vand.u32 4294901760, %v13210_v49 }
0x1531   :  { %v13279_v53 = vsub.f32 %v13210_v49, %v13278_v55  ;;  %v14737_v49 = vand.u32 4294901760, %v14736_v46 }
0x1533   :  { %v13280_v57 = vand.u32 4294901760, %v13279_v53 }
0x1535   :  { %v13281_v61 = vsub.f32 %v13279_v53, %v13280_v57 }
0x1537   :  { %v13282_v50 = vand.u32 4294901760, %v13281_v61 }
0x1539   :  { %32919 = vmatmul.mubr.f32.vlgmr.msra.gmra.mrb[26].mxu1 %v13282_v50 }
0x153a   :  { %32922 = vmatpush3.msra.mxu1 %v13293_v4  ;;  %32923 = vmatprep.mubr.msk.f32.mxu1 %vm35065_vm0, %v35064_v7 }
0x153b   :  { %32926 = vmatprep.subr.mxu1 %v35064_v7 }
0x1541   :  { %32924 = vmatmul.mubr.f32.vlgmr.msra.gmra.mrb[26].mxu1 %v13278_v55 }
0x1542   :  { %32927 = vmatpush3.msra.mxu1 %v13290_v16  ;;  %32928 = vmatprep.mubr.msk.f32.mxu1 %vm35065_vm0, %v35064_v7 }
0x1543   :  { %32931 = vmatprep.subr.mxu1 %v35064_v7 }
0x1549   :  { %32929 = vmatmul.mubr.f32.vlgmr.msra.gmra.mrb[26].mxu1 %v13279_v53 }
0x154a   :  { %32932 = vmatpush3.msra.mxu1 %v13213_v44  ;;  %32933 = vmatprep.mubr.msk.f32.mxu1 %vm35065_vm0, %v35064_v7 }
0x154b   :  { %32936 = vmatprep.subr.mxu1 %v35064_v7 }
0x1551   :  { %32934 = vmatmul.mubr.f32.vlgmr.msra.gmra.mrb[26].mxu1 %v13280_v57 }
0x1552   :  { %32937 = vmatpush3.msra.mxu1 %v13291_v56  ;;  %32938 = vmatprep.mubr.msk.f32.mxu1 %vm35065_vm0, %v35064_v7 }
0x1553   :  { %32941 = vmatprep.subr.mxu1 %v35064_v7 }
0x1555   :  { %v12734_v17 = vpop.xlane.xlu0 %12733 }
0x1556   :  { %v12738_v47 = vsub.f32 %v12730_v21, %v12734_v17  ;;  %v14725_v21 = vsub.f32 %v14723_v20, %v14724_v34 }
0x1558   :  { %v12740_v22 = vmul.f32 1.442695, %v12738_v47 }
0x1559   :  { %32939 = vmatmul.mubr.f32.vlgmr.msra.gmra.mrb[26].mxu1 %v13278_v55  ;;  %v35995_v28 = vpop.permute.xlu0 %12754 }
0x155a   :  { %34998 = vpow2.f32 %v12740_v22  ;;  %32942 = vmatpush3.msra.mxu1 %v13213_v44  ;;  %v35998_v31 = vand.u32 4294901760, %v35995_v28  ;;  %32943 = vmatprep.mubr.msk.f32.mxu1 %vm35065_vm0, %v35064_v7  ;;  %v14726_v44 = vand.u32 4294901760, %v14725_v21 }
0x155b   :  { %33006 = vmatprep.subr.mxu1 %v35064_v7 }
0x155c   :  { %32887 = vmatpush3.msra.mxu0 %v35998_v31 }
0x155d   :  { %32891 = vmatprep.subr.mxu0 %v35064_v7 }
0x1561   :  { %32944 = vmatmul.mubr.f32.vlgmr.msra.gmra.mrb[26].mxu1 %v13278_v55  ;;  %v15103_v55 = vpop.permute.xlu1 %15102 }
0x1562   :  { %33007 = vmatpush3.xpose.msra.mxu1 %v14657_v32  ;;  %33008 = vmatprep.mubr.msk.f32.mxu1 %vm35065_vm0, %v35064_v7  ;;  %v15106_v57 = vsel %vm96_vm1, %v15103_v55, 0 }
0x1563   :  { %33011 = vmatprep.subr.mxu1 %v35064_v7  ;;  %v15176_v61 = vand.u32 4294901760, %v15106_v57 }
0x1564   :  { %v36008_v16 = vpop.eup %34998 }
0x1565   :  { %33009 = vmatmul.mubr.f32.vlgmr.msra.gmra.mrb[28].mxu1 %v14726_v44  ;;  %v12744_v56 = vsel %vm96_vm1, %v36008_v16, 0.0  ;;  %v15105_v53 = vpop.permute.xlu1 %15104  ;;  %v15177_v4 = vsub.f32 %v15106_v57, %v15176_v61 }
0x1566   :  { %33012 = vmatpush3.xpose.msra.mxu1 %v14737_v49  ;;  %12745 = vadd.xlane.f32.xlu1 %v12744_v56  ;;  %v15108_v60 = vsel %vm96_vm1, %v15105_v53, 0 }
0x1567   :  { %33013 = vmatprep.mubr.msk.f32.mxu1 %vm35065_vm0, %v35064_v7  ;;  %33016 = vmatprep.subr.mxu1 %v35064_v7  ;;  %v15111_v50 = vand.u32 4294901760, %v15108_v60  ;;  %v15178_v10 = vand.u32 4294901760, %v15177_v4 }
0x1569   :  { %v15188_v9 = vsub.f32 %v15108_v60, %v15111_v50  ;;  %v15179_v12 = vsub.f32 %v15177_v4, %v15178_v10 }
0x156b   :  { %v15189_v11 = vand.u32 4294901760, %v15188_v9  ;;  %v15180_v47 = vand.u32 4294901760, %v15179_v12 }
0x156d   :  { %33014 = vmatmul.mubr.f32.vlgmr.msra.gmra.mrb[28].mxu1 %v14722_v14  ;;  %v15190_v17 = vsub.f32 %v15188_v9, %v15189_v11 }
0x156e   :  { %33017 = vmatpush3.xpose.msra.mxu1 %v14734_v48  ;;  %33018 = vmatprep.mubr.msk.f32.mxu1 %vm35065_vm0, %v35064_v7  ;;  %v12838_v48 = vsub.f32 %v35995_v28, %v35998_v31 }
0x156f   :  { %33021 = vmatprep.subr.mxu1 %v35064_v7 }
0x1570   :  { %v12839_v21 = vand.u32 4294901760, %v12838_v48 }
0x1572   :  { %v12840_v49 = vsub.f32 %v12838_v48, %v12839_v21 }
0x1574   :  { %v12841_v53 = vand.u32 4294901760, %v12840_v49 }
0x1575   :  { %33019 = vmatmul.mubr.f32.vlgmr.msra.gmra.mrb[28].mxu1 %v14723_v20  ;;  %v15191_v20 = vand.u32 4294901760, %v15190_v17 }
0x1576   :  { %33022 = vmatpush3.xpose.msra.mxu1 %v14657_v32  ;;  %33023 = vmatprep.mubr.msk.f32.mxu1 %vm35065_vm0, %v35064_v7 }
0x1577   :  { %33026 = vmatprep.subr.mxu1 %v35064_v7 }
0x157d   :  { %33024 = vmatmul.mubr.f32.vlgmr.msra.gmra.mrb[28].mxu1 %v14724_v34 }
0x157e   :  { %33027 = vmatpush3.xpose.msra.mxu1 %v14735_v45  ;;  %33028 = vmatprep.mubr.msk.f32.mxu1 %vm35065_vm0, %v35064_v7 }
0x157f   :  { %33031 = vmatprep.subr.mxu1 %v35064_v7 }
0x1585   :  { %33029 = vmatmul.mubr.f32.vlgmr.msra.gmra.mrb[28].mxu1 %v14722_v14 }
0x1586   :  { %33032 = vmatpush3.xpose.msra.mxu1 %v14657_v32  ;;  %33033 = vmatprep.mubr.msk.f32.mxu1 %vm35065_vm0, %v35064_v7 }
0x1587   :  { %33036 = vmatprep.subr.mxu1 %v35064_v7 }
0x158d   :  { %33034 = vmatmul.mubr.f32.vlgmr.msra.gmra.mrb[28].mxu1 %v14722_v14 }
0x158e   :  { %33037 = vmatpush3.xpose.msra.mxu1 %v15111_v50  ;;  %33038 = vmatprep.mubr.msk.f32.mxu1 %vm35065_vm0, %v35064_v7 }
0x158f   :  { %33041 = vmatprep.subr.mxu1 %v35064_v7 }
0x1591   :  { %33039 = vmatmul.mubr.f32.vlgmr.msra.gmra.mrb[30].mxu1 %v15180_v47 }
0x1592   :  { %33042 = vmatpush3.xpose.msra.mxu1 %v15191_v20  ;;  %33043 = vmatprep.mubr.msk.f32.mxu1 %vm35065_vm0, %v35064_v7 }
0x1593   :  { %33046 = vmatprep.subr.mxu1 %v35064_v7 }
0x1599   :  { %33044 = vmatmul.mubr.f32.vlgmr.msra.gmra.mrb[30].mxu1 %v15176_v61 }
0x159a   :  { %33047 = vmatpush3.xpose.msra.mxu1 %v15188_v9  ;;  %33048 = vmatprep.mubr.msk.f32.mxu1 %vm35065_vm0, %v35064_v7 }
0x159b   :  { %33051 = vmatprep.subr.mxu1 %v35064_v7 }
0x15a1   :  { %33049 = vmatmul.mubr.f32.vlgmr.msra.gmra.mrb[30].mxu1 %v15177_v4 }
0x15a2   :  { %33052 = vmatpush3.xpose.msra.mxu1 %v15111_v50  ;;  %33053 = vmatprep.mubr.msk.f32.mxu1 %vm35065_vm0, %v35064_v7 }
0x15a3   :  { %33056 = vmatprep.subr.mxu1 %v35064_v7 }
0x15a9   :  { %33054 = vmatmul.mubr.f32.vlgmr.msra.gmra.mrb[30].mxu1 %v15178_v10 }
0x15aa   :  { %33057 = vmatpush3.xpose.msra.mxu1 %v15189_v11  ;;  %33058 = vmatprep.mubr.msk.f32.mxu1 %vm35065_vm0, %v35064_v7 }
0x15ab   :  { %33061 = vmatprep.subr.mxu1 %v35064_v7 }
0x15b1   :  { %33059 = vmatmul.mubr.f32.vlgmr.msra.gmra.mrb[30].mxu1 %v15176_v61 }
0x15b2   :  { %33062 = vmatpush3.xpose.msra.mxu1 %v15111_v50  ;;  %33063 = vmatprep.mubr.msk.f32.mxu1 %vm35065_vm0, %v35064_v7 }
0x15b3   :  { %33096 = vmatprep.subr.mxu1 %v35064_v7 }
0x15b9   :  { %33064 = vmatmul.mubr.f32.vlgmr.msra.gmra.mrb[30].mxu1 %v15176_v61 }
0x15ba   :  { %33098 = vmatprep.mubr.msk.f32.mxu1 %vm35065_vm0, %v35064_v7 }
0x15f3   :  { %v12746_v14 = vpop.xlane.xlu1 %12745 }
0x15f4   :  { %35000 = vrcp.f32 %v12746_v14 }
0x15fe   :  { %v35001_v32 = vpop.eup %35000 }
0x15ff   :  { %v12751_v22 = vmul.f32 %v35001_v32, %v36008_v16 }
0x1601   :  { %v12758_v34 = vsel %vm96_vm1, %v12751_v22, 0 }
0x1602   :  { %v12826_v45 = vand.u32 4294901760, %v12758_v34 }
0x1604   :  { %v12827_v46 = vsub.f32 %v12758_v34, %v12826_v45 }
0x1606   :  { %v12828_v44 = vand.u32 4294901760, %v12827_v46 }
0x1608   :  { %v12829_v56 = vsub.f32 %v12827_v46, %v12828_v44 }
0x160a   :  { %v12830_v55 = vand.u32 4294901760, %v12829_v56 }
0x160c   :  { %32889 = vmatmul.mubr.f32.vlgmr.msra.gmra.mrb[22].mxu0 %v12830_v55 }
0x160d   :  { %32892 = vmatpush3.msra.mxu0 %v12841_v53  ;;  %32893 = vmatprep.mubr.msk.f32.mxu0 %vm35065_vm0, %v35064_v7 }
0x160e   :  { %32896 = vmatprep.subr.mxu0 %v35064_v7 }
0x1614   :  { %32894 = vmatmul.mubr.f32.vlgmr.msra.gmra.mrb[22].mxu0 %v12826_v45 }
0x1615   :  { %32897 = vmatpush3.msra.mxu0 %v12838_v48  ;;  %32898 = vmatprep.mubr.msk.f32.mxu0 %vm35065_vm0, %v35064_v7 }
0x1616   :  { %32901 = vmatprep.subr.mxu0 %v35064_v7 }
0x161c   :  { %32899 = vmatmul.mubr.f32.vlgmr.msra.gmra.mrb[22].mxu0 %v12827_v46 }
0x161d   :  { %32902 = vmatpush3.msra.mxu0 %v35998_v31  ;;  %32903 = vmatprep.mubr.msk.f32.mxu0 %vm35065_vm0, %v35064_v7 }
0x161e   :  { %32906 = vmatprep.subr.mxu0 %v35064_v7 }
0x1624   :  { %32904 = vmatmul.mubr.f32.vlgmr.msra.gmra.mrb[22].mxu0 %v12828_v44 }
0x1625   :  { %32907 = vmatpush3.msra.mxu0 %v12839_v21  ;;  %32908 = vmatprep.mubr.msk.f32.mxu0 %vm35065_vm0, %v35064_v7 }
0x1626   :  { %32911 = vmatprep.subr.mxu0 %v35064_v7 }
0x162c   :  { %32909 = vmatmul.mubr.f32.vlgmr.msra.gmra.mrb[22].mxu0 %v12826_v45 }
0x162d   :  { %32912 = vmatpush3.msra.mxu0 %v35998_v31  ;;  %32913 = vmatprep.mubr.msk.f32.mxu0 %vm35065_vm0, %v35064_v7 }
0x162e   :  { %32946 = vmatprep.subr.mxu0 %v35421_v38 }
0x1634   :  { %32914 = vmatmul.mubr.f32.vlgmr.msra.gmra.mrb[22].mxu0 %v12826_v45  ;;  %v13654_v28 = vpop.f32.mrb[26].mxu1 }
0x1635   :  { %v32945_v16 = vpop.f32.mrb[27].mxu1  ;;  %32947 = vmatpush3.msra.mxu0 %v35421_v38  ;;  %v13662_v47 = vsel %vm96_vm1, %v13654_v28, 0 }
0x1636   :  { %32951 = vmatprep.subr.mxu0 %v35433_v42  ;;  %v13740_v32 = vand.u32 4294901760, %v13662_v47 }
0x1638   :  { %v13741_v48 = vsub.f32 %v13662_v47, %v13740_v32 }
0x163a   :  { %v13742_v46 = vand.u32 4294901760, %v13741_v48 }
0x163c   :  { %v13743_v56 = vsub.f32 %v13741_v48, %v13742_v46 }
0x163e   :  { %v13744_v28 = vand.u32 4294901760, %v13743_v56 }
0x1660   :  { %v15098_v57 = vpop.f32.mrb[28].mxu1 }
0x1661   :  { %v15556_v60 = vmul.f32 0.35355338, %v15098_v57  ;;  %v33035_v61 = vpop.f32.mrb[29].mxu1 }
0x1663   :  { %v15558_v50 = vsel %vm96_vm1, %v15556_v60, -inf }
0x1664   :  { %15559 = vmax.xlane.f32.xlu1 %v15558_v50 }
0x168c   :  { %v15552_v4 = vpop.f32.mrb[30].mxu1 }
0x168d   :  { %v15557_v31 = vmul.f32 0.35355338, %v15552_v4  ;;  %v33065_v9 = vpop.f32.mrb[31].mxu1  ;;  %v14157_v4 = vsel %vm96_vm1, %v35940_v58, 0 }
0x168e   :  { %v14235_v9 = vand.u32 4294901760, %v14157_v4 }
0x168f   :  { %v15561_v10 = vsel %vm96_vm1, %v15557_v31, -inf }
0x1690   :  { %15562 = vmax.xlane.f32.xlu1 %v15561_v10 }
0x16a1   :  { %15580 = vrot.lane.b32.xlu1 %v35800_v13, %s35073_s12 }
0x16f1   :  { %v15560_v11 = vpop.xlane.xlu1 %15559 }
0x16f2   :  { %v15564_v12 = vsub.f32 %v15556_v60, %v15560_v11 }
0x16f4   :  { %v15566_v17 = vmul.f32 1.442695, %v15564_v12 }
0x16f6   :  { %35002 = vpow2.f32 %v15566_v17 }
0x1700   :  { %v36077_v20 = vpop.eup %35002 }
0x1701   :  { %v15570_v14 = vsel %vm96_vm1, %v36077_v20, 0.0 }
0x1702   :  { %15571 = vadd.xlane.f32.xlu0 %v15570_v14 }
0x1707   :  { %v13202_v22 = vpop.f32.mrb[22].mxu0 }
0x1708   :  { %v13659_v34 = vsel %vm96_vm1, %v13202_v22, 0  ;;  %v32915_v45 = vpop.f32.mrb[23].mxu0 }
0x1709   :  { %v13730_v21 = vand.u32 4294901760, %v13659_v34 }
0x170b   :  { %v13731_v44 = vsub.f32 %v13659_v34, %v13730_v21 }
0x170d   :  { %v13732_v49 = vand.u32 4294901760, %v13731_v44 }
0x170f   :  { %v13733_v55 = vsub.f32 %v13731_v44, %v13732_v49 }
0x1711   :  { %v13734_v53 = vand.u32 4294901760, %v13733_v55 }
0x1713   :  { %32948 = vmatprep.mubr.f32.mxu0 %v13734_v53 }
0x1714   :  { %32949 = vmatmul.mubr.f32.vlgmr.msra.gmra.mrb[24].mxu0 %v13744_v28 }
0x1715   :  { %32953 = vmatprep.mubr.f32.mxu0 %v13730_v21  ;;  %32952 = vmatpush3.msra.mxu0 %v35433_v42  ;;  %v14154_v42 = vsel %vm96_vm1, %v35972_v19, 0  ;;  %v14236_v19 = vsub.f32 %v14157_v4, %v14235_v9 }
0x1716   :  { %32956 = vmatprep.subr.mxu0 %v35426_v39  ;;  %v14225_v61 = vand.u32 4294901760, %v14154_v42 }
0x1717   :  { %v14237_v12 = vand.u32 4294901760, %v14236_v19 }
0x1718   :  { %16983 = vrot.lane.b32.xlu0 %v35800_v13, %s35075_s16 }
0x171c   :  { %32954 = vmatmul.mubr.f32.vlgmr.msra.gmra.mrb[24].mxu0 %v13740_v32 }
0x171d   :  { %v15563_v16 = vpop.xlane.xlu1 %15562  ;;  %32958 = vmatprep.mubr.f32.mxu0 %v13731_v44  ;;  %32957 = vmatpush3.msra.mxu0 %v35426_v39 }
0x171e   :  { %v15565_v57 = vsub.f32 %v15557_v31, %v15563_v16  ;;  %32961 = vmatprep.subr.mxu0 %v35421_v38  ;;  %v14226_v31 = vsub.f32 %v14154_v42, %v14225_v61 }
0x1720   :  { %v15568_v60 = vmul.f32 1.442695, %v15565_v57  ;;  %v14227_v10 = vand.u32 4294901760, %v14226_v31 }
0x1722   :  { %35004 = vpow2.f32 %v15568_v60  ;;  %v14228_v11 = vsub.f32 %v14226_v31, %v14227_v10 }
0x1724   :  { %32959 = vmatmul.mubr.f32.vlgmr.msra.gmra.mrb[24].mxu0 %v13741_v48  ;;  %v14229_v17 = vand.u32 4294901760, %v14228_v11 }
0x1725   :  { %32963 = vmatprep.mubr.f32.mxu0 %v13732_v49  ;;  %32962 = vmatpush3.msra.mxu0 %v35421_v38 }
0x1726   :  { %32966 = vmatprep.subr.mxu0 %v35429_v40 }
0x172c   :  { %v36092_v50 = vpop.eup %35004  ;;  %32964 = vmatmul.mubr.f32.vlgmr.msra.gmra.mrb[24].mxu0 %v13742_v46 }
0x172d   :  { %32968 = vmatprep.mubr.f32.mxu0 %v13730_v21  ;;  %v15573_v39 = vsel %vm96_vm1, %v36092_v50, 0.0  ;;  %32967 = vmatpush3.msra.mxu0 %v35429_v40  ;;  %v14238_v40 = vsub.f32 %v14236_v19, %v14237_v12 }
0x172e   :  { %15574 = vadd.xlane.f32.xlu1 %v15573_v39  ;;  %32971 = vmatprep.subr.mxu0 %v35421_v38 }
0x172f   :  { %v14239_v58 = vand.u32 4294901760, %v14238_v40 }
0x1734   :  { %32969 = vmatmul.mubr.f32.vlgmr.msra.gmra.mrb[24].mxu0 %v13740_v32 }
0x1735   :  { %32973 = vmatprep.mubr.f32.mxu0 %v13730_v21  ;;  %32972 = vmatpush3.msra.mxu0 %v35421_v38  ;;  %v15581_v38 = vpop.permute.xlu1 %15580 }
0x1736   :  { %32976 = vmatprep.subr.mxu0 %v35467_v6 }
0x173c   :  { %32974 = vmatmul.mubr.f32.vlgmr.msra.gmra.mrb[24].mxu0 %v13740_v32 }
0x173d   :  { %32978 = vmatprep.mubr.f32.mxu0 %v14229_v17  ;;  %32977 = vmatpush3.msra.mxu0 %v35467_v6 }
0x173e   :  { %32981 = vmatprep.subr.mxu0 %v35488_v59 }
0x173f   :  { %16032 = vrot.lane.b32.xlu1 %v35797_v30, %s35073_s12 }
0x1743   :  { %16981 = vrot.lane.b32.xlu1 %v35800_v13, %s35074_s13 }
0x1744   :  { %32979 = vmatmul.mubr.f32.vlgmr.msra.gmra.mrb[24].mxu0 %v14239_v58 }
0x1745   :  { %32983 = vmatprep.mubr.f32.mxu0 %v14225_v61  ;;  %32982 = vmatpush3.msra.mxu0 %v35488_v59 }
0x1746   :  { %32986 = vmatprep.subr.mxu0 %v35476_v15 }
0x1747   :  { %17435 = vrot.lane.b32.xlu1 %v35797_v30, %s35074_s13 }
0x174b   :  { %17437 = vrot.lane.b32.xlu1 %v35797_v30, %s35075_s16 }
0x174c   :  { %32984 = vmatmul.mubr.f32.vlgmr.msra.gmra.mrb[24].mxu0 %v14235_v9 }
0x174d   :  { %32988 = vmatprep.mubr.f32.mxu0 %v14226_v31  ;;  %32987 = vmatpush3.msra.mxu0 %v35476_v15  ;;  %v15587_v15 = vand.u32 4294901760, %v15581_v38 }
0x174e   :  { %32991 = vmatprep.subr.mxu0 %v35467_v6 }
0x174f   :  { %v15664_v47 = vsub.f32 %v15581_v38, %v15587_v15 }
0x1751   :  { %v15665_v48 = vand.u32 4294901760, %v15664_v47 }
0x1753   :  { %v15666_v45 = vsub.f32 %v15664_v47, %v15665_v48 }
0x1754   :  { %32989 = vmatmul.mubr.f32.vlgmr.msra.gmra.mrb[24].mxu0 %v14236_v19 }
0x1755   :  { %32993 = vmatprep.mubr.f32.mxu0 %v14227_v10  ;;  %32992 = vmatpush3.msra.mxu0 %v35467_v6  ;;  %v15667_v44 = vand.u32 4294901760, %v15666_v45 }
0x1756   :  { %32996 = vmatprep.subr.mxu0 %v35481_v18 }
0x175c   :  { %32994 = vmatmul.mubr.f32.vlgmr.msra.gmra.mrb[24].mxu0 %v14237_v12 }
0x175d   :  { %32998 = vmatprep.mubr.f32.mxu0 %v14225_v61  ;;  %32997 = vmatpush3.msra.mxu0 %v35481_v18 }
0x175e   :  { %33001 = vmatprep.subr.mxu0 %v35467_v6 }
0x1764   :  { %32999 = vmatmul.mubr.f32.vlgmr.msra.gmra.mrb[24].mxu0 %v14235_v9 }
0x1765   :  { %33003 = vmatprep.mubr.f32.mxu0 %v14225_v61  ;;  %33002 = vmatpush3.msra.mxu0 %v35467_v6 }
0x1766   :  { %33066 = vmatprep.subr.mxu0 %v35064_v7 }
0x176c   :  { %33004 = vmatmul.mubr.f32.vlgmr.msra.gmra.mrb[24].mxu0 %v14235_v9 }
0x176d   :  { %33067 = vmatpush3.msra.mxu0 %v15587_v15  ;;  %33068 = vmatprep.mubr.msk.f32.mxu0 %vm35065_vm0, %v35064_v7 }
0x176e   :  { %33071 = vmatprep.subr.mxu0 %v35064_v7 }
0x178f   :  { %v15572_v59 = vpop.xlane.xlu0 %15571 }
0x1790   :  { %35006 = vrcp.f32 %v15572_v59 }
0x1793   :  { %v16984_v10 = vpop.permute.xlu0 %16983 }
0x1794   :  { %v16987_v11 = vsel %vm96_vm1, %v16984_v10, 0 }
0x1795   :  { %v16990_v17 = vand.u32 4294901760, %v16987_v11 }
0x1797   :  { %v17067_v58 = vsub.f32 %v16987_v11, %v16990_v17 }
0x179a   :  { %v35007_v18 = vpop.eup %35006 }
0x179b   :  { %v15577_v14 = vmul.f32 %v35007_v18, %v36077_v20 }
0x179d   :  { %v15584_v32 = vsel %vm96_vm1, %v15577_v14, 0 }
0x179e   :  { %v15652_v6 = vand.u32 4294901760, %v15584_v32 }
0x17a0   :  { %v15653_v22 = vsub.f32 %v15584_v32, %v15652_v6 }
0x17a2   :  { %v15654_v34 = vand.u32 4294901760, %v15653_v22 }
0x17a4   :  { %v15655_v21 = vsub.f32 %v15653_v22, %v15654_v34 }
0x17a6   :  { %v15656_v46 = vand.u32 4294901760, %v15655_v21 }
0x17a8   :  { %33069 = vmatmul.mubr.f32.vlgmr.msra.gmra.mrb[26].mxu0 %v15656_v46 }
0x17a9   :  { %33072 = vmatpush3.msra.mxu0 %v15667_v44  ;;  %33073 = vmatprep.mubr.msk.f32.mxu0 %vm35065_vm0, %v35064_v7 }
0x17aa   :  { %33076 = vmatprep.subr.mxu0 %v35064_v7 }
0x17b0   :  { %33074 = vmatmul.mubr.f32.vlgmr.msra.gmra.mrb[26].mxu0 %v15652_v6 }
0x17b1   :  { %33077 = vmatpush3.msra.mxu0 %v15664_v47  ;;  %33078 = vmatprep.mubr.msk.f32.mxu0 %vm35065_vm0, %v35064_v7 }
0x17b2   :  { %33081 = vmatprep.subr.mxu0 %v35064_v7 }
0x17b8   :  { %33079 = vmatmul.mubr.f32.vlgmr.msra.gmra.mrb[26].mxu0 %v15653_v22 }
0x17b9   :  { %33082 = vmatpush3.msra.mxu0 %v15587_v15  ;;  %33083 = vmatprep.mubr.msk.f32.mxu0 %vm35065_vm0, %v35064_v7 }
0x17ba   :  { %33086 = vmatprep.subr.mxu0 %v35064_v7 }
0x17bb   :  { %v15575_v20 = vpop.xlane.xlu1 %15574 }
0x17bc   :  { %35008 = vrcp.f32 %v15575_v20 }
0x17bf   :  { %v16033_v49 = vpop.permute.xlu1 %16032 }
0x17c0   :  { %v16039_v56 = vand.u32 4294901760, %v16033_v49  ;;  %33084 = vmatmul.mubr.f32.vlgmr.msra.gmra.mrb[26].mxu0 %v15654_v34 }
0x17c1   :  { %33087 = vmatpush3.msra.mxu0 %v15665_v48  ;;  %33088 = vmatprep.mubr.msk.f32.mxu0 %vm35065_vm0, %v35064_v7 }
0x17c2   :  { %33097 = vmatpush3.msra.mxu1 %v16039_v56  ;;  %33091 = vmatprep.subr.mxu0 %v35064_v7  ;;  %v16116_v28 = vsub.f32 %v16033_v49, %v16039_v56 }
0x17c3   :  { %33101 = vmatprep.subr.mxu1 %v35064_v7  ;;  %v16982_v9 = vpop.permute.xlu1 %16981 }
0x17c4   :  { %v16117_v60 = vand.u32 4294901760, %v16116_v28  ;;  %v16985_v19 = vsel %vm96_vm1, %v16982_v9, 0 }
0x17c5   :  { %v17055_v12 = vand.u32 4294901760, %v16985_v19 }
0x17c6   :  { %v35009_v55 = vpop.eup %35008  ;;  %v16118_v39 = vsub.f32 %v16116_v28, %v16117_v60 }
0x17c7   :  { %v15579_v53 = vmul.f32 %v35009_v55, %v36092_v50  ;;  %v17056_v40 = vsub.f32 %v16985_v19, %v17055_v12 }
0x17c8   :  { %33089 = vmatmul.mubr.f32.vlgmr.msra.gmra.mrb[26].mxu0 %v15652_v6  ;;  %v16119_v31 = vand.u32 4294901760, %v16118_v39 }
0x17c9   :  { %33092 = vmatpush3.msra.mxu0 %v15587_v15  ;;  %33093 = vmatprep.mubr.msk.f32.mxu0 %vm35065_vm0, %v35064_v7  ;;  %v16036_v16 = vsel %vm96_vm1, %v15579_v53, 0  ;;  %v17057_v38 = vand.u32 4294901760, %v17056_v40  ;;  %v17068_v15 = vand.u32 4294901760, %v17067_v58 }
0x17ca   :  { %v16104_v57 = vand.u32 4294901760, %v16036_v16  ;;  %33126 = vmatprep.subr.mxu0 %v35575_v23 }
0x17cb   :  { %v17058_v59 = vsub.f32 %v17056_v40, %v17057_v38  ;;  %v17069_v18 = vsub.f32 %v17067_v58, %v17068_v15 }
0x17cc   :  { %v16105_v42 = vsub.f32 %v16036_v16, %v16104_v57 }
0x17cd   :  { %v17059_v47 = vand.u32 4294901760, %v17058_v59  ;;  %v17070_v14 = vand.u32 4294901760, %v17069_v18 }
0x17ce   :  { %v16106_v61 = vand.u32 4294901760, %v16105_v42 }
0x17d0   :  { %33094 = vmatmul.mubr.f32.vlgmr.msra.gmra.mrb[26].mxu0 %v15652_v6  ;;  %v16107_v4 = vsub.f32 %v16105_v42, %v16106_v61 }
0x17d1   :  { %33127 = vmatpush3.msra.mxu0 %v35575_v23 }
0x17d2   :  { %v16108_v50 = vand.u32 4294901760, %v16107_v4  ;;  %33131 = vmatprep.subr.mxu0 %v35587_v27 }
0x17d4   :  { %33099 = vmatmul.mubr.f32.vlgmr.msra.gmra.mrb[32].mxu1 %v16108_v50 }
0x17d5   :  { %33102 = vmatpush3.msra.mxu1 %v16119_v31  ;;  %33103 = vmatprep.mubr.msk.f32.mxu1 %vm35065_vm0, %v35064_v7 }
0x17d6   :  { %33106 = vmatprep.subr.mxu1 %v35064_v7 }
0x17dc   :  { %33104 = vmatmul.mubr.f32.vlgmr.msra.gmra.mrb[32].mxu1 %v16104_v57 }
0x17dd   :  { %33107 = vmatpush3.msra.mxu1 %v16116_v28  ;;  %33108 = vmatprep.mubr.msk.f32.mxu1 %vm35065_vm0, %v35064_v7 }
0x17de   :  { %33111 = vmatprep.subr.mxu1 %v35064_v7 }
0x17e4   :  { %33109 = vmatmul.mubr.f32.vlgmr.msra.gmra.mrb[32].mxu1 %v16105_v42 }
0x17e5   :  { %33112 = vmatpush3.msra.mxu1 %v16039_v56  ;;  %33113 = vmatprep.mubr.msk.f32.mxu1 %vm35065_vm0, %v35064_v7 }
0x17e6   :  { %33116 = vmatprep.subr.mxu1 %v35064_v7 }
0x17ec   :  { %33114 = vmatmul.mubr.f32.vlgmr.msra.gmra.mrb[32].mxu1 %v16106_v61 }
0x17ed   :  { %33117 = vmatpush3.msra.mxu1 %v16117_v60  ;;  %33118 = vmatprep.mubr.msk.f32.mxu1 %vm35065_vm0, %v35064_v7 }
0x17ee   :  { %33121 = vmatprep.subr.mxu1 %v35064_v7 }
0x17f4   :  { %33119 = vmatmul.mubr.f32.vlgmr.msra.gmra.mrb[32].mxu1 %v16104_v57 }
0x17f5   :  { %33122 = vmatpush3.msra.mxu1 %v16039_v56  ;;  %33123 = vmatprep.mubr.msk.f32.mxu1 %vm35065_vm0, %v35064_v7 }
0x17f6   :  { %33156 = vmatprep.subr.mxu1 %v35064_v7 }
0x17fc   :  { %33124 = vmatmul.mubr.f32.vlgmr.msra.gmra.mrb[32].mxu1 %v16104_v57  ;;  %v17436_v57 = vpop.permute.xlu1 %17435 }
0x17fd   :  { %33157 = vmatpush3.xpose.msra.mxu1 %v16990_v17  ;;  %33158 = vmatprep.mubr.msk.f32.mxu1 %vm35065_vm0, %v35064_v7  ;;  %v17439_v42 = vsel %vm96_vm1, %v17436_v57, 0 }
0x17fe   :  { %33161 = vmatprep.subr.mxu1 %v35064_v7  ;;  %v17509_v61 = vand.u32 4294901760, %v17439_v42 }
0x1800   :  { %33159 = vmatmul.mubr.f32.vlgmr.msra.gmra.mrb[34].mxu1 %v17059_v47  ;;  %v17438_v60 = vpop.permute.xlu1 %17437  ;;  %v17510_v39 = vsub.f32 %v17439_v42, %v17509_v61 }
0x1801   :  { %33162 = vmatpush3.xpose.msra.mxu1 %v17070_v14  ;;  %33163 = vmatprep.mubr.msk.f32.mxu1 %vm35065_vm0, %v35064_v7 }
0x1802   :  { %33166 = vmatprep.subr.mxu1 %v35064_v7  ;;  %v17511_v10 = vand.u32 4294901760, %v17510_v39 }
0x1808   :  { %33164 = vmatmul.mubr.f32.vlgmr.msra.gmra.mrb[34].mxu1 %v17055_v12 }
0x1809   :  { %33167 = vmatpush3.xpose.msra.mxu1 %v17067_v58  ;;  %33168 = vmatprep.mubr.msk.f32.mxu1 %vm35065_vm0, %v35064_v7 }
0x180a   :  { %33171 = vmatprep.subr.mxu1 %v35064_v7 }
0x1810   :  { %33169 = vmatmul.mubr.f32.vlgmr.msra.gmra.mrb[34].mxu1 %v17056_v40 }
0x1811   :  { %33172 = vmatpush3.xpose.msra.mxu1 %v16990_v17  ;;  %33173 = vmatprep.mubr.msk.f32.mxu1 %vm35065_vm0, %v35064_v7 }
0x1812   :  { %33176 = vmatprep.subr.mxu1 %v35064_v7 }
0x1818   :  { %33174 = vmatmul.mubr.f32.vlgmr.msra.gmra.mrb[34].mxu1 %v17057_v38 }
0x1819   :  { %33177 = vmatpush3.xpose.msra.mxu1 %v17068_v15  ;;  %33178 = vmatprep.mubr.msk.f32.mxu1 %vm35065_vm0, %v35064_v7 }
0x181a   :  { %33181 = vmatprep.subr.mxu1 %v35064_v7 }
0x1820   :  { %33179 = vmatmul.mubr.f32.vlgmr.msra.gmra.mrb[34].mxu1 %v17055_v12 }
0x1821   :  { %33182 = vmatpush3.xpose.msra.mxu1 %v16990_v17  ;;  %33183 = vmatprep.mubr.msk.f32.mxu1 %vm35065_vm0, %v35064_v7 }
0x1822   :  { %33216 = vmatprep.subr.mxu1 %v35064_v7 }
0x1828   :  { %33184 = vmatmul.mubr.f32.vlgmr.msra.gmra.mrb[34].mxu1 %v17055_v12 }
0x1829   :  { %33218 = vmatprep.mubr.msk.f32.mxu1 %vm35065_vm0, %v35064_v7 }
0x18a3   :  { %v16028_v32 = vpop.f32.mrb[26].mxu0 }
0x18a4   :  { %v16485_v6 = vsel %vm96_vm1, %v16028_v32, 0  ;;  %v33095_v48 = vpop.f32.mrb[27].mxu0 }
0x18a5   :  { %v16556_v22 = vand.u32 4294901760, %v16485_v6 }
0x18a7   :  { %v16557_v34 = vsub.f32 %v16485_v6, %v16556_v22 }
0x18a9   :  { %v16558_v45 = vand.u32 4294901760, %v16557_v34 }
0x18ab   :  { %v16559_v21 = vsub.f32 %v16557_v34, %v16558_v45 }
0x18ad   :  { %v16560_v46 = vand.u32 4294901760, %v16559_v21 }
0x18af   :  { %33128 = vmatprep.mubr.f32.mxu0 %v16560_v46 }
0x18cf   :  { %v16480_v44 = vpop.f32.mrb[32].mxu1 }
0x18d0   :  { %v16488_v20 = vsel %vm96_vm1, %v16480_v44, 0  ;;  %v33125_v49 = vpop.f32.mrb[33].mxu1 }
0x18d1   :  { %v16566_v56 = vand.u32 4294901760, %v16488_v20 }
0x18d3   :  { %v16567_v55 = vsub.f32 %v16488_v20, %v16566_v56 }
0x18d5   :  { %v16568_v53 = vand.u32 4294901760, %v16567_v55 }
0x18d7   :  { %v16569_v28 = vsub.f32 %v16567_v55, %v16568_v53 }
0x18d9   :  { %v16570_v16 = vand.u32 4294901760, %v16569_v28 }
0x18db   :  { %33129 = vmatmul.mubr.f32.vlgmr.msra.gmra.mrb[24].mxu0 %v16570_v16 }
0x18dc   :  { %33133 = vmatprep.mubr.f32.mxu0 %v16556_v22  ;;  %33132 = vmatpush3.msra.mxu0 %v35587_v27  ;;  %v17441_v27 = vsel %vm96_vm1, %v17438_v60, 0 }
0x18dd   :  { %33136 = vmatprep.subr.mxu0 %v35579_v24 }
0x18e3   :  { %33134 = vmatmul.mubr.f32.vlgmr.msra.gmra.mrb[24].mxu0 %v16566_v56 }
0x18e4   :  { %33138 = vmatprep.mubr.f32.mxu0 %v16557_v34  ;;  %33137 = vmatpush3.msra.mxu0 %v35579_v24  ;;  %v17444_v24 = vand.u32 4294901760, %v17441_v27 }
0x18e5   :  { %33141 = vmatprep.subr.mxu0 %v35575_v23 }
0x18e6   :  { %v17521_v4 = vsub.f32 %v17441_v27, %v17444_v24 }
0x18e8   :  { %v17522_v19 = vand.u32 4294901760, %v17521_v4 }
0x18ea   :  { %v17523_v12 = vsub.f32 %v17521_v4, %v17522_v19 }
0x18eb   :  { %33139 = vmatmul.mubr.f32.vlgmr.msra.gmra.mrb[24].mxu0 %v16567_v55 }
0x18ec   :  { %33143 = vmatprep.mubr.f32.mxu0 %v16558_v45  ;;  %33142 = vmatpush3.msra.mxu0 %v35575_v23 }
0x18ed   :  { %33146 = vmatprep.subr.mxu0 %v35583_v25 }
0x18f3   :  { %33144 = vmatmul.mubr.f32.vlgmr.msra.gmra.mrb[24].mxu0 %v16568_v53 }
0x18f4   :  { %33148 = vmatprep.mubr.f32.mxu0 %v16556_v22  ;;  %33147 = vmatpush3.msra.mxu0 %v35583_v25  ;;  %v17512_v25 = vsub.f32 %v17510_v39, %v17511_v10 }
0x18f5   :  { %33151 = vmatprep.subr.mxu0 %v35575_v23 }
0x18f6   :  { %v17513_v17 = vand.u32 4294901760, %v17512_v25 }
0x18fb   :  { %33149 = vmatmul.mubr.f32.vlgmr.msra.gmra.mrb[24].mxu0 %v16566_v56  ;;  %v17431_v50 = vpop.f32.mrb[34].mxu1 }
0x18fc   :  { %v17889_v31 = vmul.f32 0.35355338, %v17431_v50  ;;  %33152 = vmatpush3.msra.mxu0 %v35575_v23  ;;  %33153 = vmatprep.mubr.f32.mxu0 %v16556_v22  ;;  %v33185_v9 = vpop.f32.mrb[35].mxu1  ;;  %v17524_v23 = vand.u32 4294901760, %v17523_v12 }
0x18fd   :  { %33186 = vmatprep.subr.mxu0 %v35064_v7 }
0x18fe   :  { %v17891_v11 = vsel %vm96_vm1, %v17889_v31, -inf }
0x18ff   :  { %17892 = vmax.xlane.f32.xlu1 %v17891_v11 }
0x1903   :  { %33154 = vmatmul.mubr.f32.vlgmr.msra.gmra.mrb[24].mxu0 %v16566_v56 }
0x1904   :  { %33187 = vmatpush3.xpose.msra.mxu0 %v17444_v24  ;;  %33188 = vmatprep.mubr.msk.f32.mxu0 %vm35065_vm0, %v35064_v7 }
0x1905   :  { %33191 = vmatprep.subr.mxu0 %v35064_v7 }
0x1907   :  { %33189 = vmatmul.mubr.f32.vlgmr.msra.gmra.mrb[28].mxu0 %v17513_v17 }
0x1908   :  { %33192 = vmatpush3.xpose.msra.mxu0 %v17524_v23  ;;  %33193 = vmatprep.mubr.msk.f32.mxu0 %vm35065_vm0, %v35064_v7 }
0x1909   :  { %33196 = vmatprep.subr.mxu0 %v35064_v7 }
0x190f   :  { %33194 = vmatmul.mubr.f32.vlgmr.msra.gmra.mrb[28].mxu0 %v17509_v61 }
0x1910   :  { %33197 = vmatpush3.xpose.msra.mxu0 %v17521_v4  ;;  %33198 = vmatprep.mubr.msk.f32.mxu0 %vm35065_vm0, %v35064_v7 }
0x1911   :  { %33201 = vmatprep.subr.mxu0 %v35064_v7 }
0x1917   :  { %33199 = vmatmul.mubr.f32.vlgmr.msra.gmra.mrb[28].mxu0 %v17510_v39 }
0x1918   :  { %33202 = vmatpush3.xpose.msra.mxu0 %v17444_v24  ;;  %33203 = vmatprep.mubr.msk.f32.mxu0 %vm35065_vm0, %v35064_v7 }
0x1919   :  { %33206 = vmatprep.subr.mxu0 %v35064_v7 }
0x191f   :  { %33204 = vmatmul.mubr.f32.vlgmr.msra.gmra.mrb[28].mxu0 %v17511_v10 }
0x1920   :  { %33207 = vmatpush3.xpose.msra.mxu0 %v17522_v19  ;;  %33208 = vmatprep.mubr.msk.f32.mxu0 %vm35065_vm0, %v35064_v7 }
0x1921   :  { %33211 = vmatprep.subr.mxu0 %v35064_v7 }
0x1927   :  { %33209 = vmatmul.mubr.f32.vlgmr.msra.gmra.mrb[28].mxu0 %v17509_v61 }
0x1928   :  { %33212 = vmatpush3.xpose.msra.mxu0 %v17444_v24  ;;  %33213 = vmatprep.mubr.msk.f32.mxu0 %vm35065_vm0, %v35064_v7 }
0x1929   :  { %33246 = vmatprep.subr.mxu0 %v35064_v7 }
0x192f   :  { %33214 = vmatmul.mubr.f32.vlgmr.msra.gmra.mrb[28].mxu0 %v17509_v61 }
0x1930   :  { %33248 = vmatprep.mubr.msk.f32.mxu0 %vm35065_vm0, %v35064_v7 }
0x198c   :  { %v17893_v40 = vpop.xlane.xlu1 %17892 }
0x198d   :  { %v17897_v58 = vsub.f32 %v17889_v31, %v17893_v40 }
0x198f   :  { %v17899_v38 = vmul.f32 1.442695, %v17897_v58 }
0x1991   :  { %35010 = vpow2.f32 %v17899_v38 }
0x199b   :  { %v35011_v15 = vpop.eup %35010 }
0x199c   :  { %v17903_v59 = vsel %vm96_vm1, %v35011_v15, 0.0 }
0x199d   :  { %17904 = vadd.xlane.f32.xlu1 %v17903_v59 }
0x1a02   :  { %v17885_v18 = vpop.f32.mrb[28].mxu0 }
0x1a03   :  { %v17890_v47 = vmul.f32 0.35355338, %v17885_v18  ;;  %v33215_v14 = vpop.f32.mrb[29].mxu0 }
0x1a05   :  { %v17894_v32 = vsel %vm96_vm1, %v17890_v47, -inf }
0x1a06   :  { %17895 = vmax.xlane.f32.xlu0 %v17894_v32 }
0x1a1c   :  { %18365 = vrot.lane.b32.xlu0 %v35797_v30, %s35076_s19 }
0x1a2a   :  { %v17905_v44 = vpop.xlane.xlu1 %17904 }
0x1a93   :  { %v17896_v6 = vpop.xlane.xlu0 %17895 }
0x1a94   :  { %v17898_v48 = vsub.f32 %v17890_v47, %v17896_v6 }
0x1a96   :  { %v17901_v22 = vmul.f32 1.442695, %v17898_v48 }
0x1a97   :  { %v18366_v34 = vpop.permute.xlu0 %18365 }
0x1a98   :  { %35012 = vpow2.f32 %v17901_v22  ;;  %v36223_v45 = vand.u32 4294901760, %v18366_v34 }
0x1a99   :  { %35014 = vrcp.f32 %v17905_v44 }
0x1a9a   :  { %33247 = vmatpush3.msra.mxu0 %v36223_v45  ;;  %v18449_v39 = vsub.f32 %v18366_v34, %v36223_v45 }
0x1a9b   :  { %33251 = vmatprep.subr.mxu0 %v35064_v7 }
0x1a9c   :  { %v18450_v10 = vand.u32 4294901760, %v18449_v39 }
0x1a9e   :  { %v18451_v25 = vsub.f32 %v18449_v39, %v18450_v10 }
0x1aa0   :  { %v18452_v23 = vand.u32 4294901760, %v18451_v25 }
0x1aa2   :  { %v35013_v21 = vpop.eup %35012 }
0x1aa3   :  { %v17906_v46 = vsel %vm96_vm1, %v35013_v21, 0.0  ;;  %v35015_v30 = vpop.eup %35014 }
0x1aa4   :  { %17907 = vadd.xlane.f32.xlu1 %v17906_v46  ;;  %v17910_v20 = vmul.f32 %v35015_v30, %v35011_v15 }
0x1aa6   :  { %v17917_v49 = vsel %vm96_vm1, %v17910_v20, 0 }
0x1aa7   :  { %v17985_v56 = vand.u32 4294901760, %v17917_v49 }
0x1aa9   :  { %v17986_v55 = vsub.f32 %v17917_v49, %v17985_v56 }
0x1aab   :  { %v17987_v53 = vand.u32 4294901760, %v17986_v55 }
0x1aad   :  { %v17988_v16 = vsub.f32 %v17986_v55, %v17987_v53 }
0x1aaf   :  { %v17989_v42 = vand.u32 4294901760, %v17988_v16 }
0x1ab5   :  { %17913 = vrot.lane.b32.xlu1 %v35800_v13, %s35076_s19 }
0x1b31   :  { %v17908_v28 = vpop.xlane.xlu1 %17907 }
0x1b32   :  { %35016 = vrcp.f32 %v17908_v28 }
0x1b35   :  { %v17914_v57 = vpop.permute.xlu1 %17913 }
0x1b36   :  { %v17920_v60 = vand.u32 4294901760, %v17914_v57 }
0x1b38   :  { %v17997_v27 = vsub.f32 %v17914_v57, %v17920_v60  ;;  %33217 = vmatpush3.msra.mxu1 %v17920_v60 }
0x1b39   :  { %33219 = vmatmul.mubr.f32.vlgmr.msra.gmra.mrb[36].mxu1 %v17989_v42  ;;  %33221 = vmatprep.subr.mxu1 %v35064_v7 }
0x1b3a   :  { %v17998_v13 = vand.u32 4294901760, %v17997_v27  ;;  %33223 = vmatprep.mubr.msk.f32.mxu1 %vm35065_vm0, %v35064_v7 }
0x1b3c   :  { %v35017_v61 = vpop.eup %35016  ;;  %v17999_v24 = vsub.f32 %v17997_v27, %v17998_v13 }
0x1b3d   :  { %v17912_v4 = vmul.f32 %v35017_v61, %v35013_v21 }
0x1b3e   :  { %v18000_v50 = vand.u32 4294901760, %v17999_v24 }
0x1b3f   :  { %v18369_v31 = vsel %vm96_vm1, %v17912_v4, 0 }
0x1b40   :  { %33222 = vmatpush3.msra.mxu1 %v18000_v50  ;;  %v18437_v9 = vand.u32 4294901760, %v18369_v31 }
0x1b41   :  { %33224 = vmatmul.mubr.f32.vlgmr.msra.gmra.mrb[36].mxu1 %v17985_v56  ;;  %33226 = vmatprep.subr.mxu1 %v35064_v7 }
0x1b42   :  { %33227 = vmatpush3.msra.mxu1 %v17997_v27  ;;  %33228 = vmatprep.mubr.msk.f32.mxu1 %vm35065_vm0, %v35064_v7  ;;  %v18438_v19 = vsub.f32 %v18369_v31, %v18437_v9 }
0x1b43   :  { %33231 = vmatprep.subr.mxu1 %v35064_v7 }
0x1b44   :  { %v18439_v11 = vand.u32 4294901760, %v18438_v19 }
0x1b46   :  { %v18440_v12 = vsub.f32 %v18438_v19, %v18439_v11 }
0x1b48   :  { %v18441_v17 = vand.u32 4294901760, %v18440_v12 }
0x1b49   :  { %33229 = vmatmul.mubr.f32.vlgmr.msra.gmra.mrb[36].mxu1 %v17986_v55 }
0x1b4a   :  { %33232 = vmatpush3.msra.mxu1 %v17920_v60  ;;  %33249 = vmatmul.mubr.f32.vlgmr.msra.gmra.mrb[30].mxu0 %v18441_v17 }
0x1b4b   :  { %33252 = vmatpush3.msra.mxu0 %v18452_v23  ;;  %33233 = vmatprep.mubr.msk.f32.mxu1 %vm35065_vm0, %v35064_v7 }
0x1b4c   :  { %33236 = vmatprep.subr.mxu1 %v35064_v7  ;;  %33253 = vmatprep.mubr.msk.f32.mxu0 %vm35065_vm0, %v35064_v7 }
0x1b4d   :  { %33256 = vmatprep.subr.mxu0 %v35064_v7 }
0x1b51   :  { %33234 = vmatmul.mubr.f32.vlgmr.msra.gmra.mrb[36].mxu1 %v17987_v53 }
0x1b52   :  { %33237 = vmatpush3.msra.mxu1 %v17998_v13  ;;  %33254 = vmatmul.mubr.f32.vlgmr.msra.gmra.mrb[30].mxu0 %v18437_v9 }
0x1b53   :  { %33257 = vmatpush3.msra.mxu0 %v18449_v39  ;;  %33238 = vmatprep.mubr.msk.f32.mxu1 %vm35065_vm0, %v35064_v7 }
0x1b54   :  { %33241 = vmatprep.subr.mxu1 %v35064_v7  ;;  %33258 = vmatprep.mubr.msk.f32.mxu0 %vm35065_vm0, %v35064_v7 }
0x1b55   :  { %33261 = vmatprep.subr.mxu0 %v35064_v7 }
0x1b59   :  { %33239 = vmatmul.mubr.f32.vlgmr.msra.gmra.mrb[36].mxu1 %v17985_v56 }
0x1b5a   :  { %33242 = vmatpush3.msra.mxu1 %v17920_v60  ;;  %33259 = vmatmul.mubr.f32.vlgmr.msra.gmra.mrb[30].mxu0 %v18438_v19 }
0x1b5b   :  { %33262 = vmatpush3.msra.mxu0 %v36223_v45  ;;  %33243 = vmatprep.mubr.msk.f32.mxu1 %vm35065_vm0, %v35064_v7 }
0x1b5c   :  { %33263 = vmatprep.mubr.msk.f32.mxu0 %vm35065_vm0, %v35064_v7  ;;  %33266 = vmatprep.subr.mxu0 %v35064_v7 }
0x1b5d   :  { %34165 = vmatprep.subr.bf16.mxu1 %v35730_v62 }
0x1b61   :  { %33244 = vmatmul.mubr.f32.vlgmr.msra.gmra.mrb[36].mxu1 %v17985_v56 }
0x1b62   :  { %33264 = vmatmul.mubr.f32.vlgmr.msra.gmra.mrb[30].mxu0 %v18439_v11  ;;  %34167 = vmatpush3.bf16.msra.mxu1 %v35730_v62 }
0x1b63   :  { %33267 = vmatpush3.msra.mxu0 %v18450_v10  ;;  %33268 = vmatprep.mubr.msk.f32.mxu0 %vm35065_vm0, %v35064_v7 }
0x1b64   :  { %33271 = vmatprep.subr.mxu0 %v35064_v7  ;;  %34169 = vmatprep.subr.bf16.mxu1 %v35732_v2 }
0x1b66   :  { %34171 = vmatpush3.bf16.msra.mxu1 %v35732_v2 }
0x1b67   :  { %34173 = vmatprep.subr.bf16.mxu1 %v35738_v29 }
0x1b6a   :  { %33269 = vmatmul.mubr.f32.vlgmr.msra.gmra.mrb[30].mxu0 %v18437_v9 }
0x1b6b   :  { %33272 = vmatpush3.msra.mxu0 %v36223_v45  ;;  %33273 = vmatprep.mubr.msk.f32.mxu0 %vm35065_vm0, %v35064_v7 }
0x1b6c   :  { %33276 = vmatprep.subr.mxu0 %v35674_v63 }
0x1b72   :  { %33274 = vmatmul.mubr.f32.vlgmr.msra.gmra.mrb[30].mxu0 %v18437_v9 }
0x1b73   :  { %33277 = vmatpush3.msra.mxu0 %v35674_v63 }
0x1b74   :  { %33281 = vmatprep.subr.mxu0 %v35686_v3 }
0x1c34   :  { %v18361_v40 = vpop.f32.mrb[36].mxu1 }
0x1c35   :  { %v18818_v58 = vsel %vm96_vm1, %v18361_v40, 0  ;;  %v33245_v38 = vpop.f32.mrb[37].mxu1 }
0x1c36   :  { %v18889_v15 = vand.u32 4294901760, %v18818_v58 }
0x1c38   :  { %v18890_v59 = vsub.f32 %v18818_v58, %v18889_v15 }
0x1c3a   :  { %v18891_v18 = vand.u32 4294901760, %v18890_v59 }
0x1c3c   :  { %v18892_v47 = vsub.f32 %v18890_v59, %v18891_v18 }
0x1c3e   :  { %v18893_v14 = vand.u32 4294901760, %v18892_v47 }
0x1c40   :  { %33278 = vmatprep.mubr.f32.mxu0 %v18893_v14 }
0x1c45   :  { %v18813_v32 = vpop.f32.mrb[30].mxu0 }
0x1c46   :  { %v18821_v6 = vsel %vm96_vm1, %v18813_v32, 0  ;;  %v33275_v48 = vpop.f32.mrb[31].mxu0 }
0x1c47   :  { %v18899_v22 = vand.u32 4294901760, %v18821_v6 }
0x1c49   :  { %v18900_v34 = vsub.f32 %v18821_v6, %v18899_v22 }
0x1c4b   :  { %v18901_v45 = vand.u32 4294901760, %v18900_v34 }
0x1c4d   :  { %v18902_v21 = vsub.f32 %v18900_v34, %v18901_v45 }
0x1c4f   :  { %v18903_v46 = vand.u32 4294901760, %v18902_v21 }
0x1c51   :  { %33279 = vmatmul.mubr.f32.vlgmr.msra.gmra.mrb[24].mxu0 %v18903_v46 }
0x1c52   :  { %33283 = vmatprep.mubr.f32.mxu0 %v18889_v15  ;;  %33282 = vmatpush3.msra.mxu0 %v35686_v3 }
0x1c53   :  { %33286 = vmatprep.subr.mxu0 %v35678_v0 }
0x1c59   :  { %33284 = vmatmul.mubr.f32.vlgmr.msra.gmra.mrb[24].mxu0 %v18899_v22 }
0x1c5a   :  { %33288 = vmatprep.mubr.f32.mxu0 %v18890_v59  ;;  %33287 = vmatpush3.msra.mxu0 %v35678_v0 }
0x1c5b   :  { %33291 = vmatprep.subr.mxu0 %v35674_v63 }
0x1c61   :  { %33289 = vmatmul.mubr.f32.vlgmr.msra.gmra.mrb[24].mxu0 %v18900_v34 }
0x1c62   :  { %33293 = vmatprep.mubr.f32.mxu0 %v18891_v18  ;;  %33292 = vmatpush3.msra.mxu0 %v35674_v63 }
0x1c63   :  { %33296 = vmatprep.subr.mxu0 %v35682_v1 }
0x1c69   :  { %33294 = vmatmul.mubr.f32.vlgmr.msra.gmra.mrb[24].mxu0 %v18901_v45 }
0x1c6a   :  { %33298 = vmatprep.mubr.f32.mxu0 %v18889_v15  ;;  %33297 = vmatpush3.msra.mxu0 %v35682_v1 }
0x1c6b   :  { %33301 = vmatprep.subr.mxu0 %v35674_v63 }
0x1c71   :  { %33299 = vmatmul.mubr.f32.vlgmr.msra.gmra.mrb[24].mxu0 %v18899_v22 }
0x1c72   :  { %33303 = vmatprep.mubr.f32.mxu0 %v18889_v15  ;;  %33302 = vmatpush3.msra.mxu0 %v35674_v63 }
0x1c73   :  { %33372 = vmatprep.subr.mxu0 %v35064_v7 }
0x1c79   :  { %33304 = vmatmul.mubr.f32.vlgmr.msra.gmra.mrb[24].mxu0 %v18899_v22 }
0x1c7a   :  { %33374 = vmatprep.mubr.msk.f32.mxu0 %vm35065_vm0, %v35064_v7 }
0x1d4c   :  { %v33305_v0 = vpop.f32.mrb[24].mxu0 }
0x1d4d   :  { %v19315_v3 = vadd.f32 %v33305_v0, %v35710_v33  ;;  %v19302_v44 = vpop.f32.mrb[25].mxu0 }
0x1d4e   :  { %v19314_v30 = vadd.f32 %v19302_v44, %v35710_v33 }
0x1d4f   :  { %v19319_v1 = vsel %vm9422_vm2, %v19315_v3, 0.0 }
0x1d50   :  { %19320 = vadd.xlane.f32.xlu0 %v19319_v1  ;;  %v19316_v20 = vsel %vm9422_vm2, %v19314_v30, 0.0 }
0x1d51   :  { %19317 = vadd.xlane.f32.xlu1 %v19316_v20 }
0x1ddd   :  { %v19321_v49 = vpop.xlane.xlu0 %19320 }
0x1dde   :  { %v19323_v63 = vmul.f32 0.03125, %v19321_v49  ;;  %v19318_v56 = vpop.xlane.xlu1 %19317 }
0x1ddf   :  { %v19322_v55 = vmul.f32 0.03125, %v19318_v56 }
0x1de0   :  { %v19325_v53 = vsub.f32 %v19315_v3, %v19323_v63 }
0x1de1   :  { %v19324_v28 = vsub.f32 %v19314_v30, %v19322_v55 }
0x1de2   :  { %v19327_v16 = vmul.f32 %v19325_v53, %v19325_v53 }
0x1de3   :  { %v19326_v57 = vmul.f32 %v19324_v28, %v19324_v28 }
0x1de4   :  { %v19331_v60 = vsel %vm9422_vm2, %v19327_v16, 0.0 }
0x1de5   :  { %19332 = vadd.xlane.f32.xlu0 %v19331_v60  ;;  %v19328_v42 = vsel %vm9422_vm2, %v19326_v57, 0.0 }
0x1de6   :  { %19329 = vadd.xlane.f32.xlu1 %v19328_v42 }
0x1e72   :  { %v19333_v33 = vpop.xlane.xlu0 %19332 }
0x1e73   :  { %v19335_v27 = vmul.f32 0.03125, %v19333_v33  ;;  %v19330_v13 = vpop.xlane.xlu1 %19329 }
0x1e74   :  { %v19334_v61 = vmul.f32 0.03125, %v19330_v13 }
0x1e75   :  { %v19337_v24 = vadd.f32 1e-05, %v19335_v27 }
0x1e76   :  { %v19336_v39 = vadd.f32 1e-05, %v19334_v61 }
0x1e77   :  { %35018 = vrsqrt.f32 %v19337_v24 }
0x1e78   :  { %35020 = vrsqrt.f32 %v19336_v39 }
0x1e81   :  { %v35019_v4 = vpop.eup %35018 }
0x1e82   :  { %v35021_v50 = vpop.eup %35020  ;;  %v19341_v31 = vmul.f32 %v35019_v4, %v19325_v53 }
0x1e83   :  { %v19340_v9 = vmul.f32 %v35021_v50, %v19324_v28 }
0x1e84   :  { %v19343_v10 = vmul.f32 %v19341_v31, %v35756_v52 }
0x1e85   :  { %v19342_v19 = vmul.f32 %v19340_v9, %v35756_v52 }
0x1e86   :  { %v19345_v11 = vadd.f32 %v19343_v10, %v35760_v54 }
0x1e87   :  { %v19344_v25 = vadd.f32 %v19342_v19, %v35760_v54 }
0x1e88   :  { %v19350_v12 = vsel %vm9422_vm2, %v19345_v11, 0 }
0x1e89   :  { %v19347_v17 = vsel %vm9422_vm2, %v19344_v25, 0  ;;  %v19431_v23 = vand.u32 4294901760, %v19350_v12 }
0x1e8a   :  { %v19421_v40 = vand.u32 4294901760, %v19347_v17 }
0x1e8b   :  { %v19432_v58 = vsub.f32 %v19350_v12, %v19431_v23 }
0x1e8c   :  { %v19422_v38 = vsub.f32 %v19347_v17, %v19421_v40 }
0x1e8d   :  { %v19433_v15 = vand.u32 4294901760, %v19432_v58 }
0x1e8e   :  { %v19423_v59 = vand.u32 4294901760, %v19422_v38 }
0x1e8f   :  { %v19434_v18 = vsub.f32 %v19432_v58, %v19433_v15 }
0x1e90   :  { %v19424_v47 = vsub.f32 %v19422_v38, %v19423_v59 }
0x1e91   :  { %v19435_v32 = vand.u32 4294901760, %v19434_v18 }
0x1e92   :  { %v19425_v14 = vand.u32 4294901760, %v19424_v47 }
0x1e94   :  { %33314 = vmatprep.mubr.f32.mxu1 %v19425_v14 }
0x1e95   :  { %33315 = vmatmul.mubr.f32.vlgmr.msra.gmra.mrb[38].mxu1 %v19435_v32 }
0x1e96   :  { %34175 = vmatpush3.bf16.msra.mxu1 %v35738_v29  ;;  %33325 = vmatprep.mubr.f32.mxu1 %v19421_v40 }
0x1e97   :  { %34177 = vmatprep.subr.bf16.mxu1 %v35741_v35 }
0x1e9a   :  { %34179 = vmatpush3.bf16.msra.mxu1 %v35741_v35 }
0x1e9b   :  { %34181 = vmatprep.subr.bf16.mxu1 %v35743_v36 }
0x1e9d   :  { %33326 = vmatmul.mubr.f32.vlgmr.msra.gmra.mrb[38].mxu1 %v19431_v23 }
0x1e9e   :  { %34183 = vmatpush3.bf16.msra.mxu1 %v35743_v36  ;;  %33336 = vmatprep.mubr.f32.mxu1 %v19422_v38 }
0x1e9f   :  { %34185 = vmatprep.subr.bf16.mxu1 %v35745_v37 }
0x1ea2   :  { %34187 = vmatpush3.bf16.msra.mxu1 %v35745_v37 }
0x1ea3   :  { %34189 = vmatprep.subr.bf16.mxu1 %v35730_v62 }
0x1ea5   :  { %33337 = vmatmul.mubr.f32.vlgmr.msra.gmra.mrb[38].mxu1 %v19432_v58 }
0x1ea6   :  { %34191 = vmatpush3.bf16.msra.mxu1 %v35730_v62  ;;  %33347 = vmatprep.mubr.f32.mxu1 %v19423_v59 }
0x1ea7   :  { %34193 = vmatprep.subr.bf16.mxu1 %v35732_v2 }
0x1eaa   :  { %34195 = vmatpush3.bf16.msra.mxu1 %v35732_v2 }
0x1eab   :  { %34197 = vmatprep.subr.bf16.mxu1 %v35747_v41 }
0x1ead   :  { %33348 = vmatmul.mubr.f32.vlgmr.msra.gmra.mrb[38].mxu1 %v19433_v15 }
0x1eae   :  { %34199 = vmatpush3.bf16.msra.mxu1 %v35747_v41  ;;  %33358 = vmatprep.mubr.f32.mxu1 %v19421_v40 }
0x1eaf   :  { %34201 = vmatprep.subr.bf16.mxu1 %v35749_v43 }
0x1eb2   :  { %34203 = vmatpush3.bf16.msra.mxu1 %v35749_v43 }
0x1eb3   :  { %34205 = vmatprep.subr.bf16.mxu1 %v35730_v62 }
0x1eb5   :  { %33359 = vmatmul.mubr.f32.vlgmr.msra.gmra.mrb[38].mxu1 %v19431_v23 }
0x1eb6   :  { %34207 = vmatpush3.bf16.msra.mxu1 %v35730_v62  ;;  %33369 = vmatprep.mubr.f32.mxu1 %v19421_v40 }
0x1eb7   :  { %34209 = vmatprep.subr.bf16.mxu1 %v35732_v2 }
0x1eba   :  { %34211 = vmatpush3.bf16.msra.mxu1 %v35732_v2 }
0x1ebb   :  { %33402 = vmatprep.subr.mxu1 %v35064_v7 }
0x1ebd   :  { %33370 = vmatmul.mubr.f32.vlgmr.msra.gmra.mrb[38].mxu1 %v19431_v23 }
0x1ebe   :  { %33404 = vmatprep.mubr.msk.f32.mxu1 %vm35065_vm0, %v35064_v7 }
0x1f90   :  { %v33371_v29 = vpop.f32.mrb[38].mxu1 }
0x1f91   :  { %v36321_v35 = vadd.f32 %v33371_v29, %v35794_v26  ;;  %v19870_v36 = vpop.f32.mrb[39].mxu1 }
0x1f92   :  { %v36324_v37 = vadd.f32 %v19870_v36, %v35794_v26 }
0x1f93   :  { %20334 = vrot.lane.b32.xlu1 %v36321_v35, %s35066_s0  ;;  %v20336_v62 = vsel %vm96_vm1, %v36321_v35, 0 }
0x1f94   :  { %19881 = vrot.lane.b32.xlu0 %v36324_v37, %s35066_s0  ;;  %v19883_v2 = vsel %vm96_vm1, %v36324_v37, 0  ;;  %v36334_v41 = vand.u32 4294901760, %v20336_v62 }
0x1f95   :  { %v36336_v43 = vand.u32 4294901760, %v19883_v2 }
0x1f96   :  { %v20407_v52 = vsub.f32 %v20336_v62, %v36334_v41 }
0x1f97   :  { %v19954_v54 = vsub.f32 %v19883_v2, %v36336_v43 }
0x1f98   :  { %v20408_v26 = vand.u32 4294901760, %v20407_v52 }
0x1f99   :  { %v19955_v6 = vand.u32 4294901760, %v19954_v54 }
0x1f9a   :  { %v20409_v45 = vsub.f32 %v20407_v52, %v20408_v26 }
0x1f9b   :  { %v19956_v0 = vsub.f32 %v19954_v54, %v19955_v6 }
0x1f9c   :  { %v20410_v1 = vand.u32 4294901760, %v20409_v45 }
0x1f9d   :  { %v19957_v49 = vand.u32 4294901760, %v19956_v0 }
0x2005   :  { %v20335_v48 = vpop.permute.xlu1 %20334 }
0x2006   :  { %v20338_v22 = vsel %vm96_vm1, %v20335_v48, 0  ;;  %v19882_v34 = vpop.permute.xlu0 %19881 }
0x2007   :  { %v20341_v21 = vand.u32 4294901760, %v20338_v22  ;;  %v19885_v46 = vsel %vm96_vm1, %v19882_v34, 0 }
0x2008   :  { %v19888_v3 = vand.u32 4294901760, %v19885_v46 }
0x2009   :  { %v20418_v44 = vsub.f32 %v20338_v22, %v20341_v21  ;;  %33403 = vmatpush3.xpose.msra.mxu1 %v20341_v21 }
0x200a   :  { %v19965_v30 = vsub.f32 %v19885_v46, %v19888_v3  ;;  %33373 = vmatpush3.xpose.msra.mxu0 %v19888_v3  ;;  %33407 = vmatprep.subr.mxu1 %v35064_v7 }
0x200b   :  { %v20419_v20 = vand.u32 4294901760, %v20418_v44  ;;  %33377 = vmatprep.subr.mxu0 %v35064_v7 }
0x200c   :  { %v19966_v63 = vand.u32 4294901760, %v19965_v30  ;;  %33405 = vmatmul.mubr.f32.vlgmr.msra.gmra.mrb[40].mxu1 %v20410_v1 }
0x200d   :  { %v20420_v56 = vsub.f32 %v20418_v44, %v20419_v20  ;;  %33375 = vmatmul.mubr.f32.vlgmr.msra.gmra.mrb[32].mxu0 %v19957_v49  ;;  %33409 = vmatprep.mubr.msk.f32.mxu1 %vm35065_vm0, %v35064_v7 }
0x200e   :  { %v19967_v55 = vsub.f32 %v19965_v30, %v19966_v63  ;;  %33379 = vmatprep.mubr.msk.f32.mxu0 %vm35065_vm0, %v35064_v7 }
0x200f   :  { %v20421_v53 = vand.u32 4294901760, %v20420_v56 }
0x2010   :  { %v19968_v28 = vand.u32 4294901760, %v19967_v55 }
0x2011   :  { %33408 = vmatpush3.xpose.msra.mxu1 %v20421_v53 }
0x2012   :  { %33378 = vmatpush3.xpose.msra.mxu0 %v19968_v28  ;;  %33412 = vmatprep.subr.mxu1 %v35064_v7 }
0x2013   :  { %33382 = vmatprep.subr.mxu0 %v35064_v7 }
0x2014   :  { %33410 = vmatmul.mubr.f32.vlgmr.msra.gmra.mrb[40].mxu1 %v36334_v41 }
0x2015   :  { %33380 = vmatmul.mubr.f32.vlgmr.msra.gmra.mrb[32].mxu0 %v36336_v43  ;;  %33413 = vmatpush3.xpose.msra.mxu1 %v20418_v44 }
0x2016   :  { %33383 = vmatpush3.xpose.msra.mxu0 %v19965_v30  ;;  %33414 = vmatprep.mubr.msk.f32.mxu1 %vm35065_vm0, %v35064_v7 }
0x2017   :  { %33417 = vmatprep.subr.mxu1 %v35064_v7  ;;  %33384 = vmatprep.mubr.msk.f32.mxu0 %vm35065_vm0, %v35064_v7 }
0x2018   :  { %33387 = vmatprep.subr.mxu0 %v35064_v7 }
0x201c   :  { %33415 = vmatmul.mubr.f32.vlgmr.msra.gmra.mrb[40].mxu1 %v20407_v52 }
0x201d   :  { %33418 = vmatpush3.xpose.msra.mxu1 %v20341_v21  ;;  %33385 = vmatmul.mubr.f32.vlgmr.msra.gmra.mrb[32].mxu0 %v19954_v54 }
0x201e   :  { %33388 = vmatpush3.xpose.msra.mxu0 %v19888_v3  ;;  %33419 = vmatprep.mubr.msk.f32.mxu1 %vm35065_vm0, %v35064_v7 }
0x201f   :  { %33422 = vmatprep.subr.mxu1 %v35064_v7  ;;  %33389 = vmatprep.mubr.msk.f32.mxu0 %vm35065_vm0, %v35064_v7 }
0x2020   :  { %33392 = vmatprep.subr.mxu0 %v35064_v7 }
0x2024   :  { %33420 = vmatmul.mubr.f32.vlgmr.msra.gmra.mrb[40].mxu1 %v20408_v26 }
0x2025   :  { %33423 = vmatpush3.xpose.msra.mxu1 %v20419_v20  ;;  %33390 = vmatmul.mubr.f32.vlgmr.msra.gmra.mrb[32].mxu0 %v19955_v6 }
0x2026   :  { %33393 = vmatpush3.xpose.msra.mxu0 %v19966_v63  ;;  %33424 = vmatprep.mubr.msk.f32.mxu1 %vm35065_vm0, %v35064_v7 }
0x2027   :  { %33427 = vmatprep.subr.mxu1 %v35064_v7  ;;  %33394 = vmatprep.mubr.msk.f32.mxu0 %vm35065_vm0, %v35064_v7 }
0x2028   :  { %33397 = vmatprep.subr.mxu0 %v35064_v7 }
0x202c   :  { %33425 = vmatmul.mubr.f32.vlgmr.msra.gmra.mrb[40].mxu1 %v36334_v41 }
0x202d   :  { %33428 = vmatpush3.xpose.msra.mxu1 %v20341_v21  ;;  %33395 = vmatmul.mubr.f32.vlgmr.msra.gmra.mrb[32].mxu0 %v36336_v43 }
0x202e   :  { %33398 = vmatpush3.xpose.msra.mxu0 %v19888_v3  ;;  %33429 = vmatprep.mubr.msk.f32.mxu1 %vm35065_vm0, %v35064_v7 }
0x202f   :  { %33399 = vmatprep.mubr.msk.f32.mxu0 %vm35065_vm0, %v35064_v7  ;;  %33462 = vmatprep.subr.mxu1 %v35064_v7 }
0x2030   :  { %33432 = vmatprep.subr.mxu0 %v35064_v7 }
0x2034   :  { %33430 = vmatmul.mubr.f32.vlgmr.msra.gmra.mrb[40].mxu1 %v36334_v41 }
0x2035   :  { %33400 = vmatmul.mubr.f32.vlgmr.msra.gmra.mrb[32].mxu0 %v36336_v43  ;;  %33464 = vmatprep.mubr.msk.f32.mxu1 %vm35065_vm0, %v35064_v7 }
0x2036   :  { %33434 = vmatprep.mubr.msk.f32.mxu0 %vm35065_vm0, %v35064_v7 }
0x2107   :  { %v20782_v16 = vpop.f32.mrb[40].mxu1 }
0x2108   :  { %v20787_v57 = vmul.f32 0.35355338, %v20782_v16  ;;  %v20329_v60 = vpop.f32.mrb[32].mxu0  ;;  %v33431_v42 = vpop.f32.mrb[41].mxu1 }
0x2109   :  { %v33401_v33 = vpop.f32.mrb[33].mxu0  ;;  %v20786_v13 = vmul.f32 0.35355338, %v20329_v60 }
0x210a   :  { %v20791_v27 = vsel %vm96_vm1, %v20787_v57, -inf }
0x210b   :  { %20792 = vmax.xlane.f32.xlu1 %v20791_v27  ;;  %v20788_v61 = vsel %vm96_vm1, %v20786_v13, -inf }
0x211c   :  { %21262 = vrot.lane.b32.xlu1 %v36321_v35, %s35067_s23 }
0x2120   :  { %22170 = vrot.lane.b32.xlu1 %v36321_v35, %s35068_s24 }
0x2144   :  { %20789 = vmax.xlane.f32.xlu1 %v20788_v61 }
0x2155   :  { %21714 = vrot.lane.b32.xlu1 %v36324_v37, %s35069_s25 }
0x2159   :  { %21716 = vrot.lane.b32.xlu1 %v36324_v37, %s35068_s24 }
0x2198   :  { %v20793_v24 = vpop.xlane.xlu1 %20792 }
0x2199   :  { %v20795_v39 = vsub.f32 %v20787_v57, %v20793_v24 }
0x219b   :  { %v20798_v4 = vmul.f32 1.442695, %v20795_v39 }
0x219c   :  { %v21263_v50 = vpop.permute.xlu1 %21262 }
0x219d   :  { %35022 = vpow2.f32 %v20798_v4  ;;  %v21269_v31 = vand.u32 4294901760, %v21263_v50 }
0x219f   :  { %33463 = vmatpush3.msra.mxu1 %v21269_v31  ;;  %v21346_v38 = vsub.f32 %v21263_v50, %v21269_v31 }
0x21a0   :  { %33467 = vmatprep.subr.mxu1 %v35064_v7  ;;  %v22171_v19 = vpop.permute.xlu1 %22170 }
0x21a1   :  { %v21347_v47 = vand.u32 4294901760, %v21346_v38  ;;  %v22174_v52 = vsel %vm96_vm1, %v22171_v19, 0 }
0x21a2   :  { %v36418_v26 = vand.u32 4294901760, %v22174_v52 }
0x21a3   :  { %v21348_v29 = vsub.f32 %v21346_v38, %v21347_v47 }
0x21a4   :  { %v22254_v48 = vsub.f32 %v22174_v52, %v36418_v26 }
0x21a5   :  { %v21349_v2 = vand.u32 4294901760, %v21348_v29 }
0x21a6   :  { %v22255_v45 = vand.u32 4294901760, %v22254_v48 }
0x21a7   :  { %v35023_v9 = vpop.eup %35022 }
0x21a8   :  { %v20803_v10 = vsel %vm96_vm1, %v35023_v9, 0.0  ;;  %v22256_v3 = vsub.f32 %v22254_v48, %v22255_v45 }
0x21a9   :  { %20804 = vadd.xlane.f32.xlu0 %v20803_v10 }
0x21aa   :  { %v22257_v1 = vand.u32 4294901760, %v22256_v3 }
0x21bf   :  { %22168 = vrot.lane.b32.xlu0 %v36321_v35, %s35069_s25 }
0x21d1   :  { %v20790_v11 = vpop.xlane.xlu1 %20789 }
0x21d2   :  { %v20794_v25 = vsub.f32 %v20786_v13, %v20790_v11 }
0x21d4   :  { %v20796_v12 = vmul.f32 1.442695, %v20794_v25 }
0x21d5   :  { %v21715_v33 = vpop.permute.xlu1 %21714 }
0x21d6   :  { %35024 = vpow2.f32 %v20796_v12  ;;  %v21718_v13 = vsel %vm96_vm1, %v21715_v33, 0 }
0x21d7   :  { %v21788_v24 = vand.u32 4294901760, %v21718_v13 }
0x21d9   :  { %v21717_v27 = vpop.permute.xlu1 %21716  ;;  %v21789_v4 = vsub.f32 %v21718_v13, %v21788_v24 }
0x21da   :  { %v21720_v61 = vsel %vm96_vm1, %v21717_v27, 0 }
0x21db   :  { %v21723_v39 = vand.u32 4294901760, %v21720_v61 }
0x21dd   :  { %v21800_v50 = vsub.f32 %v21720_v61, %v21723_v39 }
0x21e0   :  { %v35025_v17 = vpop.eup %35024 }
0x21e1   :  { %v20800_v23 = vsel %vm96_vm1, %v35025_v17, 0.0 }
0x21e2   :  { %20801 = vadd.xlane.f32.xlu0 %v20800_v23 }
0x21f8   :  { %20810 = vrot.lane.b32.xlu0 %v36324_v37, %s35067_s23 }
0x2236   :  { %v20805_v40 = vpop.xlane.xlu0 %20804 }
0x2237   :  { %35026 = vrcp.f32 %v20805_v40 }
0x223a   :  { %v22169_v41 = vpop.permute.xlu0 %22168 }
0x223b   :  { %v22172_v43 = vsel %vm96_vm1, %v22169_v41, 0 }
0x223c   :  { %v36415_v54 = vand.u32 4294901760, %v22172_v43 }
0x223e   :  { %v22243_v6 = vsub.f32 %v22172_v43, %v36415_v54 }
0x2240   :  { %v22244_v34 = vand.u32 4294901760, %v22243_v6 }
0x2241   :  { %v35027_v58 = vpop.eup %35026 }
0x2242   :  { %v20809_v15 = vmul.f32 %v35027_v58, %v35023_v9  ;;  %v22245_v0 = vsub.f32 %v22243_v6, %v22244_v34  ;;  %v21801_v9 = vand.u32 4294901760, %v21800_v50 }
0x2244   :  { %v21266_v59 = vsel %vm96_vm1, %v20809_v15, 0  ;;  %v22246_v44 = vand.u32 4294901760, %v22245_v0  ;;  %v21802_v19 = vsub.f32 %v21800_v50, %v21801_v9 }
0x2245   :  { %v21334_v18 = vand.u32 4294901760, %v21266_v59 }
0x2246   :  { %v21803_v25 = vand.u32 4294901760, %v21802_v19 }
0x2247   :  { %v21335_v14 = vsub.f32 %v21266_v59, %v21334_v18 }
0x2249   :  { %v21336_v32 = vand.u32 4294901760, %v21335_v14 }
0x224b   :  { %v21337_v36 = vsub.f32 %v21335_v14, %v21336_v32 }
0x224d   :  { %v21338_v62 = vand.u32 4294901760, %v21337_v36 }
0x224f   :  { %33465 = vmatmul.mubr.f32.vlgmr.msra.gmra.mrb[42].mxu1 %v21338_v62 }
0x2250   :  { %33468 = vmatpush3.msra.mxu1 %v21349_v2  ;;  %33469 = vmatprep.mubr.msk.f32.mxu1 %vm35065_vm0, %v35064_v7 }
0x2251   :  { %33472 = vmatprep.subr.mxu1 %v35064_v7 }
0x2257   :  { %33470 = vmatmul.mubr.f32.vlgmr.msra.gmra.mrb[42].mxu1 %v21334_v18 }
0x2258   :  { %33473 = vmatpush3.msra.mxu1 %v21346_v38  ;;  %33474 = vmatprep.mubr.msk.f32.mxu1 %vm35065_vm0, %v35064_v7 }
0x2259   :  { %33477 = vmatprep.subr.mxu1 %v35064_v7 }
0x225f   :  { %33475 = vmatmul.mubr.f32.vlgmr.msra.gmra.mrb[42].mxu1 %v21335_v14 }
0x2260   :  { %33478 = vmatpush3.msra.mxu1 %v21269_v31  ;;  %33479 = vmatprep.mubr.msk.f32.mxu1 %vm35065_vm0, %v35064_v7 }
0x2261   :  { %33482 = vmatprep.subr.mxu1 %v35064_v7 }
0x2267   :  { %33480 = vmatmul.mubr.f32.vlgmr.msra.gmra.mrb[42].mxu1 %v21336_v32 }
0x2268   :  { %33483 = vmatpush3.msra.mxu1 %v21347_v47  ;;  %33484 = vmatprep.mubr.msk.f32.mxu1 %vm35065_vm0, %v35064_v7 }
0x2269   :  { %33487 = vmatprep.subr.mxu1 %v35064_v7 }
0x226f   :  { %33485 = vmatmul.mubr.f32.vlgmr.msra.gmra.mrb[42].mxu1 %v21334_v18  ;;  %v20802_v22 = vpop.xlane.xlu0 %20801 }
0x2270   :  { %33488 = vmatpush3.msra.mxu1 %v21269_v31  ;;  %35028 = vrcp.f32 %v20802_v22  ;;  %33489 = vmatprep.mubr.msk.f32.mxu1 %vm35065_vm0, %v35064_v7  ;;  %v21790_v31 = vand.u32 4294901760, %v21789_v4 }
0x2271   :  { %33522 = vmatprep.subr.mxu1 %v35064_v7 }
0x2272   :  { %v21791_v10 = vsub.f32 %v21789_v4, %v21790_v31 }
0x2273   :  { %v20811_v21 = vpop.permute.xlu0 %20810 }
0x2274   :  { %v36425_v46 = vand.u32 4294901760, %v20811_v21  ;;  %v21792_v11 = vand.u32 4294901760, %v21791_v10 }
0x2276   :  { %33433 = vmatpush3.msra.mxu0 %v36425_v46  ;;  %v20894_v49 = vsub.f32 %v20811_v21, %v36425_v46 }
0x2277   :  { %33490 = vmatmul.mubr.f32.vlgmr.msra.gmra.mrb[42].mxu1 %v21334_v18  ;;  %33437 = vmatprep.subr.mxu0 %v35064_v7 }
0x2278   :  { %33523 = vmatpush3.xpose.msra.mxu1 %v36418_v26  ;;  %33524 = vmatprep.mubr.msk.f32.mxu1 %vm35065_vm0, %v35064_v7  ;;  %v20895_v55 = vand.u32 4294901760, %v20894_v49 }
0x2279   :  { %33527 = vmatprep.subr.mxu1 %v35064_v7 }
0x227a   :  { %v35029_v30 = vpop.eup %35028  ;;  %v20896_v16 = vsub.f32 %v20894_v49, %v20895_v55 }
0x227b   :  { %v20807_v20 = vmul.f32 %v35029_v30, %v35025_v17  ;;  %33525 = vmatmul.mubr.f32.vlgmr.msra.gmra.mrb[44].mxu1 %v22246_v44 }
0x227c   :  { %33528 = vmatpush3.xpose.msra.mxu1 %v22257_v1  ;;  %33529 = vmatprep.mubr.msk.f32.mxu1 %vm35065_vm0, %v35064_v7  ;;  %v20897_v42 = vand.u32 4294901760, %v20896_v16 }
0x227d   :  { %33532 = vmatprep.subr.mxu1 %v35064_v7  ;;  %v20814_v63 = vsel %vm96_vm1, %v20807_v20, 0 }
0x227e   :  { %v20882_v56 = vand.u32 4294901760, %v20814_v63 }
0x2280   :  { %v20883_v53 = vsub.f32 %v20814_v63, %v20882_v56 }
0x2282   :  { %v20884_v28 = vand.u32 4294901760, %v20883_v53 }
0x2283   :  { %33530 = vmatmul.mubr.f32.vlgmr.msra.gmra.mrb[44].mxu1 %v36415_v54 }
0x2284   :  { %33533 = vmatpush3.xpose.msra.mxu1 %v22254_v48  ;;  %v20885_v57 = vsub.f32 %v20883_v53, %v20884_v28  ;;  %33534 = vmatprep.mubr.msk.f32.mxu1 %vm35065_vm0, %v35064_v7 }
0x2285   :  { %33537 = vmatprep.subr.mxu1 %v35064_v7 }
0x2286   :  { %v20886_v60 = vand.u32 4294901760, %v20885_v57 }
0x2288   :  { %33435 = vmatmul.mubr.f32.vlgmr.msra.gmra.mrb[34].mxu0 %v20886_v60 }
0x2289   :  { %33438 = vmatpush3.msra.mxu0 %v20897_v42  ;;  %33439 = vmatprep.mubr.msk.f32.mxu0 %vm35065_vm0, %v35064_v7 }
0x228a   :  { %33442 = vmatprep.subr.mxu0 %v35064_v7 }
0x228b   :  { %33535 = vmatmul.mubr.f32.vlgmr.msra.gmra.mrb[44].mxu1 %v22243_v6 }
0x228c   :  { %33538 = vmatpush3.xpose.msra.mxu1 %v36418_v26  ;;  %33539 = vmatprep.mubr.msk.f32.mxu1 %vm35065_vm0, %v35064_v7 }
0x228d   :  { %33542 = vmatprep.subr.mxu1 %v35064_v7 }
0x2290   :  { %33440 = vmatmul.mubr.f32.vlgmr.msra.gmra.mrb[34].mxu0 %v20882_v56 }
0x2291   :  { %33443 = vmatpush3.msra.mxu0 %v20894_v49  ;;  %33444 = vmatprep.mubr.msk.f32.mxu0 %vm35065_vm0, %v35064_v7 }
0x2292   :  { %33447 = vmatprep.subr.mxu0 %v35064_v7 }
0x2293   :  { %33540 = vmatmul.mubr.f32.vlgmr.msra.gmra.mrb[44].mxu1 %v22244_v34 }
0x2294   :  { %33543 = vmatpush3.xpose.msra.mxu1 %v22255_v45  ;;  %33544 = vmatprep.mubr.msk.f32.mxu1 %vm35065_vm0, %v35064_v7 }
0x2295   :  { %33547 = vmatprep.subr.mxu1 %v35064_v7 }
0x2298   :  { %33445 = vmatmul.mubr.f32.vlgmr.msra.gmra.mrb[34].mxu0 %v20883_v53 }
0x2299   :  { %33448 = vmatpush3.msra.mxu0 %v36425_v46  ;;  %33449 = vmatprep.mubr.msk.f32.mxu0 %vm35065_vm0, %v35064_v7 }
0x229a   :  { %33452 = vmatprep.subr.mxu0 %v35064_v7 }
0x229b   :  { %33545 = vmatmul.mubr.f32.vlgmr.msra.gmra.mrb[44].mxu1 %v36415_v54 }
0x229c   :  { %33548 = vmatpush3.xpose.msra.mxu1 %v36418_v26  ;;  %33549 = vmatprep.mubr.msk.f32.mxu1 %vm35065_vm0, %v35064_v7 }
0x229d   :  { %33582 = vmatprep.subr.mxu1 %v35064_v7 }
0x22a0   :  { %33450 = vmatmul.mubr.f32.vlgmr.msra.gmra.mrb[34].mxu0 %v20884_v28 }
0x22a1   :  { %33453 = vmatpush3.msra.mxu0 %v20895_v55  ;;  %33454 = vmatprep.mubr.msk.f32.mxu0 %vm35065_vm0, %v35064_v7 }
0x22a2   :  { %33457 = vmatprep.subr.mxu0 %v35064_v7 }
0x22a3   :  { %33550 = vmatmul.mubr.f32.vlgmr.msra.gmra.mrb[44].mxu1 %v36415_v54 }
0x22a4   :  { %33584 = vmatprep.mubr.msk.f32.mxu1 %vm35065_vm0, %v35064_v7 }
0x22a8   :  { %33455 = vmatmul.mubr.f32.vlgmr.msra.gmra.mrb[34].mxu0 %v20882_v56 }
0x22a9   :  { %33458 = vmatpush3.msra.mxu0 %v36425_v46  ;;  %33459 = vmatprep.mubr.msk.f32.mxu0 %vm35065_vm0, %v35064_v7 }
0x22aa   :  { %33492 = vmatprep.subr.mxu0 %v35064_v7 }
0x22b0   :  { %33460 = vmatmul.mubr.f32.vlgmr.msra.gmra.mrb[34].mxu0 %v20882_v56 }
0x22b1   :  { %33493 = vmatpush3.xpose.msra.mxu0 %v21723_v39  ;;  %33494 = vmatprep.mubr.msk.f32.mxu0 %vm35065_vm0, %v35064_v7 }
0x22b2   :  { %33497 = vmatprep.subr.mxu0 %v35064_v7 }
0x22b4   :  { %33495 = vmatmul.mubr.f32.vlgmr.msra.gmra.mrb[36].mxu0 %v21792_v11 }
0x22b5   :  { %33498 = vmatpush3.xpose.msra.mxu0 %v21803_v25  ;;  %33499 = vmatprep.mubr.msk.f32.mxu0 %vm35065_vm0, %v35064_v7 }
0x22b6   :  { %33502 = vmatprep.subr.mxu0 %v35064_v7 }
0x22bc   :  { %33500 = vmatmul.mubr.f32.vlgmr.msra.gmra.mrb[36].mxu0 %v21788_v24 }
0x22bd   :  { %33503 = vmatpush3.xpose.msra.mxu0 %v21800_v50  ;;  %33504 = vmatprep.mubr.msk.f32.mxu0 %vm35065_vm0, %v35064_v7 }
0x22be   :  { %33507 = vmatprep.subr.mxu0 %v35064_v7 }
0x22c4   :  { %33505 = vmatmul.mubr.f32.vlgmr.msra.gmra.mrb[36].mxu0 %v21789_v4 }
0x22c5   :  { %33508 = vmatpush3.xpose.msra.mxu0 %v21723_v39  ;;  %33509 = vmatprep.mubr.msk.f32.mxu0 %vm35065_vm0, %v35064_v7 }
0x22c6   :  { %33512 = vmatprep.subr.mxu0 %v35064_v7 }
0x22cc   :  { %33510 = vmatmul.mubr.f32.vlgmr.msra.gmra.mrb[36].mxu0 %v21790_v31 }
0x22cd   :  { %33513 = vmatpush3.xpose.msra.mxu0 %v21801_v9  ;;  %33514 = vmatprep.mubr.msk.f32.mxu0 %vm35065_vm0, %v35064_v7 }
0x22ce   :  { %33517 = vmatprep.subr.mxu0 %v35064_v7 }
0x22d4   :  { %33515 = vmatmul.mubr.f32.vlgmr.msra.gmra.mrb[36].mxu0 %v21788_v24 }
0x22d5   :  { %33518 = vmatpush3.xpose.msra.mxu0 %v21723_v39  ;;  %33519 = vmatprep.mubr.msk.f32.mxu0 %vm35065_vm0, %v35064_v7 }
0x22d6   :  { %33552 = vmatprep.subr.mxu0 %v35064_v7 }
0x22dc   :  { %33520 = vmatmul.mubr.f32.vlgmr.msra.gmra.mrb[36].mxu0 %v21788_v24 }
0x22dd   :  { %33554 = vmatprep.mubr.msk.f32.mxu0 %vm35065_vm0, %v35064_v7 }
0x234a   :  { %v36496_v12 = vpop.f32.mrb[42].mxu1 }
0x234b   :  { %v33491_v17 = vpop.f32.mrb[43].mxu1 }
0x2376   :  { %v22618_v23 = vpop.f32.mrb[44].mxu1 }
0x2377   :  { %v22623_v40 = vmul.f32 0.35355338, %v22618_v23  ;;  %v33551_v58 = vpop.f32.mrb[45].mxu1 }
0x2379   :  { %v22627_v38 = vsel %vm96_vm1, %v22623_v40, -inf }
0x237a   :  { %22628 = vmax.xlane.f32.xlu0 %v22627_v38 }
0x2383   :  { %v36499_v15 = vpop.f32.mrb[34].mxu0 }
0x2384   :  { %v33461_v59 = vpop.f32.mrb[35].mxu0 }
0x2390   :  { %23098 = vrot.lane.b32.xlu0 %v36321_v35, %s35070_s26 }
0x2394   :  { %24542 = vrot.lane.b32.xlu0 %v36324_v37, %s35071_s27 }
0x2398   :  { %24994 = vrot.lane.b32.xlu0 %v36321_v35, %s35072_s28 }
0x239c   :  { %24996 = vrot.lane.b32.xlu0 %v36321_v35, %s35071_s27 }
0x23af   :  { %v22164_v18 = vpop.f32.mrb[36].mxu0 }
0x23b0   :  { %v33521_v47 = vpop.f32.mrb[37].mxu0  ;;  %v22622_v43 = vmul.f32 0.35355338, %v22164_v18 }
0x23b2   :  { %v22624_v52 = vsel %vm96_vm1, %v22622_v43, -inf }
0x2407   :  { %v22629_v14 = vpop.xlane.xlu0 %22628 }
0x2408   :  { %v22631_v32 = vsub.f32 %v22623_v40, %v22629_v14 }
0x240a   :  { %v22634_v29 = vmul.f32 1.442695, %v22631_v32 }
0x240b   :  { %v23099_v36 = vpop.permute.xlu0 %23098 }
0x240c   :  { %35030 = vpow2.f32 %v22634_v29  ;;  %v23105_v62 = vand.u32 4294901760, %v23099_v36 }
0x240e   :  { %33583 = vmatpush3.msra.mxu1 %v23105_v62  ;;  %v23182_v6 = vsub.f32 %v23099_v36, %v23105_v62 }
0x240f   :  { %33587 = vmatprep.subr.mxu1 %v35064_v7  ;;  %v24543_v20 = vpop.permute.xlu0 %24542 }
0x2410   :  { %v23183_v45 = vand.u32 4294901760, %v23182_v6  ;;  %v24546_v63 = vsel %vm96_vm1, %v24543_v20, 0  ;;  %v48_v20 = vld [vmem:[%s36914_s5 + $0x8] sm:$0xff] }
0x2411   :  { %v24549_v55 = vand.u32 4294901760, %v24546_v63 }
0x2412   :  { %v23184_v0 = vsub.f32 %v23182_v6, %v23183_v45 }
0x2413   :  { %v24626_v57 = vsub.f32 %v24546_v63, %v24549_v55  ;;  %v24995_v9 = vpop.permute.xlu0 %24994  ;;  %v36610_v63 = vand.u32 4294901760, %v48_v20 }
0x2414   :  { %v23185_v30 = vand.u32 4294901760, %v23184_v0  ;;  %v24998_v19 = vsel %vm96_vm1, %v24995_v9, 0 }
0x2415   :  { %v24627_v13 = vand.u32 4294901760, %v24626_v57  ;;  %v25068_v25 = vand.u32 4294901760, %v24998_v19 }
0x2416   :  { %v35031_v2 = vpop.eup %35030 }
0x2417   :  { %v22639_v41 = vsel %vm96_vm1, %v35031_v2, 0.0  ;;  %v24628_v24 = vsub.f32 %v24626_v57, %v24627_v13  ;;  %v24997_v10 = vpop.permute.xlu0 %24996  ;;  %v25069_v23 = vsub.f32 %v24998_v19, %v25068_v25 }
0x2418   :  { %22640 = vadd.xlane.f32.xlu1 %v22639_v41  ;;  %v25000_v11 = vsel %vm96_vm1, %v24997_v10, 0 }
0x2419   :  { %v24629_v50 = vand.u32 4294901760, %v24628_v24  ;;  %v25003_v17 = vand.u32 4294901760, %v25000_v11  ;;  %v25070_v58 = vand.u32 4294901760, %v25069_v23 }
0x241b   :  { %v25080_v40 = vsub.f32 %v25000_v11, %v25003_v17  ;;  %v25071_v59 = vsub.f32 %v25069_v23, %v25070_v58 }
0x241d   :  { %v25081_v38 = vand.u32 4294901760, %v25080_v40  ;;  %v25072_v47 = vand.u32 4294901760, %v25071_v59  ;;  %v24046_v59 = vsel %vm96_vm1, %v36499_v15, 0  ;;  %v24049_v15 = vsel %vm96_vm1, %v36496_v12, 0 }
0x241f   :  { %v25082_v18 = vsub.f32 %v25080_v40, %v25081_v38 }
0x2421   :  { %v25083_v14 = vand.u32 4294901760, %v25082_v18 }
0x2429   :  { %24540 = vrot.lane.b32.xlu1 %v36324_v37, %s35072_s28 }
0x244d   :  { %22625 = vmax.xlane.f32.xlu1 %v22624_v52 }
0x245e   :  { %22646 = vrot.lane.b32.xlu1 %v36324_v37, %s35070_s26 }
0x24a5   :  { %v22641_v54 = vpop.xlane.xlu1 %22640 }
0x24a6   :  { %35032 = vrcp.f32 %v22641_v54 }
0x24a9   :  { %v24541_v1 = vpop.permute.xlu1 %24540 }
0x24aa   :  { %v24544_v49 = vsel %vm96_vm1, %v24541_v1, 0 }
0x24ab   :  { %v24614_v56 = vand.u32 4294901760, %v24544_v49 }
0x24ad   :  { %v24615_v16 = vsub.f32 %v24544_v49, %v24614_v56 }
0x24af   :  { %v24616_v27 = vand.u32 4294901760, %v24615_v16 }
0x24b0   :  { %v35033_v26 = vpop.eup %35032 }
0x24b1   :  { %v22645_v48 = vmul.f32 %v35033_v26, %v35031_v2  ;;  %v24617_v61 = vsub.f32 %v24615_v16, %v24616_v27 }
0x24b3   :  { %v23102_v22 = vsel %vm96_vm1, %v22645_v48, 0  ;;  %v24618_v39 = vand.u32 4294901760, %v24617_v61 }
0x24b4   :  { %v23170_v34 = vand.u32 4294901760, %v23102_v22 }
0x24b6   :  { %v23171_v21 = vsub.f32 %v23102_v22, %v23170_v34 }
0x24b8   :  { %v23172_v46 = vand.u32 4294901760, %v23171_v21 }
0x24ba   :  { %v23173_v3 = vsub.f32 %v23171_v21, %v23172_v46 }
0x24bc   :  { %v23174_v44 = vand.u32 4294901760, %v23173_v3 }
0x24be   :  { %33585 = vmatmul.mubr.f32.vlgmr.msra.gmra.mrb[46].mxu1 %v23174_v44 }
0x24bf   :  { %33588 = vmatpush3.msra.mxu1 %v23185_v30  ;;  %33589 = vmatprep.mubr.msk.f32.mxu1 %vm35065_vm0, %v35064_v7 }
0x24c0   :  { %33592 = vmatprep.subr.mxu1 %v35064_v7 }
0x24c6   :  { %33590 = vmatmul.mubr.f32.vlgmr.msra.gmra.mrb[46].mxu1 %v23170_v34 }
0x24c7   :  { %33593 = vmatpush3.msra.mxu1 %v23182_v6  ;;  %33594 = vmatprep.mubr.msk.f32.mxu1 %vm35065_vm0, %v35064_v7 }
0x24c8   :  { %33597 = vmatprep.subr.mxu1 %v35064_v7 }
0x24ce   :  { %33595 = vmatmul.mubr.f32.vlgmr.msra.gmra.mrb[46].mxu1 %v23171_v21 }
0x24cf   :  { %33598 = vmatpush3.msra.mxu1 %v23105_v62  ;;  %33599 = vmatprep.mubr.msk.f32.mxu1 %vm35065_vm0, %v35064_v7 }
0x24d0   :  { %33602 = vmatprep.subr.mxu1 %v35064_v7 }
0x24d6   :  { %33600 = vmatmul.mubr.f32.vlgmr.msra.gmra.mrb[46].mxu1 %v23172_v46 }
0x24d7   :  { %33603 = vmatpush3.msra.mxu1 %v23183_v45  ;;  %33604 = vmatprep.mubr.msk.f32.mxu1 %vm35065_vm0, %v35064_v7 }
0x24d8   :  { %33607 = vmatprep.subr.mxu1 %v35064_v7 }
0x24da   :  { %v22626_v53 = vpop.xlane.xlu1 %22625 }
0x24db   :  { %v22630_v28 = vsub.f32 %v22622_v43, %v22626_v53 }
0x24dd   :  { %v22632_v60 = vmul.f32 1.442695, %v22630_v28 }
0x24de   :  { %33605 = vmatmul.mubr.f32.vlgmr.msra.gmra.mrb[46].mxu1 %v23170_v34  ;;  %v36531_v42 = vpop.permute.xlu1 %22646 }
0x24df   :  { %35034 = vpow2.f32 %v22632_v60  ;;  %33608 = vmatpush3.msra.mxu1 %v23105_v62  ;;  %v36534_v33 = vand.u32 4294901760, %v36531_v42  ;;  %33609 = vmatprep.mubr.msk.f32.mxu1 %vm35065_vm0, %v35064_v7 }
0x24e0   :  { %33672 = vmatprep.subr.mxu1 %v35064_v7 }
0x24e1   :  { %33553 = vmatpush3.msra.mxu0 %v36534_v33  ;;  %v22730_v36 = vsub.f32 %v36531_v42, %v36534_v33 }
0x24e2   :  { %33557 = vmatprep.subr.mxu0 %v35064_v7 }
0x24e3   :  { %v22731_v43 = vand.u32 4294901760, %v22730_v36 }
0x24e5   :  { %v22732_v26 = vsub.f32 %v22730_v36, %v22731_v43 }
0x24e6   :  { %33610 = vmatmul.mubr.f32.vlgmr.msra.gmra.mrb[46].mxu1 %v23170_v34 }
0x24e7   :  { %33673 = vmatpush3.xpose.msra.mxu1 %v24549_v55  ;;  %33674 = vmatprep.mubr.msk.f32.mxu1 %vm35065_vm0, %v35064_v7  ;;  %v22733_v22 = vand.u32 4294901760, %v22732_v26 }
0x24e8   :  { %33677 = vmatprep.subr.mxu1 %v35064_v7 }
0x24e9   :  { %v36544_v4 = vpop.eup %35034 }
0x24ea   :  { %33675 = vmatmul.mubr.f32.vlgmr.msra.gmra.mrb[48].mxu1 %v24618_v39  ;;  %v22636_v31 = vsel %vm96_vm1, %v36544_v4, 0.0 }
0x24eb   :  { %33678 = vmatpush3.xpose.msra.mxu1 %v24629_v50  ;;  %22637 = vadd.xlane.f32.xlu0 %v22636_v31 }
0x24ec   :  { %33679 = vmatprep.mubr.msk.f32.mxu1 %vm35065_vm0, %v35064_v7  ;;  %33682 = vmatprep.subr.mxu1 %v35064_v7 }
0x24f2   :  { %33680 = vmatmul.mubr.f32.vlgmr.msra.gmra.mrb[48].mxu1 %v24614_v56 }
0x24f3   :  { %33683 = vmatpush3.xpose.msra.mxu1 %v24626_v57  ;;  %33684 = vmatprep.mubr.msk.f32.mxu1 %vm35065_vm0, %v35064_v7 }
0x24f4   :  { %33687 = vmatprep.subr.mxu1 %v35064_v7 }
0x24fa   :  { %33685 = vmatmul.mubr.f32.vlgmr.msra.gmra.mrb[48].mxu1 %v24615_v16 }
0x24fb   :  { %33688 = vmatpush3.xpose.msra.mxu1 %v24549_v55  ;;  %33689 = vmatprep.mubr.msk.f32.mxu1 %vm35065_vm0, %v35064_v7 }
0x24fc   :  { %33692 = vmatprep.subr.mxu1 %v35064_v7 }
0x2502   :  { %33690 = vmatmul.mubr.f32.vlgmr.msra.gmra.mrb[48].mxu1 %v24616_v27 }
0x2503   :  { %33693 = vmatpush3.xpose.msra.mxu1 %v24627_v13  ;;  %33694 = vmatprep.mubr.msk.f32.mxu1 %vm35065_vm0, %v35064_v7 }
0x2504   :  { %33697 = vmatprep.subr.mxu1 %v35064_v7 }
0x250a   :  { %33695 = vmatmul.mubr.f32.vlgmr.msra.gmra.mrb[48].mxu1 %v24614_v56 }
0x250b   :  { %33698 = vmatpush3.xpose.msra.mxu1 %v24549_v55  ;;  %33699 = vmatprep.mubr.msk.f32.mxu1 %vm35065_vm0, %v35064_v7 }
0x250c   :  { %33702 = vmatprep.subr.mxu1 %v35064_v7 }
0x2512   :  { %33700 = vmatmul.mubr.f32.vlgmr.msra.gmra.mrb[48].mxu1 %v24614_v56  ;;  %v23644_v56 = vsub.f32 %v48_v20, %v36610_v63 }
0x2513   :  { %33703 = vmatpush3.xpose.msra.mxu1 %v25003_v17  ;;  %33704 = vmatprep.mubr.msk.f32.mxu1 %vm35065_vm0, %v35064_v7 }
0x2514   :  { %33707 = vmatprep.subr.mxu1 %v35064_v7  ;;  %v23645_v55 = vand.u32 4294901760, %v23644_v56 }
0x2516   :  { %33705 = vmatmul.mubr.f32.vlgmr.msra.gmra.mrb[50].mxu1 %v25072_v47  ;;  %v23646_v53 = vsub.f32 %v23644_v56, %v23645_v55  ;;  %v24117_v47 = vand.u32 4294901760, %v24046_v59 }
0x2517   :  { %33708 = vmatpush3.xpose.msra.mxu1 %v25083_v14  ;;  %33709 = vmatprep.mubr.msk.f32.mxu1 %vm35065_vm0, %v35064_v7 }
0x2518   :  { %33712 = vmatprep.subr.mxu1 %v35064_v7  ;;  %v23647_v28 = vand.u32 4294901760, %v23646_v53 }
0x251e   :  { %33710 = vmatmul.mubr.f32.vlgmr.msra.gmra.mrb[50].mxu1 %v25068_v25 }
0x251f   :  { %33713 = vmatpush3.xpose.msra.mxu1 %v25080_v40  ;;  %33714 = vmatprep.mubr.msk.f32.mxu1 %vm35065_vm0, %v35064_v7 }
0x2520   :  { %33717 = vmatprep.subr.mxu1 %v35064_v7 }
0x2526   :  { %33715 = vmatmul.mubr.f32.vlgmr.msra.gmra.mrb[50].mxu1 %v25069_v23 }
0x2527   :  { %33718 = vmatpush3.xpose.msra.mxu1 %v25003_v17  ;;  %33719 = vmatprep.mubr.msk.f32.mxu1 %vm35065_vm0, %v35064_v7 }
0x2528   :  { %33722 = vmatprep.subr.mxu1 %v35064_v7 }
0x252e   :  { %33720 = vmatmul.mubr.f32.vlgmr.msra.gmra.mrb[50].mxu1 %v25070_v58 }
0x252f   :  { %33723 = vmatpush3.xpose.msra.mxu1 %v25081_v38  ;;  %33724 = vmatprep.mubr.msk.f32.mxu1 %vm35065_vm0, %v35064_v7  ;;  %v47_v38 = vld [vmem:[%s36914_s5] sm:$0xff] }
0x2530   :  { %33727 = vmatprep.subr.mxu1 %v35064_v7  ;;  %v24052_v18 = vand.u32 4294901760, %v47_v38 }
0x2536   :  { %33725 = vmatmul.mubr.f32.vlgmr.msra.gmra.mrb[50].mxu1 %v25068_v25 }
0x2537   :  { %33728 = vmatpush3.xpose.msra.mxu1 %v25003_v17  ;;  %33729 = vmatprep.mubr.msk.f32.mxu1 %vm35065_vm0, %v35064_v7 }
0x2538   :  { %33762 = vmatprep.subr.mxu1 %v35064_v7 }
0x253e   :  { %33730 = vmatmul.mubr.f32.vlgmr.msra.gmra.mrb[50].mxu1 %v25068_v25 }
0x253f   :  { %33764 = vmatprep.mubr.msk.f32.mxu1 %vm35065_vm0, %v35064_v7 }
0x2578   :  { %v22638_v32 = vpop.xlane.xlu0 %22637 }
0x2579   :  { %35036 = vrcp.f32 %v22638_v32 }
0x2583   :  { %v35037_v29 = vpop.eup %35036 }
0x2584   :  { %v22643_v62 = vmul.f32 %v35037_v29, %v36544_v4  ;;  %v24139_v29 = vsub.f32 %v47_v38, %v24052_v18 }
0x2586   :  { %v22650_v2 = vsel %vm96_vm1, %v22643_v62, 0  ;;  %v24127_v62 = vand.u32 4294901760, %v24049_v15 }
0x2587   :  { %v22718_v41 = vand.u32 4294901760, %v22650_v2 }
0x2589   :  { %v22719_v52 = vsub.f32 %v22650_v2, %v22718_v41  ;;  %v24140_v2 = vand.u32 4294901760, %v24139_v29 }
0x258b   :  { %v22720_v54 = vand.u32 4294901760, %v22719_v52 }
0x258d   :  { %v22721_v6 = vsub.f32 %v22719_v52, %v22720_v54 }
0x258f   :  { %v22722_v48 = vand.u32 4294901760, %v22721_v6 }
0x2591   :  { %33555 = vmatmul.mubr.f32.vlgmr.msra.gmra.mrb[38].mxu0 %v22722_v48 }
0x2592   :  { %33558 = vmatpush3.msra.mxu0 %v22733_v22  ;;  %33559 = vmatprep.mubr.msk.f32.mxu0 %vm35065_vm0, %v35064_v7 }
0x2593   :  { %33562 = vmatprep.subr.mxu0 %v35064_v7 }
0x2599   :  { %33560 = vmatmul.mubr.f32.vlgmr.msra.gmra.mrb[38].mxu0 %v22718_v41 }
0x259a   :  { %33563 = vmatpush3.msra.mxu0 %v22730_v36  ;;  %33564 = vmatprep.mubr.msk.f32.mxu0 %vm35065_vm0, %v35064_v7  ;;  %v24118_v36 = vsub.f32 %v24046_v59, %v24117_v47 }
0x259b   :  { %33567 = vmatprep.subr.mxu0 %v35064_v7 }
0x25a1   :  { %33565 = vmatmul.mubr.f32.vlgmr.msra.gmra.mrb[38].mxu0 %v22719_v52  ;;  %v24141_v52 = vsub.f32 %v24139_v29, %v24140_v2 }
0x25a2   :  { %33568 = vmatpush3.msra.mxu0 %v36534_v33  ;;  %33569 = vmatprep.mubr.msk.f32.mxu0 %vm35065_vm0, %v35064_v7 }
0x25a3   :  { %33572 = vmatprep.subr.mxu0 %v35064_v7  ;;  %v24142_v6 = vand.u32 4294901760, %v24141_v52 }
0x25a9   :  { %33570 = vmatmul.mubr.f32.vlgmr.msra.gmra.mrb[38].mxu0 %v22720_v54 }
0x25aa   :  { %33573 = vmatpush3.msra.mxu0 %v22731_v43  ;;  %33574 = vmatprep.mubr.msk.f32.mxu0 %vm35065_vm0, %v35064_v7  ;;  %v24128_v43 = vsub.f32 %v24049_v15, %v24127_v62  ;;  %v49_v15 = vld [vmem:[%s36914_s5 + $0x10] sm:$0xff] }
0x25ab   :  { %33577 = vmatprep.subr.mxu0 %v35064_v7 }
0x25ac   :  { %v24129_v26 = vand.u32 4294901760, %v24128_v43 }
0x25ae   :  { %v24130_v22 = vsub.f32 %v24128_v43, %v24129_v26 }
0x25b0   :  { %v24131_v12 = vand.u32 4294901760, %v24130_v22 }
0x25b1   :  { %33575 = vmatmul.mubr.f32.vlgmr.msra.gmra.mrb[38].mxu0 %v22718_v41 }
0x25b2   :  { %33578 = vmatpush3.msra.mxu0 %v36534_v33  ;;  %33579 = vmatprep.mubr.msk.f32.mxu0 %vm35065_vm0, %v35064_v7 }
0x25b3   :  { %33612 = vmatprep.subr.mxu0 %v36610_v63 }
0x25b9   :  { %33580 = vmatmul.mubr.f32.vlgmr.msra.gmra.mrb[38].mxu0 %v22718_v41  ;;  %v23546_v34 = vpop.f32.mrb[46].mxu1  ;;  %v24119_v41 = vand.u32 4294901760, %v24118_v36 }
0x25ba   :  { %v33611_v45 = vpop.f32.mrb[47].mxu1  ;;  %33613 = vmatpush3.msra.mxu0 %v36610_v63  ;;  %v23554_v42 = vsel %vm96_vm1, %v23546_v34, 0 }
0x25bb   :  { %33617 = vmatprep.subr.mxu0 %v23647_v28  ;;  %v23632_v13 = vand.u32 4294901760, %v23554_v42  ;;  %v24120_v54 = vsub.f32 %v24118_v36, %v24119_v41 }
0x25bd   :  { %v23633_v61 = vsub.f32 %v23554_v42, %v23632_v13  ;;  %v24121_v48 = vand.u32 4294901760, %v24120_v54 }
0x25bf   :  { %v23634_v31 = vand.u32 4294901760, %v23633_v61 }
0x25c1   :  { %v23635_v19 = vsub.f32 %v23633_v61, %v23634_v31 }
0x25c3   :  { %v23636_v17 = vand.u32 4294901760, %v23635_v19 }
0x25e5   :  { %v24990_v21 = vpop.f32.mrb[48].mxu1 }
0x25e6   :  { %v25448_v46 = vmul.f32 0.35355338, %v24990_v21  ;;  %v33701_v0 = vpop.f32.mrb[49].mxu1 }
0x25e8   :  { %v25450_v3 = vsel %vm96_vm1, %v25448_v46, -inf }
0x25e9   :  { %25451 = vmax.xlane.f32.xlu0 %v25450_v3 }
0x2611   :  { %v25444_v44 = vpop.f32.mrb[50].mxu1 }
0x2612   :  { %v25449_v30 = vmul.f32 0.35355338, %v25444_v44  ;;  %v33731_v1 = vpop.f32.mrb[51].mxu1 }
0x2614   :  { %v25453_v49 = vsel %vm96_vm1, %v25449_v30, -inf }
0x2615   :  { %25454 = vmax.xlane.f32.xlu0 %v25453_v49 }
0x2676   :  { %v25452_v16 = vpop.xlane.xlu0 %25451 }
0x2677   :  { %v25456_v57 = vsub.f32 %v25448_v46, %v25452_v16 }
0x2679   :  { %v25458_v60 = vmul.f32 1.442695, %v25456_v57 }
0x267b   :  { %35038 = vpow2.f32 %v25458_v60 }
0x2685   :  { %v36616_v33 = vpop.eup %35038 }
0x2686   :  { %v25462_v27 = vsel %vm96_vm1, %v36616_v33, 0.0 }
0x2687   :  { %25463 = vadd.xlane.f32.xlu0 %v25462_v27 }
0x268c   :  { %v23094_v24 = vpop.f32.mrb[38].mxu0 }
0x268d   :  { %v23551_v39 = vsel %vm96_vm1, %v23094_v24, 0  ;;  %v33581_v4 = vpop.f32.mrb[39].mxu0 }
0x268e   :  { %v23622_v50 = vand.u32 4294901760, %v23551_v39 }
0x2690   :  { %v23623_v9 = vsub.f32 %v23551_v39, %v23622_v50 }
0x2692   :  { %v23624_v10 = vand.u32 4294901760, %v23623_v9 }
0x2694   :  { %v23625_v11 = vsub.f32 %v23623_v9, %v23624_v10 }
0x2696   :  { %v23626_v25 = vand.u32 4294901760, %v23625_v11 }
0x2698   :  { %33614 = vmatprep.mubr.f32.mxu0 %v23626_v25 }
0x2699   :  { %33615 = vmatmul.mubr.f32.vlgmr.msra.gmra.mrb[40].mxu0 %v23636_v17 }
0x269a   :  { %33619 = vmatprep.mubr.f32.mxu0 %v23622_v50  ;;  %33618 = vmatpush3.msra.mxu0 %v23647_v28 }
0x269b   :  { %33622 = vmatprep.subr.mxu0 %v23644_v56 }
0x269d   :  { %25472 = vrot.lane.b32.xlu0 %v36324_v37, %s35073_s12 }
0x26a1   :  { %25924 = vrot.lane.b32.xlu0 %v36321_v35, %s35073_s12  ;;  %33620 = vmatmul.mubr.f32.vlgmr.msra.gmra.mrb[40].mxu0 %v23632_v13 }
0x26a2   :  { %v25455_v23 = vpop.xlane.xlu0 %25454  ;;  %33624 = vmatprep.mubr.f32.mxu0 %v23623_v9  ;;  %33623 = vmatpush3.msra.mxu0 %v23644_v56 }
0x26a3   :  { %v25457_v40 = vsub.f32 %v25449_v30, %v25455_v23  ;;  %33627 = vmatprep.subr.mxu0 %v36610_v63 }
0x26a5   :  { %v25460_v58 = vmul.f32 1.442695, %v25457_v40  ;;  %26873 = vrot.lane.b32.xlu0 %v36324_v37, %s35074_s13 }
0x26a7   :  { %35040 = vpow2.f32 %v25460_v58 }
0x26a9   :  { %27327 = vrot.lane.b32.xlu0 %v36321_v35, %s35074_s13  ;;  %33625 = vmatmul.mubr.f32.vlgmr.msra.gmra.mrb[40].mxu0 %v23633_v61 }
0x26aa   :  { %33629 = vmatprep.mubr.f32.mxu0 %v23624_v10  ;;  %33628 = vmatpush3.msra.mxu0 %v36610_v63 }
0x26ab   :  { %33632 = vmatprep.subr.mxu0 %v23645_v55 }
0x26ad   :  { %26875 = vrot.lane.b32.xlu0 %v36324_v37, %s35075_s16 }
0x26b1   :  { %v36638_v14 = vpop.eup %35040  ;;  %33630 = vmatmul.mubr.f32.vlgmr.msra.gmra.mrb[40].mxu0 %v23634_v31 }
0x26b2   :  { %33634 = vmatprep.mubr.f32.mxu0 %v23622_v50  ;;  %v25465_v32 = vsel %vm96_vm1, %v36638_v14, 0.0  ;;  %33633 = vmatpush3.msra.mxu0 %v23645_v55 }
0x26b3   :  { %25466 = vadd.xlane.f32.xlu1 %v25465_v32  ;;  %33637 = vmatprep.subr.mxu0 %v36610_v63 }
0x26b9   :  { %33635 = vmatmul.mubr.f32.vlgmr.msra.gmra.mrb[40].mxu0 %v23632_v13 }
0x26ba   :  { %33639 = vmatprep.mubr.f32.mxu0 %v23622_v50  ;;  %33638 = vmatpush3.msra.mxu0 %v36610_v63 }
0x26bb   :  { %33642 = vmatprep.subr.mxu0 %v24052_v18 }
0x26c1   :  { %33640 = vmatmul.mubr.f32.vlgmr.msra.gmra.mrb[40].mxu0 %v23632_v13 }
0x26c2   :  { %33644 = vmatprep.mubr.f32.mxu0 %v24121_v48  ;;  %33643 = vmatpush3.msra.mxu0 %v24052_v18 }
0x26c3   :  { %33647 = vmatprep.subr.mxu0 %v24142_v6 }
0x26c4   :  { %27329 = vrot.lane.b32.xlu1 %v36321_v35, %s35075_s16 }
0x26c9   :  { %33645 = vmatmul.mubr.f32.vlgmr.msra.gmra.mrb[40].mxu0 %v24131_v12 }
0x26ca   :  { %33649 = vmatprep.mubr.f32.mxu0 %v24117_v47  ;;  %33648 = vmatpush3.msra.mxu0 %v24142_v6 }
0x26cb   :  { %33652 = vmatprep.subr.mxu0 %v24139_v29 }
0x26d1   :  { %33650 = vmatmul.mubr.f32.vlgmr.msra.gmra.mrb[40].mxu0 %v24127_v62 }
0x26d2   :  { %33654 = vmatprep.mubr.f32.mxu0 %v24118_v36  ;;  %33653 = vmatpush3.msra.mxu0 %v24139_v29  ;;  %v26383_v36 = vand.u32 4294901760, %v49_v15 }
0x26d3   :  { %33657 = vmatprep.subr.mxu0 %v24052_v18 }
0x26d9   :  { %33655 = vmatmul.mubr.f32.vlgmr.msra.gmra.mrb[40].mxu0 %v24128_v43 }
0x26da   :  { %33659 = vmatprep.mubr.f32.mxu0 %v24119_v41  ;;  %33658 = vmatpush3.msra.mxu0 %v24052_v18 }
0x26db   :  { %33662 = vmatprep.subr.mxu0 %v24140_v2 }
0x26e1   :  { %33660 = vmatmul.mubr.f32.vlgmr.msra.gmra.mrb[40].mxu0 %v24129_v26 }
0x26e2   :  { %33664 = vmatprep.mubr.f32.mxu0 %v24117_v47  ;;  %33663 = vmatpush3.msra.mxu0 %v24140_v2 }
0x26e3   :  { %33667 = vmatprep.subr.mxu0 %v24052_v18 }
0x26e9   :  { %33665 = vmatmul.mubr.f32.vlgmr.msra.gmra.mrb[40].mxu0 %v24127_v62 }
0x26ea   :  { %33669 = vmatprep.mubr.f32.mxu0 %v24117_v47  ;;  %33668 = vmatpush3.msra.mxu0 %v24052_v18 }
0x26eb   :  { %33732 = vmatprep.subr.mxu0 %v35064_v7 }
0x26f1   :  { %33670 = vmatmul.mubr.f32.vlgmr.msra.gmra.mrb[40].mxu0 %v24127_v62  ;;  %v26470_v62 = vsub.f32 %v49_v15, %v26383_v36 }
0x26f2   :  { %33734 = vmatprep.mubr.msk.f32.mxu0 %vm35065_vm0, %v35064_v7 }
0x26f3   :  { %v26471_v2 = vand.u32 4294901760, %v26470_v62 }
0x26f5   :  { %v26472_v41 = vsub.f32 %v26470_v62, %v26471_v2 }
0x26f7   :  { %v26473_v43 = vand.u32 4294901760, %v26472_v41 }
0x2714   :  { %v25464_v34 = vpop.xlane.xlu0 %25463 }
0x2715   :  { %35042 = vrcp.f32 %v25464_v34 }
0x2718   :  { %v25473_v45 = vpop.permute.xlu0 %25472 }
0x2719   :  { %v25479_v21 = vand.u32 4294901760, %v25473_v45 }
0x271b   :  { %33733 = vmatpush3.msra.mxu0 %v25479_v21  ;;  %v25556_v30 = vsub.f32 %v25473_v45, %v25479_v21 }
0x271c   :  { %v25925_v46 = vpop.permute.xlu0 %25924  ;;  %33737 = vmatprep.subr.mxu0 %v35064_v7 }
0x271d   :  { %v36652_v0 = vand.u32 4294901760, %v25925_v46  ;;  %v25557_v49 = vand.u32 4294901760, %v25556_v30 }
0x271f   :  { %v35043_v3 = vpop.eup %35042  ;;  %33763 = vmatpush3.msra.mxu1 %v36652_v0  ;;  %v25558_v55 = vsub.f32 %v25556_v30, %v25557_v49  ;;  %v26008_v42 = vsub.f32 %v25925_v46, %v36652_v0 }
0x2720   :  { %v25469_v44 = vmul.f32 %v35043_v3, %v36616_v33  ;;  %33767 = vmatprep.subr.mxu1 %v35064_v7  ;;  %v26874_v10 = vpop.permute.xlu0 %26873 }
0x2721   :  { %v25559_v16 = vand.u32 4294901760, %v25558_v55  ;;  %v26009_v61 = vand.u32 4294901760, %v26008_v42  ;;  %v26877_v25 = vsel %vm96_vm1, %v26874_v10, 0 }
0x2722   :  { %v25476_v1 = vsel %vm96_vm1, %v25469_v44, 0  ;;  %v26947_v23 = vand.u32 4294901760, %v26877_v25 }
0x2723   :  { %v25544_v20 = vand.u32 4294901760, %v25476_v1  ;;  %v26010_v4 = vsub.f32 %v26008_v42, %v26009_v61 }
0x2724   :  { %v36681_v19 = vpop.permute.xlu0 %27327  ;;  %v26948_v58 = vsub.f32 %v26877_v25, %v26947_v23 }
0x2725   :  { %v25545_v63 = vsub.f32 %v25476_v1, %v25544_v20  ;;  %v26011_v9 = vand.u32 4294901760, %v26010_v4 }
0x2726   :  { %v26949_v59 = vand.u32 4294901760, %v26948_v58 }
0x2727   :  { %v25546_v56 = vand.u32 4294901760, %v25545_v63 }
0x2728   :  { %v26876_v11 = vpop.permute.xlu0 %26875  ;;  %v26950_v47 = vsub.f32 %v26948_v58, %v26949_v59 }
0x2729   :  { %v25547_v53 = vsub.f32 %v25545_v63, %v25546_v56  ;;  %v26879_v17 = vsel %vm96_vm1, %v26876_v11, 0 }
0x272a   :  { %v26882_v40 = vand.u32 4294901760, %v26879_v17  ;;  %v26951_v32 = vand.u32 4294901760, %v26950_v47 }
0x272b   :  { %v25548_v28 = vand.u32 4294901760, %v25547_v53 }
0x272c   :  { %v26959_v38 = vsub.f32 %v26879_v17, %v26882_v40 }
0x272d   :  { %33735 = vmatmul.mubr.f32.vlgmr.msra.gmra.mrb[42].mxu0 %v25548_v28 }
0x272e   :  { %33738 = vmatpush3.msra.mxu0 %v25559_v16  ;;  %33739 = vmatprep.mubr.msk.f32.mxu0 %vm35065_vm0, %v35064_v7  ;;  %v26960_v18 = vand.u32 4294901760, %v26959_v38 }
0x272f   :  { %33742 = vmatprep.subr.mxu0 %v35064_v7 }
0x2735   :  { %33740 = vmatmul.mubr.f32.vlgmr.msra.gmra.mrb[42].mxu0 %v25544_v20 }
0x2736   :  { %33743 = vmatpush3.msra.mxu0 %v25556_v30  ;;  %33744 = vmatprep.mubr.msk.f32.mxu0 %vm35065_vm0, %v35064_v7 }
0x2737   :  { %33747 = vmatprep.subr.mxu0 %v35064_v7 }
0x273d   :  { %33745 = vmatmul.mubr.f32.vlgmr.msra.gmra.mrb[42].mxu0 %v25545_v63 }
0x273e   :  { %33748 = vmatpush3.msra.mxu0 %v25479_v21  ;;  %33749 = vmatprep.mubr.msk.f32.mxu0 %vm35065_vm0, %v35064_v7 }
0x273f   :  { %33752 = vmatprep.subr.mxu0 %v35064_v7 }
0x2740   :  { %v25467_v57 = vpop.xlane.xlu1 %25466 }
0x2741   :  { %35044 = vrcp.f32 %v25467_v57 }
0x2745   :  { %33750 = vmatmul.mubr.f32.vlgmr.msra.gmra.mrb[42].mxu0 %v25546_v56 }
0x2746   :  { %33753 = vmatpush3.msra.mxu0 %v25557_v49  ;;  %33754 = vmatprep.mubr.msk.f32.mxu0 %vm35065_vm0, %v35064_v7  ;;  %v27331_v49 = vsel %vm96_vm1, %v36681_v19, 0 }
0x2747   :  { %33757 = vmatprep.subr.mxu0 %v35064_v7  ;;  %v27401_v56 = vand.u32 4294901760, %v27331_v49 }
0x2749   :  { %v27402_v53 = vsub.f32 %v27331_v49, %v27401_v56  ;;  %v50_v49 = vld [vmem:[%s36914_s5 + $0x18] sm:$0xff] }
0x274b   :  { %v35045_v60 = vpop.eup %35044 }
0x274c   :  { %v25471_v33 = vmul.f32 %v35045_v60, %v36638_v14  ;;  %v26961_v14 = vsub.f32 %v26959_v38, %v26960_v18 }
0x274d   :  { %33755 = vmatmul.mubr.f32.vlgmr.msra.gmra.mrb[42].mxu0 %v25544_v20 }
0x274e   :  { %33758 = vmatpush3.msra.mxu0 %v25479_v21  ;;  %33759 = vmatprep.mubr.msk.f32.mxu0 %vm35065_vm0, %v35064_v7  ;;  %v25928_v27 = vsel %vm96_vm1, %v25471_v33, 0  ;;  %v26962_v29 = vand.u32 4294901760, %v26961_v14 }
0x274f   :  { %v25996_v13 = vand.u32 4294901760, %v25928_v27  ;;  %33792 = vmatprep.subr.mxu0 %v26383_v36 }
0x2751   :  { %v25997_v24 = vsub.f32 %v25928_v27, %v25996_v13 }
0x2753   :  { %v25998_v39 = vand.u32 4294901760, %v25997_v24 }
0x2755   :  { %33760 = vmatmul.mubr.f32.vlgmr.msra.gmra.mrb[42].mxu0 %v25544_v20  ;;  %v25999_v50 = vsub.f32 %v25997_v24, %v25998_v39  ;;  %v27330_v20 = vpop.permute.xlu1 %27329 }
0x2756   :  { %33793 = vmatpush3.msra.mxu0 %v26383_v36  ;;  %v27333_v63 = vsel %vm96_vm1, %v27330_v20, 0 }
0x2757   :  { %v26000_v31 = vand.u32 4294901760, %v25999_v50  ;;  %33797 = vmatprep.subr.mxu0 %v26473_v43  ;;  %v27336_v55 = vand.u32 4294901760, %v27333_v63 }
0x2759   :  { %33765 = vmatmul.mubr.f32.vlgmr.msra.gmra.mrb[52].mxu1 %v26000_v31  ;;  %v27413_v28 = vsub.f32 %v27333_v63, %v27336_v55  ;;  %v28716_v63 = vand.u32 4294901760, %v50_v49 }
0x275a   :  { %33768 = vmatpush3.msra.mxu1 %v26011_v9  ;;  %33769 = vmatprep.mubr.msk.f32.mxu1 %vm35065_vm0, %v35064_v7 }
0x275b   :  { %33772 = vmatprep.subr.mxu1 %v35064_v7  ;;  %v27414_v33 = vand.u32 4294901760, %v27413_v28 }
0x2761   :  { %33770 = vmatmul.mubr.f32.vlgmr.msra.gmra.mrb[52].mxu1 %v25996_v13 }
0x2762   :  { %33773 = vmatpush3.msra.mxu1 %v26008_v42  ;;  %33774 = vmatprep.mubr.msk.f32.mxu1 %vm35065_vm0, %v35064_v7  ;;  %v27403_v42 = vand.u32 4294901760, %v27402_v53 }
0x2763   :  { %33777 = vmatprep.subr.mxu1 %v35064_v7 }
0x2769   :  { %33775 = vmatmul.mubr.f32.vlgmr.msra.gmra.mrb[52].mxu1 %v25997_v24 }
0x276a   :  { %33778 = vmatpush3.msra.mxu1 %v36652_v0  ;;  %33779 = vmatprep.mubr.msk.f32.mxu1 %vm35065_vm0, %v35064_v7 }
0x276b   :  { %33782 = vmatprep.subr.mxu1 %v35064_v7 }
0x2771   :  { %33780 = vmatmul.mubr.f32.vlgmr.msra.gmra.mrb[52].mxu1 %v25998_v39 }
0x2772   :  { %33783 = vmatpush3.msra.mxu1 %v26009_v61  ;;  %33784 = vmatprep.mubr.msk.f32.mxu1 %vm35065_vm0, %v35064_v7  ;;  %v27415_v61 = vsub.f32 %v27413_v28, %v27414_v33 }
0x2773   :  { %33787 = vmatprep.subr.mxu1 %v35064_v7 }
0x2774   :  { %v27416_v39 = vand.u32 4294901760, %v27415_v61 }
0x2779   :  { %33785 = vmatmul.mubr.f32.vlgmr.msra.gmra.mrb[52].mxu1 %v25996_v13 }
0x277a   :  { %33788 = vmatpush3.msra.mxu1 %v36652_v0  ;;  %33789 = vmatprep.mubr.msk.f32.mxu1 %vm35065_vm0, %v35064_v7 }
0x277b   :  { %33822 = vmatprep.subr.mxu1 %v35064_v7 }
0x2781   :  { %33790 = vmatmul.mubr.f32.vlgmr.msra.gmra.mrb[52].mxu1 %v25996_v13  ;;  %v27404_v13 = vsub.f32 %v27402_v53, %v27403_v42 }
0x2782   :  { %33823 = vmatpush3.xpose.msra.mxu1 %v26882_v40  ;;  %33824 = vmatprep.mubr.msk.f32.mxu1 %vm35065_vm0, %v35064_v7 }
0x2783   :  { %33827 = vmatprep.subr.mxu1 %v35064_v7  ;;  %v27405_v24 = vand.u32 4294901760, %v27404_v13 }
0x2785   :  { %33825 = vmatmul.mubr.f32.vlgmr.msra.gmra.mrb[54].mxu1 %v26951_v32 }
0x2786   :  { %33828 = vmatpush3.xpose.msra.mxu1 %v26962_v29  ;;  %33829 = vmatprep.mubr.msk.f32.mxu1 %vm35065_vm0, %v35064_v7 }
0x2787   :  { %33832 = vmatprep.subr.mxu1 %v35064_v7 }
0x278d   :  { %33830 = vmatmul.mubr.f32.vlgmr.msra.gmra.mrb[54].mxu1 %v26947_v23 }
0x278e   :  { %33833 = vmatpush3.xpose.msra.mxu1 %v26959_v38  ;;  %33834 = vmatprep.mubr.msk.f32.mxu1 %vm35065_vm0, %v35064_v7 }
0x278f   :  { %33837 = vmatprep.subr.mxu1 %v35064_v7 }
0x2795   :  { %33835 = vmatmul.mubr.f32.vlgmr.msra.gmra.mrb[54].mxu1 %v26948_v58 }
0x2796   :  { %33838 = vmatpush3.xpose.msra.mxu1 %v26882_v40  ;;  %33839 = vmatprep.mubr.msk.f32.mxu1 %vm35065_vm0, %v35064_v7 }
0x2797   :  { %33842 = vmatprep.subr.mxu1 %v35064_v7 }
0x279d   :  { %33840 = vmatmul.mubr.f32.vlgmr.msra.gmra.mrb[54].mxu1 %v26949_v59 }
0x279e   :  { %33843 = vmatpush3.xpose.msra.mxu1 %v26960_v18  ;;  %33844 = vmatprep.mubr.msk.f32.mxu1 %vm35065_vm0, %v35064_v7 }
0x279f   :  { %33847 = vmatprep.subr.mxu1 %v35064_v7 }
0x27a5   :  { %33845 = vmatmul.mubr.f32.vlgmr.msra.gmra.mrb[54].mxu1 %v26947_v23 }
0x27a6   :  { %33848 = vmatpush3.xpose.msra.mxu1 %v26882_v40  ;;  %33849 = vmatprep.mubr.msk.f32.mxu1 %vm35065_vm0, %v35064_v7 }
0x27a7   :  { %33882 = vmatprep.subr.mxu1 %v35064_v7 }
0x27ad   :  { %33850 = vmatmul.mubr.f32.vlgmr.msra.gmra.mrb[54].mxu1 %v26947_v23 }
0x27ae   :  { %33884 = vmatprep.mubr.msk.f32.mxu1 %vm35065_vm0, %v35064_v7 }
0x2828   :  { %v25920_v52 = vpop.f32.mrb[42].mxu0 }
0x2829   :  { %v26377_v54 = vsel %vm96_vm1, %v25920_v52, 0  ;;  %v33761_v26 = vpop.f32.mrb[43].mxu0 }
0x282a   :  { %v26448_v6 = vand.u32 4294901760, %v26377_v54 }
0x282c   :  { %v26449_v48 = vsub.f32 %v26377_v54, %v26448_v6 }
0x282e   :  { %v26450_v22 = vand.u32 4294901760, %v26449_v48 }
0x2830   :  { %v26451_v12 = vsub.f32 %v26449_v48, %v26450_v22 }
0x2832   :  { %v26452_v34 = vand.u32 4294901760, %v26451_v12 }
0x2834   :  { %33794 = vmatprep.mubr.f32.mxu0 %v26452_v34 }
0x2854   :  { %v26372_v45 = vpop.f32.mrb[52].mxu1 }
0x2855   :  { %v26380_v21 = vsel %vm96_vm1, %v26372_v45, 0  ;;  %v33791_v46 = vpop.f32.mrb[53].mxu1 }
0x2856   :  { %v26458_v0 = vand.u32 4294901760, %v26380_v21 }
0x2858   :  { %v26459_v3 = vsub.f32 %v26380_v21, %v26458_v0 }
0x285a   :  { %v26460_v44 = vand.u32 4294901760, %v26459_v3 }
0x285c   :  { %v26461_v30 = vsub.f32 %v26459_v3, %v26460_v44 }
0x285e   :  { %v26462_v1 = vand.u32 4294901760, %v26461_v30 }
0x2860   :  { %33795 = vmatmul.mubr.f32.vlgmr.msra.gmra.mrb[40].mxu0 %v26462_v1 }
0x2861   :  { %33799 = vmatprep.mubr.f32.mxu0 %v26448_v6  ;;  %33798 = vmatpush3.msra.mxu0 %v26473_v43 }
0x2862   :  { %33802 = vmatprep.subr.mxu0 %v26470_v62 }
0x2868   :  { %33800 = vmatmul.mubr.f32.vlgmr.msra.gmra.mrb[40].mxu0 %v26458_v0 }
0x2869   :  { %33804 = vmatprep.mubr.f32.mxu0 %v26449_v48  ;;  %33803 = vmatpush3.msra.mxu0 %v26470_v62 }
0x286a   :  { %33807 = vmatprep.subr.mxu0 %v26383_v36 }
0x2870   :  { %33805 = vmatmul.mubr.f32.vlgmr.msra.gmra.mrb[40].mxu0 %v26459_v3 }
0x2871   :  { %33809 = vmatprep.mubr.f32.mxu0 %v26450_v22  ;;  %33808 = vmatpush3.msra.mxu0 %v26383_v36 }
0x2872   :  { %33812 = vmatprep.subr.mxu0 %v26471_v2 }
0x2878   :  { %33810 = vmatmul.mubr.f32.vlgmr.msra.gmra.mrb[40].mxu0 %v26460_v44 }
0x2879   :  { %33814 = vmatprep.mubr.f32.mxu0 %v26448_v6  ;;  %33813 = vmatpush3.msra.mxu0 %v26471_v2 }
0x287a   :  { %33817 = vmatprep.subr.mxu0 %v26383_v36 }
0x2880   :  { %33815 = vmatmul.mubr.f32.vlgmr.msra.gmra.mrb[40].mxu0 %v26458_v0  ;;  %v27323_v16 = vpop.f32.mrb[54].mxu1 }
0x2881   :  { %v27781_v57 = vmul.f32 0.35355338, %v27323_v16  ;;  %33818 = vmatpush3.msra.mxu0 %v26383_v36  ;;  %33819 = vmatprep.mubr.f32.mxu0 %v26448_v6  ;;  %v33851_v60 = vpop.f32.mrb[55].mxu1 }
0x2882   :  { %33852 = vmatprep.subr.mxu0 %v35064_v7 }
0x2883   :  { %v27783_v27 = vsel %vm96_vm1, %v27781_v57, -inf }
0x2884   :  { %27784 = vmax.xlane.f32.xlu0 %v27783_v27 }
0x2888   :  { %33820 = vmatmul.mubr.f32.vlgmr.msra.gmra.mrb[40].mxu0 %v26458_v0 }
0x2889   :  { %33853 = vmatpush3.xpose.msra.mxu0 %v27336_v55  ;;  %33854 = vmatprep.mubr.msk.f32.mxu0 %vm35065_vm0, %v35064_v7 }
0x288a   :  { %33857 = vmatprep.subr.mxu0 %v35064_v7 }
0x288c   :  { %33855 = vmatmul.mubr.f32.vlgmr.msra.gmra.mrb[44].mxu0 %v27405_v24 }
0x288d   :  { %33858 = vmatpush3.xpose.msra.mxu0 %v27416_v39  ;;  %33859 = vmatprep.mubr.msk.f32.mxu0 %vm35065_vm0, %v35064_v7 }
0x288e   :  { %33862 = vmatprep.subr.mxu0 %v35064_v7 }
0x2894   :  { %33860 = vmatmul.mubr.f32.vlgmr.msra.gmra.mrb[44].mxu0 %v27401_v56 }
0x2895   :  { %33863 = vmatpush3.xpose.msra.mxu0 %v27413_v28  ;;  %33864 = vmatprep.mubr.msk.f32.mxu0 %vm35065_vm0, %v35064_v7 }
0x2896   :  { %33867 = vmatprep.subr.mxu0 %v35064_v7 }
0x289c   :  { %33865 = vmatmul.mubr.f32.vlgmr.msra.gmra.mrb[44].mxu0 %v27402_v53 }
0x289d   :  { %33868 = vmatpush3.xpose.msra.mxu0 %v27336_v55  ;;  %33869 = vmatprep.mubr.msk.f32.mxu0 %vm35065_vm0, %v35064_v7 }
0x289e   :  { %33872 = vmatprep.subr.mxu0 %v35064_v7 }
0x28a4   :  { %33870 = vmatmul.mubr.f32.vlgmr.msra.gmra.mrb[44].mxu0 %v27403_v42 }
0x28a5   :  { %33873 = vmatpush3.xpose.msra.mxu0 %v27414_v33  ;;  %33874 = vmatprep.mubr.msk.f32.mxu0 %vm35065_vm0, %v35064_v7 }
0x28a6   :  { %33877 = vmatprep.subr.mxu0 %v35064_v7 }
0x28ac   :  { %33875 = vmatmul.mubr.f32.vlgmr.msra.gmra.mrb[44].mxu0 %v27401_v56 }
0x28ad   :  { %33878 = vmatpush3.xpose.msra.mxu0 %v27336_v55  ;;  %33879 = vmatprep.mubr.msk.f32.mxu0 %vm35065_vm0, %v35064_v7 }
0x28ae   :  { %33912 = vmatprep.subr.mxu0 %v35064_v7 }
0x28b4   :  { %33880 = vmatmul.mubr.f32.vlgmr.msra.gmra.mrb[44].mxu0 %v27401_v56  ;;  %v28803_v56 = vsub.f32 %v50_v49, %v28716_v63 }
0x28b5   :  { %33914 = vmatprep.mubr.msk.f32.mxu0 %vm35065_vm0, %v35064_v7 }
0x28b6   :  { %v28804_v55 = vand.u32 4294901760, %v28803_v56 }
0x28b8   :  { %v28805_v53 = vsub.f32 %v28803_v56, %v28804_v55 }
0x28ba   :  { %v28806_v28 = vand.u32 4294901760, %v28805_v53 }
0x2911   :  { %v27785_v4 = vpop.xlane.xlu0 %27784 }
0x2912   :  { %v27789_v50 = vsub.f32 %v27781_v57, %v27785_v4 }
0x2914   :  { %v27791_v31 = vmul.f32 1.442695, %v27789_v50 }
0x2916   :  { %35046 = vpow2.f32 %v27791_v31 }
0x2920   :  { %v35047_v9 = vpop.eup %35046 }
0x2921   :  { %v27795_v10 = vsel %vm96_vm1, %v35047_v9, 0.0 }
0x2922   :  { %27796 = vadd.xlane.f32.xlu0 %v27795_v10 }
0x2987   :  { %v27777_v19 = vpop.f32.mrb[44].mxu0 }
0x2988   :  { %v27782_v11 = vmul.f32 0.35355338, %v27777_v19  ;;  %v33881_v25 = vpop.f32.mrb[45].mxu0 }
0x298a   :  { %v27786_v17 = vsel %vm96_vm1, %v27782_v11, -inf }
0x298b   :  { %27787 = vmax.xlane.f32.xlu1 %v27786_v17 }
0x299c   :  { %28257 = vrot.lane.b32.xlu1 %v36321_v35, %s35076_s19 }
0x29af   :  { %v27797_v14 = vpop.xlane.xlu0 %27796 }
0x2a18   :  { %v27788_v23 = vpop.xlane.xlu1 %27787 }
0x2a19   :  { %v27790_v40 = vsub.f32 %v27782_v11, %v27788_v23  ;;  %v52_v11 = vld [vmem:[%s36915_s7] sm:$0x7] }
0x2a1a   :  { %v29208_v25 = vmul.f32 2.0, %v52_v11 }
0x2a1b   :  { %v27793_v58 = vmul.f32 1.442695, %v27790_v40 }
0x2a1c   :  { %v28258_v38 = vpop.permute.xlu1 %28257  ;;  %v29212_v17 = vrot.slane %v29208_v25, %v35147_v5 }
0x2a1d   :  { %35048 = vpow2.f32 %v27793_v58  ;;  %v36750_v59 = vand.u32 4294901760, %v28258_v38 }
0x2a1e   :  { %35050 = vrcp.f32 %v27797_v14 }
0x2a1f   :  { %33913 = vmatpush3.msra.mxu0 %v36750_v59  ;;  %v28341_v22 = vsub.f32 %v28258_v38, %v36750_v59 }
0x2a20   :  { %33917 = vmatprep.subr.mxu0 %v35064_v7 }
0x2a21   :  { %v28342_v46 = vand.u32 4294901760, %v28341_v22 }
0x2a23   :  { %v28343_v44 = vsub.f32 %v28341_v22, %v28342_v46 }
0x2a25   :  { %v28344_v20 = vand.u32 4294901760, %v28343_v44 }
0x2a27   :  { %v35049_v18 = vpop.eup %35048 }
0x2a28   :  { %v27798_v47 = vsel %vm96_vm1, %v35049_v18, 0.0  ;;  %v35051_v35 = vpop.eup %35050 }
0x2a29   :  { %27799 = vadd.xlane.f32.xlu0 %v27798_v47  ;;  %v27802_v32 = vmul.f32 %v35051_v35, %v35047_v9 }
0x2a2b   :  { %v27809_v29 = vsel %vm96_vm1, %v27802_v32, 0 }
0x2a2c   :  { %v27877_v15 = vand.u32 4294901760, %v27809_v29 }
0x2a2e   :  { %v27878_v36 = vsub.f32 %v27809_v29, %v27877_v15 }
0x2a30   :  { %v27879_v62 = vand.u32 4294901760, %v27878_v36 }
0x2a32   :  { %v27880_v41 = vsub.f32 %v27878_v36, %v27879_v62 }
0x2a34   :  { %v27881_v54 = vand.u32 4294901760, %v27880_v41 }
0x2a3f   :  { %27805 = vrot.lane.b32.xlu0 %v36324_v37, %s35076_s19 }
0x2ab6   :  { %v27800_v2 = vpop.xlane.xlu0 %27799 }
0x2ab7   :  { %35052 = vrcp.f32 %v27800_v2 }
0x2aba   :  { %v27806_v43 = vpop.permute.xlu0 %27805 }
0x2abb   :  { %v27812_v52 = vand.u32 4294901760, %v27806_v43 }
0x2abd   :  { %v27889_v26 = vsub.f32 %v27806_v43, %v27812_v52  ;;  %33883 = vmatpush3.msra.mxu1 %v27812_v52 }
0x2abe   :  { %33885 = vmatmul.mubr.f32.vlgmr.msra.gmra.mrb[56].mxu1 %v27881_v54  ;;  %33887 = vmatprep.subr.mxu1 %v35064_v7 }
0x2abf   :  { %v27890_v37 = vand.u32 4294901760, %v27889_v26  ;;  %33889 = vmatprep.mubr.msk.f32.mxu1 %vm35065_vm0, %v35064_v7 }
0x2ac1   :  { %v35053_v6 = vpop.eup %35052  ;;  %v27891_v48 = vsub.f32 %v27889_v26, %v27890_v37 }
0x2ac2   :  { %v27804_v12 = vmul.f32 %v35053_v6, %v35049_v18 }
0x2ac3   :  { %v27892_v34 = vand.u32 4294901760, %v27891_v48 }
0x2ac4   :  { %v28261_v45 = vsel %vm96_vm1, %v27804_v12, 0  ;;  %v29254_v12 = vld [vmem:[%s36916_s1] sm:$0x3] }
0x2ac5   :  { %33888 = vmatpush3.msra.mxu1 %v27892_v34  ;;  %v28329_v21 = vand.u32 4294901760, %v28261_v45  ;;  %v29257_v34 = vsel %vm29255_vm3, %v29254_v12, 0 }
0x2ac6   :  { %33890 = vmatmul.mubr.f32.vlgmr.msra.gmra.mrb[56].mxu1 %v27877_v15  ;;  %33892 = vmatprep.subr.mxu1 %v35064_v7 }
0x2ac7   :  { %33893 = vmatpush3.msra.mxu1 %v27889_v26  ;;  %33894 = vmatprep.mubr.msk.f32.mxu1 %vm35065_vm0, %v35064_v7  ;;  %v28330_v0 = vsub.f32 %v28261_v45, %v28329_v21  ;;  %v29326_v45 = vand.u32 4294901760, %v29257_v34 }
0x2ac8   :  { %33897 = vmatprep.subr.mxu1 %v35064_v7 }
0x2ac9   :  { %v28331_v3 = vand.u32 4294901760, %v28330_v0  ;;  %v29327_v44 = vsub.f32 %v29257_v34, %v29326_v45 }
0x2acb   :  { %v28332_v30 = vsub.f32 %v28330_v0, %v28331_v3 }
0x2acd   :  { %v28333_v1 = vand.u32 4294901760, %v28332_v30 }
0x2ace   :  { %33895 = vmatmul.mubr.f32.vlgmr.msra.gmra.mrb[56].mxu1 %v27878_v36 }
0x2acf   :  { %33898 = vmatpush3.msra.mxu1 %v27812_v52  ;;  %33915 = vmatmul.mubr.f32.vlgmr.msra.gmra.mrb[46].mxu0 %v28333_v1 }
0x2ad0   :  { %33918 = vmatpush3.msra.mxu0 %v28344_v20  ;;  %33899 = vmatprep.mubr.msk.f32.mxu1 %vm35065_vm0, %v35064_v7 }
0x2ad1   :  { %33902 = vmatprep.subr.mxu1 %v35064_v7  ;;  %33919 = vmatprep.mubr.msk.f32.mxu0 %vm35065_vm0, %v35064_v7 }
0x2ad2   :  { %33922 = vmatprep.subr.mxu0 %v35064_v7 }
0x2ad6   :  { %33900 = vmatmul.mubr.f32.vlgmr.msra.gmra.mrb[56].mxu1 %v27879_v62 }
0x2ad7   :  { %33903 = vmatpush3.msra.mxu1 %v27890_v37  ;;  %33920 = vmatmul.mubr.f32.vlgmr.msra.gmra.mrb[46].mxu0 %v28329_v21 }
0x2ad8   :  { %33923 = vmatpush3.msra.mxu0 %v28341_v22  ;;  %33904 = vmatprep.mubr.msk.f32.mxu1 %vm35065_vm0, %v35064_v7 }
0x2ad9   :  { %33907 = vmatprep.subr.mxu1 %v35064_v7  ;;  %33924 = vmatprep.mubr.msk.f32.mxu0 %vm35065_vm0, %v35064_v7 }
0x2ada   :  { %33927 = vmatprep.subr.mxu0 %v35064_v7 }
0x2ade   :  { %33905 = vmatmul.mubr.f32.vlgmr.msra.gmra.mrb[56].mxu1 %v27877_v15 }
0x2adf   :  { %33908 = vmatpush3.msra.mxu1 %v27812_v52  ;;  %33925 = vmatmul.mubr.f32.vlgmr.msra.gmra.mrb[46].mxu0 %v28330_v0  ;;  %v35077_v52 = vmov 0.0|0.0   ;;  %v29251_v0 = vrot.slane %v52_v11, %v35752_v51 }
0x2ae0   :  { %33928 = vmatpush3.msra.mxu0 %v36750_v59  ;;  %33909 = vmatprep.mubr.msk.f32.mxu1 %vm35065_vm0, %v35064_v7 }
0x2ae1   :  { %33929 = vmatprep.mubr.msk.f32.mxu0 %vm35065_vm0, %v35064_v7  ;;  %33932 = vmatprep.subr.mxu0 %v35064_v7 }
0x2ae2   :  { %34212 = vmatprep.subr.bf16.mxu1 %v35077_v52 }
0x2ae6   :  { %33910 = vmatmul.mubr.f32.vlgmr.msra.gmra.mrb[56].mxu1 %v27877_v15 }
0x2ae7   :  { %33930 = vmatmul.mubr.f32.vlgmr.msra.gmra.mrb[46].mxu0 %v28331_v3  ;;  %33976 = vmatprep.mubr.msk.f32.mxu1 %vm35065_vm0, %v35064_v7 }
0x2ae8   :  { %33933 = vmatpush3.msra.mxu0 %v28342_v46  ;;  %33934 = vmatprep.mubr.msk.f32.mxu0 %vm35065_vm0, %v35064_v7 }
0x2ae9   :  { %33937 = vmatprep.subr.mxu0 %v35064_v7 }
0x2aef   :  { %33935 = vmatmul.mubr.f32.vlgmr.msra.gmra.mrb[46].mxu0 %v28329_v21 }
0x2af0   :  { %33938 = vmatpush3.msra.mxu0 %v36750_v59  ;;  %33939 = vmatprep.mubr.msk.f32.mxu0 %vm35065_vm0, %v35064_v7 }
0x2af1   :  { %33942 = vmatprep.subr.mxu0 %v28716_v63 }
0x2af7   :  { %33940 = vmatmul.mubr.f32.vlgmr.msra.gmra.mrb[46].mxu0 %v28329_v21  ;;  %v29245_v21 = vrot.slane %v52_v11, %v35155_v8 }
0x2af8   :  { %33943 = vmatpush3.msra.mxu0 %v28716_v63 }
0x2af9   :  { %33947 = vmatprep.subr.mxu0 %v28806_v28 }
0x2bb9   :  { %v28253_v16 = vpop.f32.mrb[56].mxu1 }
0x2bba   :  { %v28710_v57 = vsel %vm96_vm1, %v28253_v16, 0  ;;  %v33911_v60 = vpop.f32.mrb[57].mxu1 }
0x2bbb   :  { %v28781_v42 = vand.u32 4294901760, %v28710_v57 }
0x2bbd   :  { %v28782_v33 = vsub.f32 %v28710_v57, %v28781_v42 }
0x2bbf   :  { %v28783_v27 = vand.u32 4294901760, %v28782_v33 }
0x2bc1   :  { %v28784_v13 = vsub.f32 %v28782_v33, %v28783_v27 }
0x2bc3   :  { %v28785_v61 = vand.u32 4294901760, %v28784_v13 }
0x2bc5   :  { %33944 = vmatprep.mubr.f32.mxu0 %v28785_v61 }
0x2bca   :  { %v28705_v24 = vpop.f32.mrb[46].mxu0 }
0x2bcb   :  { %v28713_v39 = vsel %vm96_vm1, %v28705_v24, 0  ;;  %v33941_v4 = vpop.f32.mrb[47].mxu0 }
0x2bcc   :  { %v28791_v50 = vand.u32 4294901760, %v28713_v39 }
0x2bce   :  { %v28792_v31 = vsub.f32 %v28713_v39, %v28791_v50 }
0x2bd0   :  { %v28793_v9 = vand.u32 4294901760, %v28792_v31 }
0x2bd2   :  { %v28794_v10 = vsub.f32 %v28792_v31, %v28793_v9 }
0x2bd4   :  { %v28795_v19 = vand.u32 4294901760, %v28794_v10 }
0x2bd6   :  { %33945 = vmatmul.mubr.f32.vlgmr.msra.gmra.mrb[40].mxu0 %v28795_v19 }
0x2bd7   :  { %33949 = vmatprep.mubr.f32.mxu0 %v28781_v42  ;;  %33948 = vmatpush3.msra.mxu0 %v28806_v28 }
0x2bd8   :  { %33952 = vmatprep.subr.mxu0 %v28803_v56 }
0x2bde   :  { %33950 = vmatmul.mubr.f32.vlgmr.msra.gmra.mrb[40].mxu0 %v28791_v50 }
0x2bdf   :  { %33954 = vmatprep.mubr.f32.mxu0 %v28782_v33  ;;  %33953 = vmatpush3.msra.mxu0 %v28803_v56 }
0x2be0   :  { %33957 = vmatprep.subr.mxu0 %v28716_v63 }
0x2be6   :  { %33955 = vmatmul.mubr.f32.vlgmr.msra.gmra.mrb[40].mxu0 %v28792_v31  ;;  %v29718_v31 = vld [vmem:[%s36917_s8] sm:$0xff] }
0x2be7   :  { %33959 = vmatprep.mubr.f32.mxu0 %v28783_v27  ;;  %33958 = vmatpush3.msra.mxu0 %v28716_v63 }
0x2be8   :  { %33962 = vmatprep.subr.mxu0 %v28804_v55 }
0x2bee   :  { %33960 = vmatmul.mubr.f32.vlgmr.msra.gmra.mrb[40].mxu0 %v28793_v9  ;;  %v29728_v9 = vand.u32 4294901760, %v29718_v31 }
0x2bef   :  { %33964 = vmatprep.mubr.f32.mxu0 %v28781_v42  ;;  %33963 = vmatpush3.msra.mxu0 %v28804_v55 }
0x2bf0   :  { %33967 = vmatprep.subr.mxu0 %v28716_v63  ;;  %v29805_v10 = vsub.f32 %v29718_v31, %v29728_v9 }
0x2bf6   :  { %33965 = vmatmul.mubr.f32.vlgmr.msra.gmra.mrb[40].mxu0 %v28791_v50 }
0x2bf7   :  { %33969 = vmatprep.mubr.f32.mxu0 %v28781_v42  ;;  %33968 = vmatpush3.msra.mxu0 %v28716_v63  ;;  %v29328_v63 = vand.u32 4294901760, %v29327_v44 }
0x2bf8   :  { %34230 = vmatprep.subr.bf16.mxu0 %v35077_v52 }
0x2bf9   :  { %v29329_v16 = vsub.f32 %v29327_v44, %v29328_v63 }
0x2bfb   :  { %v29330_v8 = vand.u32 4294901760, %v29329_v16 }
0x2bfe   :  { %33970 = vmatmul.mubr.f32.vlgmr.msra.gmra.mrb[40].mxu0 %v28791_v50 }
0x2bff   :  { %34048 = vmatprep.mubr.msk.f32.mxu0 %vm35065_vm0, %v35064_v7 }
0x2cd1   :  { %v33971_v23 = vpop.f32.mrb[40].mxu0 }
0x2cd2   :  { %v29207_v40 = vmul.f32 2.0, %v33971_v23  ;;  %v29194_v58 = vpop.f32.mrb[41].mxu0 }
0x2cd3   :  { %v29206_v38 = vmul.f32 2.0, %v29194_v58 }
0x2cd4   :  { %v29214_v59 = vadd.f32 %v29212_v17, %v29207_v40 }
0x2cd5   :  { %v29213_v18 = vadd.f32 %v29212_v17, %v29206_v38  ;;  %v29806_v17 = vand.u32 4294901760, %v29805_v10 }
0x2cd6   :  { %v29218_v47 = vsel %vm96_vm1, %v29214_v59, 0.0 }
0x2cd7   :  { %29219 = vadd.xlane.f32.xlu1 %v29218_v47  ;;  %v29215_v14 = vsel %vm96_vm1, %v29213_v18, 0.0  ;;  %v29807_v58 = vsub.f32 %v29805_v10, %v29806_v17 }
0x2cd8   :  { %29216 = vadd.xlane.f32.xlu0 %v29215_v14  ;;  %v30174_v14 = vld [vmem:[%s36918_s9] sm:$0xff] }
0x2d64   :  { %v29220_v35 = vpop.xlane.xlu1 %29219 }
0x2d65   :  { %v29223_v32 = vmul.f32 0.125, %v29220_v35  ;;  %v29217_v29 = vpop.xlane.xlu0 %29216  ;;  %v30175_v35 = vld [vmem:[%s36918_s9 + $0x8] sm:$0xff] }
0x2d66   :  { %v29222_v15 = vmul.f32 0.125, %v29217_v29  ;;  %v30188_v29 = vand.u32 4294901760, %v30175_v35 }
0x2d67   :  { %v29225_v36 = vsub.f32 %v29214_v59, %v29223_v32  ;;  %v30185_v32 = vand.u32 4294901760, %v30174_v14 }
0x2d68   :  { %v29224_v62 = vsub.f32 %v29213_v18, %v29222_v15  ;;  %v29808_v18 = vand.u32 4294901760, %v29807_v58 }
0x2d69   :  { %v29227_v41 = vmul.f32 %v29225_v36, %v29225_v36  ;;  %v34231_v15 = vpack.c.bf16 %v30188_v29, %v30185_v32 }
0x2d6a   :  { %v29226_v2 = vmul.f32 %v29224_v62, %v29224_v62 }
0x2d6b   :  { %v29231_v43 = vsel %vm96_vm1, %v29227_v41, 0.0  ;;  %34232 = vmatpush3.bf16.msra.mxu0 %v34231_v15 }
0x2d6c   :  { %v29228_v5 = vsel %vm96_vm1, %v29226_v2, 0.0  ;;  %34233 = vmatprep.subr.bf16.mxu0 %v35077_v52 }
0x2d6d   :  { %29229 = vadd.xlane.f32.xlu0 %v29228_v5 }
0x2d71   :  { %29232 = vadd.xlane.f32.xlu0 %v29231_v43 }
0x2dfa   :  { %v29230_v54 = vpop.xlane.xlu0 %29229 }
0x2dfb   :  { %v29234_v26 = vmul.f32 0.125, %v29230_v54 }
0x2dfd   :  { %v29236_v37 = vadd.f32 1e-05, %v29234_v26 }
0x2dfe   :  { %v29233_v6 = vpop.xlane.xlu0 %29232 }
0x2dff   :  { %35054 = vrsqrt.f32 %v29236_v37  ;;  %v29235_v48 = vmul.f32 0.125, %v29233_v6 }
0x2e01   :  { %v29237_v22 = vadd.f32 1e-05, %v29235_v48 }
0x2e03   :  { %35056 = vrsqrt.f32 %v29237_v22  ;;  %v31112_v22 = vld [vmem:[%s36917_s8 + $0x8] ss:$0 sm:$0xff] }
0x2e09   :  { %v35055_v46 = vpop.eup %35054 }
0x2e0a   :  { %v29240_v3 = vmul.f32 %v35055_v46, %v29224_v62  ;;  %v30270_v62 = vsub.f32 %v30175_v35, %v30188_v29 }
0x2e0c   :  { %v29246_v30 = vmul.f32 %v29245_v21, %v29240_v3  ;;  %v30271_v5 = vand.u32 4294901760, %v30270_v62 }
0x2e0d   :  { %v35057_v1 = vpop.eup %35056 }
0x2e0e   :  { %v29241_v20 = vmul.f32 %v35057_v1, %v29225_v36  ;;  %v29252_v49 = vadd.f32 %v29251_v0, %v29246_v30  ;;  %v30263_v36 = vsub.f32 %v30174_v14, %v30185_v32  ;;  %v30272_v43 = vsub.f32 %v30270_v62, %v30271_v5 }
0x2e10   :  { %v29247_v56 = vmul.f32 %v29245_v21, %v29241_v20  ;;  %v29260_v55 = vand.u32 4294901760, %v29252_v49  ;;  %v30264_v2 = vand.u32 4294901760, %v30263_v36  ;;  %v30273_v26 = vand.u32 4294901760, %v30272_v43  ;;  %v30644_v20 = vld [vmem:[%s36919_s10] sm:$0xff] }
0x2e11   :  { %v34237_v6 = vpack.c.bf16 %v30270_v62, %v30263_v36 }
0x2e12   :  { %v29253_v53 = vadd.f32 %v29251_v0, %v29247_v56  ;;  %v29338_v28 = vsub.f32 %v29252_v49, %v29260_v55  ;;  %v30265_v41 = vsub.f32 %v30263_v36, %v30264_v2  ;;  %v34243_v48 = vpack.c.bf16 %v30271_v5, %v30264_v2 }
0x2e13   :  { %v30654_v49 = vand.u32 4294901760, %v30644_v20 }
0x2e14   :  { %v29263_v57 = vand.u32 4294901760, %v29253_v53  ;;  %v29339_v60 = vand.u32 4294901760, %v29338_v28  ;;  %v30266_v54 = vand.u32 4294901760, %v30265_v41 }
0x2e16   :  { %v34213_v42 = vpack.c.bf16 %v29263_v57, %v29260_v55  ;;  %v29345_v33 = vsub.f32 %v29253_v53, %v29263_v57  ;;  %v29340_v27 = vsub.f32 %v29338_v28, %v29339_v60  ;;  %v34234_v37 = vpack.c.bf16 %v30273_v26, %v30266_v54 }
0x2e17   :  { %v30731_v53 = vsub.f32 %v30644_v20, %v30654_v49 }
0x2e18   :  { %34214 = vmatpush3.bf16.msra.mxu1 %v34213_v42  ;;  %v29346_v51 = vand.u32 4294901760, %v29345_v33  ;;  %v29341_v61 = vand.u32 4294901760, %v29340_v27  ;;  %v34219_v4 = vpack.c.bf16 %v29345_v33, %v29338_v28 }
0x2e19   :  { %34215 = vmatprep.subr.bf16.mxu1 %v35077_v52  ;;  %v30732_v57 = vand.u32 4294901760, %v30731_v53 }
0x2e1a   :  { %v29347_v13 = vsub.f32 %v29345_v33, %v29346_v51  ;;  %v34225_v50 = vpack.c.bf16 %v29346_v51, %v29339_v60 }
0x2e1b   :  { %33977 = vmatmul.mubr.f32.vlgmr.msra.gmra.mrb[58].mxu1 %v29330_v8  ;;  %v30733_v33 = vsub.f32 %v30731_v53, %v30732_v57 }
0x2e1c   :  { %v29348_v24 = vand.u32 4294901760, %v29347_v13  ;;  %33983 = vmatprep.mubr.msk.f32.mxu1 %vm35065_vm0, %v35064_v7 }
0x2e1d   :  { %v30734_v51 = vand.u32 4294901760, %v30733_v33 }
0x2e1e   :  { %v34216_v39 = vpack.c.bf16 %v29348_v24, %v29341_v61  ;;  %v31114_v61 = vld [vmem:[%s36919_s10 + $0x8] ss:$0 sm:$0xff] }
0x2e20   :  { %34217 = vmatpush3.bf16.msra.mxu1 %v34216_v39 }
0x2e21   :  { %34218 = vmatprep.subr.bf16.mxu1 %v35077_v52 }
0x2e23   :  { %33984 = vmatmul.mubr.f32.vlgmr.msra.gmra.mrb[58].mxu1 %v29326_v45 }
0x2e24   :  { %34220 = vmatpush3.bf16.msra.mxu1 %v34219_v4  ;;  %33990 = vmatprep.mubr.msk.f32.mxu1 %vm35065_vm0, %v35064_v7 }
0x2e25   :  { %34221 = vmatprep.subr.bf16.mxu1 %v35077_v52 }
0x2e2b   :  { %33991 = vmatmul.mubr.f32.vlgmr.msra.gmra.mrb[58].mxu1 %v29327_v44 }
0x2e2c   :  { %34223 = vmatpush3.bf16.msra.mxu1 %v34213_v42  ;;  %33997 = vmatprep.mubr.msk.f32.mxu1 %vm35065_vm0, %v35064_v7 }
0x2e2d   :  { %34224 = vmatprep.subr.bf16.mxu1 %v35077_v52 }
0x2e33   :  { %33998 = vmatmul.mubr.f32.vlgmr.msra.gmra.mrb[58].mxu1 %v29328_v63  ;;  %v31113_v63 = vld [vmem:[%s36918_s9 + $0x10] ss:$0 sm:$0xff] }
0x2e34   :  { %34226 = vmatpush3.bf16.msra.mxu1 %v34225_v50  ;;  %34004 = vmatprep.mubr.msk.f32.mxu1 %vm35065_vm0, %v35064_v7 }
0x2e35   :  { %34227 = vmatprep.subr.bf16.mxu1 %v35077_v52 }
0x2e3b   :  { %34005 = vmatmul.mubr.f32.vlgmr.msra.gmra.mrb[58].mxu1 %v29326_v45 }
0x2e3c   :  { %34229 = vmatpush3.bf16.msra.mxu1 %v34213_v42  ;;  %34011 = vmatprep.mubr.msk.f32.mxu1 %vm35065_vm0, %v35064_v7 }
0x2e3d   :  { %34014 = vmatprep.subr.mxu1 %v35064_v7 }
0x2e43   :  { %34012 = vmatmul.mubr.f32.vlgmr.msra.gmra.mrb[58].mxu1 %v29326_v45 }
0x2e44   :  { %34016 = vmatprep.mubr.msk.f32.mxu1 %vm35065_vm0, %v35064_v7  ;;  %34015 = vmatpush3.msra.mxu1 %v29728_v9 }
0x2e45   :  { %34019 = vmatprep.subr.mxu1 %v35064_v7 }
0x2f16   :  { %v29714_v19 = vpop.f32.mrb[58].mxu1 }
0x2f17   :  { %v29725_v11 = vsel %vm96_vm1, %v29714_v19, 0  ;;  %v34013_v25 = vpop.f32.mrb[59].mxu1 }
0x2f18   :  { %v29793_v23 = vand.u32 4294901760, %v29725_v11 }
0x2f1a   :  { %v29794_v40 = vsub.f32 %v29725_v11, %v29793_v23 }
0x2f1c   :  { %v29795_v38 = vand.u32 4294901760, %v29794_v40 }
0x2f1e   :  { %v29796_v59 = vsub.f32 %v29794_v40, %v29795_v38 }
0x2f20   :  { %v29797_v47 = vand.u32 4294901760, %v29796_v59 }
0x2f22   :  { %34017 = vmatmul.mubr.f32.vlgmr.msra.gmra.mrb[60].mxu1 %v29797_v47 }
0x2f23   :  { %34020 = vmatpush3.msra.mxu1 %v29808_v18  ;;  %34021 = vmatprep.mubr.msk.f32.mxu1 %vm35065_vm0, %v35064_v7 }
0x2f24   :  { %34024 = vmatprep.subr.mxu1 %v35064_v7 }
0x2f2a   :  { %34022 = vmatmul.mubr.f32.vlgmr.msra.gmra.mrb[60].mxu1 %v29793_v23 }
0x2f2b   :  { %34025 = vmatpush3.msra.mxu1 %v29805_v10  ;;  %34026 = vmatprep.mubr.msk.f32.mxu1 %vm35065_vm0, %v35064_v7 }
0x2f2c   :  { %34029 = vmatprep.subr.mxu1 %v35064_v7 }
0x2f32   :  { %34027 = vmatmul.mubr.f32.vlgmr.msra.gmra.mrb[60].mxu1 %v29794_v40 }
0x2f33   :  { %34030 = vmatpush3.msra.mxu1 %v29728_v9  ;;  %34031 = vmatprep.mubr.msk.f32.mxu1 %vm35065_vm0, %v35064_v7 }
0x2f34   :  { %34034 = vmatprep.subr.mxu1 %v35064_v7 }
0x2f3a   :  { %34032 = vmatmul.mubr.f32.vlgmr.msra.gmra.mrb[60].mxu1 %v29795_v38 }
0x2f3b   :  { %34035 = vmatpush3.msra.mxu1 %v29806_v17  ;;  %34036 = vmatprep.mubr.msk.f32.mxu1 %vm35065_vm0, %v35064_v7 }
0x2f3c   :  { %34039 = vmatprep.subr.mxu1 %v35064_v7 }
0x2f42   :  { %34037 = vmatmul.mubr.f32.vlgmr.msra.gmra.mrb[60].mxu1 %v29793_v23 }
0x2f43   :  { %34040 = vmatpush3.msra.mxu1 %v29728_v9  ;;  %34041 = vmatprep.mubr.msk.f32.mxu1 %vm35065_vm0, %v35064_v7 }
0x2f44   :  { %34086 = vmatprep.subr.mxu1 %v35064_v7 }
0x2f4a   :  { %34042 = vmatmul.mubr.f32.vlgmr.msra.gmra.mrb[60].mxu1 %v29793_v23 }
0x2f4b   :  { %34088 = vmatprep.mubr.msk.f32.mxu1 %vm35065_vm0, %v35064_v7  ;;  %34087 = vmatpush3.msra.mxu1 %v30654_v49 }
0x2f4c   :  { %34091 = vmatprep.subr.mxu1 %v35064_v7 }
0x301d   :  { %v30169_v12 = vpop.f32.mrb[60].mxu1 }
0x301e   :  { %v34252_v34 = vadd.f32 %v31112_v22, %v30169_v12  ;;  %v34043_v45 = vpop.f32.mrb[61].mxu1 }
0x3020   :  { %v30173_v21 = vmax.f32 %v34252_v34, 0.0 }
0x3022   :  { %v30182_v46 = vsel %vm29255_vm3, %v30173_v21, 0 }
0x3023   :  { %v30251_v0 = vand.u32 4294901760, %v30182_v46 }
0x3025   :  { %v30252_v3 = vsub.f32 %v30182_v46, %v30251_v0 }
0x3027   :  { %v30253_v44 = vand.u32 4294901760, %v30252_v3 }
0x3029   :  { %v30254_v30 = vsub.f32 %v30252_v3, %v30253_v44 }
0x302b   :  { %v30255_v1 = vand.u32 4294901760, %v30254_v30 }
0x302d   :  { %34049 = vmatmul.mubr.f32.vlgmr.msra.gmra.mrb[48].mxu0 %v30255_v1 }
0x302e   :  { %34235 = vmatpush3.bf16.msra.mxu0 %v34234_v37  ;;  %34055 = vmatprep.mubr.msk.f32.mxu0 %vm35065_vm0, %v35064_v7 }
0x302f   :  { %34236 = vmatprep.subr.bf16.mxu0 %v35077_v52 }
0x3035   :  { %34056 = vmatmul.mubr.f32.vlgmr.msra.gmra.mrb[48].mxu0 %v30251_v0 }
0x3036   :  { %34238 = vmatpush3.bf16.msra.mxu0 %v34237_v6  ;;  %34062 = vmatprep.mubr.msk.f32.mxu0 %vm35065_vm0, %v35064_v7 }
0x3037   :  { %34239 = vmatprep.subr.bf16.mxu0 %v35077_v52 }
0x303d   :  { %34063 = vmatmul.mubr.f32.vlgmr.msra.gmra.mrb[48].mxu0 %v30252_v3 }
0x303e   :  { %34241 = vmatpush3.bf16.msra.mxu0 %v34231_v15  ;;  %34069 = vmatprep.mubr.msk.f32.mxu0 %vm35065_vm0, %v35064_v7 }
0x303f   :  { %34242 = vmatprep.subr.bf16.mxu0 %v35077_v52 }
0x3045   :  { %34070 = vmatmul.mubr.f32.vlgmr.msra.gmra.mrb[48].mxu0 %v30253_v44 }
0x3046   :  { %34244 = vmatpush3.bf16.msra.mxu0 %v34243_v48  ;;  %34076 = vmatprep.mubr.msk.f32.mxu0 %vm35065_vm0, %v35064_v7 }
0x3047   :  { %34245 = vmatprep.subr.bf16.mxu0 %v35077_v52 }
0x304d   :  { %34077 = vmatmul.mubr.f32.vlgmr.msra.gmra.mrb[48].mxu0 %v30251_v0 }
0x304e   :  { %34247 = vmatpush3.bf16.msra.mxu0 %v34231_v15  ;;  %34083 = vmatprep.mubr.msk.f32.mxu0 %vm35065_vm0, %v35064_v7 }
0x3055   :  { %34084 = vmatmul.mubr.f32.vlgmr.msra.gmra.mrb[48].mxu0 %v30251_v0 }
0x3128   :  { %v30639_v56 = vpop.f32.mrb[48].mxu0 }
0x3129   :  { %v34253_v52 = vadd.f32 %v31113_v63, %v30639_v56  ;;  %v34085_v55 = vpop.f32.mrb[49].mxu0 }
0x312b   :  { %v30643_v28 = vmax.f32 %v34253_v52, 0.0 }
0x312d   :  { %v30651_v16 = vsel %vm96_vm1, %v30643_v28, 0 }
0x312e   :  { %v30719_v60 = vand.u32 4294901760, %v30651_v16 }
0x3130   :  { %v30720_v42 = vsub.f32 %v30651_v16, %v30719_v60 }
0x3132   :  { %v30721_v8 = vand.u32 4294901760, %v30720_v42 }
0x3134   :  { %v30722_v27 = vsub.f32 %v30720_v42, %v30721_v8 }
0x3136   :  { %v30723_v13 = vand.u32 4294901760, %v30722_v27 }
0x3138   :  { %34089 = vmatmul.mubr.f32.vlgmr.msra.gmra.mrb[62].mxu1 %v30723_v13 }
0x3139   :  { %34092 = vmatpush3.msra.mxu1 %v30734_v51  ;;  %34093 = vmatprep.mubr.msk.f32.mxu1 %vm35065_vm0, %v35064_v7 }
0x313a   :  { %34096 = vmatprep.subr.mxu1 %v35064_v7 }
0x3140   :  { %34094 = vmatmul.mubr.f32.vlgmr.msra.gmra.mrb[62].mxu1 %v30719_v60 }
0x3141   :  { %34097 = vmatpush3.msra.mxu1 %v30731_v53  ;;  %34098 = vmatprep.mubr.msk.f32.mxu1 %vm35065_vm0, %v35064_v7 }
0x3142   :  { %34101 = vmatprep.subr.mxu1 %v35064_v7 }
0x3148   :  { %34099 = vmatmul.mubr.f32.vlgmr.msra.gmra.mrb[62].mxu1 %v30720_v42 }
0x3149   :  { %34102 = vmatpush3.msra.mxu1 %v30654_v49  ;;  %34103 = vmatprep.mubr.msk.f32.mxu1 %vm35065_vm0, %v35064_v7 }
0x314a   :  { %34106 = vmatprep.subr.mxu1 %v35064_v7 }
0x3150   :  { %34104 = vmatmul.mubr.f32.vlgmr.msra.gmra.mrb[62].mxu1 %v30721_v8 }
0x3151   :  { %34107 = vmatpush3.msra.mxu1 %v30732_v57  ;;  %34108 = vmatprep.mubr.msk.f32.mxu1 %vm35065_vm0, %v35064_v7 }
0x3152   :  { %34111 = vmatprep.subr.mxu1 %v35064_v7 }
0x3158   :  { %34109 = vmatmul.mubr.f32.vlgmr.msra.gmra.mrb[62].mxu1 %v30719_v60 }
0x3159   :  { %34112 = vmatpush3.msra.mxu1 %v30654_v49  ;;  %34113 = vmatprep.mubr.msk.f32.mxu1 %vm35065_vm0, %v35064_v7 }
0x3160   :  { %34114 = vmatmul.mubr.f32.vlgmr.msra.gmra.mrb[62].mxu1 %v30719_v60 }
0x3233   :  { %v31095_v24 = vpop.f32.mrb[62].mxu1 }
0x3234   :  { %v34254_v39 = vadd.f32 %v31114_v61, %v31095_v24  ;;  %v34115_v4 = vpop.f32.mrb[63].mxu1 }
0x3236   :  { %v31099_v50 = vmax.f32 %v34254_v39, 0.0 }
0x3238   :  { %v31115_v31 = vmul.f32 -1.442695, %v31099_v50 }
0x323a   :  { %35058 = vpow2.f32 %v31115_v31 }
0x3244   :  { %v35059_v9 = vpop.eup %35058 }
0x3245   :  { %v31103_v10 = vadd.f32 1.0, %v35059_v9 }
0x3247   :  { %35060 = vrcp.f32 %v31103_v10 }
0x3251   :  { %v35061_v19 = vpop.eup %35060 }
0x3252   :  { %31107 = vst.msk [vmem:[%s36920_s11] sm:$0x3] %vm31106_vm4, %v35061_v19 }

</bundles_post_ra>
